<compile_context>
chip_gen: v7x
topology: tpu7x:2x2x1
jax: 0.10.0
libtpu: 0.0.40
codegen_flags: <defaults>
</compile_context>

<pallas_src>
import functools

import jax
import jax.numpy as jnp
from jax.experimental import pallas as pl
from jax.experimental.pallas import tpu as pltpu


# ------------------------------ Pallas kernel ------------------------------

def attention_kernel(x_ref, ctx_ref,
                     wq_ref, wkt_ref, wv_ref, wo_ref, bo_ref,
                     o_ref,
                     oc_ref,
                     *, num_heads, dim_head, scale):
    """Multi-head attention for one batch element.

    x_ref   : (1, N, Dq)  queries input
    ctx_ref : (1, M, Dc)  context input (== x for self-attention)
    wq_ref  : (H, Dq, dh) bf16   per-head query projection
    wkt_ref : (H, dh, Dc) bf16   per-head key projection, pre-transposed
    wv_ref  : (H, Dc, dh) bf16   per-head value projection
    wo_ref  : (H*dh, Do)  bf16   output projection
    bo_ref  : (1, Do)     f32    output bias
    o_ref   : (1, N, Do)  output
    oc_ref  : (N, H*dh)   bf16 VMEM scratch — head-concat buffer
    """
    x = x_ref[0]                                   # (N, Dq) f32
    ctx = ctx_ref[0]                               # (M, Dc) f32

    xb = x.astype(jnp.bfloat16)                    # matmul operands in bf16
    cb = ctx.astype(jnp.bfloat16)
    # Hoisted K transpose: one (M, Dc) transpose per block instead of one
    # per-head transpose inside the scores dot.
    ctx_t = jnp.transpose(ctx).astype(jnp.bfloat16)        # (Dc, M)

    for h in range(num_heads):
        lo = h * dim_head

        # Per-head projections: weights indexed on the leading axis (cheap),
        # contraction over the full model dim (Dq / Dc).
        qh = jnp.dot(xb, wq_ref[h],
                     preferred_element_type=jnp.float32)    # (N, dh)
        kht = jnp.dot(wkt_ref[h], ctx_t,
                      preferred_element_type=jnp.float32)   # (dh, M) == K_h^T
        vh = jnp.dot(cb, wv_ref[h],
                     preferred_element_type=jnp.float32)    # (M, dh)

        # Scores + softmax (f32 elementwise math).
        s = jnp.dot((qh * scale).astype(jnp.bfloat16),
                    kht.astype(jnp.bfloat16),
                    preferred_element_type=jnp.float32)     # (N, M)
        s = s - jnp.max(s, axis=-1, keepdims=True)
        p = jnp.exp(s)
        p = p * pl.reciprocal(jnp.sum(p, axis=-1, keepdims=True), approx=True)

        oh = jnp.dot(p.astype(jnp.bfloat16), vh.astype(jnp.bfloat16),
                     preferred_element_type=jnp.float32)    # (N, dh)

        # Concat into the scratch; projection happens once after the loop.
        oc_ref[:, lo:lo + dim_head] = oh.astype(jnp.bfloat16)

    # Single fused output projection over the full inner dim.
    out = jnp.dot(oc_ref[...], wo_ref[...],
                  preferred_element_type=jnp.float32)       # (N, Do)
    out = out + bo_ref[...]
    o_ref[0] = out.astype(o_ref.dtype)


# ------------------------------ JAX wrappers -------------------------------

def _resident_spec(arr):
    """Full-array block that stays resident across the batch grid."""
    ndim = arr.ndim
    return pl.BlockSpec(arr.shape, lambda b, _n=ndim: (0,) * _n)


def init_attention_params(key, query_dim, context_dim, output_dim,
                          heads, dim_head, scale=0.02):
    """PyTorch-layout weights: Linear.weight is (out_features, in_features)."""
    inner = heads * dim_head
    k1, k2, k3, k4 = jax.random.split(key, 4)
    f32 = jnp.float32
    return dict(
        w_q=scale * jax.random.normal(k1, (inner, query_dim), f32),
        w_kv=scale * jax.random.normal(k2, (2 * inner, context_dim), f32),
        w_out=scale * jax.random.normal(k3, (output_dim, inner), f32),
        b_out=scale * jax.random.normal(k4, (output_dim,), f32),
    )


def _prep_kernel_weights(params, heads, dim_head):
    """Host-side layout plumbing: per-head 3-D weights, K pre-transposed, bf16."""
    inner = heads * dim_head
    wq = params["w_q"].T                        # (Dq, I)
    wkv = params["w_kv"].T                      # (Dc, 2I)
    wk = wkv[:, :inner]                         # (Dc, I)
    wv = wkv[:, inner:]                         # (Dc, I)
    wo = params["w_out"].T                      # (I, Do)
    bo = params["b_out"].reshape(1, -1)         # (1, Do)

    dq = wq.shape[0]
    dc = wk.shape[0]
    bf = jnp.bfloat16
    wq3 = wq.reshape(dq, heads, dim_head).transpose(1, 0, 2).astype(bf)   # (H, Dq, dh)
    wkt3 = wk.reshape(dc, heads, dim_head).transpose(1, 2, 0).astype(bf)  # (H, dh, Dc)
    wv3 = wv.reshape(dc, heads, dim_head).transpose(1, 0, 2).astype(bf)   # (H, Dc, dh)
    return wq3, wkt3, wv3, wo.astype(bf), bo.astype(jnp.float32)


@functools.partial(jax.jit, static_argnums=(3, 4))
def _attention_jit(x, context, params, heads, dim_head):
    wq3, wkt3, wv3, wo, bo = _prep_kernel_weights(params, heads, dim_head)
    B, N, Dq = x.shape
    _, M, Dc = context.shape
    inner = heads * dim_head
    Do = wo.shape[1]

    kernel = functools.partial(attention_kernel,
                               num_heads=heads, dim_head=dim_head,
                               scale=float(dim_head) ** -0.5)
    weights = (wq3, wkt3, wv3, wo, bo)
    in_specs = ([pl.BlockSpec((1, N, Dq), lambda b: (b, 0, 0)),
                 pl.BlockSpec((1, M, Dc), lambda b: (b, 0, 0))]
                + [_resident_spec(w) for w in weights])

    return pl.pallas_call(
        kernel,
        out_shape=jax.ShapeDtypeStruct((B, N, Do), x.dtype),
        grid=(B,),
        in_specs=in_specs,
        out_specs=pl.BlockSpec((1, N, Do), lambda b: (b, 0, 0)),
        scratch_shapes=[pltpu.VMEM((N, inner), jnp.bfloat16)],
        compiler_params=pltpu.CompilerParams(
            dimension_semantics=("parallel",)),     # v7x: shard batch over 2 TCs
    )(x, context, *weights)


def attention_forward(x, params, *, heads=8, dim_head=64, context=None):
    """Reproduces Attention.forward(x, context=None, mask=None)."""
    if context is None:
        context = x
    return _attention_jit(x, context, params, heads, dim_head)


# Pure-JAX reference (f32) for a correctness check.
def attention_reference(x, params, *, heads, dim_head, context=None):
    if context is None:
        context = x
    inner = heads * dim_head
    q = x @ params["w_q"].T
    kv = context @ params["w_kv"].T
    k, v = kv[..., :inner], kv[..., inner:]
    B, N, _ = q.shape
    M = k.shape[1]

    def split(t, L):
        return t.reshape(t.shape[0], L, heads, dim_head).transpose(0, 2, 1, 3)

    qh, kh, vh = split(q, N), split(k, M), split(v, M)
    sim = jnp.einsum('bhid,bhjd->bhij', qh, kh) * (float(dim_head) ** -0.5)
    attn = jax.nn.softmax(sim, axis=-1)
    o = jnp.einsum('bhij,bhjd->bhid', attn, vh)
    o = o.transpose(0, 2, 1, 3).reshape(B, N, inner)
    return o @ params["w_out"].T + params["b_out"]


# ----------------------------------- main -----------------------------------

if __name__ == "__main__":
    # Module defaults: heads=8, dim_head=64 -> inner_dim=512.
    HEADS, DIM_HEAD = 8, 64
    QUERY_DIM = 128            # query_dim == context_dim == output_dim
    B, N = 2, 128              # >=128 tokens per block for lane density

    kx, kp = jax.random.split(jax.random.PRNGKey(0))
    x = jax.random.normal(kx, (B, N, QUERY_DIM), jnp.float32)
    params = init_attention_params(kp, QUERY_DIM, QUERY_DIM, QUERY_DIM,
                                   HEADS, DIM_HEAD)

    out = attention_forward(x, params, heads=HEADS, dim_head=DIM_HEAD)
    out = jax.block_until_ready(out)

    assert out.shape == (B, N, QUERY_DIM), out.shape
    assert bool(jnp.all(jnp.isfinite(out)))

    ref = attention_reference(x, params, heads=HEADS, dim_head=DIM_HEAD)
    max_err = float(jnp.max(jnp.abs(out - ref)))
    assert max_err < 5e-3, f"kernel vs reference mismatch: {max_err}"

    print("KERNEL_OK")
</pallas_src>

<mosaic_0001>
module attributes {stable_mosaic.version = 11 : i64} {
  func.func @attention_kernel(%arg0: i32, %arg1: memref<1x128x128xf32, #tpu.memory_space<vmem>>, %arg2: memref<1x128x128xf32, #tpu.memory_space<vmem>>, %arg3: memref<8x128x64xbf16, #tpu.memory_space<vmem>>, %arg4: memref<8x64x128xbf16, #tpu.memory_space<vmem>>, %arg5: memref<8x128x64xbf16, #tpu.memory_space<vmem>>, %arg6: memref<512x128xbf16, #tpu.memory_space<vmem>>, %arg7: memref<1x128xf32, #tpu.memory_space<vmem>>, %arg8: memref<1x128x128xf32, #tpu.memory_space<vmem>>, %arg9: memref<128x512xbf16, #tpu.memory_space<vmem>>) attributes {dimension_semantics = [#tpu.dimension_semantics<parallel>], iteration_bounds = array<i64: 2>, scalar_prefetch = 0 : i64, scratch_operands = 1 : i64, tpu.core_type = #tpu.core_type<tc>, window_params = [{transform_indices = @transform_0, window_bounds = array<i64: 1, 128, 128>}, {transform_indices = @transform_1, window_bounds = array<i64: 1, 128, 128>}, {pipeline_mode = #tpu.pipeline_mode<synchronous>, transform_indices = @transform_2, window_bounds = array<i64: 8, 128, 64>}, {pipeline_mode = #tpu.pipeline_mode<synchronous>, transform_indices = @transform_3, window_bounds = array<i64: 8, 64, 128>}, {pipeline_mode = #tpu.pipeline_mode<synchronous>, transform_indices = @transform_4, window_bounds = array<i64: 8, 128, 64>}, {pipeline_mode = #tpu.pipeline_mode<synchronous>, transform_indices = @transform_5, window_bounds = array<i64: 512, 128>}, {pipeline_mode = #tpu.pipeline_mode<synchronous>, transform_indices = @transform_6, window_bounds = array<i64: 1, 128>}, {transform_indices = @transform_7, window_bounds = array<i64: 1, 128, 128>}]} {
    %c0 = arith.constant 0 : index
    %c0_0 = arith.constant 0 : index
    %c0_1 = arith.constant 0 : index
    %0 = vector.load %arg1[%c0, %c0_0, %c0_1] : memref<1x128x128xf32, #tpu.memory_space<vmem>>, vector<1x128x128xf32>
    %1 = vector.shape_cast %0 : vector<1x128x128xf32> to vector<128x128xf32>
    %c0_2 = arith.constant 0 : index
    %c0_3 = arith.constant 0 : index
    %c0_4 = arith.constant 0 : index
    %2 = vector.load %arg2[%c0_2, %c0_3, %c0_4] : memref<1x128x128xf32, #tpu.memory_space<vmem>>, vector<1x128x128xf32>
    %3 = vector.shape_cast %2 : vector<1x128x128xf32> to vector<128x128xf32>
    %4 = arith.truncf %1 : vector<128x128xf32> to vector<128x128xbf16>
    %5 = arith.truncf %3 : vector<128x128xf32> to vector<128x128xbf16>
    %6 = tpu.transpose %3, [1, 0] : vector<128x128xf32> -> vector<128x128xf32>
    %7 = arith.truncf %6 : vector<128x128xf32> to vector<128x128xbf16>
    %c0_5 = arith.constant 0 : index
    %c0_6 = arith.constant 0 : index
    %c0_7 = arith.constant 0 : index
    %8 = vector.load %arg3[%c0_5, %c0_6, %c0_7] : memref<8x128x64xbf16, #tpu.memory_space<vmem>>, vector<1x128x64xbf16>
    %9 = vector.shape_cast %8 : vector<1x128x64xbf16> to vector<128x64xbf16>
    %cst = arith.constant dense<0.000000e+00> : vector<128x64xf32>
    %10 = tpu.matmul %4, %9, %cst {dimension_numbers = #tpu.dot_dimension_numbers<[1], [0], [0], [1], [0, 0, 1, 1], [], []>} : vector<128x128xbf16>, vector<128x64xbf16>, vector<128x64xf32> -> vector<128x64xf32>
    %c0_8 = arith.constant 0 : index
    %c0_9 = arith.constant 0 : index
    %c0_10 = arith.constant 0 : index
    %11 = vector.load %arg4[%c0_8, %c0_9, %c0_10] : memref<8x64x128xbf16, #tpu.memory_space<vmem>>, vector<1x64x128xbf16>
    %12 = vector.shape_cast %11 : vector<1x64x128xbf16> to vector<64x128xbf16>
    %cst_11 = arith.constant dense<0.000000e+00> : vector<64x128xf32>
    %13 = tpu.matmul %12, %7, %cst_11 {dimension_numbers = #tpu.dot_dimension_numbers<[1], [0], [0], [1], [0, 0, 1, 1], [], []>} : vector<64x128xbf16>, vector<128x128xbf16>, vector<64x128xf32> -> vector<64x128xf32>
    %c0_12 = arith.constant 0 : index
    %c0_13 = arith.constant 0 : index
    %c0_14 = arith.constant 0 : index
    %14 = vector.load %arg5[%c0_12, %c0_13, %c0_14] : memref<8x128x64xbf16, #tpu.memory_space<vmem>>, vector<1x128x64xbf16>
    %15 = vector.shape_cast %14 : vector<1x128x64xbf16> to vector<128x64xbf16>
    %cst_15 = arith.constant dense<0.000000e+00> : vector<128x64xf32>
    %16 = tpu.matmul %5, %15, %cst_15 {dimension_numbers = #tpu.dot_dimension_numbers<[1], [0], [0], [1], [0, 0, 1, 1], [], []>} : vector<128x128xbf16>, vector<128x64xbf16>, vector<128x64xf32> -> vector<128x64xf32>
    %cst_16 = arith.constant 1.250000e-01 : f32
    %17 = vector.broadcast %cst_16 : f32 to vector<128x64xf32>
    %18 = arith.mulf %10, %17 : vector<128x64xf32>
    %19 = arith.truncf %18 : vector<128x64xf32> to vector<128x64xbf16>
    %20 = arith.truncf %13 : vector<64x128xf32> to vector<64x128xbf16>
    %cst_17 = arith.constant dense<0.000000e+00> : vector<128x128xf32>
    %21 = tpu.matmul %19, %20, %cst_17 {dimension_numbers = #tpu.dot_dimension_numbers<[1], [0], [0], [1], [0, 0, 1, 1], [], []>} : vector<128x64xbf16>, vector<64x128xbf16>, vector<128x128xf32> -> vector<128x128xf32>
    %cst_18 = arith.constant dense<0xFF800000> : vector<128xf32>
    %22 = vector.multi_reduction <maximumf>, %21, %cst_18 [1] : vector<128x128xf32> to vector<128xf32>
    %23 = vector.shape_cast %22 : vector<128xf32> to vector<128x1xf32>
    %24 = vector.broadcast %23 : vector<128x1xf32> to vector<128x128xf32>
    %25 = arith.subf %21, %24 : vector<128x128xf32>
    %26 = math.exp %25 : vector<128x128xf32>
    %cst_19 = arith.constant dense<0.000000e+00> : vector<128xf32>
    %27 = vector.multi_reduction <add>, %26, %cst_19 [1] : vector<128x128xf32> to vector<128xf32>
    %28 = vector.shape_cast %27 : vector<128xf32> to vector<128x1xf32>
    %29 = tpu.reciprocal %28 {approx = true} : vector<128x1xf32> -> vector<128x1xf32>
    %30 = vector.broadcast %29 : vector<128x1xf32> to vector<128x128xf32>
    %31 = arith.mulf %26, %30 : vector<128x128xf32>
    %32 = arith.truncf %31 : vector<128x128xf32> to vector<128x128xbf16>
    %33 = arith.truncf %16 : vector<128x64xf32> to vector<128x64xbf16>
    %cst_20 = arith.constant dense<0.000000e+00> : vector<128x64xf32>
    %34 = tpu.matmul %32, %33, %cst_20 {dimension_numbers = #tpu.dot_dimension_numbers<[1], [0], [0], [1], [0, 0, 1, 1], [], []>} : vector<128x128xbf16>, vector<128x64xbf16>, vector<128x64xf32> -> vector<128x64xf32>
    %35 = arith.truncf %34 : vector<128x64xf32> to vector<128x64xbf16>
    %c0_21 = arith.constant 0 : index
    %c0_22 = arith.constant 0 : index
    %36 = vector.load %arg9[%c0_21, %c0_22] : memref<128x512xbf16, #tpu.memory_space<vmem>>, vector<128x64xbf16>
    tpu.vector_store %arg9[%c0_21, %c0_22], %35 {strides = array<i32>} : memref<128x512xbf16, #tpu.memory_space<vmem>>, vector<128x64xbf16>,
    %c1 = arith.constant 1 : index
    %c0_23 = arith.constant 0 : index
    %c0_24 = arith.constant 0 : index
    %37 = vector.load %arg3[%c1, %c0_23, %c0_24] : memref<8x128x64xbf16, #tpu.memory_space<vmem>>, vector<1x128x64xbf16>
    %38 = vector.shape_cast %37 : vector<1x128x64xbf16> to vector<128x64xbf16>
    %cst_25 = arith.constant dense<0.000000e+00> : vector<128x64xf32>
    %39 = tpu.matmul %4, %38, %cst_25 {dimension_numbers = #tpu.dot_dimension_numbers<[1], [0], [0], [1], [0, 0, 1, 1], [], []>} : vector<128x128xbf16>, vector<128x64xbf16>, vector<128x64xf32> -> vector<128x64xf32>
    %c1_26 = arith.constant 1 : index
    %c0_27 = arith.constant 0 : index
    %c0_28 = arith.constant 0 : index
    %40 = vector.load %arg4[%c1_26, %c0_27, %c0_28] : memref<8x64x128xbf16, #tpu.memory_space<vmem>>, vector<1x64x128xbf16>
    %41 = vector.shape_cast %40 : vector<1x64x128xbf16> to vector<64x128xbf16>
    %cst_29 = arith.constant dense<0.000000e+00> : vector<64x128xf32>
    %42 = tpu.matmul %41, %7, %cst_29 {dimension_numbers = #tpu.dot_dimension_numbers<[1], [0], [0], [1], [0, 0, 1, 1], [], []>} : vector<64x128xbf16>, vector<128x128xbf16>, vector<64x128xf32> -> vector<64x128xf32>
    %c1_30 = arith.constant 1 : index
    %c0_31 = arith.constant 0 : index
    %c0_32 = arith.constant 0 : index
    %43 = vector.load %arg5[%c1_30, %c0_31, %c0_32] : memref<8x128x64xbf16, #tpu.memory_space<vmem>>, vector<1x128x64xbf16>
    %44 = vector.shape_cast %43 : vector<1x128x64xbf16> to vector<128x64xbf16>
    %cst_33 = arith.constant dense<0.000000e+00> : vector<128x64xf32>
    %45 = tpu.matmul %5, %44, %cst_33 {dimension_numbers = #tpu.dot_dimension_numbers<[1], [0], [0], [1], [0, 0, 1, 1], [], []>} : vector<128x128xbf16>, vector<128x64xbf16>, vector<128x64xf32> -> vector<128x64xf32>
    %cst_34 = arith.constant 1.250000e-01 : f32
    %46 = vector.broadcast %cst_34 : f32 to vector<128x64xf32>
    %47 = arith.mulf %39, %46 : vector<128x64xf32>
    %48 = arith.truncf %47 : vector<128x64xf32> to vector<128x64xbf16>
    %49 = arith.truncf %42 : vector<64x128xf32> to vector<64x128xbf16>
    %cst_35 = arith.constant dense<0.000000e+00> : vector<128x128xf32>
    %50 = tpu.matmul %48, %49, %cst_35 {dimension_numbers = #tpu.dot_dimension_numbers<[1], [0], [0], [1], [0, 0, 1, 1], [], []>} : vector<128x64xbf16>, vector<64x128xbf16>, vector<128x128xf32> -> vector<128x128xf32>
    %cst_36 = arith.constant dense<0xFF800000> : vector<128xf32>
    %51 = vector.multi_reduction <maximumf>, %50, %cst_36 [1] : vector<128x128xf32> to vector<128xf32>
    %52 = vector.shape_cast %51 : vector<128xf32> to vector<128x1xf32>
    %53 = vector.broadcast %52 : vector<128x1xf32> to vector<128x128xf32>
    %54 = arith.subf %50, %53 : vector<128x128xf32>
    %55 = math.exp %54 : vector<128x128xf32>
    %cst_37 = arith.constant dense<0.000000e+00> : vector<128xf32>
    %56 = vector.multi_reduction <add>, %55, %cst_37 [1] : vector<128x128xf32> to vector<128xf32>
    %57 = vector.shape_cast %56 : vector<128xf32> to vector<128x1xf32>
    %58 = tpu.reciprocal %57 {approx = true} : vector<128x1xf32> -> vector<128x1xf32>
    %59 = vector.broadcast %58 : vector<128x1xf32> to vector<128x128xf32>
    %60 = arith.mulf %55, %59 : vector<128x128xf32>
    %61 = arith.truncf %60 : vector<128x128xf32> to vector<128x128xbf16>
    %62 = arith.truncf %45 : vector<128x64xf32> to vector<128x64xbf16>
    %cst_38 = arith.constant dense<0.000000e+00> : vector<128x64xf32>
    %63 = tpu.matmul %61, %62, %cst_38 {dimension_numbers = #tpu.dot_dimension_numbers<[1], [0], [0], [1], [0, 0, 1, 1], [], []>} : vector<128x128xbf16>, vector<128x64xbf16>, vector<128x64xf32> -> vector<128x64xf32>
    %64 = arith.truncf %63 : vector<128x64xf32> to vector<128x64xbf16>
    %c0_39 = arith.constant 0 : index
    %c64 = arith.constant 64 : index
    %65 = vector.load %arg9[%c0_39, %c64] : memref<128x512xbf16, #tpu.memory_space<vmem>>, vector<128x64xbf16>
    tpu.vector_store %arg9[%c0_39, %c64], %64 {strides = array<i32>} : memref<128x512xbf16, #tpu.memory_space<vmem>>, vector<128x64xbf16>,
    %c2 = arith.constant 2 : index
    %c0_40 = arith.constant 0 : index
    %c0_41 = arith.constant 0 : index
    %66 = vector.load %arg3[%c2, %c0_40, %c0_41] : memref<8x128x64xbf16, #tpu.memory_space<vmem>>, vector<1x128x64xbf16>
    %67 = vector.shape_cast %66 : vector<1x128x64xbf16> to vector<128x64xbf16>
    %cst_42 = arith.constant dense<0.000000e+00> : vector<128x64xf32>
    %68 = tpu.matmul %4, %67, %cst_42 {dimension_numbers = #tpu.dot_dimension_numbers<[1], [0], [0], [1], [0, 0, 1, 1], [], []>} : vector<128x128xbf16>, vector<128x64xbf16>, vector<128x64xf32> -> vector<128x64xf32>
    %c2_43 = arith.constant 2 : index
    %c0_44 = arith.constant 0 : index
    %c0_45 = arith.constant 0 : index
    %69 = vector.load %arg4[%c2_43, %c0_44, %c0_45] : memref<8x64x128xbf16, #tpu.memory_space<vmem>>, vector<1x64x128xbf16>
    %70 = vector.shape_cast %69 : vector<1x64x128xbf16> to vector<64x128xbf16>
    %cst_46 = arith.constant dense<0.000000e+00> : vector<64x128xf32>
    %71 = tpu.matmul %70, %7, %cst_46 {dimension_numbers = #tpu.dot_dimension_numbers<[1], [0], [0], [1], [0, 0, 1, 1], [], []>} : vector<64x128xbf16>, vector<128x128xbf16>, vector<64x128xf32> -> vector<64x128xf32>
    %c2_47 = arith.constant 2 : index
    %c0_48 = arith.constant 0 : index
    %c0_49 = arith.constant 0 : index
    %72 = vector.load %arg5[%c2_47, %c0_48, %c0_49] : memref<8x128x64xbf16, #tpu.memory_space<vmem>>, vector<1x128x64xbf16>
    %73 = vector.shape_cast %72 : vector<1x128x64xbf16> to vector<128x64xbf16>
    %cst_50 = arith.constant dense<0.000000e+00> : vector<128x64xf32>
    %74 = tpu.matmul %5, %73, %cst_50 {dimension_numbers = #tpu.dot_dimension_numbers<[1], [0], [0], [1], [0, 0, 1, 1], [], []>} : vector<128x128xbf16>, vector<128x64xbf16>, vector<128x64xf32> -> vector<128x64xf32>
    %cst_51 = arith.constant 1.250000e-01 : f32
    %75 = vector.broadcast %cst_51 : f32 to vector<128x64xf32>
    %76 = arith.mulf %68, %75 : vector<128x64xf32>
    %77 = arith.truncf %76 : vector<128x64xf32> to vector<128x64xbf16>
    %78 = arith.truncf %71 : vector<64x128xf32> to vector<64x128xbf16>
    %cst_52 = arith.constant dense<0.000000e+00> : vector<128x128xf32>
    %79 = tpu.matmul %77, %78, %cst_52 {dimension_numbers = #tpu.dot_dimension_numbers<[1], [0], [0], [1], [0, 0, 1, 1], [], []>} : vector<128x64xbf16>, vector<64x128xbf16>, vector<128x128xf32> -> vector<128x128xf32>
    %cst_53 = arith.constant dense<0xFF800000> : vector<128xf32>
    %80 = vector.multi_reduction <maximumf>, %79, %cst_53 [1] : vector<128x128xf32> to vector<128xf32>
    %81 = vector.shape_cast %80 : vector<128xf32> to vector<128x1xf32>
    %82 = vector.broadcast %81 : vector<128x1xf32> to vector<128x128xf32>
    %83 = arith.subf %79, %82 : vector<128x128xf32>
    %84 = math.exp %83 : vector<128x128xf32>
    %cst_54 = arith.constant dense<0.000000e+00> : vector<128xf32>
    %85 = vector.multi_reduction <add>, %84, %cst_54 [1] : vector<128x128xf32> to vector<128xf32>
    %86 = vector.shape_cast %85 : vector<128xf32> to vector<128x1xf32>
    %87 = tpu.reciprocal %86 {approx = true} : vector<128x1xf32> -> vector<128x1xf32>
    %88 = vector.broadcast %87 : vector<128x1xf32> to vector<128x128xf32>
    %89 = arith.mulf %84, %88 : vector<128x128xf32>
    %90 = arith.truncf %89 : vector<128x128xf32> to vector<128x128xbf16>
    %91 = arith.truncf %74 : vector<128x64xf32> to vector<128x64xbf16>
    %cst_55 = arith.constant dense<0.000000e+00> : vector<128x64xf32>
    %92 = tpu.matmul %90, %91, %cst_55 {dimension_numbers = #tpu.dot_dimension_numbers<[1], [0], [0], [1], [0, 0, 1, 1], [], []>} : vector<128x128xbf16>, vector<128x64xbf16>, vector<128x64xf32> -> vector<128x64xf32>
    %93 = arith.truncf %92 : vector<128x64xf32> to vector<128x64xbf16>
    %c0_56 = arith.constant 0 : index
    %c128 = arith.constant 128 : index
    %94 = vector.load %arg9[%c0_56, %c128] : memref<128x512xbf16, #tpu.memory_space<vmem>>, vector<128x64xbf16>
    tpu.vector_store %arg9[%c0_56, %c128], %93 {strides = array<i32>} : memref<128x512xbf16, #tpu.memory_space<vmem>>, vector<128x64xbf16>,
    %c3 = arith.constant 3 : index
    %c0_57 = arith.constant 0 : index
    %c0_58 = arith.constant 0 : index
    %95 = vector.load %arg3[%c3, %c0_57, %c0_58] : memref<8x128x64xbf16, #tpu.memory_space<vmem>>, vector<1x128x64xbf16>
    %96 = vector.shape_cast %95 : vector<1x128x64xbf16> to vector<128x64xbf16>
    %cst_59 = arith.constant dense<0.000000e+00> : vector<128x64xf32>
    %97 = tpu.matmul %4, %96, %cst_59 {dimension_numbers = #tpu.dot_dimension_numbers<[1], [0], [0], [1], [0, 0, 1, 1], [], []>} : vector<128x128xbf16>, vector<128x64xbf16>, vector<128x64xf32> -> vector<128x64xf32>
    %c3_60 = arith.constant 3 : index
    %c0_61 = arith.constant 0 : index
    %c0_62 = arith.constant 0 : index
    %98 = vector.load %arg4[%c3_60, %c0_61, %c0_62] : memref<8x64x128xbf16, #tpu.memory_space<vmem>>, vector<1x64x128xbf16>
    %99 = vector.shape_cast %98 : vector<1x64x128xbf16> to vector<64x128xbf16>
    %cst_63 = arith.constant dense<0.000000e+00> : vector<64x128xf32>
    %100 = tpu.matmul %99, %7, %cst_63 {dimension_numbers = #tpu.dot_dimension_numbers<[1], [0], [0], [1], [0, 0, 1, 1], [], []>} : vector<64x128xbf16>, vector<128x128xbf16>, vector<64x128xf32> -> vector<64x128xf32>
    %c3_64 = arith.constant 3 : index
    %c0_65 = arith.constant 0 : index
    %c0_66 = arith.constant 0 : index
    %101 = vector.load %arg5[%c3_64, %c0_65, %c0_66] : memref<8x128x64xbf16, #tpu.memory_space<vmem>>, vector<1x128x64xbf16>
    %102 = vector.shape_cast %101 : vector<1x128x64xbf16> to vector<128x64xbf16>
    %cst_67 = arith.constant dense<0.000000e+00> : vector<128x64xf32>
    %103 = tpu.matmul %5, %102, %cst_67 {dimension_numbers = #tpu.dot_dimension_numbers<[1], [0], [0], [1], [0, 0, 1, 1], [], []>} : vector<128x128xbf16>, vector<128x64xbf16>, vector<128x64xf32> -> vector<128x64xf32>
    %cst_68 = arith.constant 1.250000e-01 : f32
    %104 = vector.broadcast %cst_68 : f32 to vector<128x64xf32>
    %105 = arith.mulf %97, %104 : vector<128x64xf32>
    %106 = arith.truncf %105 : vector<128x64xf32> to vector<128x64xbf16>
    %107 = arith.truncf %100 : vector<64x128xf32> to vector<64x128xbf16>
    %cst_69 = arith.constant dense<0.000000e+00> : vector<128x128xf32>
    %108 = tpu.matmul %106, %107, %cst_69 {dimension_numbers = #tpu.dot_dimension_numbers<[1], [0], [0], [1], [0, 0, 1, 1], [], []>} : vector<128x64xbf16>, vector<64x128xbf16>, vector<128x128xf32> -> vector<128x128xf32>
    %cst_70 = arith.constant dense<0xFF800000> : vector<128xf32>
    %109 = vector.multi_reduction <maximumf>, %108, %cst_70 [1] : vector<128x128xf32> to vector<128xf32>
    %110 = vector.shape_cast %109 : vector<128xf32> to vector<128x1xf32>
    %111 = vector.broadcast %110 : vector<128x1xf32> to vector<128x128xf32>
    %112 = arith.subf %108, %111 : vector<128x128xf32>
    %113 = math.exp %112 : vector<128x128xf32>
    %cst_71 = arith.constant dense<0.000000e+00> : vector<128xf32>
    %114 = vector.multi_reduction <add>, %113, %cst_71 [1] : vector<128x128xf32> to vector<128xf32>
    %115 = vector.shape_cast %114 : vector<128xf32> to vector<128x1xf32>
    %116 = tpu.reciprocal %115 {approx = true} : vector<128x1xf32> -> vector<128x1xf32>
    %117 = vector.broadcast %116 : vector<128x1xf32> to vector<128x128xf32>
    %118 = arith.mulf %113, %117 : vector<128x128xf32>
    %119 = arith.truncf %118 : vector<128x128xf32> to vector<128x128xbf16>
    %120 = arith.truncf %103 : vector<128x64xf32> to vector<128x64xbf16>
    %cst_72 = arith.constant dense<0.000000e+00> : vector<128x64xf32>
    %121 = tpu.matmul %119, %120, %cst_72 {dimension_numbers = #tpu.dot_dimension_numbers<[1], [0], [0], [1], [0, 0, 1, 1], [], []>} : vector<128x128xbf16>, vector<128x64xbf16>, vector<128x64xf32> -> vector<128x64xf32>
    %122 = arith.truncf %121 : vector<128x64xf32> to vector<128x64xbf16>
    %c0_73 = arith.constant 0 : index
    %c192 = arith.constant 192 : index
    %123 = vector.load %arg9[%c0_73, %c192] : memref<128x512xbf16, #tpu.memory_space<vmem>>, vector<128x64xbf16>
    tpu.vector_store %arg9[%c0_73, %c192], %122 {strides = array<i32>} : memref<128x512xbf16, #tpu.memory_space<vmem>>, vector<128x64xbf16>,
    %c4 = arith.constant 4 : index
    %c0_74 = arith.constant 0 : index
    %c0_75 = arith.constant 0 : index
    %124 = vector.load %arg3[%c4, %c0_74, %c0_75] : memref<8x128x64xbf16, #tpu.memory_space<vmem>>, vector<1x128x64xbf16>
    %125 = vector.shape_cast %124 : vector<1x128x64xbf16> to vector<128x64xbf16>
    %cst_76 = arith.constant dense<0.000000e+00> : vector<128x64xf32>
    %126 = tpu.matmul %4, %125, %cst_76 {dimension_numbers = #tpu.dot_dimension_numbers<[1], [0], [0], [1], [0, 0, 1, 1], [], []>} : vector<128x128xbf16>, vector<128x64xbf16>, vector<128x64xf32> -> vector<128x64xf32>
    %c4_77 = arith.constant 4 : index
    %c0_78 = arith.constant 0 : index
    %c0_79 = arith.constant 0 : index
    %127 = vector.load %arg4[%c4_77, %c0_78, %c0_79] : memref<8x64x128xbf16, #tpu.memory_space<vmem>>, vector<1x64x128xbf16>
    %128 = vector.shape_cast %127 : vector<1x64x128xbf16> to vector<64x128xbf16>
    %cst_80 = arith.constant dense<0.000000e+00> : vector<64x128xf32>
    %129 = tpu.matmul %128, %7, %cst_80 {dimension_numbers = #tpu.dot_dimension_numbers<[1], [0], [0], [1], [0, 0, 1, 1], [], []>} : vector<64x128xbf16>, vector<128x128xbf16>, vector<64x128xf32> -> vector<64x128xf32>
    %c4_81 = arith.constant 4 : index
    %c0_82 = arith.constant 0 : index
    %c0_83 = arith.constant 0 : index
    %130 = vector.load %arg5[%c4_81, %c0_82, %c0_83] : memref<8x128x64xbf16, #tpu.memory_space<vmem>>, vector<1x128x64xbf16>
    %131 = vector.shape_cast %130 : vector<1x128x64xbf16> to vector<128x64xbf16>
    %cst_84 = arith.constant dense<0.000000e+00> : vector<128x64xf32>
    %132 = tpu.matmul %5, %131, %cst_84 {dimension_numbers = #tpu.dot_dimension_numbers<[1], [0], [0], [1], [0, 0, 1, 1], [], []>} : vector<128x128xbf16>, vector<128x64xbf16>, vector<128x64xf32> -> vector<128x64xf32>
    %cst_85 = arith.constant 1.250000e-01 : f32
    %133 = vector.broadcast %cst_85 : f32 to vector<128x64xf32>
    %134 = arith.mulf %126, %133 : vector<128x64xf32>
    %135 = arith.truncf %134 : vector<128x64xf32> to vector<128x64xbf16>
    %136 = arith.truncf %129 : vector<64x128xf32> to vector<64x128xbf16>
    %cst_86 = arith.constant dense<0.000000e+00> : vector<128x128xf32>
    %137 = tpu.matmul %135, %136, %cst_86 {dimension_numbers = #tpu.dot_dimension_numbers<[1], [0], [0], [1], [0, 0, 1, 1], [], []>} : vector<128x64xbf16>, vector<64x128xbf16>, vector<128x128xf32> -> vector<128x128xf32>
    %cst_87 = arith.constant dense<0xFF800000> : vector<128xf32>
    %138 = vector.multi_reduction <maximumf>, %137, %cst_87 [1] : vector<128x128xf32> to vector<128xf32>
    %139 = vector.shape_cast %138 : vector<128xf32> to vector<128x1xf32>
    %140 = vector.broadcast %139 : vector<128x1xf32> to vector<128x128xf32>
    %141 = arith.subf %137, %140 : vector<128x128xf32>
    %142 = math.exp %141 : vector<128x128xf32>
    %cst_88 = arith.constant dense<0.000000e+00> : vector<128xf32>
    %143 = vector.multi_reduction <add>, %142, %cst_88 [1] : vector<128x128xf32> to vector<128xf32>
    %144 = vector.shape_cast %143 : vector<128xf32> to vector<128x1xf32>
    %145 = tpu.reciprocal %144 {approx = true} : vector<128x1xf32> -> vector<128x1xf32>
    %146 = vector.broadcast %145 : vector<128x1xf32> to vector<128x128xf32>
    %147 = arith.mulf %142, %146 : vector<128x128xf32>
    %148 = arith.truncf %147 : vector<128x128xf32> to vector<128x128xbf16>
    %149 = arith.truncf %132 : vector<128x64xf32> to vector<128x64xbf16>
    %cst_89 = arith.constant dense<0.000000e+00> : vector<128x64xf32>
    %150 = tpu.matmul %148, %149, %cst_89 {dimension_numbers = #tpu.dot_dimension_numbers<[1], [0], [0], [1], [0, 0, 1, 1], [], []>} : vector<128x128xbf16>, vector<128x64xbf16>, vector<128x64xf32> -> vector<128x64xf32>
    %151 = arith.truncf %150 : vector<128x64xf32> to vector<128x64xbf16>
    %c0_90 = arith.constant 0 : index
    %c256 = arith.constant 256 : index
    %152 = vector.load %arg9[%c0_90, %c256] : memref<128x512xbf16, #tpu.memory_space<vmem>>, vector<128x64xbf16>
    tpu.vector_store %arg9[%c0_90, %c256], %151 {strides = array<i32>} : memref<128x512xbf16, #tpu.memory_space<vmem>>, vector<128x64xbf16>,
    %c5 = arith.constant 5 : index
    %c0_91 = arith.constant 0 : index
    %c0_92 = arith.constant 0 : index
    %153 = vector.load %arg3[%c5, %c0_91, %c0_92] : memref<8x128x64xbf16, #tpu.memory_space<vmem>>, vector<1x128x64xbf16>
    %154 = vector.shape_cast %153 : vector<1x128x64xbf16> to vector<128x64xbf16>
    %cst_93 = arith.constant dense<0.000000e+00> : vector<128x64xf32>
    %155 = tpu.matmul %4, %154, %cst_93 {dimension_numbers = #tpu.dot_dimension_numbers<[1], [0], [0], [1], [0, 0, 1, 1], [], []>} : vector<128x128xbf16>, vector<128x64xbf16>, vector<128x64xf32> -> vector<128x64xf32>
    %c5_94 = arith.constant 5 : index
    %c0_95 = arith.constant 0 : index
    %c0_96 = arith.constant 0 : index
    %156 = vector.load %arg4[%c5_94, %c0_95, %c0_96] : memref<8x64x128xbf16, #tpu.memory_space<vmem>>, vector<1x64x128xbf16>
    %157 = vector.shape_cast %156 : vector<1x64x128xbf16> to vector<64x128xbf16>
    %cst_97 = arith.constant dense<0.000000e+00> : vector<64x128xf32>
    %158 = tpu.matmul %157, %7, %cst_97 {dimension_numbers = #tpu.dot_dimension_numbers<[1], [0], [0], [1], [0, 0, 1, 1], [], []>} : vector<64x128xbf16>, vector<128x128xbf16>, vector<64x128xf32> -> vector<64x128xf32>
    %c5_98 = arith.constant 5 : index
    %c0_99 = arith.constant 0 : index
    %c0_100 = arith.constant 0 : index
    %159 = vector.load %arg5[%c5_98, %c0_99, %c0_100] : memref<8x128x64xbf16, #tpu.memory_space<vmem>>, vector<1x128x64xbf16>
    %160 = vector.shape_cast %159 : vector<1x128x64xbf16> to vector<128x64xbf16>
    %cst_101 = arith.constant dense<0.000000e+00> : vector<128x64xf32>
    %161 = tpu.matmul %5, %160, %cst_101 {dimension_numbers = #tpu.dot_dimension_numbers<[1], [0], [0], [1], [0, 0, 1, 1], [], []>} : vector<128x128xbf16>, vector<128x64xbf16>, vector<128x64xf32> -> vector<128x64xf32>
    %cst_102 = arith.constant 1.250000e-01 : f32
    %162 = vector.broadcast %cst_102 : f32 to vector<128x64xf32>
    %163 = arith.mulf %155, %162 : vector<128x64xf32>
    %164 = arith.truncf %163 : vector<128x64xf32> to vector<128x64xbf16>
    %165 = arith.truncf %158 : vector<64x128xf32> to vector<64x128xbf16>
    %cst_103 = arith.constant dense<0.000000e+00> : vector<128x128xf32>
    %166 = tpu.matmul %164, %165, %cst_103 {dimension_numbers = #tpu.dot_dimension_numbers<[1], [0], [0], [1], [0, 0, 1, 1], [], []>} : vector<128x64xbf16>, vector<64x128xbf16>, vector<128x128xf32> -> vector<128x128xf32>
    %cst_104 = arith.constant dense<0xFF800000> : vector<128xf32>
    %167 = vector.multi_reduction <maximumf>, %166, %cst_104 [1] : vector<128x128xf32> to vector<128xf32>
    %168 = vector.shape_cast %167 : vector<128xf32> to vector<128x1xf32>
    %169 = vector.broadcast %168 : vector<128x1xf32> to vector<128x128xf32>
    %170 = arith.subf %166, %169 : vector<128x128xf32>
    %171 = math.exp %170 : vector<128x128xf32>
    %cst_105 = arith.constant dense<0.000000e+00> : vector<128xf32>
    %172 = vector.multi_reduction <add>, %171, %cst_105 [1] : vector<128x128xf32> to vector<128xf32>
    %173 = vector.shape_cast %172 : vector<128xf32> to vector<128x1xf32>
    %174 = tpu.reciprocal %173 {approx = true} : vector<128x1xf32> -> vector<128x1xf32>
    %175 = vector.broadcast %174 : vector<128x1xf32> to vector<128x128xf32>
    %176 = arith.mulf %171, %175 : vector<128x128xf32>
    %177 = arith.truncf %176 : vector<128x128xf32> to vector<128x128xbf16>
    %178 = arith.truncf %161 : vector<128x64xf32> to vector<128x64xbf16>
    %cst_106 = arith.constant dense<0.000000e+00> : vector<128x64xf32>
    %179 = tpu.matmul %177, %178, %cst_106 {dimension_numbers = #tpu.dot_dimension_numbers<[1], [0], [0], [1], [0, 0, 1, 1], [], []>} : vector<128x128xbf16>, vector<128x64xbf16>, vector<128x64xf32> -> vector<128x64xf32>
    %180 = arith.truncf %179 : vector<128x64xf32> to vector<128x64xbf16>
    %c0_107 = arith.constant 0 : index
    %c320 = arith.constant 320 : index
    %181 = vector.load %arg9[%c0_107, %c320] : memref<128x512xbf16, #tpu.memory_space<vmem>>, vector<128x64xbf16>
    tpu.vector_store %arg9[%c0_107, %c320], %180 {strides = array<i32>} : memref<128x512xbf16, #tpu.memory_space<vmem>>, vector<128x64xbf16>,
    %c6 = arith.constant 6 : index
    %c0_108 = arith.constant 0 : index
    %c0_109 = arith.constant 0 : index
    %182 = vector.load %arg3[%c6, %c0_108, %c0_109] : memref<8x128x64xbf16, #tpu.memory_space<vmem>>, vector<1x128x64xbf16>
    %183 = vector.shape_cast %182 : vector<1x128x64xbf16> to vector<128x64xbf16>
    %cst_110 = arith.constant dense<0.000000e+00> : vector<128x64xf32>
    %184 = tpu.matmul %4, %183, %cst_110 {dimension_numbers = #tpu.dot_dimension_numbers<[1], [0], [0], [1], [0, 0, 1, 1], [], []>} : vector<128x128xbf16>, vector<128x64xbf16>, vector<128x64xf32> -> vector<128x64xf32>
    %c6_111 = arith.constant 6 : index
    %c0_112 = arith.constant 0 : index
    %c0_113 = arith.constant 0 : index
    %185 = vector.load %arg4[%c6_111, %c0_112, %c0_113] : memref<8x64x128xbf16, #tpu.memory_space<vmem>>, vector<1x64x128xbf16>
    %186 = vector.shape_cast %185 : vector<1x64x128xbf16> to vector<64x128xbf16>
    %cst_114 = arith.constant dense<0.000000e+00> : vector<64x128xf32>
    %187 = tpu.matmul %186, %7, %cst_114 {dimension_numbers = #tpu.dot_dimension_numbers<[1], [0], [0], [1], [0, 0, 1, 1], [], []>} : vector<64x128xbf16>, vector<128x128xbf16>, vector<64x128xf32> -> vector<64x128xf32>
    %c6_115 = arith.constant 6 : index
    %c0_116 = arith.constant 0 : index
    %c0_117 = arith.constant 0 : index
    %188 = vector.load %arg5[%c6_115, %c0_116, %c0_117] : memref<8x128x64xbf16, #tpu.memory_space<vmem>>, vector<1x128x64xbf16>
    %189 = vector.shape_cast %188 : vector<1x128x64xbf16> to vector<128x64xbf16>
    %cst_118 = arith.constant dense<0.000000e+00> : vector<128x64xf32>
    %190 = tpu.matmul %5, %189, %cst_118 {dimension_numbers = #tpu.dot_dimension_numbers<[1], [0], [0], [1], [0, 0, 1, 1], [], []>} : vector<128x128xbf16>, vector<128x64xbf16>, vector<128x64xf32> -> vector<128x64xf32>
    %cst_119 = arith.constant 1.250000e-01 : f32
    %191 = vector.broadcast %cst_119 : f32 to vector<128x64xf32>
    %192 = arith.mulf %184, %191 : vector<128x64xf32>
    %193 = arith.truncf %192 : vector<128x64xf32> to vector<128x64xbf16>
    %194 = arith.truncf %187 : vector<64x128xf32> to vector<64x128xbf16>
    %cst_120 = arith.constant dense<0.000000e+00> : vector<128x128xf32>
    %195 = tpu.matmul %193, %194, %cst_120 {dimension_numbers = #tpu.dot_dimension_numbers<[1], [0], [0], [1], [0, 0, 1, 1], [], []>} : vector<128x64xbf16>, vector<64x128xbf16>, vector<128x128xf32> -> vector<128x128xf32>
    %cst_121 = arith.constant dense<0xFF800000> : vector<128xf32>
    %196 = vector.multi_reduction <maximumf>, %195, %cst_121 [1] : vector<128x128xf32> to vector<128xf32>
    %197 = vector.shape_cast %196 : vector<128xf32> to vector<128x1xf32>
    %198 = vector.broadcast %197 : vector<128x1xf32> to vector<128x128xf32>
    %199 = arith.subf %195, %198 : vector<128x128xf32>
    %200 = math.exp %199 : vector<128x128xf32>
    %cst_122 = arith.constant dense<0.000000e+00> : vector<128xf32>
    %201 = vector.multi_reduction <add>, %200, %cst_122 [1] : vector<128x128xf32> to vector<128xf32>
    %202 = vector.shape_cast %201 : vector<128xf32> to vector<128x1xf32>
    %203 = tpu.reciprocal %202 {approx = true} : vector<128x1xf32> -> vector<128x1xf32>
    %204 = vector.broadcast %203 : vector<128x1xf32> to vector<128x128xf32>
    %205 = arith.mulf %200, %204 : vector<128x128xf32>
    %206 = arith.truncf %205 : vector<128x128xf32> to vector<128x128xbf16>
    %207 = arith.truncf %190 : vector<128x64xf32> to vector<128x64xbf16>
    %cst_123 = arith.constant dense<0.000000e+00> : vector<128x64xf32>
    %208 = tpu.matmul %206, %207, %cst_123 {dimension_numbers = #tpu.dot_dimension_numbers<[1], [0], [0], [1], [0, 0, 1, 1], [], []>} : vector<128x128xbf16>, vector<128x64xbf16>, vector<128x64xf32> -> vector<128x64xf32>
    %209 = arith.truncf %208 : vector<128x64xf32> to vector<128x64xbf16>
    %c0_124 = arith.constant 0 : index
    %c384 = arith.constant 384 : index
    %210 = vector.load %arg9[%c0_124, %c384] : memref<128x512xbf16, #tpu.memory_space<vmem>>, vector<128x64xbf16>
    tpu.vector_store %arg9[%c0_124, %c384], %209 {strides = array<i32>} : memref<128x512xbf16, #tpu.memory_space<vmem>>, vector<128x64xbf16>,
    %c7 = arith.constant 7 : index
    %c0_125 = arith.constant 0 : index
    %c0_126 = arith.constant 0 : index
    %211 = vector.load %arg3[%c7, %c0_125, %c0_126] : memref<8x128x64xbf16, #tpu.memory_space<vmem>>, vector<1x128x64xbf16>
    %212 = vector.shape_cast %211 : vector<1x128x64xbf16> to vector<128x64xbf16>
    %cst_127 = arith.constant dense<0.000000e+00> : vector<128x64xf32>
    %213 = tpu.matmul %4, %212, %cst_127 {dimension_numbers = #tpu.dot_dimension_numbers<[1], [0], [0], [1], [0, 0, 1, 1], [], []>} : vector<128x128xbf16>, vector<128x64xbf16>, vector<128x64xf32> -> vector<128x64xf32>
    %c7_128 = arith.constant 7 : index
    %c0_129 = arith.constant 0 : index
    %c0_130 = arith.constant 0 : index
    %214 = vector.load %arg4[%c7_128, %c0_129, %c0_130] : memref<8x64x128xbf16, #tpu.memory_space<vmem>>, vector<1x64x128xbf16>
    %215 = vector.shape_cast %214 : vector<1x64x128xbf16> to vector<64x128xbf16>
    %cst_131 = arith.constant dense<0.000000e+00> : vector<64x128xf32>
    %216 = tpu.matmul %215, %7, %cst_131 {dimension_numbers = #tpu.dot_dimension_numbers<[1], [0], [0], [1], [0, 0, 1, 1], [], []>} : vector<64x128xbf16>, vector<128x128xbf16>, vector<64x128xf32> -> vector<64x128xf32>
    %c7_132 = arith.constant 7 : index
    %c0_133 = arith.constant 0 : index
    %c0_134 = arith.constant 0 : index
    %217 = vector.load %arg5[%c7_132, %c0_133, %c0_134] : memref<8x128x64xbf16, #tpu.memory_space<vmem>>, vector<1x128x64xbf16>
    %218 = vector.shape_cast %217 : vector<1x128x64xbf16> to vector<128x64xbf16>
    %cst_135 = arith.constant dense<0.000000e+00> : vector<128x64xf32>
    %219 = tpu.matmul %5, %218, %cst_135 {dimension_numbers = #tpu.dot_dimension_numbers<[1], [0], [0], [1], [0, 0, 1, 1], [], []>} : vector<128x128xbf16>, vector<128x64xbf16>, vector<128x64xf32> -> vector<128x64xf32>
    %cst_136 = arith.constant 1.250000e-01 : f32
    %220 = vector.broadcast %cst_136 : f32 to vector<128x64xf32>
    %221 = arith.mulf %213, %220 : vector<128x64xf32>
    %222 = arith.truncf %221 : vector<128x64xf32> to vector<128x64xbf16>
    %223 = arith.truncf %216 : vector<64x128xf32> to vector<64x128xbf16>
    %cst_137 = arith.constant dense<0.000000e+00> : vector<128x128xf32>
    %224 = tpu.matmul %222, %223, %cst_137 {dimension_numbers = #tpu.dot_dimension_numbers<[1], [0], [0], [1], [0, 0, 1, 1], [], []>} : vector<128x64xbf16>, vector<64x128xbf16>, vector<128x128xf32> -> vector<128x128xf32>
    %cst_138 = arith.constant dense<0xFF800000> : vector<128xf32>
    %225 = vector.multi_reduction <maximumf>, %224, %cst_138 [1] : vector<128x128xf32> to vector<128xf32>
    %226 = vector.shape_cast %225 : vector<128xf32> to vector<128x1xf32>
    %227 = vector.broadcast %226 : vector<128x1xf32> to vector<128x128xf32>
    %228 = arith.subf %224, %227 : vector<128x128xf32>
    %229 = math.exp %228 : vector<128x128xf32>
    %cst_139 = arith.constant dense<0.000000e+00> : vector<128xf32>
    %230 = vector.multi_reduction <add>, %229, %cst_139 [1] : vector<128x128xf32> to vector<128xf32>
    %231 = vector.shape_cast %230 : vector<128xf32> to vector<128x1xf32>
    %232 = tpu.reciprocal %231 {approx = true} : vector<128x1xf32> -> vector<128x1xf32>
    %233 = vector.broadcast %232 : vector<128x1xf32> to vector<128x128xf32>
    %234 = arith.mulf %229, %233 : vector<128x128xf32>
    %235 = arith.truncf %234 : vector<128x128xf32> to vector<128x128xbf16>
    %236 = arith.truncf %219 : vector<128x64xf32> to vector<128x64xbf16>
    %cst_140 = arith.constant dense<0.000000e+00> : vector<128x64xf32>
    %237 = tpu.matmul %235, %236, %cst_140 {dimension_numbers = #tpu.dot_dimension_numbers<[1], [0], [0], [1], [0, 0, 1, 1], [], []>} : vector<128x128xbf16>, vector<128x64xbf16>, vector<128x64xf32> -> vector<128x64xf32>
    %238 = arith.truncf %237 : vector<128x64xf32> to vector<128x64xbf16>
    %c0_141 = arith.constant 0 : index
    %c448 = arith.constant 448 : index
    %239 = vector.load %arg9[%c0_141, %c448] : memref<128x512xbf16, #tpu.memory_space<vmem>>, vector<128x64xbf16>
    tpu.vector_store %arg9[%c0_141, %c448], %238 {strides = array<i32>} : memref<128x512xbf16, #tpu.memory_space<vmem>>, vector<128x64xbf16>,
    %c0_142 = arith.constant 0 : index
    %c0_143 = arith.constant 0 : index
    %240 = vector.load %arg9[%c0_142, %c0_143] : memref<128x512xbf16, #tpu.memory_space<vmem>>, vector<128x512xbf16>
    %c0_144 = arith.constant 0 : index
    %c0_145 = arith.constant 0 : index
    %241 = vector.load %arg6[%c0_144, %c0_145] : memref<512x128xbf16, #tpu.memory_space<vmem>>, vector<512x128xbf16>
    %cst_146 = arith.constant dense<0.000000e+00> : vector<128x128xf32>
    %242 = tpu.matmul %240, %241, %cst_146 {dimension_numbers = #tpu.dot_dimension_numbers<[1], [0], [0], [1], [0, 0, 1, 1], [], []>} : vector<128x512xbf16>, vector<512x128xbf16>, vector<128x128xf32> -> vector<128x128xf32>
    %c0_147 = arith.constant 0 : index
    %c0_148 = arith.constant 0 : index
    %243 = vector.load %arg7[%c0_147, %c0_148] : memref<1x128xf32, #tpu.memory_space<vmem>>, vector<1x128xf32>
    %244 = vector.broadcast %243 : vector<1x128xf32> to vector<128x128xf32>
    %245 = arith.addf %242, %244 : vector<128x128xf32>
    %c0_149 = arith.constant 0 : index
    %c0_150 = arith.constant 0 : index
    %c0_151 = arith.constant 0 : index
    %246 = vector.load %arg8[%c0_149, %c0_150, %c0_151] : memref<1x128x128xf32, #tpu.memory_space<vmem>>, vector<1x128x128xf32>
    %247 = vector.shape_cast %246 : vector<1x128x128xf32> to vector<128x128xf32>
    %248 = vector.shape_cast %245 : vector<128x128xf32> to vector<1x128x128xf32>
    tpu.vector_store %arg8[%c0_149, %c0_150, %c0_151], %248 {strides = array<i32>} : memref<1x128x128xf32, #tpu.memory_space<vmem>>, vector<1x128x128xf32>,
    return
  }
  func.func @transform_0(%arg0: i32) -> (i32, i32, i32) {
    %c0_i32 = arith.constant 0 : i32
    %c0_i32_0 = arith.constant 0 : i32
    %c0_i32_1 = arith.constant 0 : i32
    return %arg0, %c0_i32, %c0_i32_0 : i32, i32, i32
  }
  func.func @transform_1(%arg0: i32) -> (i32, i32, i32) {
    %c0_i32 = arith.constant 0 : i32
    %c0_i32_0 = arith.constant 0 : i32
    %c0_i32_1 = arith.constant 0 : i32
    return %arg0, %c0_i32, %c0_i32_0 : i32, i32, i32
  }
  func.func @transform_2(%arg0: i32) -> (i32, i32, i32) {
    %c0_i32 = arith.constant 0 : i32
    %c0_i32_0 = arith.constant 0 : i32
    %c0_i32_1 = arith.constant 0 : i32
    %c0_i32_2 = arith.constant 0 : i32
    return %c0_i32, %c0_i32_0, %c0_i32_1 : i32, i32, i32
  }
  func.func @transform_3(%arg0: i32) -> (i32, i32, i32) {
    %c0_i32 = arith.constant 0 : i32
    %c0_i32_0 = arith.constant 0 : i32
    %c0_i32_1 = arith.constant 0 : i32
    %c0_i32_2 = arith.constant 0 : i32
    return %c0_i32, %c0_i32_0, %c0_i32_1 : i32, i32, i32
  }
  func.func @transform_4(%arg0: i32) -> (i32, i32, i32) {
    %c0_i32 = arith.constant 0 : i32
    %c0_i32_0 = arith.constant 0 : i32
    %c0_i32_1 = arith.constant 0 : i32
    %c0_i32_2 = arith.constant 0 : i32
    return %c0_i32, %c0_i32_0, %c0_i32_1 : i32, i32, i32
  }
  func.func @transform_5(%arg0: i32) -> (i32, i32) {
    %c0_i32 = arith.constant 0 : i32
    %c0_i32_0 = arith.constant 0 : i32
    %c0_i32_1 = arith.constant 0 : i32
    return %c0_i32, %c0_i32_0 : i32, i32
  }
  func.func @transform_6(%arg0: i32) -> (i32, i32) {
    %c0_i32 = arith.constant 0 : i32
    %c0_i32_0 = arith.constant 0 : i32
    %c0_i32_1 = arith.constant 0 : i32
    return %c0_i32, %c0_i32_0 : i32, i32
  }
  func.func @transform_7(%arg0: i32) -> (i32, i32, i32) {
    %c0_i32 = arith.constant 0 : i32
    %c0_i32_0 = arith.constant 0 : i32
    %c0_i32_1 = arith.constant 0 : i32
    return %arg0, %c0_i32, %c0_i32_0 : i32, i32, i32
  }
}

</mosaic_0001>

<bundles_post_ra>
// kernel: _attention_jit.1
= control target key start
LH: loop header
LB: loop body
LE: loop exit
PB: predicated region body
PF: predicated region fallthrough
CT: control target
= control target key end

     0   :  { %12 = vsyncpa [#allocation4], 0  ;;  %s14173_s0 = inlined_call_operand.vmem [shape: f32[2,128,128], index: 0, kind: input, shape index: {}]   ;;  %s14174_s1 = inlined_call_operand.vmem [shape: f32[2,128,128], index: 1, kind: input, shape index: {}]   ;;  %s14175_s2 = inlined_call_operand.vmem [shape: bf16[8,128,64], index: 2, kind: input, shape index: {}]   ;;  %s14176_s3 = inlined_call_operand.vmem [shape: bf16[8,64,128], index: 3, kind: input, shape index: {}]   ;;  %s14177_s4 = inlined_call_operand.vmem [shape: bf16[8,128,64], index: 4, kind: input, shape index: {}]   ;;  %s14178_s5 = inlined_call_operand.vmem [shape: bf16[512,128], index: 5, kind: input, shape index: {}]   ;;  %s14179_s6 = inlined_call_operand.vmem [shape: f32[1,128], index: 6, kind: input, shape index: {}]   ;;  %s14180_s7 = inlined_call_operand.hbm [shape: f32[2,128,128], index: 7, kind: output, shape index: {}]  }
   0x1   :  { %14 = vsyncpa [#allocation4 + $0x1], 0  ;;  %s11138_s24 = smov 0   ;;  %s11140_s25 = smov 0  }
   0x2   :  { %s11142_s26 = smov 0   ;;  %s11144_s27 = smov 0  }
   0x3 LB: > { %s11159_s28 = sadd.s32 4294967295, %s11092_s27   ;;  %s7858_s29 = sadd.s32 4294967294, %s11092_s27   ;;  %s11092_s27 = sphi %s11144_s27, %s14457_s27   ;;  %s11088_s26 = sphi %s11142_s26, %s14456_s26   ;;  %s11084_s25 = sphi %s11140_s25, %s14455_s25   ;;  %s11080_s24 = sphi %s11138_s24, %s14454_s24  }
   0x4   : > { %s11163_s30 = sadd.s32 1, %s11092_s27   ;;  %s184_s8 = sadd.s32 1, %s11088_s26 }
   0x5   : > { %s181_s9 = ssub.s32 %s11092_s27, %s11163_s30  ;;  %p194_p0 = scmp.ne.s32.totalorder %s11088_s26, %s11084_s25 }
   0x6   : > { %p182_p1 = scmp.eq.s32.totalorder %s181_s9, 0  ;;  %p195_p2 = scmp.eq.s32.totalorder %s11159_s28, 1 }
   0x7   : > { %p200_p3 = scmp.ne.s32.totalorder %s11084_s25, %s11080_s24  ;;  %p201_p4 = scmp.eq.s32.totalorder %s7858_s29, 1 }
   0x8   : > { %s11174_s10 = scalar_select %p182_p1, %s11088_s26, %s184_s8  }
   0x9   : > { %p11176_p5 = por %p195_p2, %p194_p0  ;;  %p11180_p6 = por %p201_p4, %p200_p3 }
   0xa   : > { %p7861_p7 = scmp.ge.s32.totalorder %s11092_s27, 1  ;;  %p250_p8 = scmp.lt.s32.totalorder %s11092_s27, 3 }
   0xc   : > { %p251_p9 = pnand %p7861_p7, %p250_p8 }
   0xe   : > { %254 = sbr.rel (%p251_p9) target bundleno = 7222 (0x1c36), region = 48 }
  0x15   : > { %v10326_v0 = vld [vmem:[%s14175_s2] sm:$0xff]   ;;  %p287_p10 = scmp.lt.s32.totalorder %s11159_s28, 1  ;;  %v10327_v1 = vld [vmem:[%s14175_s2 + $0x8] sm:$0xff]   ;;  %v10328_v2 = vld [vmem:[%s14175_s2 + $0x10] sm:$0xff]   ;;  %vm833_vm0 = vcmask 523264   ;;  %vm2096_vm1 = vcmask 1048064  }
  0x16   : > { %9116 = vmatprep.subr.bf16.mxu0 %v10326_v0  ;;  %v10329_v5 = vld [vmem:[%s14175_s2 + $0x18] sm:$0xff]   ;;  %v10330_v10 = vld [vmem:[%s14175_s2 + $0x20] sm:$0xff]   ;;  %v10331_v11 = vld [vmem:[%s14175_s2 + $0x28] sm:$0xff]   ;;  %s8411_s29 = sshll.u32 %s11159_s28, 11  ;;  %s11095_s16 = smov [#allocation3]  }
  0x17   : > { %s288_s17 = scalar_select %p287_p10, %s11159_s28, 1  ;;  %9117 = vmatpush3.bf16.msra.mxu0 %v10326_v0  ;;  %v10332_v14 = vld [vmem:[%s14175_s2 + $0x30] sm:$0xff]   ;;  %v10333_v16 = vld [vmem:[%s14175_s2 + $0x38] sm:$0xff]   ;;  %v10334_v18 = vld [vmem:[%s14177_s4] sm:$0xff]  }
  0x18   : > { %9118 = vmatprep.subr.bf16.mxu0 %v10327_v1  ;;  %v10335_v25 = vld [vmem:[%s14177_s4 + $0x8] sm:$0xff]   ;;  %v10336_v30 = vld [vmem:[%s14177_s4 + $0x10] sm:$0xff]   ;;  %v10337_v35 = vld [vmem:[%s14177_s4 + $0x18] sm:$0xff]   ;;  %s14122_s28 = scalar_lea.hbm %s14180_s7, %s8411_s29 }
  0x19   : > { %s8409_s18 = sshll.u32 %s288_s17, 7  ;;  %v10338_v40 = vld [vmem:[%s14177_s4 + $0x20] sm:$0xff]   ;;  %v10339_v45 = vld [vmem:[%s14177_s4 + $0x28] sm:$0xff]   ;;  %v10340_v50 = vld [vmem:[%s14177_s4 + $0x30] sm:$0xff]   ;;  %s11034_s17 = sshll.u32 %s11095_s16, 4  ;;  %s11035_s17 = int_to_ptr.vmem [resolvable:$false] %s11034_s17 }
  0x1a   : > { %s11200_s23 = scalar_lea.vmem %s14174_s1, %s8409_s18  ;;  %s11209_s9 = scalar_lea.vmem %s14173_s0, %s8409_s18  ;;  %v10341_v53 = vld [vmem:[%s14177_s4 + $0x38] sm:$0xff]   ;;  %v10342_v56 = vld [vmem:[%s14175_s2 + $0x40] sm:$0xff]   ;;  %v10343_v59 = vld [vmem:[%s14175_s2 + $0x48] sm:$0xff]  }
  0x1b   : > { %v11203_v3 = vld [vmem:[%s11200_s23] sm:$0xff]  ;;  %9119 = vmatpush3.bf16.msra.mxu0 %v10327_v1  ;;  %v11212_v4 = vld [vmem:[%s11200_s23 + $0x8] sm:$0xff]  ;;  %v11223_v9 = vld [vmem:[%s11200_s23 + $0x10] sm:$0xff]  ;;  %s11094_s18 = smov 64   ;;  %s11036_s19 = scalar_lea.vmem %s11035_s17, 4096 }
  0x1c   : > { %346 = vxpose.xlu0.b32.start [1/16] %v11203_v3, 128  ;;  %9120 = vmatprep.subr.bf16.mxu0 %v10328_v2  ;;  %v298_v6 = vld [vmem:[%s11209_s9] sm:$0xff]  ;;  %v299_v7 = vld [vmem:[%s11209_s9 + $0x8] sm:$0xff]  ;;  %v11234_v12 = vld [vmem:[%s11200_s23 + $0x18] sm:$0xff]  ;;  %v11331_v54 = vpack.c.bf16 %v11212_v4, %v11203_v3 }
  0x1d   : > { %v11220_v8 = vpack.c.bf16 %v299_v7, %v298_v6  ;;  %v11238_v13 = vld [vmem:[%s11200_s23 + $0x20] sm:$0xff]  ;;  %v11245_v15 = vld [vmem:[%s11200_s23 + $0x28] sm:$0xff]  ;;  %v11251_v17 = vld [vmem:[%s11200_s23 + $0x30] sm:$0xff]  ;;  %v11341_v57 = vpack.c.bf16 %v11234_v12, %v11223_v9 }
  0x1e   : > { %v300_v19 = vld [vmem:[%s11209_s9 + $0x10] sm:$0xff]  ;;  %v301_v20 = vld [vmem:[%s11209_s9 + $0x18] sm:$0xff]  ;;  %v302_v21 = vld [vmem:[%s11209_s9 + $0x20] sm:$0xff]  ;;  %14249 = vst [vmem:[#allocation12_spill] sm:$0xff] %v11331_v54  ;;  %v11349_v60 = vpack.c.bf16 %v11245_v15, %v11238_v13 }
  0x1f   : > { %9121 = vmatpush3.bf16.msra.mxu0 %v10328_v2  ;;  %9132 = vmatprep.mubr.bf16.mxu0 %v11220_v8  ;;  %v303_v22 = vld [vmem:[%s11209_s9 + $0x28] sm:$0xff]  ;;  %v11261_v23 = vpack.c.bf16 %v301_v20, %v300_v19  ;;  %v11265_v24 = vld [vmem:[%s11200_s23 + $0x38] sm:$0xff]  ;;  %v304_v27 = vld [vmem:[%s11209_s9 + $0x30] sm:$0xff]  ;;  %14250 = vst [vmem:[#allocation13_spill] sm:$0xff] %v11341_v57 }
  0x20   : > { %347 = vxpose.xlu0.b32.cont [2/16] %v11212_v4, 128  ;;  %9122 = vmatprep.subr.bf16.mxu0 %v10329_v5  ;;  %v11270_v26 = vpack.c.bf16 %v303_v22, %v302_v21  ;;  %v11275_v28 = vld [vmem:[%s11200_s23 + $0x40] sm:$0xff]  ;;  %v305_v29 = vld [vmem:[%s11209_s9 + $0x38] sm:$0xff]  ;;  %v307_v32 = vld [vmem:[%s11209_s9 + $0x48] sm:$0xff]  ;;  %14251 = vst [vmem:[#allocation14_spill] sm:$0xff] %v11349_v60  ;;  %v11358_v62 = vpack.c.bf16 %v11265_v24, %v11251_v17 }
  0x21   : > { %v306_v31 = vld [vmem:[%s11209_s9 + $0x40] sm:$0xff]  ;;  %v11285_v33 = vpack.c.bf16 %v305_v29, %v304_v27  ;;  %v323_v34 = vld [vmem:[%s11200_s23 + $0x48] sm:$0xff]  ;;  %v308_v37 = vld [vmem:[%s11209_s9 + $0x50] sm:$0xff] }
  0x22   : > { %14243 = vst [vmem:[#allocation6_spill] sm:$0xff] %v11270_v26  ;;  %v11292_v36 = vpack.c.bf16 %v307_v32, %v306_v31  ;;  %v309_v38 = vld [vmem:[%s11209_s9 + $0x58] sm:$0xff]  ;;  %v11298_v39 = vld [vmem:[%s11200_s23 + $0x50] sm:$0xff]  ;;  %v310_v41 = vld [vmem:[%s11209_s9 + $0x60] sm:$0xff]  ;;  %v11361_v63 = vpack.c.bf16 %v323_v34, %v11275_v28 }
  0x23   : > { %9123 = vmatpush3.bf16.msra.mxu0 %v10329_v5  ;;  %14244 = vst [vmem:[#allocation7_spill] sm:$0xff] %v11285_v33  ;;  %v311_v42 = vld [vmem:[%s11209_s9 + $0x68] sm:$0xff]  ;;  %v325_v43 = vld [vmem:[%s11200_s23 + $0x58] sm:$0xff]  ;;  %v11307_v44 = vpack.c.bf16 %v309_v38, %v308_v37  ;;  %v312_v47 = vld [vmem:[%s11209_s9 + $0x70] sm:$0xff] }
  0x24   : > { %348 = vxpose.xlu0.b32.cont [3/16] %v11223_v9, 128  ;;  %9124 = vmatprep.subr.bf16.mxu0 %v10330_v10  ;;  %14245 = vst [vmem:[#allocation8_spill] sm:$0xff] %v11292_v36  ;;  %v11313_v46 = vpack.c.bf16 %v311_v42, %v310_v41  ;;  %v313_v48 = vld [vmem:[%s11209_s9 + $0x78] sm:$0xff]  ;;  %v326_v49 = vld [vmem:[%s11200_s23 + $0x60] sm:$0xff]  ;;  %v327_v51 = vld [vmem:[%s11200_s23 + $0x68] sm:$0xff]  ;;  %v11375_v3 = vpack.c.bf16 %v325_v43, %v11298_v39 }
  0x25   : > { %14246 = vst [vmem:[#allocation9_spill] sm:$0xff] %v11307_v44  ;;  %v11324_v52 = vpack.c.bf16 %v313_v48, %v312_v47  ;;  %v328_v55 = vld [vmem:[%s11200_s23 + $0x70] sm:$0xff]  ;;  %v329_v58 = vld [vmem:[%s11200_s23 + $0x78] sm:$0xff]  ;;  %14252 = vst [vmem:[#allocation15_spill] sm:$0xff] %v11358_v62  ;;  %v11380_v5 = vpack.c.bf16 %v327_v51, %v326_v49 }
  0x26   : > { %14247 = vst [vmem:[#allocation10_spill] sm:$0xff] %v11313_v46  ;;  %v10344_v61 = vld [vmem:[%s14175_s2 + $0x50] sm:$0xff]   ;;  %14253 = vst [vmem:[#allocation16_spill] sm:$0xff] %v11361_v63  ;;  %v10345_v0 = vld [vmem:[%s14175_s2 + $0x58] sm:$0xff]   ;;  %v11387_v7 = vpack.c.bf16 %v329_v58, %v328_v55 }
  0x27   : > { %9125 = vmatpush3.bf16.msra.mxu0 %v10330_v10  ;;  %14248 = vst [vmem:[#allocation11_spill] sm:$0xff] %v11324_v52  ;;  %v10358_v1 = vld [vmem:[%s14176_s3] sm:$0xff]   ;;  %14254 = vst [vmem:[#allocation17_spill] sm:$0xff] %v11375_v3  ;;  %v10347_v4 = vld [vmem:[%s14175_s2 + $0x68] sm:$0xff]  }
  0x28   : > { %349 = vxpose.xlu0.b32.cont [4/16] %v11234_v12, 128  ;;  %9126 = vmatprep.subr.bf16.mxu0 %v10331_v11  ;;  %v10346_v2 = vld [vmem:[%s14175_s2 + $0x60] sm:$0xff]   ;;  %14255 = vst [vmem:[#allocation18_spill] sm:$0xff] %v11380_v5  ;;  %v10348_v6 = vld [vmem:[%s14175_s2 + $0x70] sm:$0xff]   ;;  %14256 = vst [vmem:[#allocation19_spill] sm:$0xff] %v11387_v7 }
  0x29   : > { %9164 = vmatprep.mubr.bf16.mxu1 %v10358_v1  ;;  %v10349_v9 = vld [vmem:[%s14175_s2 + $0x78] sm:$0xff]   ;;  %v10350_v10 = vld [vmem:[%s14177_s4 + $0x40] sm:$0xff]   ;;  %v10352_v12 = vld [vmem:[%s14177_s4 + $0x50] sm:$0xff]  }
  0x2a   : > { %v10359_v48 = vld [vmem:[%s14176_s3 + $0x8] sm:$0xff]  }
  0x2b   : > { %9127 = vmatpush3.bf16.msra.mxu0 %v10331_v11  ;;  %v10351_v11 = vld [vmem:[%s14177_s4 + $0x48] sm:$0xff]  }
  0x2c   : > { %350 = vxpose.xlu0.b32.cont [5/16] %v11238_v13, 128  ;;  %9128 = vmatprep.subr.bf16.mxu0 %v10332_v14  ;;  %v10353_v13 = vld [vmem:[%s14177_s4 + $0x58] sm:$0xff]  }
  0x2f   : > { %9129 = vmatpush3.bf16.msra.mxu0 %v10332_v14  ;;  %v10354_v14 = vld [vmem:[%s14177_s4 + $0x60] sm:$0xff]  }
  0x30   : > { %351 = vxpose.xlu0.b32.cont [6/16] %v11245_v15, 128  ;;  %9130 = vmatprep.subr.bf16.mxu0 %v10333_v16  ;;  %v10355_v15 = vld [vmem:[%s14177_s4 + $0x68] sm:$0xff]  }
  0x33   : > { %9131 = vmatpush3.bf16.msra.mxu0 %v10333_v16  ;;  %v10356_v16 = vld [vmem:[%s14177_s4 + $0x70] sm:$0xff]  }
  0x34   : > { %352 = vxpose.xlu0.b32.cont [7/16] %v11251_v17, 128  ;;  %9172 = vmatprep.subr.bf16.mxu0 %v10334_v18  ;;  %v10357_v17 = vld [vmem:[%s14177_s4 + $0x78] sm:$0xff]  }
  0x36   : > { %9133 = vmatmul.mubr.bf16.vlgmr.msra.gmra.mrb[0].mxu0 %v11261_v23 }
  0x37   : > { %9173 = vmatpush3.bf16.msra.mxu0 %v10334_v18  ;;  %9136 = vmatprep.mubr.bf16.mxu0 %v11270_v26 }
  0x38   : > { %353 = vxpose.xlu0.b32.cont [8/16] %v11265_v24, 128  ;;  %9174 = vmatprep.subr.bf16.mxu0 %v10335_v25 }
  0x3b   : > { %9175 = vmatpush3.bf16.msra.mxu0 %v10335_v25 }
  0x3c   : > { %354 = vxpose.xlu0.b32.cont [9/16] %v11275_v28, 128  ;;  %9176 = vmatprep.subr.bf16.mxu0 %v10336_v30 }
  0x3e   : > { %9137 = vmatmul.mubr.bf16.gmra.mrb[4].mxu0 %v11285_v33 }
  0x3f   : > { %9177 = vmatpush3.bf16.msra.mxu0 %v10336_v30  ;;  %9140 = vmatprep.mubr.bf16.mxu0 %v11292_v36 }
  0x40   : > { %355 = vxpose.xlu0.b32.cont [10/16] %v323_v34, 128  ;;  %9178 = vmatprep.subr.bf16.mxu0 %v10337_v35 }
  0x43   : > { %9179 = vmatpush3.bf16.msra.mxu0 %v10337_v35 }
  0x44   : > { %356 = vxpose.xlu0.b32.cont [11/16] %v11298_v39, 128  ;;  %9180 = vmatprep.subr.bf16.mxu0 %v10338_v40 }
  0x46   : > { %9141 = vmatmul.mubr.bf16.gmra.mrb[8].mxu0 %v11307_v44 }
  0x47   : > { %9181 = vmatpush3.bf16.msra.mxu0 %v10338_v40  ;;  %9144 = vmatprep.mubr.bf16.mxu0 %v11313_v46 }
  0x48   : > { %357 = vxpose.xlu0.b32.cont [12/16] %v325_v43, 128  ;;  %9182 = vmatprep.subr.bf16.mxu0 %v10339_v45 }
  0x4b   : > { %9183 = vmatpush3.bf16.msra.mxu0 %v10339_v45 }
  0x4c   : > { %358 = vxpose.xlu0.b32.cont [13/16] %v326_v49, 128  ;;  %9184 = vmatprep.subr.bf16.mxu0 %v10340_v50  ;;  %v10360_v49 = vld [vmem:[%s14176_s3 + $0x10] sm:$0xff]  }
  0x4e   : > { %9145 = vmatmul.mubr.bf16.gmra.mrb[12].mxu0 %v11324_v52 }
  0x4f   : > { %9185 = vmatpush3.bf16.msra.mxu0 %v10340_v50  ;;  %9188 = vmatprep.mubr.bf16.mxu0 %v11331_v54  ;;  %v10361_v50 = vld [vmem:[%s14176_s3 + $0x18] sm:$0xff]  }
  0x50   : > { %359 = vxpose.xlu0.b32.cont [14/16] %v327_v51, 128  ;;  %9186 = vmatprep.subr.bf16.mxu0 %v10341_v53 }
  0x53   : > { %9187 = vmatpush3.bf16.msra.mxu0 %v10341_v53 }
  0x54   : > { %360 = vxpose.xlu0.b32.cont [15/16] %v328_v55, 128  ;;  %9260 = vmatprep.subr.bf16.mxu0 %v10342_v56 }
  0x56   : > { %9189 = vmatmul.mubr.bf16.vlgmr.msra.gmra.mrb[16].mxu0 %v11341_v57 }
  0x57   : > { %9261 = vmatpush3.bf16.msra.mxu0 %v10342_v56  ;;  %9192 = vmatprep.mubr.bf16.mxu0 %v11349_v60 }
  0x58   : > { %361 = vxpose.xlu0.b32.end [16/16] %v329_v58, 128  ;;  %9262 = vmatprep.subr.bf16.mxu0 %v10343_v59 }
  0x5b   : > { %9263 = vmatpush3.bf16.msra.mxu0 %v10343_v59 }
  0x5c   : > { %9264 = vmatprep.subr.bf16.mxu0 %v10344_v61 }
  0x5e   : > { %9193 = vmatmul.mubr.bf16.gmra.mrb[20].mxu0 %v11358_v62 }
  0x5f   : > { %9265 = vmatpush3.bf16.msra.mxu0 %v10344_v61  ;;  %9196 = vmatprep.mubr.bf16.mxu0 %v11361_v63 }
  0x60   : > { %9266 = vmatprep.subr.bf16.mxu0 %v10345_v0 }
  0x63   : > { %9267 = vmatpush3.bf16.msra.mxu0 %v10345_v0 }
  0x64   : > { %9268 = vmatprep.subr.bf16.mxu0 %v10346_v2 }
  0x66   : > { %9197 = vmatmul.mubr.bf16.gmra.mrb[24].mxu0 %v11375_v3 }
  0x67   : > { %9269 = vmatpush3.bf16.msra.mxu0 %v10346_v2  ;;  %9200 = vmatprep.mubr.bf16.mxu0 %v11380_v5 }
  0x68   : > { %9270 = vmatprep.subr.bf16.mxu0 %v10347_v4 }
  0x6b   : > { %9271 = vmatpush3.bf16.msra.mxu0 %v10347_v4 }
  0x6c   : > { %9272 = vmatprep.subr.bf16.mxu0 %v10348_v6 }
  0x6e   : > { %9201 = vmatmul.mubr.bf16.gmra.mrb[28].mxu0 %v11387_v7 }
  0x6f   : > { %9273 = vmatpush3.bf16.msra.mxu0 %v10348_v6  ;;  %9276 = vmatprep.mubr.bf16.mxu0 %v11220_v8 }
  0x70   : > { %9274 = vmatprep.subr.bf16.mxu0 %v10349_v9 }
  0x73   : > { %9275 = vmatpush3.bf16.msra.mxu0 %v10349_v9 }
  0x74   : > { %9316 = vmatprep.subr.bf16.mxu0 %v10350_v10 }
  0x76   : > { %9277 = vmatmul.mubr.bf16.vlgmr.msra.gmra.mrb[32].mxu0 %v11261_v23 }
  0x77   : > { %9317 = vmatpush3.bf16.msra.mxu0 %v10350_v10  ;;  %9280 = vmatprep.mubr.bf16.mxu0 %v11270_v26 }
  0x78   : > { %9318 = vmatprep.subr.bf16.mxu0 %v10351_v11 }
  0x7b   : > { %9319 = vmatpush3.bf16.msra.mxu0 %v10351_v11 }
  0x7c   : > { %9320 = vmatprep.subr.bf16.mxu0 %v10352_v12 }
  0x7e   : > { %9281 = vmatmul.mubr.bf16.gmra.mrb[36].mxu0 %v11285_v33 }
  0x7f   : > { %9321 = vmatpush3.bf16.msra.mxu0 %v10352_v12  ;;  %9284 = vmatprep.mubr.bf16.mxu0 %v11292_v36 }
  0x80   : > { %9322 = vmatprep.subr.bf16.mxu0 %v10353_v13 }
  0x83   : > { %9323 = vmatpush3.bf16.msra.mxu0 %v10353_v13 }
  0x84   : > { %9324 = vmatprep.subr.bf16.mxu0 %v10354_v14 }
  0x86   : > { %9285 = vmatmul.mubr.bf16.gmra.mrb[40].mxu0 %v11307_v44 }
  0x87   : > { %9325 = vmatpush3.bf16.msra.mxu0 %v10354_v14  ;;  %9288 = vmatprep.mubr.bf16.mxu0 %v11313_v46 }
  0x88   : > { %9326 = vmatprep.subr.bf16.mxu0 %v10355_v15 }
  0x8b   : > { %9327 = vmatpush3.bf16.msra.mxu0 %v10355_v15 }
  0x8c   : > { %9328 = vmatprep.subr.bf16.mxu0 %v10356_v16 }
  0x8e   : > { %9289 = vmatmul.mubr.bf16.gmra.mrb[44].mxu0 %v11324_v52 }
  0x8f   : > { %9329 = vmatpush3.bf16.msra.mxu0 %v10356_v16  ;;  %9332 = vmatprep.mubr.bf16.mxu0 %v11331_v54 }
  0x90   : > { %9330 = vmatprep.subr.bf16.mxu0 %v10357_v17 }
  0x93   : > { %9331 = vmatpush3.bf16.msra.mxu0 %v10357_v17 }
  0x96   : > { %9333 = vmatmul.mubr.bf16.vlgmr.msra.gmra.mrb[48].mxu0 %v11341_v57 }
  0x97   : > { %9336 = vmatprep.mubr.bf16.mxu0 %v11349_v60 }
  0x9c   : > { %v362_v18 = vpop.trf.xlu0 }
  0x9e   : > { %9337 = vmatmul.mubr.bf16.gmra.mrb[52].mxu0 %v11358_v62 }
  0x9f   : > { %9340 = vmatprep.mubr.bf16.mxu0 %v11361_v63 }
  0xa0   : > { %v363_v19 = vpop.trf.xlu0 }
  0xa1   : > { %v11430_v20 = vpack.c.bf16 %v363_v19, %v362_v18 }
  0xa3   : > { %9148 = vmatprep.subr.bf16.mxu1 %v11430_v20 }
  0xa4   : > { %9149 = vmatpush3.bf16.msra.mxu1 %v11430_v20  ;;  %v364_v21 = vpop.trf.xlu0 }
  0xa6   : > { %9341 = vmatmul.mubr.bf16.gmra.mrb[56].mxu0 %v11375_v3 }
  0xa7   : > { %9344 = vmatprep.mubr.bf16.mxu0 %v11380_v5 }
  0xa8   : > { %v365_v22 = vpop.trf.xlu0 }
  0xa9   : > { %v11436_v24 = vpack.c.bf16 %v365_v22, %v364_v21 }
  0xab   : > { %9150 = vmatprep.subr.bf16.mxu1 %v11436_v24 }
  0xac   : > { %9151 = vmatpush3.bf16.msra.mxu1 %v11436_v24  ;;  %v366_v25 = vpop.trf.xlu0 }
  0xae   : > { %9345 = vmatmul.mubr.bf16.gmra.mrb[60].mxu0 %v11387_v7 }
  0xb0   : > { %v367_v27 = vpop.trf.xlu0 }
  0xb1   : > { %v11441_v28 = vpack.c.bf16 %v367_v27, %v366_v25 }
  0xb3   : > { %9152 = vmatprep.subr.bf16.mxu1 %v11441_v28 }
  0xb4   : > { %9153 = vmatpush3.bf16.msra.mxu1 %v11441_v28  ;;  %v368_v29 = vpop.trf.xlu0 }
  0xb8   : > { %v369_v30 = vpop.trf.xlu0 }
  0xb9   : > { %v11445_v31 = vpack.c.bf16 %v369_v30, %v368_v29 }
  0xbb   : > { %9154 = vmatprep.subr.bf16.mxu1 %v11445_v31 }
  0xbc   : > { %9155 = vmatpush3.bf16.msra.mxu1 %v11445_v31  ;;  %v370_v32 = vpop.trf.xlu0 }
  0xc0   : > { %v371_v34 = vpop.trf.xlu0 }
  0xc1   : > { %v11449_v35 = vpack.c.bf16 %v371_v34, %v370_v32 }
  0xc3   : > { %9156 = vmatprep.subr.bf16.mxu1 %v11449_v35 }
  0xc4   : > { %9157 = vmatpush3.bf16.msra.mxu1 %v11449_v35  ;;  %v372_v37 = vpop.trf.xlu0 }
  0xc8   : > { %v373_v38 = vpop.trf.xlu0 }
  0xc9   : > { %v11453_v39 = vpack.c.bf16 %v373_v38, %v372_v37 }
  0xcb   : > { %9158 = vmatprep.subr.bf16.mxu1 %v11453_v39 }
  0xcc   : > { %9159 = vmatpush3.bf16.msra.mxu1 %v11453_v39  ;;  %v374_v40 = vpop.trf.xlu0 }
  0xd0   : > { %v375_v41 = vpop.trf.xlu0 }
  0xd1   : > { %v11457_v42 = vpack.c.bf16 %v375_v41, %v374_v40 }
  0xd3   : > { %9160 = vmatprep.subr.bf16.mxu1 %v11457_v42 }
  0xd4   : > { %9161 = vmatpush3.bf16.msra.mxu1 %v11457_v42  ;;  %v376_v43 = vpop.trf.xlu0 }
  0xd8   : > { %v377_v45 = vpop.trf.xlu0 }
  0xd9   : > { %v11461_v47 = vpack.c.bf16 %v377_v45, %v376_v43 }
  0xdb   : > { %9162 = vmatprep.subr.bf16.mxu1 %v11461_v47 }
  0xdc   : > { %9163 = vmatpush3.bf16.msra.mxu1 %v11461_v47 }
  0xdf   : > { %9165 = vmatmul.mubr.bf16.vlgmr.msra.gmra.mrb[0].mxu1 %v10359_v48 }
  0xe0   : > { %9168 = vmatprep.mubr.bf16.mxu1 %v10360_v49 }
  0xe7   : > { %9169 = vmatmul.mubr.bf16.gmra.mrb[4].mxu1 %v10361_v50 }
 0x109   : > { %v9134_v51 = vpop.f32.mrb[0].mxu0 }
 0x10a   : > { %v11474_v53 = vmul.f32 0.125, %v9134_v51  ;;  %v484_v55 = vpop.f32.mrb[1].mxu0 }
 0x10b   : > { %v805_v56 = vmul.f32 0.125, %v484_v55  ;;  %v9135_v58 = vpop.f32.mrb[2].mxu0 }
 0x10c   : > { %v11476_v59 = vmul.f32 0.125, %v9135_v58  ;;  %v487_v61 = vpop.f32.mrb[3].mxu0 }
 0x10d   : > { %v806_v0 = vmul.f32 0.125, %v487_v61 }
 0x10f   : > { %v821_v2 = vpack.c.bf16 %v806_v0, %v805_v56 }
 0x111   : > { %v9138_v4 = vpop.f32.mrb[4].mxu0  ;;  %9212 = vmatprep.mubr.msk.bf16.mxu1 %vm833_vm0, %v821_v2 }
 0x112   : > { %v11480_v6 = vmul.f32 0.125, %v9138_v4  ;;  %v500_v9 = vpop.f32.mrb[5].mxu0 }
 0x113   : > { %v11482_v10 = vmul.f32 0.125, %v500_v9  ;;  %v9139_v11 = vpop.f32.mrb[6].mxu0 }
 0x114   : > { %v11484_v12 = vmul.f32 0.125, %v9139_v11  ;;  %v503_v13 = vpop.f32.mrb[7].mxu0 }
 0x115   : > { %v11486_v14 = vmul.f32 0.125, %v503_v13 }
 0x119   : > { %v9142_v17 = vpop.f32.mrb[8].mxu0 }
 0x11a   : > { %v11492_v18 = vmul.f32 0.125, %v9142_v17  ;;  %v516_v19 = vpop.f32.mrb[9].mxu0 }
 0x11b   : > { %v11494_v21 = vmul.f32 0.125, %v516_v19  ;;  %v9143_v22 = vpop.f32.mrb[10].mxu0 }
 0x11c   : > { %v11496_v25 = vmul.f32 0.125, %v9143_v22  ;;  %v519_v27 = vpop.f32.mrb[11].mxu0 }
 0x11d   : > { %v11498_v29 = vmul.f32 0.125, %v519_v27 }
 0x121   : > { %v9146_v34 = vpop.f32.mrb[12].mxu0 }
 0x122   : > { %v11504_v37 = vmul.f32 0.125, %v9146_v34  ;;  %v532_v38 = vpop.f32.mrb[13].mxu0 }
 0x123   : > { %v11506_v40 = vmul.f32 0.125, %v532_v38  ;;  %v9147_v41 = vpop.f32.mrb[14].mxu0 }
 0x124   : > { %v11508_v43 = vmul.f32 0.125, %v9147_v41  ;;  %v535_v45 = vpop.f32.mrb[15].mxu0 }
 0x125   : > { %v11510_v48 = vmul.f32 0.125, %v535_v45 }
 0x129   : > { %v9190_v51 = vpop.f32.mrb[16].mxu0 }
 0x12a   : > { %v742_v55 = vpop.f32.mrb[17].mxu0 }
 0x12b   : > { %v9191_v56 = vpop.f32.mrb[18].mxu0 }
 0x12c   : > { %v11516_v58 = vpack.c.bf16 %v9191_v56, %v9190_v51  ;;  %v745_v61 = vpop.f32.mrb[19].mxu0 }
 0x12d   : > { %v11518_v0 = vpack.c.bf16 %v745_v61, %v742_v55 }
 0x131   : > { %v9194_v4 = vpop.f32.mrb[20].mxu0 }
 0x132   : > { %v758_v9 = vpop.f32.mrb[21].mxu0 }
 0x133   : > { %v9195_v11 = vpop.f32.mrb[22].mxu0 }
 0x134   : > { %v11520_v13 = vpack.c.bf16 %v9195_v11, %v9194_v4  ;;  %v761_v17 = vpop.f32.mrb[23].mxu0 }
 0x135   : > { %v11522_v19 = vpack.c.bf16 %v761_v17, %v758_v9 }
 0x139   : > { %v9198_v22 = vpop.f32.mrb[24].mxu0 }
 0x13a   : > { %v774_v27 = vpop.f32.mrb[25].mxu0 }
 0x13b   : > { %v9199_v34 = vpop.f32.mrb[26].mxu0 }
 0x13c   : > { %v11524_v38 = vpack.c.bf16 %v9199_v34, %v9198_v22  ;;  %v777_v41 = vpop.f32.mrb[27].mxu0 }
 0x13d   : > { %v11526_v45 = vpack.c.bf16 %v777_v41, %v774_v27 }
 0x141   : > { %v9202_v51 = vpop.f32.mrb[28].mxu0 }
 0x142   : > { %v790_v55 = vpop.f32.mrb[29].mxu0 }
 0x143   : > { %v9203_v56 = vpop.f32.mrb[30].mxu0 }
 0x144   : > { %v11529_v61 = vpack.c.bf16 %v9203_v56, %v9202_v51  ;;  %v793_v4 = vpop.f32.mrb[31].mxu0 }
 0x145   : > { %v11531_v11 = vpack.c.bf16 %v793_v4, %v790_v55 }
 0x149   : > { %v9278_v9 = vpop.f32.mrb[32].mxu0 }
 0x14a   : > { %v11533_v17 = vmul.f32 0.125, %v9278_v9  ;;  %v1327_v49 = vpop.f32.mrb[33].mxu0 }
 0x14b   : > { %v11535_v22 = vmul.f32 0.125, %v1327_v49  ;;  %v9279_v34 = vpop.f32.mrb[34].mxu0 }
 0x14c   : > { %v11537_v27 = vmul.f32 0.125, %v9279_v34  ;;  %v1330_v41 = vpop.f32.mrb[35].mxu0 }
 0x14d   : > { %v11539_v50 = vmul.f32 0.125, %v1330_v41 }
 0x151   : > { %v9282_v55 = vpop.f32.mrb[36].mxu0 }
 0x152   : > { %v11545_v56 = vmul.f32 0.125, %v9282_v55  ;;  %v1343_v4 = vpop.f32.mrb[37].mxu0 }
 0x153   : > { %v11547_v9 = vmul.f32 0.125, %v1343_v4  ;;  %v9283_v49 = vpop.f32.mrb[38].mxu0 }
 0x154   : > { %v11549_v30 = vmul.f32 0.125, %v9283_v49  ;;  %v1346_v34 = vpop.f32.mrb[39].mxu0 }
 0x155   : > { %v11551_v32 = vmul.f32 0.125, %v1346_v34 }
 0x159   : > { %v9286_v15 = vpop.f32.mrb[40].mxu0 }
 0x15a   : > { %v11557_v51 = vmul.f32 0.125, %v9286_v15  ;;  %v1359_v55 = vpop.f32.mrb[41].mxu0 }
 0x15b   : > { %v11559_v16 = vmul.f32 0.125, %v1359_v55  ;;  %v9287_v4 = vpop.f32.mrb[42].mxu0 }
 0x15c   : > { %v11561_v1 = vmul.f32 0.125, %v9287_v4  ;;  %v1362_v49 = vpop.f32.mrb[43].mxu0 }
 0x15d   : > { %v11563_v7 = vmul.f32 0.125, %v1362_v49 }
 0x161   : > { %v9290_v5 = vpop.f32.mrb[44].mxu0 }
 0x162   : > { %v11569_v2 = vmul.f32 0.125, %v9290_v5  ;;  %v1375_v15 = vpop.f32.mrb[45].mxu0 }
 0x163   : > { %v11571_v3 = vmul.f32 0.125, %v1375_v15  ;;  %v9291_v55 = vpop.f32.mrb[46].mxu0 }
 0x164   : > { %v11573_v63 = vmul.f32 0.125, %v9291_v55  ;;  %v1378_v4 = vpop.f32.mrb[47].mxu0 }
 0x165   : > { %v11575_v62 = vmul.f32 0.125, %v1378_v4 }
 0x169   : > { %v9334_v60 = vpop.f32.mrb[48].mxu0 }
 0x16a   : > { %v1587_v41 = vpop.f32.mrb[49].mxu0 }
 0x16b   : > { %v9335_v57 = vpop.f32.mrb[50].mxu0 }
 0x16c   : > { %v1952_v5 = vpack.c.bf16 %v9335_v57, %v9334_v60  ;;  %v1590_v54 = vpop.f32.mrb[51].mxu0 }
 0x16d   : > { %v1951_v52 = vpack.c.bf16 %v1590_v54, %v1587_v41 }
 0x16f   : > { %9372 = vmatprep.subr.bf16.mxu0 %v1951_v52 }
 0x170   : > { %9373 = vmatpush3.bf16.msra.mxu0 %v1951_v52 }
 0x171   : > { %v9338_v15 = vpop.f32.mrb[52].mxu0  ;;  %9374 = vmatprep.subr.bf16.mxu0 %v1952_v5 }
 0x172   : > { %v1603_v55 = vpop.f32.mrb[53].mxu0 }
 0x173   : > { %v9339_v46 = vpop.f32.mrb[54].mxu0 }
 0x174   : > { %v1954_v4 = vpack.c.bf16 %v9339_v46, %v9338_v15  ;;  %v1606_v44 = vpop.f32.mrb[55].mxu0  ;;  %9375 = vmatpush3.bf16.msra.mxu0 %v1952_v5 }
 0x175   : > { %v1953_v36 = vpack.c.bf16 %v1606_v44, %v1603_v55 }
 0x177   : > { %9376 = vmatprep.subr.bf16.mxu0 %v1953_v36 }
 0x178   : > { %9377 = vmatpush3.bf16.msra.mxu0 %v1953_v36 }
 0x179   : > { %v9342_v49 = vpop.f32.mrb[56].mxu0  ;;  %9378 = vmatprep.subr.bf16.mxu0 %v1954_v4 }
 0x17a   : > { %v1619_v34 = vpop.f32.mrb[57].mxu0 }
 0x17b   : > { %v9343_v33 = vpop.f32.mrb[58].mxu0 }
 0x17c   : > { %v1956_v26 = vpack.c.bf16 %v9343_v33, %v9342_v49  ;;  %v1622_v57 = vpop.f32.mrb[59].mxu0  ;;  %9379 = vmatpush3.bf16.msra.mxu0 %v1954_v4 }
 0x17d   : > { %v1955_v54 = vpack.c.bf16 %v1622_v57, %v1619_v34 }
 0x17f   : > { %9380 = vmatprep.subr.bf16.mxu0 %v1955_v54 }
 0x180   : > { %9381 = vmatpush3.bf16.msra.mxu0 %v1955_v54 }
 0x181   : > { %v9346_v52 = vpop.f32.mrb[60].mxu0  ;;  %9382 = vmatprep.subr.bf16.mxu0 %v1956_v26 }
 0x182   : > { %v1635_v60 = vpop.f32.mrb[61].mxu0 }
 0x183   : > { %v9347_v41 = vpop.f32.mrb[62].mxu0 }
 0x184   : > { %v1958_v46 = vpack.c.bf16 %v9347_v41, %v9346_v52  ;;  %v1638_v15 = vpop.f32.mrb[63].mxu0  ;;  %9383 = vmatpush3.bf16.msra.mxu0 %v1956_v26  ;;  %v14257_v41 = vpack.c.bf16 %v11476_v59, %v11474_v53  ;;  %v14260_v53 = vpack.c.bf16 %v11498_v29, %v11494_v21  ;;  %v14261_v59 = vpack.c.bf16 %v11496_v25, %v11492_v18 }
 0x185   : > { %v1957_v44 = vpack.c.bf16 %v1638_v15, %v1635_v60  ;;  %v14259_v15 = vpack.c.bf16 %v11484_v12, %v11480_v6  ;;  %v14262_v6 = vpack.c.bf16 %v11510_v48, %v11506_v40 }
 0x187   : > { %9384 = vmatprep.subr.bf16.mxu0 %v1957_v44 }
 0x188   : > { %9385 = vmatpush3.bf16.msra.mxu0 %v1957_v44 }
 0x189   : > { %9386 = vmatprep.subr.bf16.mxu0 %v1958_v46 }
 0x18c   : > { %9387 = vmatpush3.bf16.msra.mxu0 %v1958_v46  ;;  %v14258_v46 = vpack.c.bf16 %v11486_v14, %v11482_v10  ;;  %v14263_v10 = vpack.c.bf16 %v11508_v43, %v11504_v37 }
 0x18d   : > { %9436 = vmatprep.subr.bf16.mxu0 %v11430_v20 }
 0x1b2   : > { %v9166_v33 = vpop.f32.mrb[0].mxu1 }
 0x1b3   : > { %v613_v36 = vpop.f32.mrb[1].mxu1 }
 0x1b4   : > { %v9167_v49 = vpop.f32.mrb[2].mxu1 }
 0x1b5   : > { %v830_v34 = vpack.c.bf16 %v9167_v49, %v9166_v33  ;;  %v616_v5 = vpop.f32.mrb[3].mxu1 }
 0x1b6   : > { %v829_v55 = vpack.c.bf16 %v616_v5, %v613_v36 }
 0x1b8   : > { %9204 = vmatprep.subr.bf16.mxu1 %v829_v55 }
 0x1b9   : > { %9205 = vmatpush3.bf16.msra.mxu1 %v829_v55 }
 0x1ba   : > { %v9170_v4 = vpop.f32.mrb[4].mxu1  ;;  %9206 = vmatprep.subr.bf16.mxu1 %v830_v34 }
 0x1bb   : > { %v629_v57 = vpop.f32.mrb[5].mxu1 }
 0x1bc   : > { %v9171_v54 = vpop.f32.mrb[6].mxu1 }
 0x1bd   : > { %v832_v26 = vpack.c.bf16 %v9171_v54, %v9170_v4  ;;  %v632_v52 = vpop.f32.mrb[7].mxu1  ;;  %9207 = vmatpush3.bf16.msra.mxu1 %v830_v34 }
 0x1be   : > { %v831_v60 = vpack.c.bf16 %v632_v52, %v629_v57 }
 0x1c0   : > { %9208 = vmatprep.subr.bf16.mxu1 %v831_v60 }
 0x1c1   : > { %9209 = vmatpush3.bf16.msra.mxu1 %v831_v60 }
 0x1c2   : > { %9210 = vmatprep.subr.bf16.mxu1 %v832_v26 }
 0x1c5   : > { %9211 = vmatpush3.bf16.msra.mxu1 %v832_v26 }
 0x1c6   : > { %9228 = vmatprep.subr.bf16.mxu1 %v11518_v0 }
 0x1c8   : > { %9213 = vmatmul.mubr.msk.bf16.vlgmr.msra.gmra.mrb[8].mxu1 %vm833_vm0, %v14257_v41 }
 0x1c9   : > { %9229 = vmatpush3.bf16.msra.mxu1 %v11518_v0  ;;  %9216 = vmatprep.mubr.msk.bf16.mxu1 %vm833_vm0, %v14258_v46 }
 0x1ca   : > { %9230 = vmatprep.subr.bf16.mxu1 %v11516_v58 }
 0x1cd   : > { %9231 = vmatpush3.bf16.msra.mxu1 %v11516_v58 }
 0x1ce   : > { %9232 = vmatprep.subr.bf16.mxu1 %v11522_v19 }
 0x1d0   : > { %9217 = vmatmul.mubr.msk.bf16.gmra.mrb[12].mxu1 %vm833_vm0, %v14259_v15 }
 0x1d1   : > { %9233 = vmatpush3.bf16.msra.mxu1 %v11522_v19  ;;  %9220 = vmatprep.mubr.msk.bf16.mxu1 %vm833_vm0, %v14260_v53 }
 0x1d2   : > { %9234 = vmatprep.subr.bf16.mxu1 %v11520_v13 }
 0x1d5   : > { %9235 = vmatpush3.bf16.msra.mxu1 %v11520_v13 }
 0x1d6   : > { %9236 = vmatprep.subr.bf16.mxu1 %v11526_v45 }
 0x1d8   : > { %9221 = vmatmul.mubr.msk.bf16.gmra.mrb[16].mxu1 %vm833_vm0, %v14261_v59 }
 0x1d9   : > { %9237 = vmatpush3.bf16.msra.mxu1 %v11526_v45  ;;  %9224 = vmatprep.mubr.msk.bf16.mxu1 %vm833_vm0, %v14262_v6 }
 0x1da   : > { %9238 = vmatprep.subr.bf16.mxu1 %v11524_v38 }
 0x1dd   : > { %9239 = vmatpush3.bf16.msra.mxu1 %v11524_v38 }
 0x1de   : > { %9240 = vmatprep.subr.bf16.mxu1 %v11531_v11 }
 0x1e0   : > { %9225 = vmatmul.mubr.msk.bf16.gmra.mrb[20].mxu1 %vm833_vm0, %v14263_v10 }
 0x1e1   : > { %9241 = vmatpush3.bf16.msra.mxu1 %v11531_v11 }
 0x1e2   : > { %9242 = vmatprep.subr.bf16.mxu1 %v11529_v61 }
 0x1e5   : > { %9243 = vmatpush3.bf16.msra.mxu1 %v11529_v61 }
 0x1e6   : > { %9292 = vmatprep.subr.bf16.mxu1 %v11430_v20 }
 0x29b   : > { %v9214_v12 = vpop.f32.mrb[8].mxu1 }
 0x29c   : > { %959 = vmax.xlane.f32.xlu1 %v9214_v12  ;;  %v892_v14 = vpop.f32.mrb[9].mxu1 }
 0x29d   : > { %v9215_v18 = vpop.f32.mrb[10].mxu1 }
 0x29e   : > { %v895_v21 = vpop.f32.mrb[11].mxu1 }
 0x2a0   : > { %955 = vmax.xlane.f32.xlu1 %v892_v14 }
 0x2a3   : > { %v9218_v25 = vpop.f32.mrb[12].mxu1 }
 0x2a4   : > { %961 = vmax.xlane.f32.xlu1 %v9215_v18  ;;  %v908_v29 = vpop.f32.mrb[13].mxu1 }
 0x2a5   : > { %v9219_v37 = vpop.f32.mrb[14].mxu1 }
 0x2a6   : > { %v911_v40 = vpop.f32.mrb[15].mxu1 }
 0x2a8   : > { %957 = vmax.xlane.f32.xlu1 %v895_v21 }
 0x2ab   : > { %v11627_v43 = vpop.f32.mrb[16].mxu1 }
 0x2ac   : > { %967 = vmax.xlane.f32.xlu1 %v9218_v25  ;;  %v11629_v48 = vpop.f32.mrb[17].mxu1 }
 0x2ad   : > { %v11631_v58 = vpop.f32.mrb[18].mxu1 }
 0x2ae   : > { %v11633_v0 = vpop.f32.mrb[19].mxu1 }
 0x2b0   : > { %963 = vmax.xlane.f32.xlu1 %v908_v29 }
 0x2b3   : > { %v11635_v13 = vpop.f32.mrb[20].mxu1 }
 0x2b4   : > { %969 = vmax.xlane.f32.xlu1 %v9219_v37  ;;  %v11637_v19 = vpop.f32.mrb[21].mxu1 }
 0x2b5   : > { %v11639_v38 = vpop.f32.mrb[22].mxu1 }
 0x2b6   : > { %v11641_v45 = vpop.f32.mrb[23].mxu1 }
 0x2b8   : > { %965 = vmax.xlane.f32.xlu1 %v911_v40 }
 0x2bc   : > { %975 = vmax.xlane.f32.xlu1 %v11627_v43 }
 0x2c0   : > { %971 = vmax.xlane.f32.xlu1 %v11629_v48 }
 0x2c4   : > { %977 = vmax.xlane.f32.xlu1 %v11631_v58 }
 0x2c8   : > { %973 = vmax.xlane.f32.xlu1 %v11633_v0 }
 0x2cc   : > { %983 = vmax.xlane.f32.xlu1 %v11635_v13 }
 0x2d0   : > { %979 = vmax.xlane.f32.xlu1 %v11637_v19 }
 0x2d4   : > { %981 = vmax.xlane.f32.xlu1 %v11641_v45 }
 0x2d8   : > { %985 = vmax.xlane.f32.xlu1 %v11639_v38 }
 0x329   : > { %v960_v61 = vpop.xlane.xlu1 %959 }
 0x32a   : > { %v989_v11 = vsub.f32 %v9214_v12, %v960_v61 }
 0x32c   : > { %v1007_v44 = vmul.f32 1.442695, %v989_v11 }
 0x32d   : > { %v956_v33 = vpop.xlane.xlu1 %955 }
 0x32e   : > { %10518 = vpow2.f32 %v1007_v44  ;;  %v987_v36 = vsub.f32 %v892_v14, %v956_v33 }
 0x330   : > { %v1003_v49 = vmul.f32 1.442695, %v987_v36 }
 0x331   : > { %v962_v34 = vpop.xlane.xlu1 %961 }
 0x332   : > { %10520 = vpow2.f32 %v1003_v49  ;;  %v990_v5 = vsub.f32 %v9215_v18, %v962_v34 }
 0x334   : > { %v1009_v55 = vmul.f32 1.442695, %v990_v5 }
 0x335   : > { %v958_v4 = vpop.xlane.xlu1 %957 }
 0x336   : > { %10522 = vpow2.f32 %v1009_v55  ;;  %v988_v57 = vsub.f32 %v895_v21, %v958_v4 }
 0x338   : > { %v11651_v54 = vpop.eup %10518  ;;  %v1005_v26 = vmul.f32 1.442695, %v988_v57 }
 0x339   : > { %v968_v52 = vpop.xlane.xlu1 %967  ;;  %1039 = vadd.xlane.f32.xlu1 %v11651_v54 }
 0x33a   : > { %10524 = vpow2.f32 %v1005_v26  ;;  %v993_v60 = vsub.f32 %v9218_v25, %v968_v52 }
 0x33c   : > { %v11654_v41 = vpop.eup %10520  ;;  %v1015_v46 = vmul.f32 1.442695, %v993_v60 }
 0x33d   : > { %1035 = vadd.xlane.f32.xlu0 %v11654_v41  ;;  %v964_v15 = vpop.xlane.xlu1 %963 }
 0x33e   : > { %10526 = vpow2.f32 %v1015_v46  ;;  %v991_v53 = vsub.f32 %v908_v29, %v964_v15 }
 0x340   : > { %v11657_v59 = vpop.eup %10522  ;;  %v1011_v6 = vmul.f32 1.442695, %v991_v53 }
 0x341   : > { %v970_v10 = vpop.xlane.xlu1 %969  ;;  %1041 = vadd.xlane.f32.xlu1 %v11657_v59 }
 0x342   : > { %10528 = vpow2.f32 %v1011_v6  ;;  %v994_v12 = vsub.f32 %v9219_v37, %v970_v10 }
 0x344   : > { %v11660_v14 = vpop.eup %10524  ;;  %v1017_v18 = vmul.f32 1.442695, %v994_v12 }
 0x345   : > { %v966_v21 = vpop.xlane.xlu1 %965  ;;  %1037 = vadd.xlane.f32.xlu1 %v11660_v14 }
 0x346   : > { %10530 = vpow2.f32 %v1017_v18  ;;  %v992_v25 = vsub.f32 %v911_v40, %v966_v21 }
 0x348   : > { %v11663_v61 = vpop.eup %10526  ;;  %v1013_v11 = vmul.f32 1.442695, %v992_v25 }
 0x349   : > { %v976_v29 = vpop.xlane.xlu1 %975  ;;  %1047 = vadd.xlane.f32.xlu1 %v11663_v61 }
 0x34a   : > { %10532 = vpow2.f32 %v1013_v11  ;;  %v997_v44 = vsub.f32 %v11627_v43, %v976_v29 }
 0x34c   : > { %v11667_v33 = vpop.eup %10528  ;;  %v1023_v37 = vmul.f32 1.442695, %v997_v44 }
 0x34d   : > { %v972_v36 = vpop.xlane.xlu1 %971  ;;  %1043 = vadd.xlane.f32.xlu1 %v11667_v33 }
 0x34e   : > { %10534 = vpow2.f32 %v1023_v37  ;;  %v995_v49 = vsub.f32 %v11629_v48, %v972_v36 }
 0x350   : > { %v11671_v34 = vpop.eup %10530  ;;  %v1019_v40 = vmul.f32 1.442695, %v995_v49 }
 0x351   : > { %v978_v5 = vpop.xlane.xlu1 %977  ;;  %1049 = vadd.xlane.f32.xlu1 %v11671_v34 }
 0x352   : > { %10536 = vpow2.f32 %v1019_v40  ;;  %v998_v43 = vsub.f32 %v11631_v58, %v978_v5 }
 0x354   : > { %v11674_v55 = vpop.eup %10532  ;;  %v1025_v60 = vmul.f32 1.442695, %v998_v43 }
 0x355   : > { %v974_v4 = vpop.xlane.xlu1 %973  ;;  %1045 = vadd.xlane.f32.xlu1 %v11674_v55 }
 0x356   : > { %v996_v57 = vsub.f32 %v11633_v0, %v974_v4 }
 0x358   : > { %v11679_v26 = vpop.eup %10534  ;;  %v1021_v52 = vmul.f32 1.442695, %v996_v57 }
 0x359   : > { %v984_v48 = vpop.xlane.xlu1 %983  ;;  %1055 = vadd.xlane.f32.xlu1 %v11679_v26 }
 0x35a   : > { %10538 = vpow2.f32 %v1021_v52  ;;  %v1001_v15 = vsub.f32 %v11635_v13, %v984_v48 }
 0x35b   : > { %10540 = vpow2.f32 %v1025_v60 }
 0x35c   : > { %v11682_v46 = vpop.eup %10536  ;;  %v1031_v0 = vmul.f32 1.442695, %v1001_v15 }
 0x35d   : > { %v980_v53 = vpop.xlane.xlu1 %979  ;;  %1051 = vadd.xlane.f32.xlu1 %v11682_v46 }
 0x35e   : > { %v999_v58 = vsub.f32 %v11637_v19, %v980_v53 }
 0x360   : > { %v1027_v6 = vmul.f32 1.442695, %v999_v58 }
 0x361   : > { %v982_v10 = vpop.xlane.xlu1 %981 }
 0x362   : > { %10542 = vpow2.f32 %v1027_v6  ;;  %v1000_v12 = vsub.f32 %v11641_v45, %v982_v10 }
 0x363   : > { %10544 = vpow2.f32 %v1031_v0 }
 0x364   : > { %v11688_v18 = vpop.eup %10538  ;;  %v1029_v21 = vmul.f32 1.442695, %v1000_v12 }
 0x365   : > { %1053 = vadd.xlane.f32.xlu1 %v11688_v18  ;;  %v986_v25 = vpop.xlane.xlu1 %985  ;;  %v11692_v11 = vpop.eup %10540 }
 0x366   : > { %10546 = vpow2.f32 %v1029_v21  ;;  %v1002_v13 = vsub.f32 %v11639_v38, %v986_v25 }
 0x368   : > { %v1033_v29 = vmul.f32 1.442695, %v1002_v13 }
 0x369   : > { %1057 = vadd.xlane.f32.xlu1 %v11692_v11 }
 0x36a   : > { %10548 = vpow2.f32 %v1033_v29 }
 0x36c   : > { %v11695_v19 = vpop.eup %10542 }
 0x36d   : > { %1059 = vadd.xlane.f32.xlu1 %v11695_v19  ;;  %v11698_v45 = vpop.eup %10544 }
 0x370   : > { %v11700_v44 = vpop.eup %10546 }
 0x371   : > { %1063 = vadd.xlane.f32.xlu1 %v11698_v45  ;;  %1061 = vadd.xlane.f32.xlu0 %v11700_v44 }
 0x374   : > { %v11704_v37 = vpop.eup %10548 }
 0x375   : > { %1065 = vadd.xlane.f32.xlu0 %v11704_v37 }
 0x3c6   : > { %v1040_v38 = vpop.xlane.xlu1 %1039 }
 0x3ca   : > { %v1036_v36 = vpop.xlane.xlu0 %1035 }
 0x3ce   : > { %v1042_v49 = vpop.xlane.xlu1 %1041 }
 0x3cf   : > { %10550 = vrcp.f32 %v1042_v49 }
 0x3d0   : > { %10552 = vrcp.f32 %v1036_v36 }
 0x3d1   : > { %10554 = vrcp.f32 %v1040_v38 }
 0x3d2   : > { %v1038_v40 = vpop.xlane.xlu1 %1037 }
 0x3d3   : > { %10556 = vrcp.f32 %v1038_v40 }
 0x3d6   : > { %v1048_v5 = vpop.xlane.xlu1 %1047 }
 0x3d9   : > { %v10551_v4 = vpop.eup %10550 }
 0x3da   : > { %v1044_v43 = vpop.xlane.xlu1 %1043  ;;  %v10553_v57 = vpop.eup %10552  ;;  %v1086_v60 = vmul.f32 %v10551_v4, %v11657_v59 }
 0x3db   : > { %v10555_v52 = vpop.eup %10554  ;;  %v1083_v53 = vmul.f32 %v10553_v57, %v11654_v41 }
 0x3dc   : > { %v1085_v6 = vmul.f32 %v10555_v52, %v11651_v54 }
 0x3dd   : > { %v10557_v48 = vpop.eup %10556 }
 0x3de   : > { %v1050_v15 = vpop.xlane.xlu1 %1049  ;;  %v1084_v58 = vmul.f32 %v10557_v48, %v11660_v14  ;;  %v1100_v10 = vpack.c.bf16 %v1086_v60, %v1085_v6 }
 0x3df   : > { %10558 = vrcp.f32 %v1050_v15 }
 0x3e0   : > { %v1099_v0 = vpack.c.bf16 %v1084_v58, %v1083_v53  ;;  %10560 = vrcp.f32 %v1044_v43 }
 0x3e1   : > { %10562 = vrcp.f32 %v1048_v5 }
 0x3e2   : > { %9244 = vmatprep.mubr.bf16.mxu1 %v1099_v0  ;;  %v1046_v12 = vpop.xlane.xlu1 %1045 }
 0x3e3   : > { %10564 = vrcp.f32 %v1046_v12  ;;  %9245 = vmatmul.mubr.bf16.vlgmr.msra.gmra.mrb[24].mxu1 %v1100_v10 }
 0x3e4   : > { %9293 = vmatpush3.bf16.msra.mxu1 %v11430_v20 }
 0x3e5   : > { %9294 = vmatprep.subr.bf16.mxu1 %v11436_v24 }
 0x3e6   : > { %v1056_v59 = vpop.xlane.xlu1 %1055 }
 0x3e8   : > { %9295 = vmatpush3.bf16.msra.mxu1 %v11436_v24 }
 0x3e9   : > { %9296 = vmatprep.subr.bf16.mxu1 %v11441_v28  ;;  %v10559_v41 = vpop.eup %10558 }
 0x3ea   : > { %v10561_v54 = vpop.eup %10560  ;;  %v1090_v25 = vmul.f32 %v10559_v41, %v11671_v34  ;;  %v1052_v13 = vpop.xlane.xlu1 %1051 }
 0x3eb   : > { %v10563_v14 = vpop.eup %10562  ;;  %v1087_v29 = vmul.f32 %v10561_v54, %v11667_v33  ;;  %10566 = vrcp.f32 %v1052_v13 }
 0x3ec   : > { %9297 = vmatpush3.bf16.msra.mxu1 %v11441_v28  ;;  %v1089_v36 = vmul.f32 %v10563_v14, %v11663_v61 }
 0x3ed   : > { %v10565_v21 = vpop.eup %10564  ;;  %9298 = vmatprep.subr.bf16.mxu1 %v11445_v31 }
 0x3ee   : > { %v1088_v38 = vmul.f32 %v10565_v21, %v11674_v55  ;;  %v1102_v40 = vpack.c.bf16 %v1090_v25, %v1089_v36 }
 0x3f0   : > { %9299 = vmatpush3.bf16.msra.mxu1 %v11445_v31  ;;  %v1101_v49 = vpack.c.bf16 %v1088_v38, %v1087_v29 }
 0x3f1   : > { %9300 = vmatprep.subr.bf16.mxu1 %v11449_v35 }
 0x3f2   : > { %v1054_v5 = vpop.xlane.xlu1 %1053  ;;  %9248 = vmatprep.mubr.bf16.mxu1 %v1101_v49 }
 0x3f3   : > { %10568 = vrcp.f32 %v1054_v5  ;;  %9249 = vmatmul.mubr.bf16.gmra.mrb[28].mxu1 %v1102_v40 }
 0x3f4   : > { %9301 = vmatpush3.bf16.msra.mxu1 %v11449_v35  ;;  %10570 = vrcp.f32 %v1056_v59 }
 0x3f5   : > { %9302 = vmatprep.subr.bf16.mxu1 %v11453_v39  ;;  %v10567_v34 = vpop.eup %10566 }
 0x3f6   : > { %v1058_v33 = vpop.xlane.xlu1 %1057  ;;  %v1091_v57 = vmul.f32 %v10567_v34, %v11682_v46 }
 0x3f7   : > { %10572 = vrcp.f32 %v1058_v33 }
 0x3f8   : > { %9303 = vmatpush3.bf16.msra.mxu1 %v11453_v39 }
 0x3f9   : > { %9304 = vmatprep.subr.bf16.mxu1 %v11457_v42 }
 0x3fa   : > { %v1060_v61 = vpop.xlane.xlu1 %1059 }
 0x3fb   : > { %10574 = vrcp.f32 %v1060_v61 }
 0x3fc   : > { %9305 = vmatpush3.bf16.msra.mxu1 %v11457_v42 }
 0x3fd   : > { %v10569_v55 = vpop.eup %10568  ;;  %9306 = vmatprep.subr.bf16.mxu1 %v11461_v47 }
 0x3fe   : > { %v1062_v4 = vpop.xlane.xlu0 %1061  ;;  %v1064_v43 = vpop.xlane.xlu1 %1063  ;;  %v1092_v52 = vmul.f32 %v10569_v55, %v11688_v18 }
 0x3ff   : > { %v10571_v48 = vpop.eup %10570  ;;  %10576 = vrcp.f32 %v1062_v4 }
 0x400   : > { %9307 = vmatpush3.bf16.msra.mxu1 %v11461_v47  ;;  %v1103_v60 = vpack.c.bf16 %v1092_v52, %v1091_v57  ;;  %10578 = vrcp.f32 %v1064_v43  ;;  %v1093_v58 = vmul.f32 %v10571_v48, %v11679_v26  ;;  %v10362_v26 = vld [vmem:[%s14176_s3 + $0x20] sm:$0xff]  }
 0x401   : > { %v10573_v15 = vpop.eup %10572 }
 0x402   : > { %v1066_v53 = vpop.xlane.xlu0 %1065  ;;  %9252 = vmatprep.mubr.bf16.mxu1 %v1103_v60  ;;  %v1094_v6 = vmul.f32 %v10573_v15, %v11692_v11 }
 0x403   : > { %10580 = vrcp.f32 %v1066_v53 }
 0x404   : > { %v1104_v0 = vpack.c.bf16 %v1094_v6, %v1093_v58 }
 0x405   : > { %v10575_v10 = vpop.eup %10574 }
 0x406   : > { %9253 = vmatmul.mubr.bf16.gmra.mrb[32].mxu1 %v1104_v0  ;;  %v1095_v18 = vmul.f32 %v10575_v10, %v11695_v19  ;;  %v10363_v19 = vld [vmem:[%s14176_s3 + $0x28] sm:$0xff]  }
 0x409   : > { %v10577_v46 = vpop.eup %10576 }
 0x40a   : > { %v1096_v12 = vmul.f32 %v10577_v46, %v11700_v44  ;;  %v10579_v59 = vpop.eup %10578  ;;  %v10364_v44 = vld [vmem:[%s14176_s3 + $0x30] sm:$0xff]  }
 0x40b   : > { %v1097_v14 = vmul.f32 %v10579_v59, %v11698_v45  ;;  %v10365_v45 = vld [vmem:[%s14176_s3 + $0x38] sm:$0xff]  }
 0x40c   : > { %v1105_v41 = vpack.c.bf16 %v1096_v12, %v1095_v18 }
 0x40d   : > { %v10581_v54 = vpop.eup %10580 }
 0x40e   : > { %9256 = vmatprep.mubr.bf16.mxu1 %v1105_v41  ;;  %v1098_v21 = vmul.f32 %v10581_v54, %v11704_v37  ;;  %v14264_v37 = vpack.c.bf16 %v11539_v50, %v11535_v22 }
 0x410   : > { %v1106_v11 = vpack.c.bf16 %v1098_v21, %v1097_v14 }
 0x412   : > { %9257 = vmatmul.mubr.bf16.gmra.mrb[36].mxu1 %v1106_v11 }
 0x413   : > { %9308 = vmatprep.mubr.bf16.mxu1 %v10362_v26 }
 0x41a   : > { %9309 = vmatmul.mubr.bf16.vlgmr.msra.gmra.mrb[40].mxu1 %v10363_v19  ;;  %v10366_v19 = vld [vmem:[%s14175_s2 + $0x80] sm:$0xff]  }
 0x41b   : > { %9312 = vmatprep.mubr.bf16.mxu1 %v10364_v44  ;;  %v10367_v44 = vld [vmem:[%s14175_s2 + $0x88] sm:$0xff]  }
 0x422   : > { %9313 = vmatmul.mubr.bf16.gmra.mrb[44].mxu1 %v10365_v45  ;;  %v14265_v45 = vpack.c.bf16 %v11537_v27, %v11533_v17  ;;  %v14267_v17 = vpack.c.bf16 %v11549_v30, %v11545_v56  ;;  %v10370_v27 = vld [vmem:[%s14175_s2 + $0xa0] sm:$0xff]   ;;  %v14269_v30 = vpack.c.bf16 %v11561_v1, %v11557_v51  ;;  %v10373_v56 = vld [vmem:[%s14175_s2 + $0xb8] sm:$0xff]   ;;  %v14271_v1 = vpack.c.bf16 %v11573_v63, %v11569_v2  ;;  %v10376_v2 = vld [vmem:[%s14177_s4 + $0x90] sm:$0xff]  }
 0x423   : > { %9356 = vmatprep.mubr.msk.bf16.mxu1 %vm833_vm0, %v14264_v37  ;;  %v14266_v37 = vpack.c.bf16 %v11551_v32, %v11547_v9  ;;  %v14268_v32 = vpack.c.bf16 %v11563_v7, %v11559_v16  ;;  %v10371_v9 = vld [vmem:[%s14175_s2 + $0xa8] sm:$0xff]   ;;  %v14270_v7 = vpack.c.bf16 %v11575_v62, %v11571_v3  ;;  %v10372_v16 = vld [vmem:[%s14175_s2 + $0xb0] sm:$0xff]   ;;  %v10374_v62 = vld [vmem:[%s14177_s4 + $0x80] sm:$0xff]  }
 0x424   : > { %v10375_v3 = vld [vmem:[%s14177_s4 + $0x88] sm:$0xff]   ;;  %v14272_v63 = vld [vmem:[#allocation6_spill] sm:$0xff]  ;;  %v10377_v51 = vld [vmem:[%s14177_s4 + $0x98] sm:$0xff]  }
 0x4b6   : > { %v9246_v25 = vpop.f32.mrb[24].mxu1 }
 0x4b7   : > { %v1149_v13 = vpop.f32.mrb[25].mxu1 }
 0x4b8   : > { %v9247_v29 = vpop.f32.mrb[26].mxu1 }
 0x4b9   : > { %v1213_v38 = vpack.c.bf16 %v9247_v29, %v9246_v25  ;;  %v1152_v36 = vpop.f32.mrb[27].mxu1  ;;  %v10368_v25 = vld [vmem:[%s14175_s2 + $0x90] sm:$0xff]   ;;  %v14273_v29 = vld [vmem:[#allocation7_spill] sm:$0xff] }
 0x4ba   : > { %v1212_v49 = vpack.c.bf16 %v1152_v36, %v1149_v13  ;;  %v10369_v13 = vld [vmem:[%s14175_s2 + $0x98] sm:$0xff]   ;;  %v10378_v36 = vld [vmem:[%s14177_s4 + $0xa0] sm:$0xff]  }
 0x4bb   : > { %1221 = vst.msk [vmem:[#allocation2 + $0x20] sm:$0xff] %vm833_vm0, %v1213_v38  ;;  %v14274_v38 = vld [vmem:[#allocation8_spill] sm:$0xff] }
 0x4bc   : > { %1220 = vst.msk [vmem:[#allocation2] sm:$0xff] %vm833_vm0, %v1212_v49  ;;  %v10379_v49 = vld [vmem:[%s14177_s4 + $0xa8] sm:$0xff]  }
 0x4c6   : > { %v9250_v40 = vpop.f32.mrb[28].mxu1 }
 0x4c7   : > { %v1165_v5 = vpop.f32.mrb[29].mxu1 }
 0x4c8   : > { %v9251_v33 = vpop.f32.mrb[30].mxu1 }
 0x4c9   : > { %v1215_v61 = vpack.c.bf16 %v9251_v33, %v9250_v40  ;;  %v1168_v34 = vpop.f32.mrb[31].mxu1  ;;  %v14275_v40 = vld [vmem:[#allocation9_spill] sm:$0xff]  ;;  %v10380_v33 = vld [vmem:[%s14177_s4 + $0xb0] sm:$0xff]  }
 0x4ca   : > { %v1214_v55 = vpack.c.bf16 %v1168_v34, %v1165_v5  ;;  %v14276_v5 = vld [vmem:[#allocation10_spill] sm:$0xff]  ;;  %v14277_v34 = vld [vmem:[#allocation11_spill] sm:$0xff] }
 0x4cb   : > { %1223 = vst.msk [vmem:[#allocation2 + $0x60] sm:$0xff] %vm833_vm0, %v1215_v61  ;;  %v10381_v61 = vld [vmem:[%s14177_s4 + $0xb8] sm:$0xff]  }
 0x4cc   : > { %1222 = vst.msk [vmem:[#allocation2 + $0x40] sm:$0xff] %vm833_vm0, %v1214_v55  ;;  %v14278_v55 = vld [vmem:[#allocation12_spill] sm:$0xff] }
 0x4d9   : > { %v9254_v50 = vpop.f32.mrb[32].mxu1 }
 0x4da   : > { %v1181_v22 = vpop.f32.mrb[33].mxu1 }
 0x4db   : > { %v9255_v4 = vpop.f32.mrb[34].mxu1 }
 0x4dc   : > { %v1217_v43 = vpack.c.bf16 %v9255_v4, %v9254_v50  ;;  %v1184_v57 = vpop.f32.mrb[35].mxu1  ;;  %v14279_v50 = vld [vmem:[#allocation13_spill] sm:$0xff]  ;;  %v14281_v4 = vld [vmem:[#allocation15_spill] sm:$0xff] }
 0x4dd   : > { %v1216_v52 = vpack.c.bf16 %v1184_v57, %v1181_v22  ;;  %v14280_v22 = vld [vmem:[#allocation14_spill] sm:$0xff]  ;;  %v14283_v57 = vld [vmem:[#allocation17_spill] sm:$0xff] }
 0x4de   : > { %1225 = vst.msk [vmem:[#allocation2 + $0xa0] sm:$0xff] %vm833_vm0, %v1217_v43  ;;  %v14282_v43 = vld [vmem:[#allocation16_spill] sm:$0xff] }
 0x4df   : > { %1224 = vst.msk [vmem:[#allocation2 + $0x80] sm:$0xff] %vm833_vm0, %v1216_v52  ;;  %v14284_v52 = vld [vmem:[#allocation18_spill] sm:$0xff] }
 0x4e5   : > { %v9258_v48 = vpop.f32.mrb[36].mxu1 }
 0x4e6   : > { %v1197_v60 = vpop.f32.mrb[37].mxu1 }
 0x4e7   : > { %v9259_v15 = vpop.f32.mrb[38].mxu1 }
 0x4e8   : > { %v1219_v53 = vpack.c.bf16 %v9259_v15, %v9258_v48  ;;  %v1200_v58 = vpop.f32.mrb[39].mxu1  ;;  %v14285_v48 = vld [vmem:[#allocation19_spill] sm:$0xff] }
 0x4e9   : > { %v1218_v6 = vpack.c.bf16 %v1200_v58, %v1197_v60 }
 0x4ea   : > { %1227 = vst.msk [vmem:[#allocation2 + $0xe0] sm:$0xff] %vm833_vm0, %v1219_v53 }
 0x4eb   : > { %1226 = vst.msk [vmem:[#allocation2 + $0xc0] sm:$0xff] %vm833_vm0, %v1218_v6 }
 0x4ed   : > { %v9310_v0 = vpop.f32.mrb[40].mxu1 }
 0x4ee   : > { %v1457_v10 = vpop.f32.mrb[41].mxu1 }
 0x4ef   : > { %v9311_v46 = vpop.f32.mrb[42].mxu1 }
 0x4f0   : > { %v1675_v18 = vpack.c.bf16 %v9311_v46, %v9310_v0  ;;  %v1460_v12 = vpop.f32.mrb[43].mxu1 }
 0x4f1   : > { %v1674_v59 = vpack.c.bf16 %v1460_v12, %v1457_v10 }
 0x4f3   : > { %9348 = vmatprep.subr.bf16.mxu1 %v1674_v59 }
 0x4f4   : > { %9349 = vmatpush3.bf16.msra.mxu1 %v1674_v59 }
 0x4f5   : > { %v9314_v41 = vpop.f32.mrb[44].mxu1  ;;  %9350 = vmatprep.subr.bf16.mxu1 %v1675_v18 }
 0x4f6   : > { %v1473_v54 = vpop.f32.mrb[45].mxu1 }
 0x4f7   : > { %v9315_v14 = vpop.f32.mrb[46].mxu1 }
 0x4f8   : > { %v1677_v21 = vpack.c.bf16 %v9315_v14, %v9314_v41  ;;  %v1476_v26 = vpop.f32.mrb[47].mxu1  ;;  %9351 = vmatpush3.bf16.msra.mxu1 %v1675_v18 }
 0x4f9   : > { %v1676_v11 = vpack.c.bf16 %v1476_v26, %v1473_v54 }
 0x4fb   : > { %9352 = vmatprep.subr.bf16.mxu1 %v1676_v11 }
 0x4fc   : > { %9353 = vmatpush3.bf16.msra.mxu1 %v1676_v11 }
 0x4fd   : > { %9354 = vmatprep.subr.bf16.mxu1 %v1677_v21 }
 0x500   : > { %9355 = vmatpush3.bf16.msra.mxu1 %v1677_v21 }
 0x501   : > { %9404 = vmatprep.subr.bf16.mxu1 %v10366_v19 }
 0x503   : > { %9357 = vmatmul.mubr.msk.bf16.vlgmr.msra.gmra.mrb[48].mxu1 %vm833_vm0, %v14265_v45 }
 0x504   : > { %9405 = vmatpush3.bf16.msra.mxu1 %v10366_v19  ;;  %9360 = vmatprep.mubr.msk.bf16.mxu1 %vm833_vm0, %v14266_v37 }
 0x505   : > { %9406 = vmatprep.subr.bf16.mxu1 %v10367_v44 }
 0x508   : > { %9407 = vmatpush3.bf16.msra.mxu1 %v10367_v44 }
 0x509   : > { %9408 = vmatprep.subr.bf16.mxu1 %v10368_v25 }
 0x50b   : > { %9361 = vmatmul.mubr.msk.bf16.gmra.mrb[52].mxu1 %vm833_vm0, %v14267_v17 }
 0x50c   : > { %9409 = vmatpush3.bf16.msra.mxu1 %v10368_v25  ;;  %9364 = vmatprep.mubr.msk.bf16.mxu1 %vm833_vm0, %v14268_v32 }
 0x50d   : > { %9410 = vmatprep.subr.bf16.mxu1 %v10369_v13 }
 0x510   : > { %9411 = vmatpush3.bf16.msra.mxu1 %v10369_v13 }
 0x511   : > { %9412 = vmatprep.subr.bf16.mxu1 %v10370_v27 }
 0x513   : > { %9365 = vmatmul.mubr.msk.bf16.gmra.mrb[56].mxu1 %vm833_vm0, %v14269_v30 }
 0x514   : > { %9413 = vmatpush3.bf16.msra.mxu1 %v10370_v27  ;;  %9368 = vmatprep.mubr.msk.bf16.mxu1 %vm833_vm0, %v14270_v7 }
 0x515   : > { %9414 = vmatprep.subr.bf16.mxu1 %v10371_v9 }
 0x518   : > { %9415 = vmatpush3.bf16.msra.mxu1 %v10371_v9 }
 0x519   : > { %9416 = vmatprep.subr.bf16.mxu1 %v10372_v16 }
 0x51b   : > { %9369 = vmatmul.mubr.msk.bf16.gmra.mrb[60].mxu1 %vm833_vm0, %v14271_v1 }
 0x51c   : > { %9417 = vmatpush3.bf16.msra.mxu1 %v10372_v16  ;;  %9420 = vmatprep.mubr.bf16.mxu1 %v11220_v8 }
 0x51d   : > { %9418 = vmatprep.subr.bf16.mxu1 %v10373_v56 }
 0x520   : > { %9419 = vmatpush3.bf16.msra.mxu1 %v10373_v56 }
 0x521   : > { %9460 = vmatprep.subr.bf16.mxu1 %v10374_v62 }
 0x523   : > { %9421 = vmatmul.mubr.bf16.vlgmr.msra.gmra.mrb[64].mxu1 %v11261_v23 }
 0x524   : > { %9461 = vmatpush3.bf16.msra.mxu1 %v10374_v62  ;;  %9424 = vmatprep.mubr.bf16.mxu1 %v14272_v63 }
 0x525   : > { %9462 = vmatprep.subr.bf16.mxu1 %v10375_v3 }
 0x528   : > { %9463 = vmatpush3.bf16.msra.mxu1 %v10375_v3 }
 0x529   : > { %9464 = vmatprep.subr.bf16.mxu1 %v10376_v2 }
 0x52b   : > { %9425 = vmatmul.mubr.bf16.gmra.mrb[68].mxu1 %v14273_v29 }
 0x52c   : > { %9465 = vmatpush3.bf16.msra.mxu1 %v10376_v2  ;;  %9428 = vmatprep.mubr.bf16.mxu1 %v14274_v38 }
 0x52d   : > { %9466 = vmatprep.subr.bf16.mxu1 %v10377_v51 }
 0x530   : > { %9467 = vmatpush3.bf16.msra.mxu1 %v10377_v51 }
 0x531   : > { %9468 = vmatprep.subr.bf16.mxu1 %v10378_v36 }
 0x533   : > { %9429 = vmatmul.mubr.bf16.gmra.mrb[72].mxu1 %v14275_v40 }
 0x534   : > { %9469 = vmatpush3.bf16.msra.mxu1 %v10378_v36  ;;  %9432 = vmatprep.mubr.bf16.mxu1 %v14276_v5 }
 0x535   : > { %9470 = vmatprep.subr.bf16.mxu1 %v10379_v49 }
 0x538   : > { %9471 = vmatpush3.bf16.msra.mxu1 %v10379_v49 }
 0x539   : > { %9472 = vmatprep.subr.bf16.mxu1 %v10380_v33 }
 0x53b   : > { %9433 = vmatmul.mubr.bf16.gmra.mrb[76].mxu1 %v14277_v34 }
 0x53c   : > { %9473 = vmatpush3.bf16.msra.mxu1 %v10380_v33  ;;  %9476 = vmatprep.mubr.bf16.mxu1 %v14278_v55 }
 0x53d   : > { %9474 = vmatprep.subr.bf16.mxu1 %v10381_v61 }
 0x540   : > { %9475 = vmatpush3.bf16.msra.mxu1 %v10381_v61 }
 0x543   : > { %9477 = vmatmul.mubr.bf16.vlgmr.msra.gmra.mrb[80].mxu1 %v14279_v50 }
 0x544   : > { %9480 = vmatprep.mubr.bf16.mxu1 %v14280_v22 }
 0x54b   : > { %9481 = vmatmul.mubr.bf16.gmra.mrb[84].mxu1 %v14281_v4 }
 0x54c   : > { %9484 = vmatprep.mubr.bf16.mxu1 %v14282_v43 }
 0x553   : > { %9485 = vmatmul.mubr.bf16.gmra.mrb[88].mxu1 %v14283_v57 }
 0x554   : > { %9488 = vmatprep.mubr.bf16.mxu1 %v14284_v52 }
 0x55b   : > { %9489 = vmatmul.mubr.bf16.gmra.mrb[92].mxu1 %v14285_v48 }
 0x5d6   : > { %v11854_v60 = vpop.f32.mrb[48].mxu1 }
 0x5d7   : > { %v11856_v15 = vpop.f32.mrb[49].mxu1 }
 0x5d8   : > { %1799 = vmax.xlane.f32.xlu1 %v11856_v15  ;;  %v11859_v53 = vpop.f32.mrb[50].mxu1 }
 0x5d9   : > { %v11861_v58 = vpop.f32.mrb[51].mxu1 }
 0x5da   : > { %1801 = vmax.xlane.f32.xlu0 %v11861_v58 }
 0x5dc   : > { %1803 = vmax.xlane.f32.xlu1 %v11854_v60 }
 0x5de   : > { %1805 = vmax.xlane.f32.xlu0 %v11859_v53  ;;  %v11866_v6 = vpop.f32.mrb[52].mxu1 }
 0x5df   : > { %v11868_v0 = vpop.f32.mrb[53].mxu1 }
 0x5e0   : > { %1807 = vmax.xlane.f32.xlu1 %v11868_v0  ;;  %v11871_v10 = vpop.f32.mrb[54].mxu1 }
 0x5e1   : > { %v11873_v46 = vpop.f32.mrb[55].mxu1 }
 0x5e2   : > { %1809 = vmax.xlane.f32.xlu0 %v11873_v46 }
 0x5e4   : > { %1811 = vmax.xlane.f32.xlu1 %v11866_v6 }
 0x5e6   : > { %1813 = vmax.xlane.f32.xlu0 %v11871_v10  ;;  %v11878_v18 = vpop.f32.mrb[56].mxu1 }
 0x5e7   : > { %v11880_v12 = vpop.f32.mrb[57].mxu1 }
 0x5e8   : > { %1815 = vmax.xlane.f32.xlu1 %v11880_v12  ;;  %v11883_v59 = vpop.f32.mrb[58].mxu1 }
 0x5e9   : > { %v11885_v41 = vpop.f32.mrb[59].mxu1 }
 0x5ea   : > { %1817 = vmax.xlane.f32.xlu0 %v11885_v41 }
 0x5ec   : > { %1819 = vmax.xlane.f32.xlu1 %v11878_v18 }
 0x5ee   : > { %1821 = vmax.xlane.f32.xlu0 %v11883_v59  ;;  %v11890_v54 = vpop.f32.mrb[60].mxu1 }
 0x5ef   : > { %v11892_v14 = vpop.f32.mrb[61].mxu1 }
 0x5f0   : > { %1823 = vmax.xlane.f32.xlu1 %v11892_v14  ;;  %v11895_v21 = vpop.f32.mrb[62].mxu1 }
 0x5f1   : > { %v11897_v26 = vpop.f32.mrb[63].mxu1 }
 0x5f2   : > { %1825 = vmax.xlane.f32.xlu0 %v11897_v26 }
 0x5f4   : > { %1827 = vmax.xlane.f32.xlu1 %v11890_v54 }
 0x5f6   : > { %1829 = vmax.xlane.f32.xlu0 %v11895_v21  ;;  %v9422_v11 = vpop.f32.mrb[64].mxu1 }
 0x5f7   : > { %v11902_v19 = vmul.f32 0.125, %v9422_v11  ;;  %v2204_v44 = vpop.f32.mrb[65].mxu1 }
 0x5f8   : > { %v11904_v45 = vmul.f32 0.125, %v2204_v44  ;;  %v9423_v37 = vpop.f32.mrb[66].mxu1 }
 0x5f9   : > { %v11906_v25 = vmul.f32 0.125, %v9423_v37  ;;  %v2207_v13 = vpop.f32.mrb[67].mxu1 }
 0x5fa   : > { %v11908_v17 = vmul.f32 0.125, %v2207_v13 }
 0x5fe   : > { %v9426_v9 = vpop.f32.mrb[68].mxu1 }
 0x5ff   : > { %v11914_v30 = vmul.f32 0.125, %v9426_v9  ;;  %v2220_v7 = vpop.f32.mrb[69].mxu1 }
 0x600   : > { %v11916_v16 = vmul.f32 0.125, %v2220_v7  ;;  %v9427_v56 = vpop.f32.mrb[70].mxu1 }
 0x601   : > { %v11918_v1 = vmul.f32 0.125, %v9427_v56  ;;  %v2223_v62 = vpop.f32.mrb[71].mxu1 }
 0x602   : > { %v11920_v3 = vmul.f32 0.125, %v2223_v62 }
 0x606   : > { %v9430_v36 = vpop.f32.mrb[72].mxu1 }
 0x607   : > { %v11926_v49 = vmul.f32 0.125, %v9430_v36  ;;  %v2236_v33 = vpop.f32.mrb[73].mxu1 }
 0x608   : > { %v11928_v61 = vmul.f32 0.125, %v2236_v33  ;;  %v9431_v11 = vpop.f32.mrb[74].mxu1 }
 0x609   : > { %v11930_v44 = vmul.f32 0.125, %v9431_v11  ;;  %v2239_v37 = vpop.f32.mrb[75].mxu1 }
 0x60a   : > { %v11932_v13 = vmul.f32 0.125, %v2239_v37 }
 0x60e   : > { %v9434_v56 = vpop.f32.mrb[76].mxu1 }
 0x60f   : > { %v11938_v62 = vmul.f32 0.125, %v9434_v56  ;;  %v2252_v36 = vpop.f32.mrb[77].mxu1 }
 0x610   : > { %v11940_v2 = vmul.f32 0.125, %v2252_v36  ;;  %v9435_v33 = vpop.f32.mrb[78].mxu1 }
 0x611   : > { %v11942_v51 = vmul.f32 0.125, %v9435_v33  ;;  %v2255_v11 = vpop.f32.mrb[79].mxu1 }
 0x612   : > { %v11944_v32 = vmul.f32 0.125, %v2255_v11 }
 0x616   : > { %v9478_v27 = vpop.f32.mrb[80].mxu1 }
 0x617   : > { %v2464_v7 = vpop.f32.mrb[81].mxu1 }
 0x618   : > { %v9479_v48 = vpop.f32.mrb[82].mxu1 }
 0x619   : > { %v2829_v56 = vpack.c.bf16 %v9479_v48, %v9478_v27  ;;  %v2467_v52 = vpop.f32.mrb[83].mxu1 }
 0x61a   : > { %v2828_v57 = vpack.c.bf16 %v2467_v52, %v2464_v7 }
 0x61c   : > { %9516 = vmatprep.subr.bf16.mxu1 %v2828_v57 }
 0x61d   : > { %9517 = vmatpush3.bf16.msra.mxu1 %v2828_v57 }
 0x61e   : > { %v9482_v36 = vpop.f32.mrb[84].mxu1  ;;  %9518 = vmatprep.subr.bf16.mxu1 %v2829_v56 }
 0x61f   : > { %v2480_v33 = vpop.f32.mrb[85].mxu1 }
 0x620   : > { %v9483_v43 = vpop.f32.mrb[86].mxu1 }
 0x621   : > { %v2831_v11 = vpack.c.bf16 %v9483_v43, %v9482_v36  ;;  %v2483_v4 = vpop.f32.mrb[87].mxu1  ;;  %9519 = vmatpush3.bf16.msra.mxu1 %v2829_v56 }
 0x622   : > { %v2830_v22 = vpack.c.bf16 %v2483_v4, %v2480_v33 }
 0x624   : > { %9520 = vmatprep.subr.bf16.mxu1 %v2830_v22 }
 0x625   : > { %9521 = vmatpush3.bf16.msra.mxu1 %v2830_v22 }
 0x626   : > { %v9486_v37 = vpop.f32.mrb[88].mxu1  ;;  %9522 = vmatprep.subr.bf16.mxu1 %v2831_v11 }
 0x627   : > { %v2496_v9 = vpop.f32.mrb[89].mxu1 }
 0x628   : > { %v9487_v50 = vpop.f32.mrb[90].mxu1 }
 0x629   : > { %v2833_v55 = vpack.c.bf16 %v9487_v50, %v9486_v37  ;;  %v2499_v48 = vpop.f32.mrb[91].mxu1  ;;  %9523 = vmatpush3.bf16.msra.mxu1 %v2831_v11 }
 0x62a   : > { %v2832_v52 = vpack.c.bf16 %v2499_v48, %v2496_v9 }
 0x62c   : > { %9524 = vmatprep.subr.bf16.mxu1 %v2832_v52 }
 0x62d   : > { %9525 = vmatpush3.bf16.msra.mxu1 %v2832_v52 }
 0x62e   : > { %v9490_v57 = vpop.f32.mrb[92].mxu1  ;;  %9526 = vmatprep.subr.bf16.mxu1 %v2833_v55 }
 0x62f   : > { %v2512_v27 = vpop.f32.mrb[93].mxu1 }
 0x630   : > { %v9491_v7 = vpop.f32.mrb[94].mxu1 }
 0x631   : > { %v2835_v43 = vpack.c.bf16 %v9491_v7, %v9490_v57  ;;  %v2515_v36 = vpop.f32.mrb[95].mxu1  ;;  %9527 = vmatpush3.bf16.msra.mxu1 %v2833_v55 }
 0x632   : > { %v2834_v4 = vpack.c.bf16 %v2515_v36, %v2512_v27 }
 0x634   : > { %9528 = vmatprep.subr.bf16.mxu1 %v2834_v4 }
 0x635   : > { %9529 = vmatpush3.bf16.msra.mxu1 %v2834_v4 }
 0x636   : > { %9530 = vmatprep.subr.bf16.mxu1 %v2835_v43 }
 0x639   : > { %9531 = vmatpush3.bf16.msra.mxu1 %v2835_v43 }
 0x63a   : > { %9580 = vmatprep.subr.bf16.mxu1 %v11430_v20 }
 0x665   : > { %v1800_v50 = vpop.xlane.xlu1 %1799 }
 0x666   : > { %v1831_v22 = vsub.f32 %v11856_v15, %v1800_v50 }
 0x667   : > { %v1802_v9 = vpop.xlane.xlu0 %1801 }
 0x668   : > { %v1847_v37 = vmul.f32 1.442695, %v1831_v22  ;;  %v1832_v56 = vsub.f32 %v11861_v58, %v1802_v9 }
 0x669   : > { %v1804_v33 = vpop.xlane.xlu1 %1803 }
 0x66a   : > { %10582 = vpow2.f32 %v1847_v37  ;;  %v1849_v11 = vmul.f32 1.442695, %v1832_v56  ;;  %v1833_v48 = vsub.f32 %v11854_v60, %v1804_v33 }
 0x66b   : > { %v1806_v55 = vpop.xlane.xlu0 %1805 }
 0x66c   : > { %10584 = vpow2.f32 %v1849_v11  ;;  %v1851_v52 = vmul.f32 1.442695, %v1833_v48  ;;  %v1834_v57 = vsub.f32 %v11859_v53, %v1806_v55 }
 0x66d   : > { %v1808_v27 = vpop.xlane.xlu1 %1807 }
 0x66e   : > { %10586 = vpow2.f32 %v1851_v52  ;;  %v1853_v7 = vmul.f32 1.442695, %v1834_v57  ;;  %v1835_v43 = vsub.f32 %v11868_v0, %v1808_v27 }
 0x66f   : > { %v1810_v15 = vpop.xlane.xlu0 %1809 }
 0x670   : > { %10588 = vpow2.f32 %v1853_v7  ;;  %v1855_v36 = vmul.f32 1.442695, %v1835_v43  ;;  %v1836_v58 = vsub.f32 %v11873_v46, %v1810_v15 }
 0x671   : > { %v1812_v4 = vpop.xlane.xlu1 %1811 }
 0x672   : > { %10590 = vpow2.f32 %v1855_v36  ;;  %v1857_v50 = vmul.f32 1.442695, %v1836_v58  ;;  %v1837_v60 = vsub.f32 %v11866_v6, %v1812_v4 }
 0x673   : > { %v1814_v22 = vpop.xlane.xlu0 %1813 }
 0x674   : > { %v11958_v9 = vpop.eup %10582  ;;  %10592 = vpow2.f32 %v1857_v50  ;;  %v1859_v53 = vmul.f32 1.442695, %v1837_v60  ;;  %v1838_v37 = vsub.f32 %v11871_v10, %v1814_v22 }
 0x675   : > { %v1816_v56 = vpop.xlane.xlu1 %1815  ;;  %1879 = vadd.xlane.f32.xlu1 %v11958_v9 }
 0x676   : > { %v11962_v0 = vpop.eup %10584  ;;  %10594 = vpow2.f32 %v1859_v53  ;;  %v1861_v33 = vmul.f32 1.442695, %v1838_v37  ;;  %v1839_v46 = vsub.f32 %v11880_v12, %v1816_v56 }
 0x677   : > { %v1818_v11 = vpop.xlane.xlu0 %1817  ;;  %1881 = vadd.xlane.f32.xlu0 %v11962_v0 }
 0x678   : > { %v11966_v6 = vpop.eup %10586  ;;  %10596 = vpow2.f32 %v1861_v33  ;;  %v1863_v48 = vmul.f32 1.442695, %v1839_v46  ;;  %v1840_v55 = vsub.f32 %v11885_v41, %v1818_v11 }
 0x679   : > { %v1820_v52 = vpop.xlane.xlu1 %1819  ;;  %1883 = vadd.xlane.f32.xlu1 %v11966_v6 }
 0x67a   : > { %v11970_v10 = vpop.eup %10588  ;;  %10598 = vpow2.f32 %v1863_v48  ;;  %v1865_v57 = vmul.f32 1.442695, %v1840_v55  ;;  %v1841_v27 = vsub.f32 %v11878_v18, %v1820_v52 }
 0x67b   : > { %v1822_v7 = vpop.xlane.xlu0 %1821  ;;  %1885 = vadd.xlane.f32.xlu0 %v11970_v10 }
 0x67c   : > { %v11974_v12 = vpop.eup %10590  ;;  %10600 = vpow2.f32 %v1865_v57  ;;  %v1867_v43 = vmul.f32 1.442695, %v1841_v27  ;;  %v1842_v15 = vsub.f32 %v11883_v59, %v1822_v7 }
 0x67d   : > { %1887 = vadd.xlane.f32.xlu1 %v11974_v12  ;;  %v1824_v41 = vpop.xlane.xlu1 %1823 }
 0x67e   : > { %v11978_v36 = vpop.eup %10592  ;;  %10602 = vpow2.f32 %v1867_v43  ;;  %v1869_v58 = vmul.f32 1.442695, %v1842_v15  ;;  %v1843_v4 = vsub.f32 %v11892_v14, %v1824_v41 }
 0x67f   : > { %1889 = vadd.xlane.f32.xlu0 %v11978_v36  ;;  %v1826_v18 = vpop.xlane.xlu0 %1825 }
 0x680   : > { %v11982_v50 = vpop.eup %10594  ;;  %10604 = vpow2.f32 %v1869_v58  ;;  %v1871_v60 = vmul.f32 1.442695, %v1843_v4  ;;  %v1844_v22 = vsub.f32 %v11897_v26, %v1826_v18 }
 0x681   : > { %1891 = vadd.xlane.f32.xlu1 %v11982_v50  ;;  %v1828_v59 = vpop.xlane.xlu1 %1827 }
 0x682   : > { %v11986_v53 = vpop.eup %10596  ;;  %10606 = vpow2.f32 %v1871_v60  ;;  %v1873_v37 = vmul.f32 1.442695, %v1844_v22  ;;  %v1845_v56 = vsub.f32 %v11890_v54, %v1828_v59 }
 0x683   : > { %1893 = vadd.xlane.f32.xlu0 %v11986_v53  ;;  %v1830_v14 = vpop.xlane.xlu0 %1829 }
 0x684   : > { %v11990_v33 = vpop.eup %10598  ;;  %10608 = vpow2.f32 %v1873_v37  ;;  %v1875_v46 = vmul.f32 1.442695, %v1845_v56  ;;  %v1846_v11 = vsub.f32 %v11895_v21, %v1830_v14 }
 0x685   : > { %1895 = vadd.xlane.f32.xlu1 %v11990_v33 }
 0x686   : > { %v11994_v26 = vpop.eup %10600  ;;  %10610 = vpow2.f32 %v1875_v46  ;;  %v1877_v48 = vmul.f32 1.442695, %v1846_v11 }
 0x687   : > { %1897 = vadd.xlane.f32.xlu0 %v11994_v26 }
 0x688   : > { %v11997_v55 = vpop.eup %10602  ;;  %10612 = vpow2.f32 %v1877_v48 }
 0x689   : > { %1899 = vadd.xlane.f32.xlu1 %v11997_v55 }
 0x68a   : > { %v12000_v54 = vpop.eup %10604 }
 0x68b   : > { %1901 = vadd.xlane.f32.xlu0 %v12000_v54 }
 0x68c   : > { %v12003_v52 = vpop.eup %10606 }
 0x68d   : > { %1903 = vadd.xlane.f32.xlu1 %v12003_v52 }
 0x68e   : > { %v12006_v21 = vpop.eup %10608 }
 0x68f   : > { %1905 = vadd.xlane.f32.xlu0 %v12006_v21 }
 0x690   : > { %v12009_v57 = vpop.eup %10610 }
 0x691   : > { %1907 = vadd.xlane.f32.xlu1 %v12009_v57 }
 0x692   : > { %v12012_v27 = vpop.eup %10612 }
 0x693   : > { %1909 = vadd.xlane.f32.xlu0 %v12012_v27 }
 0x702   : > { %v1880_v7 = vpop.xlane.xlu1 %1879 }
 0x703   : > { %10614 = vrcp.f32 %v1880_v7 }
 0x704   : > { %v1882_v43 = vpop.xlane.xlu0 %1881 }
 0x705   : > { %10616 = vrcp.f32 %v1882_v43 }
 0x706   : > { %v1884_v15 = vpop.xlane.xlu1 %1883 }
 0x707   : > { %10618 = vrcp.f32 %v1884_v15 }
 0x708   : > { %v1886_v41 = vpop.xlane.xlu0 %1885 }
 0x709   : > { %10620 = vrcp.f32 %v1886_v41 }
 0x70a   : > { %v1888_v58 = vpop.xlane.xlu1 %1887 }
 0x70b   : > { %10622 = vrcp.f32 %v1888_v58 }
 0x70c   : > { %v1890_v4 = vpop.xlane.xlu0 %1889 }
 0x70d   : > { %v10615_v18 = vpop.eup %10614  ;;  %10624 = vrcp.f32 %v1890_v4 }
 0x70e   : > { %v1892_v60 = vpop.xlane.xlu1 %1891  ;;  %v1927_v37 = vmul.f32 %v10615_v18, %v11958_v9 }
 0x70f   : > { %v10617_v22 = vpop.eup %10616  ;;  %10626 = vrcp.f32 %v1892_v60 }
 0x710   : > { %v1894_v59 = vpop.xlane.xlu0 %1893  ;;  %v1928_v56 = vmul.f32 %v10617_v22, %v11962_v0 }
 0x711   : > { %v10619_v14 = vpop.eup %10618  ;;  %10628 = vrcp.f32 %v1894_v59 }
 0x712   : > { %v1896_v46 = vpop.xlane.xlu1 %1895  ;;  %v1943_v11 = vpack.c.bf16 %v1928_v56, %v1927_v37  ;;  %v1929_v7 = vmul.f32 %v10619_v14, %v11966_v6 }
 0x713   : > { %v10621_v48 = vpop.eup %10620  ;;  %10630 = vrcp.f32 %v1896_v46 }
 0x714   : > { %v1930_v43 = vmul.f32 %v10621_v48, %v11970_v10  ;;  %9388 = vmatprep.mubr.bf16.mxu0 %v1943_v11  ;;  %v1898_v15 = vpop.xlane.xlu0 %1897 }
 0x715   : > { %v10623_v41 = vpop.eup %10622  ;;  %10632 = vrcp.f32 %v1898_v15 }
 0x716   : > { %v1900_v58 = vpop.xlane.xlu1 %1899  ;;  %v1944_v4 = vpack.c.bf16 %v1930_v43, %v1929_v7  ;;  %v1931_v0 = vmul.f32 %v10623_v41, %v11974_v12 }
 0x717   : > { %v10625_v60 = vpop.eup %10624  ;;  %10634 = vrcp.f32 %v1900_v58 }
 0x718   : > { %9389 = vmatmul.mubr.bf16.vlgmr.msra.gmra.mrb[64].mxu0 %v1944_v4  ;;  %v1902_v9 = vpop.xlane.xlu0 %1901  ;;  %v1932_v18 = vmul.f32 %v10625_v60, %v11978_v36 }
 0x719   : > { %v10627_v22 = vpop.eup %10626  ;;  %9437 = vmatpush3.bf16.msra.mxu0 %v11430_v20  ;;  %10636 = vrcp.f32 %v1902_v9 }
 0x71a   : > { %9438 = vmatprep.subr.bf16.mxu0 %v11436_v24  ;;  %v1904_v6 = vpop.xlane.xlu1 %1903  ;;  %v1945_v10 = vpack.c.bf16 %v1932_v18, %v1931_v0  ;;  %v1933_v56 = vmul.f32 %v10627_v22, %v11982_v50 }
 0x71b   : > { %v10629_v59 = vpop.eup %10628  ;;  %10638 = vrcp.f32 %v1904_v6  ;;  %v10385_v6 = vld [vmem:[%s14176_s3 + $0x58] sm:$0xff]  }
 0x71c   : > { %9392 = vmatprep.mubr.bf16.mxu0 %v1945_v10  ;;  %v1906_v37 = vpop.xlane.xlu0 %1905  ;;  %v1934_v14 = vmul.f32 %v10629_v59, %v11986_v53  ;;  %v14286_v10 = vpack.c.bf16 %v11908_v17, %v11904_v45 }
 0x71d   : > { %v10631_v46 = vpop.eup %10630  ;;  %9439 = vmatpush3.bf16.msra.mxu0 %v11436_v24  ;;  %10640 = vrcp.f32 %v1906_v37 }
 0x71e   : > { %9440 = vmatprep.subr.bf16.mxu0 %v11441_v28  ;;  %v1908_v12 = vpop.xlane.xlu1 %1907  ;;  %v1946_v36 = vpack.c.bf16 %v1934_v14, %v1933_v56  ;;  %v1935_v7 = vmul.f32 %v10631_v46, %v11990_v33 }
 0x71f   : > { %v10633_v11 = vpop.eup %10632  ;;  %10642 = vrcp.f32 %v1908_v12 }
 0x720   : > { %9393 = vmatmul.mubr.bf16.gmra.mrb[68].mxu0 %v1946_v36  ;;  %v1910_v48 = vpop.xlane.xlu0 %1909  ;;  %v1936_v43 = vmul.f32 %v10633_v11, %v11994_v26 }
 0x721   : > { %v10635_v15 = vpop.eup %10634  ;;  %9441 = vmatpush3.bf16.msra.mxu0 %v11441_v28  ;;  %10644 = vrcp.f32 %v1910_v48 }
 0x722   : > { %9442 = vmatprep.subr.bf16.mxu0 %v11445_v31  ;;  %v1947_v50 = vpack.c.bf16 %v1936_v43, %v1935_v7  ;;  %v1937_v41 = vmul.f32 %v10635_v15, %v11997_v55 }
 0x723   : > { %v10637_v53 = vpop.eup %10636 }
 0x724   : > { %9396 = vmatprep.mubr.bf16.mxu0 %v1947_v50  ;;  %v1938_v58 = vmul.f32 %v10637_v53, %v12000_v54 }
 0x725   : > { %v10639_v4 = vpop.eup %10638  ;;  %9443 = vmatpush3.bf16.msra.mxu0 %v11445_v31 }
 0x726   : > { %9444 = vmatprep.subr.bf16.mxu0 %v11449_v35  ;;  %v1948_v33 = vpack.c.bf16 %v1938_v58, %v1937_v41  ;;  %v1939_v60 = vmul.f32 %v10639_v4, %v12003_v52  ;;  %v10382_v52 = vld [vmem:[%s14176_s3 + $0x40] sm:$0xff]  }
 0x727   : > { %v10641_v26 = vpop.eup %10640 }
 0x728   : > { %9397 = vmatmul.mubr.bf16.gmra.mrb[72].mxu0 %v1948_v33  ;;  %v1940_v9 = vmul.f32 %v10641_v26, %v12006_v21 }
 0x729   : > { %v10643_v0 = vpop.eup %10642  ;;  %9445 = vmatpush3.bf16.msra.mxu0 %v11449_v35 }
 0x72a   : > { %9446 = vmatprep.subr.bf16.mxu0 %v11453_v39  ;;  %v1949_v55 = vpack.c.bf16 %v1940_v9, %v1939_v60  ;;  %v1941_v54 = vmul.f32 %v10643_v0, %v12009_v57  ;;  %v10383_v57 = vld [vmem:[%s14176_s3 + $0x48] sm:$0xff]   ;;  %v10386_v0 = vld [vmem:[%s14175_s2 + $0xc0] sm:$0xff]  }
 0x72b   : > { %v10645_v18 = vpop.eup %10644 }
 0x72c   : > { %9400 = vmatprep.mubr.bf16.mxu0 %v1949_v55  ;;  %v1942_v22 = vmul.f32 %v10645_v18, %v12012_v27  ;;  %v10384_v27 = vld [vmem:[%s14176_s3 + $0x50] sm:$0xff]  }
 0x72d   : > { %9447 = vmatpush3.bf16.msra.mxu0 %v11453_v39 }
 0x72e   : > { %9448 = vmatprep.subr.bf16.mxu0 %v11457_v42  ;;  %v1950_v21 = vpack.c.bf16 %v1942_v22, %v1941_v54 }
 0x730   : > { %9401 = vmatmul.mubr.bf16.gmra.mrb[76].mxu0 %v1950_v21 }
 0x731   : > { %9449 = vmatpush3.bf16.msra.mxu0 %v11457_v42  ;;  %9452 = vmatprep.mubr.bf16.mxu0 %v10382_v52 }
 0x732   : > { %9450 = vmatprep.subr.bf16.mxu0 %v11461_v47 }
 0x735   : > { %9451 = vmatpush3.bf16.msra.mxu0 %v11461_v47 }
 0x738   : > { %9453 = vmatmul.mubr.bf16.vlgmr.msra.gmra.mrb[80].mxu0 %v10383_v57 }
 0x739   : > { %9456 = vmatprep.mubr.bf16.mxu0 %v10384_v27 }
 0x740   : > { %9457 = vmatmul.mubr.bf16.gmra.mrb[84].mxu0 %v10385_v6 }
 0x741   : > { %9500 = vmatprep.mubr.msk.bf16.mxu0 %vm833_vm0, %v14286_v10 }
 0x7eb   : > { %v12062_v59 = vpop.f32.mrb[64].mxu0 }
 0x7ec   : > { %14287 = vst [vmem:[#allocation6_spill] sm:$0xff] %v12062_v59  ;;  %v12064_v37 = vpop.f32.mrb[65].mxu0 }
 0x7ed   : > { %14288 = vst [vmem:[#allocation7_spill] sm:$0xff] %v12064_v37  ;;  %v12066_v56 = vpop.f32.mrb[66].mxu0 }
 0x7ee   : > { %14289 = vst [vmem:[#allocation8_spill] sm:$0xff] %v12066_v56  ;;  %v12070_v46 = vpop.f32.mrb[67].mxu0 }
 0x7ef   : > { %14290 = vst [vmem:[#allocation9_spill] sm:$0xff] %v12070_v46 }
 0x7f3   : > { %v12074_v36 = vpop.f32.mrb[68].mxu0 }
 0x7f4   : > { %14291 = vst [vmem:[#allocation10_spill] sm:$0xff] %v12074_v36  ;;  %v12076_v11 = vpop.f32.mrb[69].mxu0 }
 0x7f5   : > { %14292 = vst [vmem:[#allocation11_spill] sm:$0xff] %v12076_v11  ;;  %v12078_v45 = vpop.f32.mrb[70].mxu0 }
 0x7f6   : > { %14293 = vst [vmem:[#allocation20_spill] sm:$0xff] %v12078_v45  ;;  %v12082_v48 = vpop.f32.mrb[71].mxu0 }
 0x7f7   : > { %14294 = vst [vmem:[#allocation21_spill] sm:$0xff] %v12082_v48 }
 0x7fb   : > { %v12086_v43 = vpop.f32.mrb[72].mxu0 }
 0x7fc   : > { %14295 = vst [vmem:[#allocation22_spill] sm:$0xff] %v12086_v43  ;;  %v12088_v15 = vpop.f32.mrb[73].mxu0 }
 0x7fd   : > { %14296 = vst [vmem:[#allocation23_spill] sm:$0xff] %v12088_v15  ;;  %v12090_v50 = vpop.f32.mrb[74].mxu0 }
 0x7fe   : > { %14297 = vst [vmem:[#allocation24_spill] sm:$0xff] %v12090_v50  ;;  %v12094_v41 = vpop.f32.mrb[75].mxu0 }
 0x7ff   : > { %14298 = vst [vmem:[#allocation25_spill] sm:$0xff] %v12094_v41 }
 0x803   : > { %v12098_v4 = vpop.f32.mrb[76].mxu0 }
 0x804   : > { %14299 = vst [vmem:[#allocation26_spill] sm:$0xff] %v12098_v4  ;;  %v12100_v33 = vpop.f32.mrb[77].mxu0 }
 0x805   : > { %14300 = vst [vmem:[#allocation27_spill] sm:$0xff] %v12100_v33  ;;  %v12102_v26 = vpop.f32.mrb[78].mxu0 }
 0x806   : > { %14301 = vst [vmem:[#allocation28_spill] sm:$0xff] %v12102_v26  ;;  %v12106_v9 = vpop.f32.mrb[79].mxu0 }
 0x807   : > { %14302 = vst [vmem:[#allocation29_spill] sm:$0xff] %v12106_v9 }
 0x80b   : > { %v9454_v55 = vpop.f32.mrb[80].mxu0 }
 0x80c   : > { %v2334_v18 = vpop.f32.mrb[81].mxu0 }
 0x80d   : > { %v9455_v54 = vpop.f32.mrb[82].mxu0 }
 0x80e   : > { %v2552_v22 = vpack.c.bf16 %v9455_v54, %v9454_v55  ;;  %v2337_v52 = vpop.f32.mrb[83].mxu0  ;;  %v10387_v55 = vld [vmem:[%s14175_s2 + $0xc8] sm:$0xff]   ;;  %v10389_v54 = vld [vmem:[%s14175_s2 + $0xd8] sm:$0xff]  }
 0x80f   : > { %v2551_v21 = vpack.c.bf16 %v2337_v52, %v2334_v18  ;;  %v14303_v18 = vpack.c.bf16 %v11906_v25, %v11902_v19  ;;  %v14305_v19 = vpack.c.bf16 %v11918_v1, %v11914_v30  ;;  %v14306_v25 = vpack.c.bf16 %v11932_v13, %v11928_v61  ;;  %v10392_v61 = vld [vmem:[%s14175_s2 + $0xf0] sm:$0xff]   ;;  %v10393_v13 = vld [vmem:[%s14175_s2 + $0xf8] sm:$0xff]  }
 0x810   : > { %v14307_v30 = vpack.c.bf16 %v11930_v44, %v11926_v49  ;;  %v14308_v1 = vpack.c.bf16 %v11944_v32, %v11940_v2  ;;  %v14309_v49 = vpack.c.bf16 %v11942_v51, %v11938_v62  ;;  %v10394_v32 = vld [vmem:[%s14177_s4 + $0xc0] sm:$0xff]   ;;  %v10395_v2 = vld [vmem:[%s14177_s4 + $0xc8] sm:$0xff]   ;;  %v10396_v51 = vld [vmem:[%s14177_s4 + $0xd0] sm:$0xff]  }
 0x811   : > { %9492 = vmatprep.subr.bf16.mxu0 %v2551_v21  ;;  %v10397_v44 = vld [vmem:[%s14177_s4 + $0xd8] sm:$0xff]   ;;  %v10398_v62 = vld [vmem:[%s14177_s4 + $0xe0] sm:$0xff]  }
 0x812   : > { %9493 = vmatpush3.bf16.msra.mxu0 %v2551_v21  ;;  %v10401_v52 = vld [vmem:[%s14177_s4 + $0xf8] sm:$0xff]   ;;  %v14310_v21 = vld [vmem:[#allocation12_spill] sm:$0xff] }
 0x813   : > { %v9458_v57 = vpop.f32.mrb[84].mxu0  ;;  %9494 = vmatprep.subr.bf16.mxu0 %v2552_v22 }
 0x814   : > { %v2350_v27 = vpop.f32.mrb[85].mxu0 }
 0x815   : > { %v9459_v6 = vpop.f32.mrb[86].mxu0 }
 0x816   : > { %v2554_v10 = vpack.c.bf16 %v9459_v6, %v9458_v57  ;;  %v2353_v53 = vpop.f32.mrb[87].mxu0  ;;  %9495 = vmatpush3.bf16.msra.mxu0 %v2552_v22  ;;  %v10400_v22 = vld [vmem:[%s14177_s4 + $0xf0] sm:$0xff]   ;;  %v14311_v57 = vld [vmem:[#allocation13_spill] sm:$0xff]  ;;  %v14313_v6 = vld [vmem:[#allocation15_spill] sm:$0xff] }
 0x817   : > { %v2553_v60 = vpack.c.bf16 %v2353_v53, %v2350_v27  ;;  %v14304_v53 = vpack.c.bf16 %v11920_v3, %v11916_v16  ;;  %v10390_v16 = vld [vmem:[%s14175_s2 + $0xe0] sm:$0xff]   ;;  %v10391_v3 = vld [vmem:[%s14175_s2 + $0xe8] sm:$0xff]  }
 0x818   : > { %v14312_v27 = vld [vmem:[#allocation14_spill] sm:$0xff] }
 0x819   : > { %9496 = vmatprep.subr.bf16.mxu0 %v2553_v60 }
 0x81a   : > { %9497 = vmatpush3.bf16.msra.mxu0 %v2553_v60  ;;  %v10388_v60 = vld [vmem:[%s14175_s2 + $0xd0] sm:$0xff]  }
 0x81b   : > { %9498 = vmatprep.subr.bf16.mxu0 %v2554_v10 }
 0x81e   : > { %9499 = vmatpush3.bf16.msra.mxu0 %v2554_v10  ;;  %v14314_v10 = vld [vmem:[#allocation16_spill] sm:$0xff] }
 0x81f   : > { %9548 = vmatprep.subr.bf16.mxu0 %v10386_v0 }
 0x821   : > { %9501 = vmatmul.mubr.msk.bf16.vlgmr.msra.gmra.mrb[88].mxu0 %vm833_vm0, %v14303_v18  ;;  %v14316_v18 = vld [vmem:[#allocation18_spill] sm:$0xff] }
 0x822   : > { %9549 = vmatpush3.bf16.msra.mxu0 %v10386_v0  ;;  %9504 = vmatprep.mubr.msk.bf16.mxu0 %vm833_vm0, %v14304_v53  ;;  %v10399_v0 = vld [vmem:[%s14177_s4 + $0xe8] sm:$0xff]  }
 0x823   : > { %9550 = vmatprep.subr.bf16.mxu0 %v10387_v55  ;;  %v14317_v53 = vld [vmem:[#allocation19_spill] sm:$0xff] }
 0x826   : > { %9551 = vmatpush3.bf16.msra.mxu0 %v10387_v55  ;;  %v14315_v55 = vld [vmem:[#allocation17_spill] sm:$0xff] }
 0x827   : > { %9552 = vmatprep.subr.bf16.mxu0 %v10388_v60 }
 0x829   : > { %9505 = vmatmul.mubr.msk.bf16.gmra.mrb[92].mxu0 %vm833_vm0, %v14305_v19 }
 0x82a   : > { %9553 = vmatpush3.bf16.msra.mxu0 %v10388_v60  ;;  %9508 = vmatprep.mubr.msk.bf16.mxu0 %vm833_vm0, %v14306_v25 }
 0x82b   : > { %9554 = vmatprep.subr.bf16.mxu0 %v10389_v54 }
 0x82e   : > { %9555 = vmatpush3.bf16.msra.mxu0 %v10389_v54 }
 0x82f   : > { %9556 = vmatprep.subr.bf16.mxu0 %v10390_v16 }
 0x831   : > { %9509 = vmatmul.mubr.msk.bf16.gmra.mrb[96].mxu0 %vm833_vm0, %v14307_v30 }
 0x832   : > { %9557 = vmatpush3.bf16.msra.mxu0 %v10390_v16  ;;  %9512 = vmatprep.mubr.msk.bf16.mxu0 %vm833_vm0, %v14308_v1 }
 0x833   : > { %9558 = vmatprep.subr.bf16.mxu0 %v10391_v3 }
 0x836   : > { %9559 = vmatpush3.bf16.msra.mxu0 %v10391_v3 }
 0x837   : > { %9560 = vmatprep.subr.bf16.mxu0 %v10392_v61 }
 0x839   : > { %9513 = vmatmul.mubr.msk.bf16.gmra.mrb[100].mxu0 %vm833_vm0, %v14309_v49 }
 0x83a   : > { %9561 = vmatpush3.bf16.msra.mxu0 %v10392_v61  ;;  %9564 = vmatprep.mubr.bf16.mxu0 %v11220_v8 }
 0x83b   : > { %9562 = vmatprep.subr.bf16.mxu0 %v10393_v13 }
 0x83e   : > { %9563 = vmatpush3.bf16.msra.mxu0 %v10393_v13 }
 0x83f   : > { %9604 = vmatprep.subr.bf16.mxu0 %v10394_v32 }
 0x841   : > { %9565 = vmatmul.mubr.bf16.vlgmr.msra.gmra.mrb[104].mxu0 %v11261_v23 }
 0x842   : > { %9605 = vmatpush3.bf16.msra.mxu0 %v10394_v32  ;;  %9568 = vmatprep.mubr.bf16.mxu0 %v14272_v63 }
 0x843   : > { %9606 = vmatprep.subr.bf16.mxu0 %v10395_v2 }
 0x846   : > { %9607 = vmatpush3.bf16.msra.mxu0 %v10395_v2 }
 0x847   : > { %9608 = vmatprep.subr.bf16.mxu0 %v10396_v51 }
 0x849   : > { %9569 = vmatmul.mubr.bf16.gmra.mrb[108].mxu0 %v14273_v29 }
 0x84a   : > { %9609 = vmatpush3.bf16.msra.mxu0 %v10396_v51  ;;  %9572 = vmatprep.mubr.bf16.mxu0 %v14274_v38 }
 0x84b   : > { %9610 = vmatprep.subr.bf16.mxu0 %v10397_v44 }
 0x84e   : > { %9611 = vmatpush3.bf16.msra.mxu0 %v10397_v44 }
 0x84f   : > { %9612 = vmatprep.subr.bf16.mxu0 %v10398_v62 }
 0x851   : > { %9573 = vmatmul.mubr.bf16.gmra.mrb[112].mxu0 %v14275_v40 }
 0x852   : > { %9613 = vmatpush3.bf16.msra.mxu0 %v10398_v62  ;;  %9576 = vmatprep.mubr.bf16.mxu0 %v14276_v5 }
 0x853   : > { %9614 = vmatprep.subr.bf16.mxu0 %v10399_v0 }
 0x856   : > { %9615 = vmatpush3.bf16.msra.mxu0 %v10399_v0 }
 0x857   : > { %9616 = vmatprep.subr.bf16.mxu0 %v10400_v22 }
 0x859   : > { %9577 = vmatmul.mubr.bf16.gmra.mrb[116].mxu0 %v14277_v34 }
 0x85a   : > { %9617 = vmatpush3.bf16.msra.mxu0 %v10400_v22  ;;  %9620 = vmatprep.mubr.bf16.mxu0 %v14310_v21 }
 0x85b   : > { %9618 = vmatprep.subr.bf16.mxu0 %v10401_v52 }
 0x85e   : > { %9619 = vmatpush3.bf16.msra.mxu0 %v10401_v52 }
 0x861   : > { %9621 = vmatmul.mubr.bf16.vlgmr.msra.gmra.mrb[120].mxu0 %v14311_v57 }
 0x862   : > { %9624 = vmatprep.mubr.bf16.mxu0 %v14312_v27 }
 0x869   : > { %9625 = vmatmul.mubr.bf16.gmra.mrb[124].mxu0 %v14313_v6 }
 0x86a   : > { %9628 = vmatprep.mubr.bf16.mxu0 %v14314_v10 }
 0x871   : > { %9629 = vmatmul.mubr.bf16.gmra.mrb[128].mxu0 %v14315_v55 }
 0x872   : > { %9632 = vmatprep.mubr.bf16.mxu0 %v14316_v18 }
 0x879   : > { %9633 = vmatmul.mubr.bf16.gmra.mrb[132].mxu0 %v14317_v53 }
 0x8f4   : > { %v12202_v60 = vpop.f32.mrb[88].mxu0 }
 0x8f5   : > { %v12204_v54 = vpop.f32.mrb[89].mxu0 }
 0x8f6   : > { %2676 = vmax.xlane.f32.xlu1 %v12204_v54  ;;  %v12207_v19 = vpop.f32.mrb[90].mxu0 }
 0x8f7   : > { %v12209_v25 = vpop.f32.mrb[91].mxu0 }
 0x8f8   : > { %2678 = vmax.xlane.f32.xlu0 %v12209_v25 }
 0x8fa   : > { %2680 = vmax.xlane.f32.xlu1 %v12202_v60 }
 0x8fc   : > { %2682 = vmax.xlane.f32.xlu0 %v12207_v19  ;;  %v12214_v16 = vpop.f32.mrb[92].mxu0 }
 0x8fd   : > { %v12216_v3 = vpop.f32.mrb[93].mxu0 }
 0x8fe   : > { %2684 = vmax.xlane.f32.xlu1 %v12216_v3  ;;  %v12219_v30 = vpop.f32.mrb[94].mxu0 }
 0x8ff   : > { %v12221_v1 = vpop.f32.mrb[95].mxu0 }
 0x900   : > { %2686 = vmax.xlane.f32.xlu0 %v12221_v1 }
 0x902   : > { %2688 = vmax.xlane.f32.xlu1 %v12214_v16 }
 0x904   : > { %2690 = vmax.xlane.f32.xlu0 %v12219_v30  ;;  %v12226_v61 = vpop.f32.mrb[96].mxu0 }
 0x905   : > { %v12228_v13 = vpop.f32.mrb[97].mxu0 }
 0x906   : > { %2692 = vmax.xlane.f32.xlu1 %v12228_v13  ;;  %v12231_v49 = vpop.f32.mrb[98].mxu0 }
 0x907   : > { %v12233_v32 = vpop.f32.mrb[99].mxu0 }
 0x908   : > { %2694 = vmax.xlane.f32.xlu0 %v12233_v32 }
 0x90a   : > { %2696 = vmax.xlane.f32.xlu1 %v12226_v61 }
 0x90c   : > { %2698 = vmax.xlane.f32.xlu0 %v12231_v49  ;;  %v12238_v2 = vpop.f32.mrb[100].mxu0 }
 0x90d   : > { %v12240_v51 = vpop.f32.mrb[101].mxu0 }
 0x90e   : > { %2700 = vmax.xlane.f32.xlu1 %v12240_v51  ;;  %v12243_v44 = vpop.f32.mrb[102].mxu0 }
 0x90f   : > { %v12245_v62 = vpop.f32.mrb[103].mxu0 }
 0x910   : > { %2702 = vmax.xlane.f32.xlu0 %v12245_v62 }
 0x912   : > { %2704 = vmax.xlane.f32.xlu1 %v12238_v2 }
 0x914   : > { %2706 = vmax.xlane.f32.xlu0 %v12243_v44  ;;  %v9566_v0 = vpop.f32.mrb[104].mxu0 }
 0x915   : > { %v12250_v22 = vmul.f32 0.125, %v9566_v0  ;;  %v3048_v52 = vpop.f32.mrb[105].mxu0 }
 0x916   : > { %v12252_v58 = vmul.f32 0.125, %v3048_v52  ;;  %v9567_v17 = vpop.f32.mrb[106].mxu0 }
 0x917   : > { %v12254_v7 = vmul.f32 0.125, %v9567_v17  ;;  %v3051_v14 = vpop.f32.mrb[107].mxu0 }
 0x918   : > { %v12256_v12 = vmul.f32 0.125, %v3051_v14 }
 0x91c   : > { %v9570_v33 = vpop.f32.mrb[108].mxu0 }
 0x91d   : > { %v12262_v9 = vmul.f32 0.125, %v9570_v33  ;;  %v3064_v0 = vpop.f32.mrb[109].mxu0 }
 0x91e   : > { %v12264_v43 = vmul.f32 0.125, %v3064_v0  ;;  %v9571_v52 = vpop.f32.mrb[110].mxu0 }
 0x91f   : > { %v12266_v50 = vmul.f32 0.125, %v9571_v52  ;;  %v3067_v17 = vpop.f32.mrb[111].mxu0 }
 0x920   : > { %v12268_v15 = vmul.f32 0.125, %v3067_v17 }
 0x924   : > { %v9574_v41 = vpop.f32.mrb[112].mxu0 }
 0x925   : > { %v12274_v26 = vmul.f32 0.125, %v9574_v41  ;;  %v3080_v33 = vpop.f32.mrb[113].mxu0 }
 0x926   : > { %v12276_v36 = vmul.f32 0.125, %v3080_v33  ;;  %v9575_v0 = vpop.f32.mrb[114].mxu0 }
 0x927   : > { %v12278_v45 = vmul.f32 0.125, %v9575_v0  ;;  %v3083_v52 = vpop.f32.mrb[115].mxu0 }
 0x928   : > { %v12280_v11 = vmul.f32 0.125, %v3083_v52 }
 0x92c   : > { %v9578_v48 = vpop.f32.mrb[116].mxu0 }
 0x92d   : > { %v12286_v4 = vmul.f32 0.125, %v9578_v48  ;;  %v3096_v41 = vpop.f32.mrb[117].mxu0 }
 0x92e   : > { %v12288_v59 = vmul.f32 0.125, %v3096_v41  ;;  %v9579_v33 = vpop.f32.mrb[118].mxu0 }
 0x92f   : > { %v12290_v56 = vmul.f32 0.125, %v9579_v33  ;;  %v3099_v0 = vpop.f32.mrb[119].mxu0 }
 0x930   : > { %v12292_v37 = vmul.f32 0.125, %v3099_v0 }
 0x934   : > { %v9622_v46 = vpop.f32.mrb[120].mxu0 }
 0x935   : > { %v3308_v14 = vpop.f32.mrb[121].mxu0 }
 0x936   : > { %v9623_v53 = vpop.f32.mrb[122].mxu0 }
 0x937   : > { %v3673_v48 = vpack.c.bf16 %v9623_v53, %v9622_v46  ;;  %v3311_v18 = vpop.f32.mrb[123].mxu0 }
 0x938   : > { %v3672_v55 = vpack.c.bf16 %v3311_v18, %v3308_v14 }
 0x93a   : > { %9660 = vmatprep.subr.bf16.mxu0 %v3672_v55 }
 0x93b   : > { %9661 = vmatpush3.bf16.msra.mxu0 %v3672_v55 }
 0x93c   : > { %v9626_v41 = vpop.f32.mrb[124].mxu0  ;;  %9662 = vmatprep.subr.bf16.mxu0 %v3673_v48 }
 0x93d   : > { %v3324_v33 = vpop.f32.mrb[125].mxu0 }
 0x93e   : > { %v9627_v10 = vpop.f32.mrb[126].mxu0 }
 0x93f   : > { %v3675_v0 = vpack.c.bf16 %v9627_v10, %v9626_v41  ;;  %v3327_v6 = vpop.f32.mrb[127].mxu0  ;;  %9663 = vmatpush3.bf16.msra.mxu0 %v3673_v48 }
 0x940   : > { %v3674_v27 = vpack.c.bf16 %v3327_v6, %v3324_v33 }
 0x942   : > { %9664 = vmatprep.subr.bf16.mxu0 %v3674_v27 }
 0x943   : > { %9665 = vmatpush3.bf16.msra.mxu0 %v3674_v27 }
 0x944   : > { %v9630_v52 = vpop.f32.mrb[128].mxu0  ;;  %9666 = vmatprep.subr.bf16.mxu0 %v3675_v0 }
 0x945   : > { %v3340_v17 = vpop.f32.mrb[129].mxu0 }
 0x946   : > { %v9631_v57 = vpop.f32.mrb[130].mxu0 }
 0x947   : > { %v3677_v21 = vpack.c.bf16 %v9631_v57, %v9630_v52  ;;  %v3343_v46 = vpop.f32.mrb[131].mxu0  ;;  %9667 = vmatpush3.bf16.msra.mxu0 %v3675_v0 }
 0x948   : > { %v3676_v18 = vpack.c.bf16 %v3343_v46, %v3340_v17 }
 0x94a   : > { %9668 = vmatprep.subr.bf16.mxu0 %v3676_v18 }
 0x94b   : > { %9669 = vmatpush3.bf16.msra.mxu0 %v3676_v18 }
 0x94c   : > { %v9634_v55 = vpop.f32.mrb[132].mxu0  ;;  %9670 = vmatprep.subr.bf16.mxu0 %v3677_v21 }
 0x94d   : > { %v3356_v53 = vpop.f32.mrb[133].mxu0 }
 0x94e   : > { %v9635_v14 = vpop.f32.mrb[134].mxu0 }
 0x94f   : > { %v3679_v10 = vpack.c.bf16 %v9635_v14, %v9634_v55  ;;  %v3359_v41 = vpop.f32.mrb[135].mxu0  ;;  %9671 = vmatpush3.bf16.msra.mxu0 %v3677_v21 }
 0x950   : > { %v3678_v6 = vpack.c.bf16 %v3359_v41, %v3356_v53 }
 0x952   : > { %9672 = vmatprep.subr.bf16.mxu0 %v3678_v6 }
 0x953   : > { %9673 = vmatpush3.bf16.msra.mxu0 %v3678_v6 }
 0x954   : > { %9674 = vmatprep.subr.bf16.mxu0 %v3679_v10 }
 0x957   : > { %9675 = vmatpush3.bf16.msra.mxu0 %v3679_v10 }
 0x958   : > { %9724 = vmatprep.subr.bf16.mxu0 %v11430_v20 }
 0x983   : > { %v2677_v57 = vpop.xlane.xlu1 %2676 }
 0x984   : > { %v2708_v27 = vsub.f32 %v12204_v54, %v2677_v57 }
 0x985   : > { %v2679_v17 = vpop.xlane.xlu0 %2678 }
 0x986   : > { %v2724_v52 = vmul.f32 1.442695, %v2708_v27  ;;  %v2709_v48 = vsub.f32 %v12209_v25, %v2679_v17 }
 0x987   : > { %v2681_v33 = vpop.xlane.xlu1 %2680 }
 0x988   : > { %10646 = vpow2.f32 %v2724_v52  ;;  %v2726_v0 = vmul.f32 1.442695, %v2709_v48  ;;  %v2710_v46 = vsub.f32 %v12202_v60, %v2681_v33 }
 0x989   : > { %v2683_v21 = vpop.xlane.xlu0 %2682 }
 0x98a   : > { %10648 = vpow2.f32 %v2726_v0  ;;  %v2728_v18 = vmul.f32 1.442695, %v2710_v46  ;;  %v2711_v55 = vsub.f32 %v12207_v19, %v2683_v21 }
 0x98b   : > { %v2685_v53 = vpop.xlane.xlu1 %2684 }
 0x98c   : > { %10650 = vpow2.f32 %v2728_v18  ;;  %v2730_v14 = vmul.f32 1.442695, %v2711_v55  ;;  %v2712_v10 = vsub.f32 %v12216_v3, %v2685_v53 }
 0x98d   : > { %v2687_v54 = vpop.xlane.xlu0 %2686 }
 0x98e   : > { %10652 = vpow2.f32 %v2730_v14  ;;  %v2732_v41 = vmul.f32 1.442695, %v2712_v10  ;;  %v2713_v25 = vsub.f32 %v12221_v1, %v2687_v54 }
 0x98f   : > { %v2689_v6 = vpop.xlane.xlu1 %2688 }
 0x990   : > { %10654 = vpow2.f32 %v2732_v41  ;;  %v2734_v57 = vmul.f32 1.442695, %v2713_v25  ;;  %v2714_v60 = vsub.f32 %v12214_v16, %v2689_v6 }
 0x991   : > { %v2691_v27 = vpop.xlane.xlu0 %2690 }
 0x992   : > { %v12306_v17 = vpop.eup %10646  ;;  %10656 = vpow2.f32 %v2734_v57  ;;  %v2736_v19 = vmul.f32 1.442695, %v2714_v60  ;;  %v2715_v52 = vsub.f32 %v12219_v30, %v2691_v27 }
 0x993   : > { %v2693_v48 = vpop.xlane.xlu1 %2692  ;;  %2756 = vadd.xlane.f32.xlu1 %v12306_v17 }
 0x994   : > { %v12310_v3 = vpop.eup %10648  ;;  %10658 = vpow2.f32 %v2736_v19  ;;  %v2738_v33 = vmul.f32 1.442695, %v2715_v52  ;;  %v2716_v1 = vsub.f32 %v12228_v13, %v2693_v48 }
 0x995   : > { %v2695_v0 = vpop.xlane.xlu0 %2694  ;;  %2758 = vadd.xlane.f32.xlu0 %v12310_v3 }
 0x996   : > { %v12314_v16 = vpop.eup %10650  ;;  %10660 = vpow2.f32 %v2738_v33  ;;  %v2740_v46 = vmul.f32 1.442695, %v2716_v1  ;;  %v2717_v21 = vsub.f32 %v12233_v32, %v2695_v0 }
 0x997   : > { %v2697_v18 = vpop.xlane.xlu1 %2696  ;;  %2760 = vadd.xlane.f32.xlu1 %v12314_v16 }
 0x998   : > { %v12318_v30 = vpop.eup %10652  ;;  %10662 = vpow2.f32 %v2740_v46  ;;  %v2742_v55 = vmul.f32 1.442695, %v2717_v21  ;;  %v2718_v53 = vsub.f32 %v12226_v61, %v2697_v18 }
 0x999   : > { %v2699_v14 = vpop.xlane.xlu0 %2698  ;;  %2762 = vadd.xlane.f32.xlu0 %v12318_v30 }
 0x99a   : > { %v12322_v13 = vpop.eup %10654  ;;  %10664 = vpow2.f32 %v2742_v55  ;;  %v2744_v10 = vmul.f32 1.442695, %v2718_v53  ;;  %v2719_v54 = vsub.f32 %v12231_v49, %v2699_v14 }
 0x99b   : > { %2764 = vadd.xlane.f32.xlu1 %v12322_v13  ;;  %v2701_v32 = vpop.xlane.xlu1 %2700 }
 0x99c   : > { %v12326_v41 = vpop.eup %10656  ;;  %10666 = vpow2.f32 %v2744_v10  ;;  %v2746_v25 = vmul.f32 1.442695, %v2719_v54  ;;  %v2720_v6 = vsub.f32 %v12240_v51, %v2701_v32 }
 0x99d   : > { %2766 = vadd.xlane.f32.xlu0 %v12326_v41  ;;  %v2703_v61 = vpop.xlane.xlu0 %2702 }
 0x99e   : > { %v12330_v57 = vpop.eup %10658  ;;  %10668 = vpow2.f32 %v2746_v25  ;;  %v2748_v60 = vmul.f32 1.442695, %v2720_v6  ;;  %v2721_v27 = vsub.f32 %v12245_v62, %v2703_v61 }
 0x99f   : > { %2768 = vadd.xlane.f32.xlu1 %v12330_v57  ;;  %v2705_v49 = vpop.xlane.xlu1 %2704 }
 0x9a0   : > { %v12334_v19 = vpop.eup %10660  ;;  %10670 = vpow2.f32 %v2748_v60  ;;  %v2750_v52 = vmul.f32 1.442695, %v2721_v27  ;;  %v2722_v48 = vsub.f32 %v12238_v2, %v2705_v49 }
 0x9a1   : > { %2770 = vadd.xlane.f32.xlu0 %v12334_v19  ;;  %v2707_v51 = vpop.xlane.xlu0 %2706 }
 0x9a2   : > { %v12338_v33 = vpop.eup %10662  ;;  %10672 = vpow2.f32 %v2750_v52  ;;  %v2752_v1 = vmul.f32 1.442695, %v2722_v48  ;;  %v2723_v0 = vsub.f32 %v12243_v44, %v2707_v51 }
 0x9a3   : > { %2772 = vadd.xlane.f32.xlu1 %v12338_v33 }
 0x9a4   : > { %v12342_v62 = vpop.eup %10664  ;;  %10674 = vpow2.f32 %v2752_v1  ;;  %v2754_v46 = vmul.f32 1.442695, %v2723_v0 }
 0x9a5   : > { %2774 = vadd.xlane.f32.xlu0 %v12342_v62 }
 0x9a6   : > { %v12345_v21 = vpop.eup %10666  ;;  %10676 = vpow2.f32 %v2754_v46 }
 0x9a7   : > { %2776 = vadd.xlane.f32.xlu1 %v12345_v21 }
 0x9a8   : > { %v12348_v2 = vpop.eup %10668 }
 0x9a9   : > { %2778 = vadd.xlane.f32.xlu0 %v12348_v2 }
 0x9aa   : > { %v12351_v18 = vpop.eup %10670 }
 0x9ab   : > { %2780 = vadd.xlane.f32.xlu1 %v12351_v18 }
 0x9ac   : > { %v12354_v44 = vpop.eup %10672 }
 0x9ad   : > { %2782 = vadd.xlane.f32.xlu0 %v12354_v44 }
 0x9ae   : > { %v12357_v55 = vpop.eup %10674 }
 0x9af   : > { %2784 = vadd.xlane.f32.xlu1 %v12357_v55 }
 0x9b0   : > { %v12360_v53 = vpop.eup %10676 }
 0x9b1   : > { %2786 = vadd.xlane.f32.xlu0 %v12360_v53 }
 0xa20   : > { %v2757_v14 = vpop.xlane.xlu1 %2756 }
 0xa21   : > { %10678 = vrcp.f32 %v2757_v14 }
 0xa22   : > { %v2759_v10 = vpop.xlane.xlu0 %2758 }
 0xa23   : > { %10680 = vrcp.f32 %v2759_v10 }
 0xa24   : > { %v2761_v54 = vpop.xlane.xlu1 %2760 }
 0xa25   : > { %10682 = vrcp.f32 %v2761_v54 }
 0xa26   : > { %v2763_v32 = vpop.xlane.xlu0 %2762 }
 0xa27   : > { %10684 = vrcp.f32 %v2763_v32 }
 0xa28   : > { %v2765_v25 = vpop.xlane.xlu1 %2764 }
 0xa29   : > { %10686 = vrcp.f32 %v2765_v25 }
 0xa2a   : > { %v2767_v6 = vpop.xlane.xlu0 %2766 }
 0xa2b   : > { %v10679_v61 = vpop.eup %10678  ;;  %10688 = vrcp.f32 %v2767_v6 }
 0xa2c   : > { %v2769_v60 = vpop.xlane.xlu1 %2768  ;;  %v2804_v52 = vmul.f32 %v10679_v61, %v12306_v17 }
 0xa2d   : > { %v10681_v27 = vpop.eup %10680  ;;  %10690 = vrcp.f32 %v2769_v60 }
 0xa2e   : > { %v2771_v49 = vpop.xlane.xlu0 %2770  ;;  %v2805_v48 = vmul.f32 %v10681_v27, %v12310_v3 }
 0xa2f   : > { %v10683_v51 = vpop.eup %10682  ;;  %10692 = vrcp.f32 %v2771_v49 }
 0xa30   : > { %v2773_v1 = vpop.xlane.xlu1 %2772  ;;  %v2820_v0 = vpack.c.bf16 %v2805_v48, %v2804_v52  ;;  %v2806_v14 = vmul.f32 %v10683_v51, %v12314_v16 }
 0xa31   : > { %v10685_v46 = vpop.eup %10684  ;;  %10694 = vrcp.f32 %v2773_v1 }
 0xa32   : > { %v2807_v10 = vmul.f32 %v10685_v46, %v12318_v30  ;;  %9532 = vmatprep.mubr.bf16.mxu1 %v2820_v0  ;;  %v2775_v54 = vpop.xlane.xlu0 %2774 }
 0xa33   : > { %v10687_v32 = vpop.eup %10686  ;;  %10696 = vrcp.f32 %v2775_v54 }
 0xa34   : > { %v2777_v25 = vpop.xlane.xlu1 %2776  ;;  %v2821_v6 = vpack.c.bf16 %v2807_v10, %v2806_v14  ;;  %v2808_v3 = vmul.f32 %v10687_v32, %v12322_v13 }
 0xa35   : > { %v10689_v60 = vpop.eup %10688  ;;  %10698 = vrcp.f32 %v2777_v25 }
 0xa36   : > { %v2779_v17 = vpop.xlane.xlu0 %2778  ;;  %9533 = vmatmul.mubr.bf16.vlgmr.msra.gmra.mrb[96].mxu1 %v2821_v6  ;;  %v2809_v61 = vmul.f32 %v10689_v60, %v12326_v41 }
 0xa37   : > { %v10691_v27 = vpop.eup %10690  ;;  %10700 = vrcp.f32 %v2779_v17  ;;  %9581 = vmatpush3.bf16.msra.mxu1 %v11430_v20 }
 0xa38   : > { %9582 = vmatprep.subr.bf16.mxu1 %v11436_v24  ;;  %v2781_v16 = vpop.xlane.xlu1 %2780  ;;  %v2822_v30 = vpack.c.bf16 %v2809_v61, %v2808_v3  ;;  %v2810_v48 = vmul.f32 %v10691_v27, %v12330_v57 }
 0xa39   : > { %v10693_v49 = vpop.eup %10692  ;;  %10702 = vrcp.f32 %v2781_v16  ;;  %v10405_v16 = vld [vmem:[%s14176_s3 + $0x78] sm:$0xff]  }
 0xa3a   : > { %v2783_v52 = vpop.xlane.xlu0 %2782  ;;  %9536 = vmatprep.mubr.bf16.mxu1 %v2822_v30  ;;  %v2811_v51 = vmul.f32 %v10693_v49, %v12334_v19  ;;  %v14318_v30 = vpack.c.bf16 %v12256_v12, %v12252_v58 }
 0xa3b   : > { %v10695_v1 = vpop.eup %10694  ;;  %10704 = vrcp.f32 %v2783_v52  ;;  %9583 = vmatpush3.bf16.msra.mxu1 %v11436_v24 }
 0xa3c   : > { %9584 = vmatprep.subr.bf16.mxu1 %v11441_v28  ;;  %v2785_v13 = vpop.xlane.xlu1 %2784  ;;  %v2823_v41 = vpack.c.bf16 %v2811_v51, %v2810_v48  ;;  %v2812_v14 = vmul.f32 %v10695_v1, %v12338_v33 }
 0xa3d   : > { %v10697_v0 = vpop.eup %10696  ;;  %10706 = vrcp.f32 %v2785_v13 }
 0xa3e   : > { %v2787_v46 = vpop.xlane.xlu0 %2786  ;;  %9537 = vmatmul.mubr.bf16.gmra.mrb[100].mxu1 %v2823_v41  ;;  %v2813_v10 = vmul.f32 %v10697_v0, %v12342_v62 }
 0xa3f   : > { %v10699_v54 = vpop.eup %10698  ;;  %10708 = vrcp.f32 %v2787_v46  ;;  %9585 = vmatpush3.bf16.msra.mxu1 %v11441_v28 }
 0xa40   : > { %9586 = vmatprep.subr.bf16.mxu1 %v11445_v31  ;;  %v2824_v57 = vpack.c.bf16 %v2813_v10, %v2812_v14  ;;  %v2814_v32 = vmul.f32 %v10699_v54, %v12345_v21 }
 0xa41   : > { %v10701_v19 = vpop.eup %10700 }
 0xa42   : > { %9540 = vmatprep.mubr.bf16.mxu1 %v2824_v57  ;;  %v2815_v25 = vmul.f32 %v10701_v19, %v12348_v2 }
 0xa43   : > { %v10703_v6 = vpop.eup %10702  ;;  %9587 = vmatpush3.bf16.msra.mxu1 %v11445_v31 }
 0xa44   : > { %9588 = vmatprep.subr.bf16.mxu1 %v11449_v35  ;;  %v2825_v33 = vpack.c.bf16 %v2815_v25, %v2814_v32  ;;  %v2816_v60 = vmul.f32 %v10703_v6, %v12351_v18  ;;  %v10402_v18 = vld [vmem:[%s14176_s3 + $0x60] sm:$0xff]  }
 0xa45   : > { %v10705_v62 = vpop.eup %10704 }
 0xa46   : > { %9541 = vmatmul.mubr.bf16.gmra.mrb[104].mxu1 %v2825_v33  ;;  %v2817_v17 = vmul.f32 %v10705_v62, %v12354_v44 }
 0xa47   : > { %v10707_v3 = vpop.eup %10706  ;;  %9589 = vmatpush3.bf16.msra.mxu1 %v11449_v35 }
 0xa48   : > { %9590 = vmatprep.subr.bf16.mxu1 %v11453_v39  ;;  %v2826_v21 = vpack.c.bf16 %v2817_v17, %v2816_v60  ;;  %v2818_v2 = vmul.f32 %v10707_v3, %v12357_v55  ;;  %v10403_v55 = vld [vmem:[%s14176_s3 + $0x68] sm:$0xff]  }
 0xa49   : > { %v10709_v61 = vpop.eup %10708 }
 0xa4a   : > { %9544 = vmatprep.mubr.bf16.mxu1 %v2826_v21  ;;  %v2819_v27 = vmul.f32 %v10709_v61, %v12360_v53  ;;  %v10404_v53 = vld [vmem:[%s14176_s3 + $0x70] sm:$0xff]  }
 0xa4b   : > { %9591 = vmatpush3.bf16.msra.mxu1 %v11453_v39 }
 0xa4c   : > { %9592 = vmatprep.subr.bf16.mxu1 %v11457_v42  ;;  %v2827_v44 = vpack.c.bf16 %v2819_v27, %v2818_v2 }
 0xa4e   : > { %9545 = vmatmul.mubr.bf16.gmra.mrb[108].mxu1 %v2827_v44 }
 0xa4f   : > { %9593 = vmatpush3.bf16.msra.mxu1 %v11457_v42  ;;  %9596 = vmatprep.mubr.bf16.mxu1 %v10402_v18 }
 0xa50   : > { %9594 = vmatprep.subr.bf16.mxu1 %v11461_v47 }
 0xa53   : > { %9595 = vmatpush3.bf16.msra.mxu1 %v11461_v47 }
 0xa56   : > { %9597 = vmatmul.mubr.bf16.vlgmr.msra.gmra.mrb[112].mxu1 %v10403_v55 }
 0xa57   : > { %9600 = vmatprep.mubr.bf16.mxu1 %v10404_v53 }
 0xa5e   : > { %9601 = vmatmul.mubr.bf16.gmra.mrb[116].mxu1 %v10405_v16 }
 0xa5f   : > { %9644 = vmatprep.mubr.msk.bf16.mxu1 %vm833_vm0, %v14318_v30 }
 0xb09   : > { %v9534_v49 = vpop.f32.mrb[96].mxu1 }
 0xb0a   : > { %v2870_v52 = vpop.f32.mrb[97].mxu1 }
 0xb0b   : > { %v9535_v48 = vpop.f32.mrb[98].mxu1 }
 0xb0c   : > { %v2934_v51 = vpack.c.bf16 %v9535_v48, %v9534_v49  ;;  %v2873_v1 = vpop.f32.mrb[99].mxu1  ;;  %v10406_v48 = vld [vmem:[%s14175_s2 + $0x100] sm:$0xff]  }
 0xb0d   : > { %v2933_v13 = vpack.c.bf16 %v2873_v1, %v2870_v52  ;;  %v14319_v1 = vpack.c.bf16 %v12254_v7, %v12250_v22  ;;  %v14321_v7 = vpack.c.bf16 %v12266_v50, %v12262_v9  ;;  %v10411_v22 = vld [vmem:[%s14175_s2 + $0x128] sm:$0xff]   ;;  %v14323_v50 = vpack.c.bf16 %v12278_v45, %v12274_v26  ;;  %v10413_v9 = vld [vmem:[%s14175_s2 + $0x138] sm:$0xff]   ;;  %v10418_v26 = vld [vmem:[%s14177_s4 + $0x120] sm:$0xff]  }
 0xb0e   : > { %2942 = vst.msk [vmem:[#allocation2 + $0x28] sm:$0xff] %vm833_vm0, %v2934_v51  ;;  %v10407_v51 = vld [vmem:[%s14175_s2 + $0x108] sm:$0xff]   ;;  %v14325_v45 = vpack.c.bf16 %v12290_v56, %v12286_v4  ;;  %v10416_v56 = vld [vmem:[%s14177_s4 + $0x110] sm:$0xff]   ;;  %v10417_v4 = vld [vmem:[%s14177_s4 + $0x118] sm:$0xff]  }
 0xb0f   : > { %2941 = vst.msk [vmem:[#allocation2 + $0x8] sm:$0xff] %vm833_vm0, %v2933_v13  ;;  %v14320_v13 = vpack.c.bf16 %v12268_v15, %v12264_v43  ;;  %v14322_v43 = vpack.c.bf16 %v12280_v11, %v12276_v36  ;;  %v10410_v15 = vld [vmem:[%s14175_s2 + $0x120] sm:$0xff]   ;;  %v14324_v36 = vpack.c.bf16 %v12292_v37, %v12288_v59  ;;  %v10412_v11 = vld [vmem:[%s14175_s2 + $0x130] sm:$0xff]   ;;  %v10415_v37 = vld [vmem:[%s14177_s4 + $0x108] sm:$0xff]  }
 0xb10   : > { %v10414_v59 = vld [vmem:[%s14177_s4 + $0x100] sm:$0xff]  }
 0xb11   : > { %v9538_v41 = vpop.f32.mrb[100].mxu1 }
 0xb12   : > { %v2886_v0 = vpop.f32.mrb[101].mxu1 }
 0xb13   : > { %v9539_v46 = vpop.f32.mrb[102].mxu1 }
 0xb14   : > { %v2936_v14 = vpack.c.bf16 %v9539_v46, %v9538_v41  ;;  %v2889_v10 = vpop.f32.mrb[103].mxu1  ;;  %v10408_v41 = vld [vmem:[%s14175_s2 + $0x110] sm:$0xff]   ;;  %v10419_v46 = vld [vmem:[%s14177_s4 + $0x128] sm:$0xff]  }
 0xb15   : > { %v2935_v54 = vpack.c.bf16 %v2889_v10, %v2886_v0  ;;  %v10409_v0 = vld [vmem:[%s14175_s2 + $0x118] sm:$0xff]  }
 0xb16   : > { %2944 = vst.msk [vmem:[#allocation2 + $0x68] sm:$0xff] %vm833_vm0, %v2936_v14  ;;  %v10420_v14 = vld [vmem:[%s14177_s4 + $0x130] sm:$0xff]   ;;  %v10421_v10 = vld [vmem:[%s14177_s4 + $0x138] sm:$0xff]  }
 0xb17   : > { %2943 = vst.msk [vmem:[#allocation2 + $0x48] sm:$0xff] %vm833_vm0, %v2935_v54  ;;  %v14326_v54 = vld [vmem:[#allocation12_spill] sm:$0xff] }
 0xb19   : > { %v9542_v12 = vpop.f32.mrb[104].mxu1 }
 0xb1a   : > { %v2902_v58 = vpop.f32.mrb[105].mxu1 }
 0xb1b   : > { %v9543_v57 = vpop.f32.mrb[106].mxu1 }
 0xb1c   : > { %v2938_v19 = vpack.c.bf16 %v9543_v57, %v9542_v12  ;;  %v2905_v32 = vpop.f32.mrb[107].mxu1  ;;  %v14327_v12 = vld [vmem:[#allocation13_spill] sm:$0xff]  ;;  %v14329_v57 = vld [vmem:[#allocation15_spill] sm:$0xff] }
 0xb1d   : > { %v2937_v25 = vpack.c.bf16 %v2905_v32, %v2902_v58  ;;  %v14328_v58 = vld [vmem:[#allocation14_spill] sm:$0xff]  ;;  %v14331_v32 = vld [vmem:[#allocation17_spill] sm:$0xff] }
 0xb1e   : > { %2946 = vst.msk [vmem:[#allocation2 + $0xa8] sm:$0xff] %vm833_vm0, %v2938_v19  ;;  %v14330_v19 = vld [vmem:[#allocation16_spill] sm:$0xff] }
 0xb1f   : > { %2945 = vst.msk [vmem:[#allocation2 + $0x88] sm:$0xff] %vm833_vm0, %v2937_v25  ;;  %v14332_v25 = vld [vmem:[#allocation18_spill] sm:$0xff] }
 0xb21   : > { %v9546_v6 = vpop.f32.mrb[108].mxu1 }
 0xb22   : > { %v2918_v33 = vpop.f32.mrb[109].mxu1 }
 0xb23   : > { %v9547_v62 = vpop.f32.mrb[110].mxu1 }
 0xb24   : > { %v2940_v60 = vpack.c.bf16 %v9547_v62, %v9546_v6  ;;  %v2921_v17 = vpop.f32.mrb[111].mxu1  ;;  %v14333_v6 = vld [vmem:[#allocation19_spill] sm:$0xff] }
 0xb25   : > { %v2939_v3 = vpack.c.bf16 %v2921_v17, %v2918_v33 }
 0xb26   : > { %2948 = vst.msk [vmem:[#allocation2 + $0xe8] sm:$0xff] %vm833_vm0, %v2940_v60 }
 0xb27   : > { %2947 = vst.msk [vmem:[#allocation2 + $0xc8] sm:$0xff] %vm833_vm0, %v2939_v3 }
 0xb29   : > { %v9598_v21 = vpop.f32.mrb[112].mxu1 }
 0xb2a   : > { %v3178_v61 = vpop.f32.mrb[113].mxu1 }
 0xb2b   : > { %v9599_v2 = vpop.f32.mrb[114].mxu1 }
 0xb2c   : > { %v3396_v27 = vpack.c.bf16 %v9599_v2, %v9598_v21  ;;  %v3181_v18 = vpop.f32.mrb[115].mxu1 }
 0xb2d   : > { %v3395_v44 = vpack.c.bf16 %v3181_v18, %v3178_v61 }
 0xb2f   : > { %9636 = vmatprep.subr.bf16.mxu1 %v3395_v44 }
 0xb30   : > { %9637 = vmatpush3.bf16.msra.mxu1 %v3395_v44 }
 0xb31   : > { %v9602_v55 = vpop.f32.mrb[116].mxu1  ;;  %9638 = vmatprep.subr.bf16.mxu1 %v3396_v27 }
 0xb32   : > { %v3194_v53 = vpop.f32.mrb[117].mxu1 }
 0xb33   : > { %v9603_v16 = vpop.f32.mrb[118].mxu1 }
 0xb34   : > { %v3398_v30 = vpack.c.bf16 %v9603_v16, %v9602_v55  ;;  %v3197_v49 = vpop.f32.mrb[119].mxu1  ;;  %9639 = vmatpush3.bf16.msra.mxu1 %v3396_v27 }
 0xb35   : > { %v3397_v52 = vpack.c.bf16 %v3197_v49, %v3194_v53 }
 0xb37   : > { %9640 = vmatprep.subr.bf16.mxu1 %v3397_v52 }
 0xb38   : > { %9641 = vmatpush3.bf16.msra.mxu1 %v3397_v52 }
 0xb39   : > { %9642 = vmatprep.subr.bf16.mxu1 %v3398_v30 }
 0xb3c   : > { %9643 = vmatpush3.bf16.msra.mxu1 %v3398_v30 }
 0xb3d   : > { %9692 = vmatprep.subr.bf16.mxu1 %v10406_v48 }
 0xb3f   : > { %9645 = vmatmul.mubr.msk.bf16.vlgmr.msra.gmra.mrb[120].mxu1 %vm833_vm0, %v14319_v1 }
 0xb40   : > { %9693 = vmatpush3.bf16.msra.mxu1 %v10406_v48  ;;  %9648 = vmatprep.mubr.msk.bf16.mxu1 %vm833_vm0, %v14320_v13 }
 0xb41   : > { %9694 = vmatprep.subr.bf16.mxu1 %v10407_v51 }
 0xb44   : > { %9695 = vmatpush3.bf16.msra.mxu1 %v10407_v51 }
 0xb45   : > { %9696 = vmatprep.subr.bf16.mxu1 %v10408_v41 }
 0xb47   : > { %9649 = vmatmul.mubr.msk.bf16.gmra.mrb[124].mxu1 %vm833_vm0, %v14321_v7 }
 0xb48   : > { %9697 = vmatpush3.bf16.msra.mxu1 %v10408_v41  ;;  %9652 = vmatprep.mubr.msk.bf16.mxu1 %vm833_vm0, %v14322_v43 }
 0xb49   : > { %9698 = vmatprep.subr.bf16.mxu1 %v10409_v0 }
 0xb4c   : > { %9699 = vmatpush3.bf16.msra.mxu1 %v10409_v0 }
 0xb4d   : > { %9700 = vmatprep.subr.bf16.mxu1 %v10410_v15 }
 0xb4f   : > { %9653 = vmatmul.mubr.msk.bf16.gmra.mrb[128].mxu1 %vm833_vm0, %v14323_v50 }
 0xb50   : > { %9701 = vmatpush3.bf16.msra.mxu1 %v10410_v15  ;;  %9656 = vmatprep.mubr.msk.bf16.mxu1 %vm833_vm0, %v14324_v36 }
 0xb51   : > { %9702 = vmatprep.subr.bf16.mxu1 %v10411_v22 }
 0xb54   : > { %9703 = vmatpush3.bf16.msra.mxu1 %v10411_v22 }
 0xb55   : > { %9704 = vmatprep.subr.bf16.mxu1 %v10412_v11 }
 0xb57   : > { %9657 = vmatmul.mubr.msk.bf16.gmra.mrb[132].mxu1 %vm833_vm0, %v14325_v45 }
 0xb58   : > { %9705 = vmatpush3.bf16.msra.mxu1 %v10412_v11  ;;  %9708 = vmatprep.mubr.bf16.mxu1 %v11220_v8 }
 0xb59   : > { %9706 = vmatprep.subr.bf16.mxu1 %v10413_v9 }
 0xb5c   : > { %9707 = vmatpush3.bf16.msra.mxu1 %v10413_v9 }
 0xb5d   : > { %9748 = vmatprep.subr.bf16.mxu1 %v10414_v59 }
 0xb5f   : > { %9709 = vmatmul.mubr.bf16.vlgmr.msra.gmra.mrb[136].mxu1 %v11261_v23 }
 0xb60   : > { %9749 = vmatpush3.bf16.msra.mxu1 %v10414_v59  ;;  %9712 = vmatprep.mubr.bf16.mxu1 %v14272_v63 }
 0xb61   : > { %9750 = vmatprep.subr.bf16.mxu1 %v10415_v37 }
 0xb64   : > { %9751 = vmatpush3.bf16.msra.mxu1 %v10415_v37 }
 0xb65   : > { %9752 = vmatprep.subr.bf16.mxu1 %v10416_v56 }
 0xb67   : > { %9713 = vmatmul.mubr.bf16.gmra.mrb[140].mxu1 %v14273_v29 }
 0xb68   : > { %9753 = vmatpush3.bf16.msra.mxu1 %v10416_v56  ;;  %9716 = vmatprep.mubr.bf16.mxu1 %v14274_v38 }
 0xb69   : > { %9754 = vmatprep.subr.bf16.mxu1 %v10417_v4 }
 0xb6c   : > { %9755 = vmatpush3.bf16.msra.mxu1 %v10417_v4 }
 0xb6d   : > { %9756 = vmatprep.subr.bf16.mxu1 %v10418_v26 }
 0xb6f   : > { %9717 = vmatmul.mubr.bf16.gmra.mrb[144].mxu1 %v14275_v40 }
 0xb70   : > { %9757 = vmatpush3.bf16.msra.mxu1 %v10418_v26  ;;  %9720 = vmatprep.mubr.bf16.mxu1 %v14276_v5 }
 0xb71   : > { %9758 = vmatprep.subr.bf16.mxu1 %v10419_v46 }
 0xb74   : > { %9759 = vmatpush3.bf16.msra.mxu1 %v10419_v46 }
 0xb75   : > { %9760 = vmatprep.subr.bf16.mxu1 %v10420_v14 }
 0xb77   : > { %9721 = vmatmul.mubr.bf16.gmra.mrb[148].mxu1 %v14277_v34 }
 0xb78   : > { %9761 = vmatpush3.bf16.msra.mxu1 %v10420_v14  ;;  %9764 = vmatprep.mubr.bf16.mxu1 %v14326_v54 }
 0xb79   : > { %9762 = vmatprep.subr.bf16.mxu1 %v10421_v10 }
 0xb7c   : > { %9763 = vmatpush3.bf16.msra.mxu1 %v10421_v10 }
 0xb7f   : > { %9765 = vmatmul.mubr.bf16.vlgmr.msra.gmra.mrb[152].mxu1 %v14327_v12 }
 0xb80   : > { %9768 = vmatprep.mubr.bf16.mxu1 %v14328_v58 }
 0xb87   : > { %9769 = vmatmul.mubr.bf16.gmra.mrb[156].mxu1 %v14329_v57 }
 0xb88   : > { %9772 = vmatprep.mubr.bf16.mxu1 %v14330_v19 }
 0xb8f   : > { %9773 = vmatmul.mubr.bf16.gmra.mrb[160].mxu1 %v14331_v32 }
 0xb90   : > { %9776 = vmatprep.mubr.bf16.mxu1 %v14332_v25 }
 0xb97   : > { %9777 = vmatmul.mubr.bf16.gmra.mrb[164].mxu1 %v14333_v6 }
 0xc12   : > { %v12510_v33 = vpop.f32.mrb[120].mxu1 }
 0xc13   : > { %v12512_v62 = vpop.f32.mrb[121].mxu1 }
 0xc14   : > { %3520 = vmax.xlane.f32.xlu1 %v12512_v62  ;;  %v12515_v60 = vpop.f32.mrb[122].mxu1 }
 0xc15   : > { %v12517_v17 = vpop.f32.mrb[123].mxu1 }
 0xc16   : > { %3522 = vmax.xlane.f32.xlu0 %v12517_v17 }
 0xc18   : > { %3524 = vmax.xlane.f32.xlu1 %v12510_v33 }
 0xc1a   : > { %3526 = vmax.xlane.f32.xlu0 %v12515_v60  ;;  %v12522_v3 = vpop.f32.mrb[124].mxu1 }
 0xc1b   : > { %v12524_v21 = vpop.f32.mrb[125].mxu1 }
 0xc1c   : > { %3528 = vmax.xlane.f32.xlu1 %v12524_v21  ;;  %v12527_v61 = vpop.f32.mrb[126].mxu1 }
 0xc1d   : > { %v12529_v2 = vpop.f32.mrb[127].mxu1 }
 0xc1e   : > { %3530 = vmax.xlane.f32.xlu0 %v12529_v2 }
 0xc20   : > { %3532 = vmax.xlane.f32.xlu1 %v12522_v3 }
 0xc22   : > { %3534 = vmax.xlane.f32.xlu0 %v12527_v61  ;;  %v12534_v27 = vpop.f32.mrb[128].mxu1 }
 0xc23   : > { %v12536_v18 = vpop.f32.mrb[129].mxu1 }
 0xc24   : > { %3536 = vmax.xlane.f32.xlu1 %v12536_v18  ;;  %v12539_v44 = vpop.f32.mrb[130].mxu1 }
 0xc25   : > { %v12541_v55 = vpop.f32.mrb[131].mxu1 }
 0xc26   : > { %3538 = vmax.xlane.f32.xlu0 %v12541_v55 }
 0xc28   : > { %3540 = vmax.xlane.f32.xlu1 %v12534_v27 }
 0xc2a   : > { %3542 = vmax.xlane.f32.xlu0 %v12539_v44  ;;  %v12546_v53 = vpop.f32.mrb[132].mxu1 }
 0xc2b   : > { %v12548_v16 = vpop.f32.mrb[133].mxu1 }
 0xc2c   : > { %3544 = vmax.xlane.f32.xlu1 %v12548_v16  ;;  %v12551_v30 = vpop.f32.mrb[134].mxu1 }
 0xc2d   : > { %v12553_v49 = vpop.f32.mrb[135].mxu1 }
 0xc2e   : > { %3546 = vmax.xlane.f32.xlu0 %v12553_v49 }
 0xc30   : > { %3548 = vmax.xlane.f32.xlu1 %v12546_v53 }
 0xc32   : > { %3550 = vmax.xlane.f32.xlu0 %v12551_v30  ;;  %v9710_v52 = vpop.f32.mrb[136].mxu1 }
 0xc33   : > { %v12558_v48 = vmul.f32 0.125, %v9710_v52  ;;  %v3924_v51 = vpop.f32.mrb[137].mxu1 }
 0xc34   : > { %v12560_v1 = vmul.f32 0.125, %v3924_v51  ;;  %v9711_v13 = vpop.f32.mrb[138].mxu1 }
 0xc35   : > { %v12562_v41 = vmul.f32 0.125, %v9711_v13  ;;  %v3927_v0 = vpop.f32.mrb[139].mxu1 }
 0xc36   : > { %v12564_v7 = vmul.f32 0.125, %v3927_v0 }
 0xc3a   : > { %v9714_v22 = vpop.f32.mrb[140].mxu1 }
 0xc3b   : > { %v12570_v50 = vmul.f32 0.125, %v9714_v22  ;;  %v3940_v36 = vpop.f32.mrb[141].mxu1 }
 0xc3c   : > { %v12572_v11 = vmul.f32 0.125, %v3940_v36  ;;  %v9715_v9 = vpop.f32.mrb[142].mxu1 }
 0xc3d   : > { %v12574_v45 = vmul.f32 0.125, %v9715_v9  ;;  %v3943_v59 = vpop.f32.mrb[143].mxu1 }
 0xc3e   : > { %v12576_v37 = vmul.f32 0.125, %v3943_v59 }
 0xc42   : > { %v9718_v26 = vpop.f32.mrb[144].mxu1 }
 0xc43   : > { %v12582_v46 = vmul.f32 0.125, %v9718_v26  ;;  %v3956_v14 = vpop.f32.mrb[145].mxu1 }
 0xc44   : > { %v12584_v10 = vmul.f32 0.125, %v3956_v14  ;;  %v9719_v52 = vpop.f32.mrb[146].mxu1 }
 0xc45   : > { %v12586_v51 = vmul.f32 0.125, %v9719_v52  ;;  %v3959_v13 = vpop.f32.mrb[147].mxu1 }
 0xc46   : > { %v12588_v0 = vmul.f32 0.125, %v3959_v13 }
 0xc4a   : > { %v9722_v9 = vpop.f32.mrb[148].mxu1 }
 0xc4b   : > { %v12594_v59 = vmul.f32 0.125, %v9722_v9  ;;  %v3972_v26 = vpop.f32.mrb[149].mxu1 }
 0xc4c   : > { %v12596_v56 = vmul.f32 0.125, %v3972_v26  ;;  %v9723_v14 = vpop.f32.mrb[150].mxu1 }
 0xc4d   : > { %v12598_v4 = vmul.f32 0.125, %v9723_v14  ;;  %v3975_v52 = vpop.f32.mrb[151].mxu1 }
 0xc4e   : > { %v12600_v43 = vmul.f32 0.125, %v3975_v52 }
 0xc52   : > { %v9766_v15 = vpop.f32.mrb[152].mxu1 }
 0xc53   : > { %v4184_v36 = vpop.f32.mrb[153].mxu1 }
 0xc54   : > { %v9767_v6 = vpop.f32.mrb[154].mxu1 }
 0xc55   : > { %v4549_v9 = vpack.c.bf16 %v9767_v6, %v9766_v15  ;;  %v4187_v25 = vpop.f32.mrb[155].mxu1 }
 0xc56   : > { %v4548_v32 = vpack.c.bf16 %v4187_v25, %v4184_v36 }
 0xc58   : > { %9804 = vmatprep.subr.bf16.mxu1 %v4548_v32 }
 0xc59   : > { %9805 = vmatpush3.bf16.msra.mxu1 %v4548_v32 }
 0xc5a   : > { %v9770_v26 = vpop.f32.mrb[156].mxu1  ;;  %9806 = vmatprep.subr.bf16.mxu1 %v4549_v9 }
 0xc5b   : > { %v4200_v14 = vpop.f32.mrb[157].mxu1 }
 0xc5c   : > { %v9771_v19 = vpop.f32.mrb[158].mxu1 }
 0xc5d   : > { %v4551_v52 = vpack.c.bf16 %v9771_v19, %v9770_v26  ;;  %v4203_v57 = vpop.f32.mrb[159].mxu1  ;;  %9807 = vmatpush3.bf16.msra.mxu1 %v4549_v9 }
 0xc5e   : > { %v4550_v58 = vpack.c.bf16 %v4203_v57, %v4200_v14 }
 0xc60   : > { %9808 = vmatprep.subr.bf16.mxu1 %v4550_v58 }
 0xc61   : > { %9809 = vmatpush3.bf16.msra.mxu1 %v4550_v58 }
 0xc62   : > { %v9774_v13 = vpop.f32.mrb[160].mxu1  ;;  %9810 = vmatprep.subr.bf16.mxu1 %v4551_v52 }
 0xc63   : > { %v4216_v22 = vpop.f32.mrb[161].mxu1 }
 0xc64   : > { %v9775_v12 = vpop.f32.mrb[162].mxu1 }
 0xc65   : > { %v4553_v54 = vpack.c.bf16 %v9775_v12, %v9774_v13  ;;  %v4219_v6 = vpop.f32.mrb[163].mxu1  ;;  %9811 = vmatpush3.bf16.msra.mxu1 %v4551_v52 }
 0xc66   : > { %v4552_v25 = vpack.c.bf16 %v4219_v6, %v4216_v22 }
 0xc68   : > { %9812 = vmatprep.subr.bf16.mxu1 %v4552_v25 }
 0xc69   : > { %9813 = vmatpush3.bf16.msra.mxu1 %v4552_v25 }
 0xc6a   : > { %v9778_v32 = vpop.f32.mrb[164].mxu1  ;;  %9814 = vmatprep.subr.bf16.mxu1 %v4553_v54 }
 0xc6b   : > { %v4232_v15 = vpop.f32.mrb[165].mxu1 }
 0xc6c   : > { %v9779_v36 = vpop.f32.mrb[166].mxu1 }
 0xc6d   : > { %v4555_v19 = vpack.c.bf16 %v9779_v36, %v9778_v32  ;;  %v4235_v26 = vpop.f32.mrb[167].mxu1  ;;  %9815 = vmatpush3.bf16.msra.mxu1 %v4553_v54 }
 0xc6e   : > { %v4554_v57 = vpack.c.bf16 %v4235_v26, %v4232_v15 }
 0xc70   : > { %9816 = vmatprep.subr.bf16.mxu1 %v4554_v57 }
 0xc71   : > { %9817 = vmatpush3.bf16.msra.mxu1 %v4554_v57 }
 0xc72   : > { %9818 = vmatprep.subr.bf16.mxu1 %v4555_v19 }
 0xc75   : > { %9819 = vmatpush3.bf16.msra.mxu1 %v4555_v19 }
 0xc76   : > { %9868 = vmatprep.subr.bf16.mxu1 %v11430_v20 }
 0xca1   : > { %v3521_v12 = vpop.xlane.xlu1 %3520 }
 0xca2   : > { %v3552_v58 = vsub.f32 %v12512_v62, %v3521_v12 }
 0xca3   : > { %v3523_v22 = vpop.xlane.xlu0 %3522 }
 0xca4   : > { %v3568_v13 = vmul.f32 1.442695, %v3552_v58  ;;  %v3553_v9 = vsub.f32 %v12517_v17, %v3523_v22 }
 0xca5   : > { %v3525_v14 = vpop.xlane.xlu1 %3524 }
 0xca6   : > { %10710 = vpow2.f32 %v3568_v13  ;;  %v3570_v52 = vmul.f32 1.442695, %v3553_v9  ;;  %v3554_v6 = vsub.f32 %v12510_v33, %v3525_v14 }
 0xca7   : > { %v3527_v54 = vpop.xlane.xlu0 %3526 }
 0xca8   : > { %10712 = vpow2.f32 %v3570_v52  ;;  %v3572_v25 = vmul.f32 1.442695, %v3554_v6  ;;  %v3555_v32 = vsub.f32 %v12515_v60, %v3527_v54 }
 0xca9   : > { %v3529_v15 = vpop.xlane.xlu1 %3528 }
 0xcaa   : > { %10714 = vpow2.f32 %v3572_v25  ;;  %v3574_v36 = vmul.f32 1.442695, %v3555_v32  ;;  %v3556_v19 = vsub.f32 %v12524_v21, %v3529_v15 }
 0xcab   : > { %v3531_v62 = vpop.xlane.xlu0 %3530 }
 0xcac   : > { %10716 = vpow2.f32 %v3574_v36  ;;  %v3576_v26 = vmul.f32 1.442695, %v3556_v19  ;;  %v3557_v17 = vsub.f32 %v12529_v2, %v3531_v62 }
 0xcad   : > { %v3533_v57 = vpop.xlane.xlu1 %3532 }
 0xcae   : > { %10718 = vpow2.f32 %v3576_v26  ;;  %v3578_v12 = vmul.f32 1.442695, %v3557_v17  ;;  %v3558_v33 = vsub.f32 %v12522_v3, %v3533_v57 }
 0xcaf   : > { %v3535_v58 = vpop.xlane.xlu0 %3534 }
 0xcb0   : > { %v12614_v22 = vpop.eup %10710  ;;  %10720 = vpow2.f32 %v3578_v12  ;;  %v3580_v60 = vmul.f32 1.442695, %v3558_v33  ;;  %v3559_v13 = vsub.f32 %v12527_v61, %v3535_v58 }
 0xcb1   : > { %v3537_v9 = vpop.xlane.xlu1 %3536  ;;  %3600 = vadd.xlane.f32.xlu1 %v12614_v22 }
 0xcb2   : > { %v12618_v21 = vpop.eup %10712  ;;  %10722 = vpow2.f32 %v3580_v60  ;;  %v3582_v14 = vmul.f32 1.442695, %v3559_v13  ;;  %v3560_v2 = vsub.f32 %v12536_v18, %v3537_v9 }
 0xcb3   : > { %v3539_v52 = vpop.xlane.xlu0 %3538  ;;  %3602 = vadd.xlane.f32.xlu0 %v12618_v21 }
 0xcb4   : > { %v12622_v3 = vpop.eup %10714  ;;  %10724 = vpow2.f32 %v3582_v14  ;;  %v3584_v6 = vmul.f32 1.442695, %v3560_v2  ;;  %v3561_v54 = vsub.f32 %v12541_v55, %v3539_v52 }
 0xcb5   : > { %v3541_v25 = vpop.xlane.xlu1 %3540  ;;  %3604 = vadd.xlane.f32.xlu1 %v12622_v3 }
 0xcb6   : > { %v12626_v61 = vpop.eup %10716  ;;  %10726 = vpow2.f32 %v3584_v6  ;;  %v3586_v32 = vmul.f32 1.442695, %v3561_v54  ;;  %v3562_v15 = vsub.f32 %v12534_v27, %v3541_v25 }
 0xcb7   : > { %v3543_v36 = vpop.xlane.xlu0 %3542  ;;  %3606 = vadd.xlane.f32.xlu0 %v12626_v61 }
 0xcb8   : > { %v12630_v18 = vpop.eup %10718  ;;  %10728 = vpow2.f32 %v3586_v32  ;;  %v3588_v19 = vmul.f32 1.442695, %v3562_v15  ;;  %v3563_v62 = vsub.f32 %v12539_v44, %v3543_v36 }
 0xcb9   : > { %3608 = vadd.xlane.f32.xlu1 %v12630_v18  ;;  %v3545_v55 = vpop.xlane.xlu1 %3544 }
 0xcba   : > { %v12634_v26 = vpop.eup %10720  ;;  %10730 = vpow2.f32 %v3588_v19  ;;  %v3590_v17 = vmul.f32 1.442695, %v3563_v62  ;;  %v3564_v57 = vsub.f32 %v12548_v16, %v3545_v55 }
 0xcbb   : > { %3610 = vadd.xlane.f32.xlu0 %v12634_v26  ;;  %v3547_v27 = vpop.xlane.xlu0 %3546 }
 0xcbc   : > { %v12638_v12 = vpop.eup %10722  ;;  %10732 = vpow2.f32 %v3590_v17  ;;  %v3592_v33 = vmul.f32 1.442695, %v3564_v57  ;;  %v3565_v58 = vsub.f32 %v12553_v49, %v3547_v27 }
 0xcbd   : > { %3612 = vadd.xlane.f32.xlu1 %v12638_v12  ;;  %v3549_v44 = vpop.xlane.xlu1 %3548 }
 0xcbe   : > { %v12642_v60 = vpop.eup %10724  ;;  %10734 = vpow2.f32 %v3592_v33  ;;  %v3594_v13 = vmul.f32 1.442695, %v3565_v58  ;;  %v3566_v9 = vsub.f32 %v12546_v53, %v3549_v44 }
 0xcbf   : > { %3614 = vadd.xlane.f32.xlu0 %v12642_v60  ;;  %v3551_v16 = vpop.xlane.xlu0 %3550 }
 0xcc0   : > { %v12646_v14 = vpop.eup %10726  ;;  %10736 = vpow2.f32 %v3594_v13  ;;  %v3596_v2 = vmul.f32 1.442695, %v3566_v9  ;;  %v3567_v52 = vsub.f32 %v12551_v30, %v3551_v16 }
 0xcc1   : > { %3616 = vadd.xlane.f32.xlu1 %v12646_v14 }
 0xcc2   : > { %v12650_v49 = vpop.eup %10728  ;;  %10738 = vpow2.f32 %v3596_v2  ;;  %v3598_v6 = vmul.f32 1.442695, %v3567_v52 }
 0xcc3   : > { %3618 = vadd.xlane.f32.xlu0 %v12650_v49 }
 0xcc4   : > { %v12653_v54 = vpop.eup %10730  ;;  %10740 = vpow2.f32 %v3598_v6 }
 0xcc5   : > { %3620 = vadd.xlane.f32.xlu1 %v12653_v54 }
 0xcc6   : > { %v12656_v53 = vpop.eup %10732 }
 0xcc7   : > { %3622 = vadd.xlane.f32.xlu0 %v12656_v53 }
 0xcc8   : > { %v12659_v25 = vpop.eup %10734 }
 0xcc9   : > { %3624 = vadd.xlane.f32.xlu1 %v12659_v25 }
 0xcca   : > { %v12662_v30 = vpop.eup %10736 }
 0xccb   : > { %3626 = vadd.xlane.f32.xlu0 %v12662_v30 }
 0xccc   : > { %v12665_v32 = vpop.eup %10738 }
 0xccd   : > { %3628 = vadd.xlane.f32.xlu1 %v12665_v32 }
 0xcce   : > { %v12668_v15 = vpop.eup %10740 }
 0xccf   : > { %3630 = vadd.xlane.f32.xlu0 %v12668_v15 }
 0xd3e   : > { %v3601_v36 = vpop.xlane.xlu1 %3600 }
 0xd3f   : > { %10742 = vrcp.f32 %v3601_v36 }
 0xd40   : > { %v3603_v19 = vpop.xlane.xlu0 %3602 }
 0xd41   : > { %10744 = vrcp.f32 %v3603_v19 }
 0xd42   : > { %v3605_v62 = vpop.xlane.xlu1 %3604 }
 0xd43   : > { %10746 = vrcp.f32 %v3605_v62 }
 0xd44   : > { %v3607_v55 = vpop.xlane.xlu0 %3606 }
 0xd45   : > { %10748 = vrcp.f32 %v3607_v55 }
 0xd46   : > { %v3609_v17 = vpop.xlane.xlu1 %3608 }
 0xd47   : > { %10750 = vrcp.f32 %v3609_v17 }
 0xd48   : > { %v3611_v57 = vpop.xlane.xlu0 %3610 }
 0xd49   : > { %v10743_v27 = vpop.eup %10742  ;;  %10752 = vrcp.f32 %v3611_v57 }
 0xd4a   : > { %v3613_v33 = vpop.xlane.xlu1 %3612  ;;  %v3648_v13 = vmul.f32 %v10743_v27, %v12614_v22 }
 0xd4b   : > { %v10745_v58 = vpop.eup %10744  ;;  %10754 = vrcp.f32 %v3613_v33 }
 0xd4c   : > { %v3615_v44 = vpop.xlane.xlu0 %3614  ;;  %v3649_v9 = vmul.f32 %v10745_v58, %v12618_v21 }
 0xd4d   : > { %v10747_v16 = vpop.eup %10746  ;;  %10756 = vrcp.f32 %v3615_v44 }
 0xd4e   : > { %v3617_v2 = vpop.xlane.xlu1 %3616  ;;  %v3664_v52 = vpack.c.bf16 %v3649_v9, %v3648_v13  ;;  %v3650_v36 = vmul.f32 %v10747_v16, %v12622_v3 }
 0xd4f   : > { %v10749_v6 = vpop.eup %10748  ;;  %10758 = vrcp.f32 %v3617_v2 }
 0xd50   : > { %v3651_v19 = vmul.f32 %v10749_v6, %v12626_v61  ;;  %9676 = vmatprep.mubr.bf16.mxu0 %v3664_v52  ;;  %v3619_v62 = vpop.xlane.xlu0 %3618 }
 0xd51   : > { %v10751_v55 = vpop.eup %10750  ;;  %10760 = vrcp.f32 %v3619_v62 }
 0xd52   : > { %v3621_v17 = vpop.xlane.xlu1 %3620  ;;  %v3665_v57 = vpack.c.bf16 %v3651_v19, %v3650_v36  ;;  %v3652_v21 = vmul.f32 %v10751_v55, %v12630_v18 }
 0xd53   : > { %v10753_v33 = vpop.eup %10752  ;;  %10762 = vrcp.f32 %v3621_v17 }
 0xd54   : > { %9677 = vmatmul.mubr.bf16.vlgmr.msra.gmra.mrb[136].mxu0 %v3665_v57  ;;  %v3623_v22 = vpop.xlane.xlu0 %3622  ;;  %v3653_v27 = vmul.f32 %v10753_v33, %v12634_v26 }
 0xd55   : > { %v10755_v58 = vpop.eup %10754  ;;  %9725 = vmatpush3.bf16.msra.mxu0 %v11430_v20  ;;  %10764 = vrcp.f32 %v3623_v22 }
 0xd56   : > { %9726 = vmatprep.subr.bf16.mxu0 %v11436_v24  ;;  %v3625_v3 = vpop.xlane.xlu1 %3624  ;;  %v3666_v61 = vpack.c.bf16 %v3653_v27, %v3652_v21  ;;  %v3654_v9 = vmul.f32 %v10755_v58, %v12638_v12 }
 0xd57   : > { %v10757_v44 = vpop.eup %10756  ;;  %10766 = vrcp.f32 %v3625_v3  ;;  %v10425_v3 = vld [vmem:[%s14176_s3 + $0x98] sm:$0xff]  }
 0xd58   : > { %9680 = vmatprep.mubr.bf16.mxu0 %v3666_v61  ;;  %v3627_v13 = vpop.xlane.xlu0 %3626  ;;  %v3655_v16 = vmul.f32 %v10757_v44, %v12642_v60  ;;  %v14334_v61 = vpack.c.bf16 %v12564_v7, %v12560_v1 }
 0xd59   : > { %v10759_v2 = vpop.eup %10758  ;;  %9727 = vmatpush3.bf16.msra.mxu0 %v11436_v24  ;;  %10768 = vrcp.f32 %v3627_v13 }
 0xd5a   : > { %9728 = vmatprep.subr.bf16.mxu0 %v11441_v28  ;;  %v3629_v18 = vpop.xlane.xlu1 %3628  ;;  %v3667_v26 = vpack.c.bf16 %v3655_v16, %v3654_v9  ;;  %v3656_v36 = vmul.f32 %v10759_v2, %v12646_v14 }
 0xd5b   : > { %v10761_v52 = vpop.eup %10760  ;;  %10770 = vrcp.f32 %v3629_v18 }
 0xd5c   : > { %9681 = vmatmul.mubr.bf16.gmra.mrb[140].mxu0 %v3667_v26  ;;  %v3631_v6 = vpop.xlane.xlu0 %3630  ;;  %v3657_v19 = vmul.f32 %v10761_v52, %v12650_v49 }
 0xd5d   : > { %v10763_v62 = vpop.eup %10762  ;;  %9729 = vmatpush3.bf16.msra.mxu0 %v11441_v28  ;;  %10772 = vrcp.f32 %v3631_v6 }
 0xd5e   : > { %9730 = vmatprep.subr.bf16.mxu0 %v11445_v31  ;;  %v3668_v12 = vpack.c.bf16 %v3657_v19, %v3656_v36  ;;  %v3658_v55 = vmul.f32 %v10763_v62, %v12653_v54 }
 0xd5f   : > { %v10765_v60 = vpop.eup %10764 }
 0xd60   : > { %9684 = vmatprep.mubr.bf16.mxu0 %v3668_v12  ;;  %v3659_v17 = vmul.f32 %v10765_v60, %v12656_v53 }
 0xd61   : > { %v10767_v57 = vpop.eup %10766  ;;  %9731 = vmatpush3.bf16.msra.mxu0 %v11445_v31 }
 0xd62   : > { %9732 = vmatprep.subr.bf16.mxu0 %v11449_v35  ;;  %v3669_v14 = vpack.c.bf16 %v3659_v17, %v3658_v55  ;;  %v3660_v33 = vmul.f32 %v10767_v57, %v12659_v25  ;;  %v10422_v25 = vld [vmem:[%s14176_s3 + $0x80] sm:$0xff]  }
 0xd63   : > { %v10769_v49 = vpop.eup %10768 }
 0xd64   : > { %9685 = vmatmul.mubr.bf16.gmra.mrb[144].mxu0 %v3669_v14  ;;  %v3661_v22 = vmul.f32 %v10769_v49, %v12662_v30 }
 0xd65   : > { %v10771_v21 = vpop.eup %10770  ;;  %9733 = vmatpush3.bf16.msra.mxu0 %v11449_v35 }
 0xd66   : > { %9734 = vmatprep.subr.bf16.mxu0 %v11453_v39  ;;  %v3670_v54 = vpack.c.bf16 %v3661_v22, %v3660_v33  ;;  %v3662_v53 = vmul.f32 %v10771_v21, %v12665_v32  ;;  %v10423_v32 = vld [vmem:[%s14176_s3 + $0x88] sm:$0xff]   ;;  %v10426_v21 = vld [vmem:[%s14175_s2 + $0x140] sm:$0xff]  }
 0xd67   : > { %v10773_v27 = vpop.eup %10772 }
 0xd68   : > { %9688 = vmatprep.mubr.bf16.mxu0 %v3670_v54  ;;  %v3663_v58 = vmul.f32 %v10773_v27, %v12668_v15  ;;  %v10424_v15 = vld [vmem:[%s14176_s3 + $0x90] sm:$0xff]  }
 0xd69   : > { %9735 = vmatpush3.bf16.msra.mxu0 %v11453_v39 }
 0xd6a   : > { %9736 = vmatprep.subr.bf16.mxu0 %v11457_v42  ;;  %v3671_v30 = vpack.c.bf16 %v3663_v58, %v3662_v53 }
 0xd6c   : > { %9689 = vmatmul.mubr.bf16.gmra.mrb[148].mxu0 %v3671_v30 }
 0xd6d   : > { %9737 = vmatpush3.bf16.msra.mxu0 %v11457_v42  ;;  %9740 = vmatprep.mubr.bf16.mxu0 %v10422_v25 }
 0xd6e   : > { %9738 = vmatprep.subr.bf16.mxu0 %v11461_v47 }
 0xd71   : > { %9739 = vmatpush3.bf16.msra.mxu0 %v11461_v47 }
 0xd74   : > { %9741 = vmatmul.mubr.bf16.vlgmr.msra.gmra.mrb[152].mxu0 %v10423_v32 }
 0xd75   : > { %9744 = vmatprep.mubr.bf16.mxu0 %v10424_v15 }
 0xd7c   : > { %9745 = vmatmul.mubr.bf16.gmra.mrb[156].mxu0 %v10425_v3 }
 0xd7d   : > { %9788 = vmatprep.mubr.msk.bf16.mxu0 %vm833_vm0, %v14334_v61 }
 0xe27   : > { %v12718_v44 = vpop.f32.mrb[136].mxu0 }
 0xe28   : > { %14335 = vst [vmem:[#allocation30_spill] sm:$0xff] %v12718_v44  ;;  %v12720_v13 = vpop.f32.mrb[137].mxu0 }
 0xe29   : > { %14336 = vst [vmem:[#allocation31_spill] sm:$0xff] %v12720_v13  ;;  %v12722_v9 = vpop.f32.mrb[138].mxu0 }
 0xe2a   : > { %14337 = vst [vmem:[#allocation32_spill] sm:$0xff] %v12722_v9  ;;  %v12726_v2 = vpop.f32.mrb[139].mxu0 }
 0xe2b   : > { %14338 = vst [vmem:[#allocation33_spill] sm:$0xff] %v12726_v2 }
 0xe2f   : > { %v12730_v26 = vpop.f32.mrb[140].mxu0 }
 0xe30   : > { %14339 = vst [vmem:[#allocation34_spill] sm:$0xff] %v12730_v26  ;;  %v12732_v52 = vpop.f32.mrb[141].mxu0 }
 0xe31   : > { %14340 = vst [vmem:[#allocation35_spill] sm:$0xff] %v12732_v52  ;;  %v12734_v1 = vpop.f32.mrb[142].mxu0 }
 0xe32   : > { %14341 = vst [vmem:[#allocation36_spill] sm:$0xff] %v12734_v1  ;;  %v12738_v6 = vpop.f32.mrb[143].mxu0 }
 0xe33   : > { %14342 = vst [vmem:[#allocation37_spill] sm:$0xff] %v12738_v6 }
 0xe37   : > { %v12742_v19 = vpop.f32.mrb[144].mxu0 }
 0xe38   : > { %14343 = vst [vmem:[#allocation38_spill] sm:$0xff] %v12742_v19  ;;  %v12744_v62 = vpop.f32.mrb[145].mxu0 }
 0xe39   : > { %14344 = vst [vmem:[#allocation39_spill] sm:$0xff] %v12744_v62  ;;  %v12746_v12 = vpop.f32.mrb[146].mxu0 }
 0xe3a   : > { %14345 = vst [vmem:[#allocation40_spill] sm:$0xff] %v12746_v12  ;;  %v12750_v55 = vpop.f32.mrb[147].mxu0 }
 0xe3b   : > { %14346 = vst [vmem:[#allocation41_spill] sm:$0xff] %v12750_v55 }
 0xe3f   : > { %v12754_v57 = vpop.f32.mrb[148].mxu0 }
 0xe40   : > { %14347 = vst [vmem:[#allocation42_spill] sm:$0xff] %v12754_v57  ;;  %v12756_v14 = vpop.f32.mrb[149].mxu0 }
 0xe41   : > { %14348 = vst [vmem:[#allocation43_spill] sm:$0xff] %v12756_v14  ;;  %v12758_v49 = vpop.f32.mrb[150].mxu0 }
 0xe42   : > { %14349 = vst [vmem:[#allocation44_spill] sm:$0xff] %v12758_v49  ;;  %v12762_v22 = vpop.f32.mrb[151].mxu0 }
 0xe43   : > { %14350 = vst [vmem:[#allocation45_spill] sm:$0xff] %v12762_v22 }
 0xe47   : > { %v9742_v54 = vpop.f32.mrb[152].mxu0 }
 0xe48   : > { %v4054_v27 = vpop.f32.mrb[153].mxu0 }
 0xe49   : > { %v9743_v53 = vpop.f32.mrb[154].mxu0 }
 0xe4a   : > { %v4272_v58 = vpack.c.bf16 %v9743_v53, %v9742_v54  ;;  %v4057_v25 = vpop.f32.mrb[155].mxu0  ;;  %v10427_v54 = vld [vmem:[%s14175_s2 + $0x148] sm:$0xff]   ;;  %v10429_v53 = vld [vmem:[%s14175_s2 + $0x158] sm:$0xff]  }
 0xe4b   : > { %v4271_v30 = vpack.c.bf16 %v4057_v25, %v4054_v27  ;;  %v14351_v27 = vpack.c.bf16 %v12562_v41, %v12558_v48  ;;  %v14353_v48 = vpack.c.bf16 %v12574_v45, %v12570_v50  ;;  %v14354_v41 = vpack.c.bf16 %v12588_v0, %v12584_v10  ;;  %v10432_v10 = vld [vmem:[%s14175_s2 + $0x170] sm:$0xff]   ;;  %v10433_v0 = vld [vmem:[%s14175_s2 + $0x178] sm:$0xff]  }
 0xe4c   : > { %v14355_v50 = vpack.c.bf16 %v12586_v51, %v12582_v46  ;;  %v14356_v45 = vpack.c.bf16 %v12600_v43, %v12596_v56  ;;  %v14357_v46 = vpack.c.bf16 %v12598_v4, %v12594_v59  ;;  %v10434_v43 = vld [vmem:[%s14177_s4 + $0x140] sm:$0xff]   ;;  %v10435_v56 = vld [vmem:[%s14177_s4 + $0x148] sm:$0xff]   ;;  %v10436_v4 = vld [vmem:[%s14177_s4 + $0x150] sm:$0xff]  }
 0xe4d   : > { %9780 = vmatprep.subr.bf16.mxu0 %v4271_v30  ;;  %v10437_v51 = vld [vmem:[%s14177_s4 + $0x158] sm:$0xff]   ;;  %v10438_v59 = vld [vmem:[%s14177_s4 + $0x160] sm:$0xff]  }
 0xe4e   : > { %9781 = vmatpush3.bf16.msra.mxu0 %v4271_v30  ;;  %v10441_v25 = vld [vmem:[%s14177_s4 + $0x178] sm:$0xff]   ;;  %v14358_v30 = vld [vmem:[#allocation12_spill] sm:$0xff] }
 0xe4f   : > { %v9746_v32 = vpop.f32.mrb[156].mxu0  ;;  %9782 = vmatprep.subr.bf16.mxu0 %v4272_v58 }
 0xe50   : > { %v4070_v15 = vpop.f32.mrb[157].mxu0 }
 0xe51   : > { %v9747_v3 = vpop.f32.mrb[158].mxu0 }
 0xe52   : > { %v4274_v61 = vpack.c.bf16 %v9747_v3, %v9746_v32  ;;  %v4073_v60 = vpop.f32.mrb[159].mxu0  ;;  %9783 = vmatpush3.bf16.msra.mxu0 %v4272_v58  ;;  %v10440_v58 = vld [vmem:[%s14177_s4 + $0x170] sm:$0xff]   ;;  %v14359_v32 = vld [vmem:[#allocation13_spill] sm:$0xff]  ;;  %v14361_v3 = vld [vmem:[#allocation15_spill] sm:$0xff] }
 0xe53   : > { %v4273_v33 = vpack.c.bf16 %v4073_v60, %v4070_v15  ;;  %v14352_v60 = vpack.c.bf16 %v12576_v37, %v12572_v11  ;;  %v10430_v11 = vld [vmem:[%s14175_s2 + $0x160] sm:$0xff]   ;;  %v10431_v37 = vld [vmem:[%s14175_s2 + $0x168] sm:$0xff]  }
 0xe54   : > { %v14360_v15 = vld [vmem:[#allocation14_spill] sm:$0xff] }
 0xe55   : > { %9784 = vmatprep.subr.bf16.mxu0 %v4273_v33 }
 0xe56   : > { %9785 = vmatpush3.bf16.msra.mxu0 %v4273_v33  ;;  %v10428_v33 = vld [vmem:[%s14175_s2 + $0x150] sm:$0xff]  }
 0xe57   : > { %9786 = vmatprep.subr.bf16.mxu0 %v4274_v61 }
 0xe5a   : > { %9787 = vmatpush3.bf16.msra.mxu0 %v4274_v61  ;;  %v14362_v61 = vld [vmem:[#allocation16_spill] sm:$0xff] }
 0xe5b   : > { %9836 = vmatprep.subr.bf16.mxu0 %v10426_v21 }
 0xe5d   : > { %9789 = vmatmul.mubr.msk.bf16.vlgmr.msra.gmra.mrb[160].mxu0 %vm833_vm0, %v14351_v27  ;;  %v14364_v27 = vld [vmem:[#allocation18_spill] sm:$0xff] }
 0xe5e   : > { %9837 = vmatpush3.bf16.msra.mxu0 %v10426_v21  ;;  %9792 = vmatprep.mubr.msk.bf16.mxu0 %vm833_vm0, %v14352_v60  ;;  %v10439_v21 = vld [vmem:[%s14177_s4 + $0x168] sm:$0xff]  }
 0xe5f   : > { %9838 = vmatprep.subr.bf16.mxu0 %v10427_v54  ;;  %v14365_v60 = vld [vmem:[#allocation19_spill] sm:$0xff] }
 0xe62   : > { %9839 = vmatpush3.bf16.msra.mxu0 %v10427_v54  ;;  %v14363_v54 = vld [vmem:[#allocation17_spill] sm:$0xff] }
 0xe63   : > { %9840 = vmatprep.subr.bf16.mxu0 %v10428_v33 }
 0xe65   : > { %9793 = vmatmul.mubr.msk.bf16.gmra.mrb[164].mxu0 %vm833_vm0, %v14353_v48 }
 0xe66   : > { %9841 = vmatpush3.bf16.msra.mxu0 %v10428_v33  ;;  %9796 = vmatprep.mubr.msk.bf16.mxu0 %vm833_vm0, %v14354_v41 }
 0xe67   : > { %9842 = vmatprep.subr.bf16.mxu0 %v10429_v53 }
 0xe6a   : > { %9843 = vmatpush3.bf16.msra.mxu0 %v10429_v53 }
 0xe6b   : > { %9844 = vmatprep.subr.bf16.mxu0 %v10430_v11 }
 0xe6d   : > { %9797 = vmatmul.mubr.msk.bf16.gmra.mrb[168].mxu0 %vm833_vm0, %v14355_v50 }
 0xe6e   : > { %9845 = vmatpush3.bf16.msra.mxu0 %v10430_v11  ;;  %9800 = vmatprep.mubr.msk.bf16.mxu0 %vm833_vm0, %v14356_v45 }
 0xe6f   : > { %9846 = vmatprep.subr.bf16.mxu0 %v10431_v37 }
 0xe72   : > { %9847 = vmatpush3.bf16.msra.mxu0 %v10431_v37 }
 0xe73   : > { %9848 = vmatprep.subr.bf16.mxu0 %v10432_v10 }
 0xe75   : > { %9801 = vmatmul.mubr.msk.bf16.gmra.mrb[172].mxu0 %vm833_vm0, %v14357_v46 }
 0xe76   : > { %9849 = vmatpush3.bf16.msra.mxu0 %v10432_v10  ;;  %9852 = vmatprep.mubr.bf16.mxu0 %v11220_v8 }
 0xe77   : > { %9850 = vmatprep.subr.bf16.mxu0 %v10433_v0 }
 0xe7a   : > { %9851 = vmatpush3.bf16.msra.mxu0 %v10433_v0 }
 0xe7b   : > { %9892 = vmatprep.subr.bf16.mxu0 %v10434_v43 }
 0xe7d   : > { %9853 = vmatmul.mubr.bf16.vlgmr.msra.gmra.mrb[176].mxu0 %v11261_v23 }
 0xe7e   : > { %9893 = vmatpush3.bf16.msra.mxu0 %v10434_v43  ;;  %9856 = vmatprep.mubr.bf16.mxu0 %v14272_v63 }
 0xe7f   : > { %9894 = vmatprep.subr.bf16.mxu0 %v10435_v56 }
 0xe82   : > { %9895 = vmatpush3.bf16.msra.mxu0 %v10435_v56 }
 0xe83   : > { %9896 = vmatprep.subr.bf16.mxu0 %v10436_v4 }
 0xe85   : > { %9857 = vmatmul.mubr.bf16.gmra.mrb[180].mxu0 %v14273_v29 }
 0xe86   : > { %9897 = vmatpush3.bf16.msra.mxu0 %v10436_v4  ;;  %9860 = vmatprep.mubr.bf16.mxu0 %v14274_v38 }
 0xe87   : > { %9898 = vmatprep.subr.bf16.mxu0 %v10437_v51 }
 0xe8a   : > { %9899 = vmatpush3.bf16.msra.mxu0 %v10437_v51 }
 0xe8b   : > { %9900 = vmatprep.subr.bf16.mxu0 %v10438_v59 }
 0xe8d   : > { %9861 = vmatmul.mubr.bf16.gmra.mrb[184].mxu0 %v14275_v40 }
 0xe8e   : > { %9901 = vmatpush3.bf16.msra.mxu0 %v10438_v59  ;;  %9864 = vmatprep.mubr.bf16.mxu0 %v14276_v5 }
 0xe8f   : > { %9902 = vmatprep.subr.bf16.mxu0 %v10439_v21 }
 0xe92   : > { %9903 = vmatpush3.bf16.msra.mxu0 %v10439_v21 }
 0xe93   : > { %9904 = vmatprep.subr.bf16.mxu0 %v10440_v58 }
 0xe95   : > { %9865 = vmatmul.mubr.bf16.gmra.mrb[188].mxu0 %v14277_v34 }
 0xe96   : > { %9905 = vmatpush3.bf16.msra.mxu0 %v10440_v58  ;;  %9908 = vmatprep.mubr.bf16.mxu0 %v14358_v30 }
 0xe97   : > { %9906 = vmatprep.subr.bf16.mxu0 %v10441_v25 }
 0xe9a   : > { %9907 = vmatpush3.bf16.msra.mxu0 %v10441_v25 }
 0xe9d   : > { %9909 = vmatmul.mubr.bf16.vlgmr.msra.gmra.mrb[192].mxu0 %v14359_v32 }
 0xe9e   : > { %9912 = vmatprep.mubr.bf16.mxu0 %v14360_v15 }
 0xea5   : > { %9913 = vmatmul.mubr.bf16.gmra.mrb[196].mxu0 %v14361_v3 }
 0xea6   : > { %9916 = vmatprep.mubr.bf16.mxu0 %v14362_v61 }
 0xead   : > { %9917 = vmatmul.mubr.bf16.gmra.mrb[200].mxu0 %v14363_v54 }
 0xeae   : > { %9920 = vmatprep.mubr.bf16.mxu0 %v14364_v27 }
 0xeb5   : > { %9921 = vmatmul.mubr.bf16.gmra.mrb[204].mxu0 %v14365_v60 }
 0xf30   : > { %v12858_v33 = vpop.f32.mrb[160].mxu0 }
 0xf31   : > { %v12860_v53 = vpop.f32.mrb[161].mxu0 }
 0xf32   : > { %4396 = vmax.xlane.f32.xlu1 %v12860_v53  ;;  %v12863_v48 = vpop.f32.mrb[162].mxu0 }
 0xf33   : > { %v12865_v41 = vpop.f32.mrb[163].mxu0 }
 0xf34   : > { %4398 = vmax.xlane.f32.xlu0 %v12865_v41 }
 0xf36   : > { %4400 = vmax.xlane.f32.xlu1 %v12858_v33 }
 0xf38   : > { %4402 = vmax.xlane.f32.xlu0 %v12863_v48  ;;  %v12870_v11 = vpop.f32.mrb[164].mxu0 }
 0xf39   : > { %v12872_v37 = vpop.f32.mrb[165].mxu0 }
 0xf3a   : > { %4404 = vmax.xlane.f32.xlu1 %v12872_v37  ;;  %v12875_v50 = vpop.f32.mrb[166].mxu0 }
 0xf3b   : > { %v12877_v45 = vpop.f32.mrb[167].mxu0 }
 0xf3c   : > { %4406 = vmax.xlane.f32.xlu0 %v12877_v45 }
 0xf3e   : > { %4408 = vmax.xlane.f32.xlu1 %v12870_v11 }
 0xf40   : > { %4410 = vmax.xlane.f32.xlu0 %v12875_v50  ;;  %v12882_v10 = vpop.f32.mrb[168].mxu0 }
 0xf41   : > { %v12884_v0 = vpop.f32.mrb[169].mxu0 }
 0xf42   : > { %4412 = vmax.xlane.f32.xlu1 %v12884_v0  ;;  %v12887_v46 = vpop.f32.mrb[170].mxu0 }
 0xf43   : > { %v12889_v43 = vpop.f32.mrb[171].mxu0 }
 0xf44   : > { %4414 = vmax.xlane.f32.xlu0 %v12889_v43 }
 0xf46   : > { %4416 = vmax.xlane.f32.xlu1 %v12882_v10 }
 0xf48   : > { %4418 = vmax.xlane.f32.xlu0 %v12887_v46  ;;  %v12894_v56 = vpop.f32.mrb[172].mxu0 }
 0xf49   : > { %v12896_v4 = vpop.f32.mrb[173].mxu0 }
 0xf4a   : > { %4420 = vmax.xlane.f32.xlu1 %v12896_v4  ;;  %v12899_v51 = vpop.f32.mrb[174].mxu0 }
 0xf4b   : > { %v12901_v59 = vpop.f32.mrb[175].mxu0 }
 0xf4c   : > { %4422 = vmax.xlane.f32.xlu0 %v12901_v59 }
 0xf4e   : > { %4424 = vmax.xlane.f32.xlu1 %v12894_v56 }
 0xf50   : > { %4426 = vmax.xlane.f32.xlu0 %v12899_v51  ;;  %v9854_v21 = vpop.f32.mrb[176].mxu0 }
 0xf51   : > { %v12906_v58 = vmul.f32 0.125, %v9854_v21  ;;  %v4768_v25 = vpop.f32.mrb[177].mxu0 }
 0xf52   : > { %v12908_v17 = vmul.f32 0.125, %v4768_v25  ;;  %v9855_v7 = vpop.f32.mrb[178].mxu0 }
 0xf53   : > { %v12910_v36 = vmul.f32 0.125, %v9855_v7  ;;  %v4771_v16 = vpop.f32.mrb[179].mxu0 }
 0xf54   : > { %v12912_v18 = vmul.f32 0.125, %v4771_v16 }
 0xf58   : > { %v9858_v14 = vpop.f32.mrb[180].mxu0 }
 0xf59   : > { %v12918_v22 = vmul.f32 0.125, %v9858_v14  ;;  %v4784_v21 = vpop.f32.mrb[181].mxu0 }
 0xf5a   : > { %v12920_v19 = vmul.f32 0.125, %v4784_v21  ;;  %v9859_v25 = vpop.f32.mrb[182].mxu0 }
 0xf5b   : > { %v12922_v12 = vmul.f32 0.125, %v9859_v25  ;;  %v4787_v7 = vpop.f32.mrb[183].mxu0 }
 0xf5c   : > { %v12924_v62 = vmul.f32 0.125, %v4787_v7 }
 0xf60   : > { %v9862_v55 = vpop.f32.mrb[184].mxu0 }
 0xf61   : > { %v12930_v49 = vmul.f32 0.125, %v9862_v55  ;;  %v4800_v14 = vpop.f32.mrb[185].mxu0 }
 0xf62   : > { %v12932_v26 = vmul.f32 0.125, %v4800_v14  ;;  %v9863_v21 = vpop.f32.mrb[186].mxu0 }
 0xf63   : > { %v12934_v1 = vmul.f32 0.125, %v9863_v21  ;;  %v4803_v25 = vpop.f32.mrb[187].mxu0 }
 0xf64   : > { %v12936_v52 = vmul.f32 0.125, %v4803_v25 }
 0xf68   : > { %v9866_v6 = vpop.f32.mrb[188].mxu0 }
 0xf69   : > { %v12942_v57 = vmul.f32 0.125, %v9866_v6  ;;  %v4816_v55 = vpop.f32.mrb[189].mxu0 }
 0xf6a   : > { %v12944_v44 = vmul.f32 0.125, %v4816_v55  ;;  %v9867_v14 = vpop.f32.mrb[190].mxu0 }
 0xf6b   : > { %v12946_v9 = vmul.f32 0.125, %v9867_v14  ;;  %v4819_v21 = vpop.f32.mrb[191].mxu0 }
 0xf6c   : > { %v12948_v13 = vmul.f32 0.125, %v4819_v21 }
 0xf70   : > { %v9910_v2 = vpop.f32.mrb[192].mxu0 }
 0xf71   : > { %v5028_v16 = vpop.f32.mrb[193].mxu0 }
 0xf72   : > { %v9911_v60 = vpop.f32.mrb[194].mxu0 }
 0xf73   : > { %v5393_v6 = vpack.c.bf16 %v9911_v60, %v9910_v2  ;;  %v5031_v27 = vpop.f32.mrb[195].mxu0 }
 0xf74   : > { %v5392_v54 = vpack.c.bf16 %v5031_v27, %v5028_v16 }
 0xf76   : > { %9948 = vmatprep.subr.bf16.mxu0 %v5392_v54 }
 0xf77   : > { %9949 = vmatpush3.bf16.msra.mxu0 %v5392_v54 }
 0xf78   : > { %v9914_v55 = vpop.f32.mrb[196].mxu0  ;;  %9950 = vmatprep.subr.bf16.mxu0 %v5393_v6 }
 0xf79   : > { %v5044_v14 = vpop.f32.mrb[197].mxu0 }
 0xf7a   : > { %v9915_v61 = vpop.f32.mrb[198].mxu0 }
 0xf7b   : > { %v5395_v21 = vpack.c.bf16 %v9915_v61, %v9914_v55  ;;  %v5047_v3 = vpop.f32.mrb[199].mxu0  ;;  %9951 = vmatpush3.bf16.msra.mxu0 %v5393_v6 }
 0xf7c   : > { %v5394_v15 = vpack.c.bf16 %v5047_v3, %v5044_v14 }
 0xf7e   : > { %9952 = vmatprep.subr.bf16.mxu0 %v5394_v15 }
 0xf7f   : > { %9953 = vmatpush3.bf16.msra.mxu0 %v5394_v15 }
 0xf80   : > { %v9918_v25 = vpop.f32.mrb[200].mxu0  ;;  %9954 = vmatprep.subr.bf16.mxu0 %v5395_v21 }
 0xf81   : > { %v5060_v7 = vpop.f32.mrb[201].mxu0 }
 0xf82   : > { %v9919_v32 = vpop.f32.mrb[202].mxu0 }
 0xf83   : > { %v5397_v30 = vpack.c.bf16 %v9919_v32, %v9918_v25  ;;  %v5063_v2 = vpop.f32.mrb[203].mxu0  ;;  %9955 = vmatpush3.bf16.msra.mxu0 %v5395_v21 }
 0xf84   : > { %v5396_v27 = vpack.c.bf16 %v5063_v2, %v5060_v7 }
 0xf86   : > { %9956 = vmatprep.subr.bf16.mxu0 %v5396_v27 }
 0xf87   : > { %9957 = vmatpush3.bf16.msra.mxu0 %v5396_v27 }
 0xf88   : > { %v9922_v54 = vpop.f32.mrb[204].mxu0  ;;  %9958 = vmatprep.subr.bf16.mxu0 %v5397_v30 }
 0xf89   : > { %v5076_v60 = vpop.f32.mrb[205].mxu0 }
 0xf8a   : > { %v9923_v16 = vpop.f32.mrb[206].mxu0 }
 0xf8b   : > { %v5399_v61 = vpack.c.bf16 %v9923_v16, %v9922_v54  ;;  %v5079_v55 = vpop.f32.mrb[207].mxu0  ;;  %9959 = vmatpush3.bf16.msra.mxu0 %v5397_v30 }
 0xf8c   : > { %v5398_v3 = vpack.c.bf16 %v5079_v55, %v5076_v60 }
 0xf8e   : > { %9960 = vmatprep.subr.bf16.mxu0 %v5398_v3 }
 0xf8f   : > { %9961 = vmatpush3.bf16.msra.mxu0 %v5398_v3 }
 0xf90   : > { %9962 = vmatprep.subr.bf16.mxu0 %v5399_v61 }
 0xf93   : > { %9963 = vmatpush3.bf16.msra.mxu0 %v5399_v61 }
 0xf94   : > { %10012 = vmatprep.subr.bf16.mxu0 %v11430_v20 }
 0xfbf   : > { %v4397_v32 = vpop.xlane.xlu1 %4396 }
 0xfc0   : > { %v4428_v15 = vsub.f32 %v12860_v53, %v4397_v32 }
 0xfc1   : > { %v4399_v7 = vpop.xlane.xlu0 %4398 }
 0xfc2   : > { %v4444_v25 = vmul.f32 1.442695, %v4428_v15  ;;  %v4429_v6 = vsub.f32 %v12865_v41, %v4399_v7 }
 0xfc3   : > { %v4401_v14 = vpop.xlane.xlu1 %4400 }
 0xfc4   : > { %10774 = vpow2.f32 %v4444_v25  ;;  %v4446_v21 = vmul.f32 1.442695, %v4429_v6  ;;  %v4430_v2 = vsub.f32 %v12858_v33, %v4401_v14 }
 0xfc5   : > { %v4403_v30 = vpop.xlane.xlu0 %4402 }
 0xfc6   : > { %10776 = vpow2.f32 %v4446_v21  ;;  %v4448_v27 = vmul.f32 1.442695, %v4430_v2  ;;  %v4431_v54 = vsub.f32 %v12863_v48, %v4403_v30 }
 0xfc7   : > { %v4405_v60 = vpop.xlane.xlu1 %4404 }
 0xfc8   : > { %10778 = vpow2.f32 %v4448_v27  ;;  %v4450_v16 = vmul.f32 1.442695, %v4431_v54  ;;  %v4432_v61 = vsub.f32 %v12872_v37, %v4405_v60 }
 0xfc9   : > { %v4407_v53 = vpop.xlane.xlu0 %4406 }
 0xfca   : > { %10780 = vpow2.f32 %v4450_v16  ;;  %v4452_v55 = vmul.f32 1.442695, %v4432_v61  ;;  %v4433_v41 = vsub.f32 %v12877_v45, %v4407_v53 }
 0xfcb   : > { %v4409_v3 = vpop.xlane.xlu1 %4408 }
 0xfcc   : > { %10782 = vpow2.f32 %v4452_v55  ;;  %v4454_v32 = vmul.f32 1.442695, %v4433_v41  ;;  %v4434_v33 = vsub.f32 %v12870_v11, %v4409_v3 }
 0xfcd   : > { %v4411_v15 = vpop.xlane.xlu0 %4410 }
 0xfce   : > { %v12962_v7 = vpop.eup %10774  ;;  %10784 = vpow2.f32 %v4454_v32  ;;  %v4456_v48 = vmul.f32 1.442695, %v4434_v33  ;;  %v4435_v25 = vsub.f32 %v12875_v50, %v4411_v15 }
 0xfcf   : > { %v4413_v6 = vpop.xlane.xlu1 %4412  ;;  %4476 = vadd.xlane.f32.xlu1 %v12962_v7 }
 0xfd0   : > { %v12966_v37 = vpop.eup %10776  ;;  %10786 = vpow2.f32 %v4456_v48  ;;  %v4458_v14 = vmul.f32 1.442695, %v4435_v25  ;;  %v4436_v45 = vsub.f32 %v12884_v0, %v4413_v6 }
 0xfd1   : > { %v4415_v21 = vpop.xlane.xlu0 %4414  ;;  %4478 = vadd.xlane.f32.xlu0 %v12966_v37 }
 0xfd2   : > { %v12970_v11 = vpop.eup %10778  ;;  %10788 = vpow2.f32 %v4458_v14  ;;  %v4460_v2 = vmul.f32 1.442695, %v4436_v45  ;;  %v4437_v30 = vsub.f32 %v12889_v43, %v4415_v21 }
 0xfd3   : > { %v4417_v27 = vpop.xlane.xlu1 %4416  ;;  %4480 = vadd.xlane.f32.xlu1 %v12970_v11 }
 0xfd4   : > { %v12974_v50 = vpop.eup %10780  ;;  %10790 = vpow2.f32 %v4460_v2  ;;  %v4462_v54 = vmul.f32 1.442695, %v4437_v30  ;;  %v4438_v60 = vsub.f32 %v12882_v10, %v4417_v27 }
 0xfd5   : > { %v4419_v16 = vpop.xlane.xlu0 %4418  ;;  %4482 = vadd.xlane.f32.xlu0 %v12974_v50 }
 0xfd6   : > { %v12978_v0 = vpop.eup %10782  ;;  %10792 = vpow2.f32 %v4462_v54  ;;  %v4464_v61 = vmul.f32 1.442695, %v4438_v60  ;;  %v4439_v53 = vsub.f32 %v12887_v46, %v4419_v16 }
 0xfd7   : > { %4484 = vadd.xlane.f32.xlu1 %v12978_v0  ;;  %v4421_v43 = vpop.xlane.xlu1 %4420 }
 0xfd8   : > { %v12982_v55 = vpop.eup %10784  ;;  %10794 = vpow2.f32 %v4464_v61  ;;  %v4466_v41 = vmul.f32 1.442695, %v4439_v53  ;;  %v4440_v3 = vsub.f32 %v12896_v4, %v4421_v43 }
 0xfd9   : > { %4486 = vadd.xlane.f32.xlu0 %v12982_v55  ;;  %v4423_v10 = vpop.xlane.xlu0 %4422 }
 0xfda   : > { %v12986_v32 = vpop.eup %10786  ;;  %10796 = vpow2.f32 %v4466_v41  ;;  %v4468_v33 = vmul.f32 1.442695, %v4440_v3  ;;  %v4441_v15 = vsub.f32 %v12901_v59, %v4423_v10 }
 0xfdb   : > { %4488 = vadd.xlane.f32.xlu1 %v12986_v32  ;;  %v4425_v46 = vpop.xlane.xlu1 %4424 }
 0xfdc   : > { %v12990_v48 = vpop.eup %10788  ;;  %10798 = vpow2.f32 %v4468_v33  ;;  %v4470_v25 = vmul.f32 1.442695, %v4441_v15  ;;  %v4442_v6 = vsub.f32 %v12894_v56, %v4425_v46 }
 0xfdd   : > { %4490 = vadd.xlane.f32.xlu0 %v12990_v48  ;;  %v4427_v4 = vpop.xlane.xlu0 %4426 }
 0xfde   : > { %v12994_v14 = vpop.eup %10790  ;;  %10800 = vpow2.f32 %v4470_v25  ;;  %v4472_v45 = vmul.f32 1.442695, %v4442_v6  ;;  %v4443_v21 = vsub.f32 %v12899_v51, %v4427_v4 }
 0xfdf   : > { %4492 = vadd.xlane.f32.xlu1 %v12994_v14 }
 0xfe0   : > { %v12998_v59 = vpop.eup %10792  ;;  %10802 = vpow2.f32 %v4472_v45  ;;  %v4474_v2 = vmul.f32 1.442695, %v4443_v21 }
 0xfe1   : > { %4494 = vadd.xlane.f32.xlu0 %v12998_v59 }
 0xfe2   : > { %v13001_v30 = vpop.eup %10794  ;;  %10804 = vpow2.f32 %v4474_v2 }
 0xfe3   : > { %4496 = vadd.xlane.f32.xlu1 %v13001_v30 }
 0xfe4   : > { %v13004_v56 = vpop.eup %10796 }
 0xfe5   : > { %4498 = vadd.xlane.f32.xlu0 %v13004_v56 }
 0xfe6   : > { %v13007_v27 = vpop.eup %10798 }
 0xfe7   : > { %4500 = vadd.xlane.f32.xlu1 %v13007_v27 }
 0xfe8   : > { %v13010_v51 = vpop.eup %10800 }
 0xfe9   : > { %4502 = vadd.xlane.f32.xlu0 %v13010_v51 }
 0xfea   : > { %v13013_v54 = vpop.eup %10802 }
 0xfeb   : > { %4504 = vadd.xlane.f32.xlu1 %v13013_v54 }
 0xfec   : > { %v13016_v60 = vpop.eup %10804 }
 0xfed   : > { %4506 = vadd.xlane.f32.xlu0 %v13016_v60 }
0x105c   : > { %v4477_v16 = vpop.xlane.xlu1 %4476 }
0x105d   : > { %10806 = vrcp.f32 %v4477_v16 }
0x105e   : > { %v4479_v61 = vpop.xlane.xlu0 %4478 }
0x105f   : > { %10808 = vrcp.f32 %v4479_v61 }
0x1060   : > { %v4481_v53 = vpop.xlane.xlu1 %4480 }
0x1061   : > { %10810 = vrcp.f32 %v4481_v53 }
0x1062   : > { %v4483_v43 = vpop.xlane.xlu0 %4482 }
0x1063   : > { %10812 = vrcp.f32 %v4483_v43 }
0x1064   : > { %v4485_v41 = vpop.xlane.xlu1 %4484 }
0x1065   : > { %10814 = vrcp.f32 %v4485_v41 }
0x1066   : > { %v4487_v3 = vpop.xlane.xlu0 %4486 }
0x1067   : > { %v10807_v10 = vpop.eup %10806  ;;  %10816 = vrcp.f32 %v4487_v3 }
0x1068   : > { %v4489_v33 = vpop.xlane.xlu1 %4488  ;;  %v4524_v25 = vmul.f32 %v10807_v10, %v12962_v7 }
0x1069   : > { %v10809_v15 = vpop.eup %10808  ;;  %10818 = vrcp.f32 %v4489_v33 }
0x106a   : > { %v4491_v46 = vpop.xlane.xlu0 %4490  ;;  %v4525_v6 = vmul.f32 %v10809_v15, %v12966_v37 }
0x106b   : > { %v10811_v4 = vpop.eup %10810  ;;  %10820 = vrcp.f32 %v4491_v46 }
0x106c   : > { %v4493_v45 = vpop.xlane.xlu1 %4492  ;;  %v4540_v21 = vpack.c.bf16 %v4525_v6, %v4524_v25  ;;  %v4526_v16 = vmul.f32 %v10811_v4, %v12970_v11 }
0x106d   : > { %v10813_v2 = vpop.eup %10812  ;;  %10822 = vrcp.f32 %v4493_v45 }
0x106e   : > { %v4527_v61 = vmul.f32 %v10813_v2, %v12974_v50  ;;  %9820 = vmatprep.mubr.bf16.mxu1 %v4540_v21  ;;  %v4495_v53 = vpop.xlane.xlu0 %4494 }
0x106f   : > { %v10815_v43 = vpop.eup %10814  ;;  %10824 = vrcp.f32 %v4495_v53 }
0x1070   : > { %v4497_v41 = vpop.xlane.xlu1 %4496  ;;  %v4541_v3 = vpack.c.bf16 %v4527_v61, %v4526_v16  ;;  %v4528_v37 = vmul.f32 %v10815_v43, %v12978_v0 }
0x1071   : > { %v10817_v33 = vpop.eup %10816  ;;  %10826 = vrcp.f32 %v4497_v41 }
0x1072   : > { %v4499_v7 = vpop.xlane.xlu0 %4498  ;;  %9821 = vmatmul.mubr.bf16.vlgmr.msra.gmra.mrb[168].mxu1 %v4541_v3  ;;  %v4529_v10 = vmul.f32 %v10817_v33, %v12982_v55 }
0x1073   : > { %v10819_v15 = vpop.eup %10818  ;;  %10828 = vrcp.f32 %v4499_v7  ;;  %9869 = vmatpush3.bf16.msra.mxu1 %v11430_v20 }
0x1074   : > { %9870 = vmatprep.subr.bf16.mxu1 %v11436_v24  ;;  %v4501_v11 = vpop.xlane.xlu1 %4500  ;;  %v4542_v50 = vpack.c.bf16 %v4529_v10, %v4528_v37  ;;  %v4530_v6 = vmul.f32 %v10819_v15, %v12986_v32 }
0x1075   : > { %v10821_v46 = vpop.eup %10820  ;;  %10830 = vrcp.f32 %v4501_v11  ;;  %v10445_v11 = vld [vmem:[%s14176_s3 + $0xb8] sm:$0xff]  }
0x1076   : > { %v4503_v25 = vpop.xlane.xlu0 %4502  ;;  %9824 = vmatprep.mubr.bf16.mxu1 %v4542_v50  ;;  %v4531_v4 = vmul.f32 %v10821_v46, %v12990_v48  ;;  %v14366_v50 = vpack.c.bf16 %v12912_v18, %v12908_v17 }
0x1077   : > { %v10823_v45 = vpop.eup %10822  ;;  %10832 = vrcp.f32 %v4503_v25  ;;  %9871 = vmatpush3.bf16.msra.mxu1 %v11436_v24 }
0x1078   : > { %9872 = vmatprep.subr.bf16.mxu1 %v11441_v28  ;;  %v4505_v0 = vpop.xlane.xlu1 %4504  ;;  %v4543_v55 = vpack.c.bf16 %v4531_v4, %v4530_v6  ;;  %v4532_v16 = vmul.f32 %v10823_v45, %v12994_v14 }
0x1079   : > { %v10825_v21 = vpop.eup %10824  ;;  %10834 = vrcp.f32 %v4505_v0 }
0x107a   : > { %v4507_v2 = vpop.xlane.xlu0 %4506  ;;  %9825 = vmatmul.mubr.bf16.gmra.mrb[172].mxu1 %v4543_v55  ;;  %v4533_v61 = vmul.f32 %v10825_v21, %v12998_v59 }
0x107b   : > { %v10827_v53 = vpop.eup %10826  ;;  %10836 = vrcp.f32 %v4507_v2  ;;  %9873 = vmatpush3.bf16.msra.mxu1 %v11441_v28 }
0x107c   : > { %9874 = vmatprep.subr.bf16.mxu1 %v11445_v31  ;;  %v4544_v32 = vpack.c.bf16 %v4533_v61, %v4532_v16  ;;  %v4534_v43 = vmul.f32 %v10827_v53, %v13001_v30 }
0x107d   : > { %v10829_v48 = vpop.eup %10828 }
0x107e   : > { %9828 = vmatprep.mubr.bf16.mxu1 %v4544_v32  ;;  %v4535_v41 = vmul.f32 %v10829_v48, %v13004_v56 }
0x107f   : > { %v10831_v3 = vpop.eup %10830  ;;  %9875 = vmatpush3.bf16.msra.mxu1 %v11445_v31 }
0x1080   : > { %9876 = vmatprep.subr.bf16.mxu1 %v11449_v35  ;;  %v4545_v14 = vpack.c.bf16 %v4535_v41, %v4534_v43  ;;  %v4536_v33 = vmul.f32 %v10831_v3, %v13007_v27  ;;  %v10442_v27 = vld [vmem:[%s14176_s3 + $0xa0] sm:$0xff]  }
0x1081   : > { %v10833_v59 = vpop.eup %10832 }
0x1082   : > { %9829 = vmatmul.mubr.bf16.gmra.mrb[176].mxu1 %v4545_v14  ;;  %v4537_v7 = vmul.f32 %v10833_v59, %v13010_v51 }
0x1083   : > { %v10835_v37 = vpop.eup %10834  ;;  %9877 = vmatpush3.bf16.msra.mxu1 %v11449_v35 }
0x1084   : > { %9878 = vmatprep.subr.bf16.mxu1 %v11453_v39  ;;  %v4546_v30 = vpack.c.bf16 %v4537_v7, %v4536_v33  ;;  %v4538_v56 = vmul.f32 %v10835_v37, %v13013_v54  ;;  %v10443_v54 = vld [vmem:[%s14176_s3 + $0xa8] sm:$0xff]  }
0x1085   : > { %v10837_v10 = vpop.eup %10836 }
0x1086   : > { %9832 = vmatprep.mubr.bf16.mxu1 %v4546_v30  ;;  %v4539_v15 = vmul.f32 %v10837_v10, %v13016_v60  ;;  %v10444_v60 = vld [vmem:[%s14176_s3 + $0xb0] sm:$0xff]  }
0x1087   : > { %9879 = vmatpush3.bf16.msra.mxu1 %v11453_v39 }
0x1088   : > { %9880 = vmatprep.subr.bf16.mxu1 %v11457_v42  ;;  %v4547_v51 = vpack.c.bf16 %v4539_v15, %v4538_v56 }
0x108a   : > { %9833 = vmatmul.mubr.bf16.gmra.mrb[180].mxu1 %v4547_v51 }
0x108b   : > { %9881 = vmatpush3.bf16.msra.mxu1 %v11457_v42  ;;  %9884 = vmatprep.mubr.bf16.mxu1 %v10442_v27 }
0x108c   : > { %9882 = vmatprep.subr.bf16.mxu1 %v11461_v47 }
0x108f   : > { %9883 = vmatpush3.bf16.msra.mxu1 %v11461_v47 }
0x1092   : > { %9885 = vmatmul.mubr.bf16.vlgmr.msra.gmra.mrb[184].mxu1 %v10443_v54 }
0x1093   : > { %9888 = vmatprep.mubr.bf16.mxu1 %v10444_v60 }
0x109a   : > { %9889 = vmatmul.mubr.bf16.gmra.mrb[188].mxu1 %v10445_v11 }
0x109b   : > { %9932 = vmatprep.mubr.msk.bf16.mxu1 %vm833_vm0, %v14366_v50 }
0x1145   : > { %v9822_v46 = vpop.f32.mrb[168].mxu1 }
0x1146   : > { %v4590_v25 = vpop.f32.mrb[169].mxu1 }
0x1147   : > { %v9823_v6 = vpop.f32.mrb[170].mxu1 }
0x1148   : > { %v4654_v4 = vpack.c.bf16 %v9823_v6, %v9822_v46  ;;  %v4593_v45 = vpop.f32.mrb[171].mxu1  ;;  %v10446_v6 = vld [vmem:[%s14175_s2 + $0x180] sm:$0xff]  }
0x1149   : > { %v4653_v0 = vpack.c.bf16 %v4593_v45, %v4590_v25  ;;  %v14367_v45 = vpack.c.bf16 %v12910_v36, %v12906_v58  ;;  %v14369_v36 = vpack.c.bf16 %v12922_v12, %v12918_v22  ;;  %v10451_v58 = vld [vmem:[%s14175_s2 + $0x1a8] sm:$0xff]   ;;  %v14371_v12 = vpack.c.bf16 %v12934_v1, %v12930_v49  ;;  %v10453_v22 = vld [vmem:[%s14175_s2 + $0x1b8] sm:$0xff]   ;;  %v10458_v49 = vld [vmem:[%s14177_s4 + $0x1a0] sm:$0xff]  }
0x114a   : > { %4662 = vst.msk [vmem:[#allocation2 + $0x30] sm:$0xff] %vm833_vm0, %v4654_v4  ;;  %v10447_v4 = vld [vmem:[%s14175_s2 + $0x188] sm:$0xff]   ;;  %v14373_v1 = vpack.c.bf16 %v12946_v9, %v12942_v57  ;;  %v10456_v9 = vld [vmem:[%s14177_s4 + $0x190] sm:$0xff]   ;;  %v10457_v57 = vld [vmem:[%s14177_s4 + $0x198] sm:$0xff]  }
0x114b   : > { %4661 = vst.msk [vmem:[#allocation2 + $0x10] sm:$0xff] %vm833_vm0, %v4653_v0  ;;  %v14368_v0 = vpack.c.bf16 %v12924_v62, %v12920_v19  ;;  %v14370_v19 = vpack.c.bf16 %v12936_v52, %v12932_v26  ;;  %v10450_v62 = vld [vmem:[%s14175_s2 + $0x1a0] sm:$0xff]   ;;  %v14372_v26 = vpack.c.bf16 %v12948_v13, %v12944_v44  ;;  %v10452_v52 = vld [vmem:[%s14175_s2 + $0x1b0] sm:$0xff]   ;;  %v10455_v13 = vld [vmem:[%s14177_s4 + $0x188] sm:$0xff]  }
0x114c   : > { %v10454_v44 = vld [vmem:[%s14177_s4 + $0x180] sm:$0xff]  }
0x114d   : > { %v9826_v55 = vpop.f32.mrb[172].mxu1 }
0x114e   : > { %v4606_v21 = vpop.f32.mrb[173].mxu1 }
0x114f   : > { %v9827_v2 = vpop.f32.mrb[174].mxu1 }
0x1150   : > { %v4656_v16 = vpack.c.bf16 %v9827_v2, %v9826_v55  ;;  %v4609_v61 = vpop.f32.mrb[175].mxu1  ;;  %v10448_v55 = vld [vmem:[%s14175_s2 + $0x190] sm:$0xff]   ;;  %v10459_v2 = vld [vmem:[%s14177_s4 + $0x1a8] sm:$0xff]  }
0x1151   : > { %v4655_v53 = vpack.c.bf16 %v4609_v61, %v4606_v21  ;;  %v10449_v21 = vld [vmem:[%s14175_s2 + $0x198] sm:$0xff]  }
0x1152   : > { %4664 = vst.msk [vmem:[#allocation2 + $0x70] sm:$0xff] %vm833_vm0, %v4656_v16  ;;  %v10460_v16 = vld [vmem:[%s14177_s4 + $0x1b0] sm:$0xff]   ;;  %v10461_v61 = vld [vmem:[%s14177_s4 + $0x1b8] sm:$0xff]  }
0x1153   : > { %4663 = vst.msk [vmem:[#allocation2 + $0x50] sm:$0xff] %vm833_vm0, %v4655_v53  ;;  %v14374_v53 = vld [vmem:[#allocation12_spill] sm:$0xff] }
0x1155   : > { %v9830_v18 = vpop.f32.mrb[176].mxu1 }
0x1156   : > { %v4622_v17 = vpop.f32.mrb[177].mxu1 }
0x1157   : > { %v9831_v32 = vpop.f32.mrb[178].mxu1 }
0x1158   : > { %v4658_v48 = vpack.c.bf16 %v9831_v32, %v9830_v18  ;;  %v4625_v43 = vpop.f32.mrb[179].mxu1  ;;  %v14375_v18 = vld [vmem:[#allocation13_spill] sm:$0xff]  ;;  %v14377_v32 = vld [vmem:[#allocation15_spill] sm:$0xff] }
0x1159   : > { %v4657_v41 = vpack.c.bf16 %v4625_v43, %v4622_v17  ;;  %v14376_v17 = vld [vmem:[#allocation14_spill] sm:$0xff]  ;;  %v14379_v43 = vld [vmem:[#allocation17_spill] sm:$0xff] }
0x115a   : > { %4666 = vst.msk [vmem:[#allocation2 + $0xb0] sm:$0xff] %vm833_vm0, %v4658_v48  ;;  %v14378_v48 = vld [vmem:[#allocation16_spill] sm:$0xff] }
0x115b   : > { %4665 = vst.msk [vmem:[#allocation2 + $0x90] sm:$0xff] %vm833_vm0, %v4657_v41  ;;  %v14380_v41 = vld [vmem:[#allocation18_spill] sm:$0xff] }
0x115d   : > { %v9834_v3 = vpop.f32.mrb[180].mxu1 }
0x115e   : > { %v4638_v14 = vpop.f32.mrb[181].mxu1 }
0x115f   : > { %v9835_v59 = vpop.f32.mrb[182].mxu1 }
0x1160   : > { %v4660_v33 = vpack.c.bf16 %v9835_v59, %v9834_v3  ;;  %v4641_v7 = vpop.f32.mrb[183].mxu1  ;;  %v14381_v3 = vld [vmem:[#allocation19_spill] sm:$0xff] }
0x1161   : > { %v4659_v37 = vpack.c.bf16 %v4641_v7, %v4638_v14 }
0x1162   : > { %4668 = vst.msk [vmem:[#allocation2 + $0xf0] sm:$0xff] %vm833_vm0, %v4660_v33 }
0x1163   : > { %4667 = vst.msk [vmem:[#allocation2 + $0xd0] sm:$0xff] %vm833_vm0, %v4659_v37 }
0x1165   : > { %v9886_v30 = vpop.f32.mrb[184].mxu1 }
0x1166   : > { %v4898_v10 = vpop.f32.mrb[185].mxu1 }
0x1167   : > { %v9887_v56 = vpop.f32.mrb[186].mxu1 }
0x1168   : > { %v5116_v15 = vpack.c.bf16 %v9887_v56, %v9886_v30  ;;  %v4901_v27 = vpop.f32.mrb[187].mxu1 }
0x1169   : > { %v5115_v51 = vpack.c.bf16 %v4901_v27, %v4898_v10 }
0x116b   : > { %9924 = vmatprep.subr.bf16.mxu1 %v5115_v51 }
0x116c   : > { %9925 = vmatpush3.bf16.msra.mxu1 %v5115_v51 }
0x116d   : > { %v9890_v54 = vpop.f32.mrb[188].mxu1  ;;  %9926 = vmatprep.subr.bf16.mxu1 %v5116_v15 }
0x116e   : > { %v4914_v60 = vpop.f32.mrb[189].mxu1 }
0x116f   : > { %v9891_v11 = vpop.f32.mrb[190].mxu1 }
0x1170   : > { %v5118_v50 = vpack.c.bf16 %v9891_v11, %v9890_v54  ;;  %v4917_v46 = vpop.f32.mrb[191].mxu1  ;;  %9927 = vmatpush3.bf16.msra.mxu1 %v5116_v15 }
0x1171   : > { %v5117_v25 = vpack.c.bf16 %v4917_v46, %v4914_v60 }
0x1173   : > { %9928 = vmatprep.subr.bf16.mxu1 %v5117_v25 }
0x1174   : > { %9929 = vmatpush3.bf16.msra.mxu1 %v5117_v25 }
0x1175   : > { %9930 = vmatprep.subr.bf16.mxu1 %v5118_v50 }
0x1178   : > { %9931 = vmatpush3.bf16.msra.mxu1 %v5118_v50 }
0x1179   : > { %9980 = vmatprep.subr.bf16.mxu1 %v10446_v6 }
0x117b   : > { %9933 = vmatmul.mubr.msk.bf16.vlgmr.msra.gmra.mrb[192].mxu1 %vm833_vm0, %v14367_v45 }
0x117c   : > { %9981 = vmatpush3.bf16.msra.mxu1 %v10446_v6  ;;  %9936 = vmatprep.mubr.msk.bf16.mxu1 %vm833_vm0, %v14368_v0 }
0x117d   : > { %9982 = vmatprep.subr.bf16.mxu1 %v10447_v4 }
0x1180   : > { %9983 = vmatpush3.bf16.msra.mxu1 %v10447_v4 }
0x1181   : > { %9984 = vmatprep.subr.bf16.mxu1 %v10448_v55 }
0x1183   : > { %9937 = vmatmul.mubr.msk.bf16.gmra.mrb[196].mxu1 %vm833_vm0, %v14369_v36 }
0x1184   : > { %9985 = vmatpush3.bf16.msra.mxu1 %v10448_v55  ;;  %9940 = vmatprep.mubr.msk.bf16.mxu1 %vm833_vm0, %v14370_v19 }
0x1185   : > { %9986 = vmatprep.subr.bf16.mxu1 %v10449_v21 }
0x1188   : > { %9987 = vmatpush3.bf16.msra.mxu1 %v10449_v21 }
0x1189   : > { %9988 = vmatprep.subr.bf16.mxu1 %v10450_v62 }
0x118b   : > { %9941 = vmatmul.mubr.msk.bf16.gmra.mrb[200].mxu1 %vm833_vm0, %v14371_v12 }
0x118c   : > { %9989 = vmatpush3.bf16.msra.mxu1 %v10450_v62  ;;  %9944 = vmatprep.mubr.msk.bf16.mxu1 %vm833_vm0, %v14372_v26 }
0x118d   : > { %9990 = vmatprep.subr.bf16.mxu1 %v10451_v58 }
0x1190   : > { %9991 = vmatpush3.bf16.msra.mxu1 %v10451_v58 }
0x1191   : > { %9992 = vmatprep.subr.bf16.mxu1 %v10452_v52 }
0x1193   : > { %9945 = vmatmul.mubr.msk.bf16.gmra.mrb[204].mxu1 %vm833_vm0, %v14373_v1 }
0x1194   : > { %9993 = vmatpush3.bf16.msra.mxu1 %v10452_v52  ;;  %9996 = vmatprep.mubr.bf16.mxu1 %v11220_v8 }
0x1195   : > { %9994 = vmatprep.subr.bf16.mxu1 %v10453_v22 }
0x1198   : > { %9995 = vmatpush3.bf16.msra.mxu1 %v10453_v22 }
0x1199   : > { %10036 = vmatprep.subr.bf16.mxu1 %v10454_v44 }
0x119b   : > { %9997 = vmatmul.mubr.bf16.vlgmr.msra.gmra.mrb[208].mxu1 %v11261_v23 }
0x119c   : > { %10037 = vmatpush3.bf16.msra.mxu1 %v10454_v44  ;;  %10000 = vmatprep.mubr.bf16.mxu1 %v14272_v63 }
0x119d   : > { %10038 = vmatprep.subr.bf16.mxu1 %v10455_v13 }
0x11a0   : > { %10039 = vmatpush3.bf16.msra.mxu1 %v10455_v13 }
0x11a1   : > { %10040 = vmatprep.subr.bf16.mxu1 %v10456_v9 }
0x11a3   : > { %10001 = vmatmul.mubr.bf16.gmra.mrb[212].mxu1 %v14273_v29 }
0x11a4   : > { %10041 = vmatpush3.bf16.msra.mxu1 %v10456_v9  ;;  %10004 = vmatprep.mubr.bf16.mxu1 %v14274_v38 }
0x11a5   : > { %10042 = vmatprep.subr.bf16.mxu1 %v10457_v57 }
0x11a8   : > { %10043 = vmatpush3.bf16.msra.mxu1 %v10457_v57 }
0x11a9   : > { %10044 = vmatprep.subr.bf16.mxu1 %v10458_v49 }
0x11ab   : > { %10005 = vmatmul.mubr.bf16.gmra.mrb[216].mxu1 %v14275_v40 }
0x11ac   : > { %10045 = vmatpush3.bf16.msra.mxu1 %v10458_v49  ;;  %10008 = vmatprep.mubr.bf16.mxu1 %v14276_v5 }
0x11ad   : > { %10046 = vmatprep.subr.bf16.mxu1 %v10459_v2 }
0x11b0   : > { %10047 = vmatpush3.bf16.msra.mxu1 %v10459_v2 }
0x11b1   : > { %10048 = vmatprep.subr.bf16.mxu1 %v10460_v16 }
0x11b3   : > { %10009 = vmatmul.mubr.bf16.gmra.mrb[220].mxu1 %v14277_v34 }
0x11b4   : > { %10049 = vmatpush3.bf16.msra.mxu1 %v10460_v16  ;;  %10052 = vmatprep.mubr.bf16.mxu1 %v14374_v53 }
0x11b5   : > { %10050 = vmatprep.subr.bf16.mxu1 %v10461_v61 }
0x11b8   : > { %10051 = vmatpush3.bf16.msra.mxu1 %v10461_v61 }
0x11bb   : > { %10053 = vmatmul.mubr.bf16.vlgmr.msra.gmra.mrb[224].mxu1 %v14375_v18 }
0x11bc   : > { %10056 = vmatprep.mubr.bf16.mxu1 %v14376_v17 }
0x11c3   : > { %10057 = vmatmul.mubr.bf16.gmra.mrb[228].mxu1 %v14377_v32 }
0x11c4   : > { %10060 = vmatprep.mubr.bf16.mxu1 %v14378_v48 }
0x11cb   : > { %10061 = vmatmul.mubr.bf16.gmra.mrb[232].mxu1 %v14379_v43 }
0x11cc   : > { %10064 = vmatprep.mubr.bf16.mxu1 %v14380_v41 }
0x11d3   : > { %10065 = vmatmul.mubr.bf16.gmra.mrb[236].mxu1 %v14381_v3 }
0x124e   : > { %v13166_v14 = vpop.f32.mrb[192].mxu1 }
0x124f   : > { %v13168_v59 = vpop.f32.mrb[193].mxu1 }
0x1250   : > { %5240 = vmax.xlane.f32.xlu1 %v13168_v59  ;;  %v13171_v33 = vpop.f32.mrb[194].mxu1 }
0x1251   : > { %v13173_v7 = vpop.f32.mrb[195].mxu1 }
0x1252   : > { %5242 = vmax.xlane.f32.xlu0 %v13173_v7 }
0x1254   : > { %5244 = vmax.xlane.f32.xlu1 %v13166_v14 }
0x1256   : > { %5246 = vmax.xlane.f32.xlu0 %v13171_v33  ;;  %v13178_v37 = vpop.f32.mrb[196].mxu1 }
0x1257   : > { %v13180_v30 = vpop.f32.mrb[197].mxu1 }
0x1258   : > { %5248 = vmax.xlane.f32.xlu1 %v13180_v30  ;;  %v13183_v10 = vpop.f32.mrb[198].mxu1 }
0x1259   : > { %v13185_v56 = vpop.f32.mrb[199].mxu1 }
0x125a   : > { %5250 = vmax.xlane.f32.xlu0 %v13185_v56 }
0x125c   : > { %5252 = vmax.xlane.f32.xlu1 %v13178_v37 }
0x125e   : > { %5254 = vmax.xlane.f32.xlu0 %v13183_v10  ;;  %v13190_v15 = vpop.f32.mrb[200].mxu1 }
0x125f   : > { %v13192_v27 = vpop.f32.mrb[201].mxu1 }
0x1260   : > { %5256 = vmax.xlane.f32.xlu1 %v13192_v27  ;;  %v13195_v51 = vpop.f32.mrb[202].mxu1 }
0x1261   : > { %v13197_v54 = vpop.f32.mrb[203].mxu1 }
0x1262   : > { %5258 = vmax.xlane.f32.xlu0 %v13197_v54 }
0x1264   : > { %5260 = vmax.xlane.f32.xlu1 %v13190_v15 }
0x1266   : > { %5262 = vmax.xlane.f32.xlu0 %v13195_v51  ;;  %v13202_v60 = vpop.f32.mrb[204].mxu1 }
0x1267   : > { %v13204_v11 = vpop.f32.mrb[205].mxu1 }
0x1268   : > { %5264 = vmax.xlane.f32.xlu1 %v13204_v11  ;;  %v13207_v50 = vpop.f32.mrb[206].mxu1 }
0x1269   : > { %v13209_v46 = vpop.f32.mrb[207].mxu1 }
0x126a   : > { %5266 = vmax.xlane.f32.xlu0 %v13209_v46 }
0x126c   : > { %5268 = vmax.xlane.f32.xlu1 %v13202_v60 }
0x126e   : > { %5270 = vmax.xlane.f32.xlu0 %v13207_v50  ;;  %v9998_v25 = vpop.f32.mrb[208].mxu1 }
0x126f   : > { %v13214_v6 = vmul.f32 0.125, %v9998_v25  ;;  %v5644_v4 = vpop.f32.mrb[209].mxu1 }
0x1270   : > { %v13216_v45 = vmul.f32 0.125, %v5644_v4  ;;  %v9999_v0 = vpop.f32.mrb[210].mxu1 }
0x1271   : > { %v13218_v55 = vmul.f32 0.125, %v9999_v0  ;;  %v5647_v21 = vpop.f32.mrb[211].mxu1 }
0x1272   : > { %v13220_v36 = vmul.f32 0.125, %v5647_v21 }
0x1276   : > { %v10002_v58 = vpop.f32.mrb[212].mxu1 }
0x1277   : > { %v13226_v12 = vmul.f32 0.125, %v10002_v58  ;;  %v5660_v26 = vpop.f32.mrb[213].mxu1 }
0x1278   : > { %v13228_v52 = vmul.f32 0.125, %v5660_v26  ;;  %v10003_v22 = vpop.f32.mrb[214].mxu1 }
0x1279   : > { %v13230_v1 = vmul.f32 0.125, %v10003_v22  ;;  %v5663_v44 = vpop.f32.mrb[215].mxu1 }
0x127a   : > { %v13232_v13 = vmul.f32 0.125, %v5663_v44 }
0x127e   : > { %v10006_v49 = vpop.f32.mrb[216].mxu1 }
0x127f   : > { %v13238_v2 = vmul.f32 0.125, %v10006_v49  ;;  %v5676_v16 = vpop.f32.mrb[217].mxu1 }
0x1280   : > { %v13240_v61 = vmul.f32 0.125, %v5676_v16  ;;  %v10007_v25 = vpop.f32.mrb[218].mxu1 }
0x1281   : > { %v13242_v4 = vmul.f32 0.125, %v10007_v25  ;;  %v5679_v0 = vpop.f32.mrb[219].mxu1 }
0x1282   : > { %v13244_v21 = vmul.f32 0.125, %v5679_v0 }
0x1286   : > { %v10010_v22 = vpop.f32.mrb[220].mxu1 }
0x1287   : > { %v13250_v44 = vmul.f32 0.125, %v10010_v22  ;;  %v5692_v49 = vpop.f32.mrb[221].mxu1 }
0x1288   : > { %v13252_v9 = vmul.f32 0.125, %v5692_v49  ;;  %v10011_v16 = vpop.f32.mrb[222].mxu1 }
0x1289   : > { %v13254_v57 = vmul.f32 0.125, %v10011_v16  ;;  %v5695_v25 = vpop.f32.mrb[223].mxu1 }
0x128a   : > { %v13256_v19 = vmul.f32 0.125, %v5695_v25 }
0x128e   : > { %v10054_v62 = vpop.f32.mrb[224].mxu1 }
0x128f   : > { %v5904_v26 = vpop.f32.mrb[225].mxu1 }
0x1290   : > { %v10055_v3 = vpop.f32.mrb[226].mxu1 }
0x1291   : > { %v6269_v22 = vpack.c.bf16 %v10055_v3, %v10054_v62  ;;  %v5907_v41 = vpop.f32.mrb[227].mxu1 }
0x1292   : > { %v6268_v43 = vpack.c.bf16 %v5907_v41, %v5904_v26 }
0x1294   : > { %10092 = vmatprep.subr.bf16.mxu1 %v6268_v43 }
0x1295   : > { %10093 = vmatpush3.bf16.msra.mxu1 %v6268_v43 }
0x1296   : > { %v10058_v49 = vpop.f32.mrb[228].mxu1  ;;  %10094 = vmatprep.subr.bf16.mxu1 %v6269_v22 }
0x1297   : > { %v5920_v16 = vpop.f32.mrb[229].mxu1 }
0x1298   : > { %v10059_v48 = vpop.f32.mrb[230].mxu1 }
0x1299   : > { %v6271_v25 = vpack.c.bf16 %v10059_v48, %v10058_v49  ;;  %v5923_v32 = vpop.f32.mrb[231].mxu1  ;;  %10095 = vmatpush3.bf16.msra.mxu1 %v6269_v22 }
0x129a   : > { %v6270_v17 = vpack.c.bf16 %v5923_v32, %v5920_v16 }
0x129c   : > { %10096 = vmatprep.subr.bf16.mxu1 %v6270_v17 }
0x129d   : > { %10097 = vmatpush3.bf16.msra.mxu1 %v6270_v17 }
0x129e   : > { %v10062_v0 = vpop.f32.mrb[232].mxu1  ;;  %10098 = vmatprep.subr.bf16.mxu1 %v6271_v25 }
0x129f   : > { %v5936_v58 = vpop.f32.mrb[233].mxu1 }
0x12a0   : > { %v10063_v18 = vpop.f32.mrb[234].mxu1 }
0x12a1   : > { %v6273_v53 = vpack.c.bf16 %v10063_v18, %v10062_v0  ;;  %v5939_v3 = vpop.f32.mrb[235].mxu1  ;;  %10099 = vmatpush3.bf16.msra.mxu1 %v6271_v25 }
0x12a2   : > { %v6272_v41 = vpack.c.bf16 %v5939_v3, %v5936_v58 }
0x12a4   : > { %10100 = vmatprep.subr.bf16.mxu1 %v6272_v41 }
0x12a5   : > { %10101 = vmatpush3.bf16.msra.mxu1 %v6272_v41 }
0x12a6   : > { %v10066_v43 = vpop.f32.mrb[236].mxu1  ;;  %10102 = vmatprep.subr.bf16.mxu1 %v6273_v53 }
0x12a7   : > { %v5952_v62 = vpop.f32.mrb[237].mxu1 }
0x12a8   : > { %v10067_v26 = vpop.f32.mrb[238].mxu1 }
0x12a9   : > { %v6275_v48 = vpack.c.bf16 %v10067_v26, %v10066_v43  ;;  %v5955_v49 = vpop.f32.mrb[239].mxu1  ;;  %10103 = vmatpush3.bf16.msra.mxu1 %v6273_v53 }
0x12aa   : > { %v6274_v32 = vpack.c.bf16 %v5955_v49, %v5952_v62 }
0x12ac   : > { %10104 = vmatprep.subr.bf16.mxu1 %v6274_v32 }
0x12ad   : > { %10105 = vmatpush3.bf16.msra.mxu1 %v6274_v32 }
0x12ae   : > { %10106 = vmatprep.subr.bf16.mxu1 %v6275_v48 }
0x12b1   : > { %10107 = vmatpush3.bf16.msra.mxu1 %v6275_v48 }
0x12b2   : > { %10156 = vmatprep.subr.bf16.mxu1 %v11430_v20 }
0x12dd   : > { %v5241_v18 = vpop.xlane.xlu1 %5240 }
0x12de   : > { %v5272_v17 = vsub.f32 %v13168_v59, %v5241_v18 }
0x12df   : > { %v5243_v58 = vpop.xlane.xlu0 %5242 }
0x12e0   : > { %v5288_v0 = vmul.f32 1.442695, %v5272_v17  ;;  %v5273_v22 = vsub.f32 %v13173_v7, %v5243_v58 }
0x12e1   : > { %v5245_v16 = vpop.xlane.xlu1 %5244 }
0x12e2   : > { %10838 = vpow2.f32 %v5288_v0  ;;  %v5290_v25 = vmul.f32 1.442695, %v5273_v22  ;;  %v5274_v3 = vsub.f32 %v13166_v14, %v5245_v16 }
0x12e3   : > { %v5247_v53 = vpop.xlane.xlu0 %5246 }
0x12e4   : > { %10840 = vpow2.f32 %v5290_v25  ;;  %v5292_v41 = vmul.f32 1.442695, %v5274_v3  ;;  %v5275_v43 = vsub.f32 %v13171_v33, %v5247_v53 }
0x12e5   : > { %v5249_v62 = vpop.xlane.xlu1 %5248 }
0x12e6   : > { %10842 = vpow2.f32 %v5292_v41  ;;  %v5294_v26 = vmul.f32 1.442695, %v5275_v43  ;;  %v5276_v48 = vsub.f32 %v13180_v30, %v5249_v62 }
0x12e7   : > { %v5251_v59 = vpop.xlane.xlu0 %5250 }
0x12e8   : > { %10844 = vpow2.f32 %v5294_v26  ;;  %v5296_v49 = vmul.f32 1.442695, %v5276_v48  ;;  %v5277_v7 = vsub.f32 %v13185_v56, %v5251_v59 }
0x12e9   : > { %v5253_v32 = vpop.xlane.xlu1 %5252 }
0x12ea   : > { %10846 = vpow2.f32 %v5296_v49  ;;  %v5298_v18 = vmul.f32 1.442695, %v5277_v7  ;;  %v5278_v14 = vsub.f32 %v13178_v37, %v5253_v32 }
0x12eb   : > { %v5255_v17 = vpop.xlane.xlu0 %5254 }
0x12ec   : > { %v13270_v58 = vpop.eup %10838  ;;  %10848 = vpow2.f32 %v5298_v18  ;;  %v5300_v33 = vmul.f32 1.442695, %v5278_v14  ;;  %v5279_v0 = vsub.f32 %v13183_v10, %v5255_v17 }
0x12ed   : > { %v5257_v22 = vpop.xlane.xlu1 %5256  ;;  %5320 = vadd.xlane.f32.xlu1 %v13270_v58 }
0x12ee   : > { %v13274_v30 = vpop.eup %10840  ;;  %10850 = vpow2.f32 %v5300_v33  ;;  %v5302_v16 = vmul.f32 1.442695, %v5279_v0  ;;  %v5280_v56 = vsub.f32 %v13192_v27, %v5257_v22 }
0x12ef   : > { %v5259_v25 = vpop.xlane.xlu0 %5258  ;;  %5322 = vadd.xlane.f32.xlu0 %v13274_v30 }
0x12f0   : > { %v13278_v37 = vpop.eup %10842  ;;  %10852 = vpow2.f32 %v5302_v16  ;;  %v5304_v3 = vmul.f32 1.442695, %v5280_v56  ;;  %v5281_v53 = vsub.f32 %v13197_v54, %v5259_v25 }
0x12f1   : > { %v5261_v41 = vpop.xlane.xlu1 %5260  ;;  %5324 = vadd.xlane.f32.xlu1 %v13278_v37 }
0x12f2   : > { %v13282_v10 = vpop.eup %10844  ;;  %10854 = vpow2.f32 %v5304_v3  ;;  %v5306_v43 = vmul.f32 1.442695, %v5281_v53  ;;  %v5282_v62 = vsub.f32 %v13190_v15, %v5261_v41 }
0x12f3   : > { %v5263_v26 = vpop.xlane.xlu0 %5262  ;;  %5326 = vadd.xlane.f32.xlu0 %v13282_v10 }
0x12f4   : > { %v13286_v27 = vpop.eup %10846  ;;  %10856 = vpow2.f32 %v5306_v43  ;;  %v5308_v48 = vmul.f32 1.442695, %v5282_v62  ;;  %v5283_v59 = vsub.f32 %v13195_v51, %v5263_v26 }
0x12f5   : > { %5328 = vadd.xlane.f32.xlu1 %v13286_v27  ;;  %v5265_v54 = vpop.xlane.xlu1 %5264 }
0x12f6   : > { %v13290_v49 = vpop.eup %10848  ;;  %10858 = vpow2.f32 %v5308_v48  ;;  %v5310_v7 = vmul.f32 1.442695, %v5283_v59  ;;  %v5284_v32 = vsub.f32 %v13204_v11, %v5265_v54 }
0x12f7   : > { %5330 = vadd.xlane.f32.xlu0 %v13290_v49  ;;  %v5267_v15 = vpop.xlane.xlu0 %5266 }
0x12f8   : > { %v13294_v18 = vpop.eup %10850  ;;  %10860 = vpow2.f32 %v5310_v7  ;;  %v5312_v14 = vmul.f32 1.442695, %v5284_v32  ;;  %v5285_v17 = vsub.f32 %v13209_v46, %v5267_v15 }
0x12f9   : > { %5332 = vadd.xlane.f32.xlu1 %v13294_v18  ;;  %v5269_v51 = vpop.xlane.xlu1 %5268 }
0x12fa   : > { %v13298_v33 = vpop.eup %10852  ;;  %10862 = vpow2.f32 %v5312_v14  ;;  %v5314_v0 = vmul.f32 1.442695, %v5285_v17  ;;  %v5286_v22 = vsub.f32 %v13202_v60, %v5269_v51 }
0x12fb   : > { %5334 = vadd.xlane.f32.xlu0 %v13298_v33  ;;  %v5271_v11 = vpop.xlane.xlu0 %5270 }
0x12fc   : > { %v13302_v16 = vpop.eup %10854  ;;  %10864 = vpow2.f32 %v5314_v0  ;;  %v5316_v56 = vmul.f32 1.442695, %v5286_v22  ;;  %v5287_v25 = vsub.f32 %v13207_v50, %v5271_v11 }
0x12fd   : > { %5336 = vadd.xlane.f32.xlu1 %v13302_v16 }
0x12fe   : > { %v13306_v46 = vpop.eup %10856  ;;  %10866 = vpow2.f32 %v5316_v56  ;;  %v5318_v3 = vmul.f32 1.442695, %v5287_v25 }
0x12ff   : > { %5338 = vadd.xlane.f32.xlu0 %v13306_v46 }
0x1300   : > { %v13309_v53 = vpop.eup %10858  ;;  %10868 = vpow2.f32 %v5318_v3 }
0x1301   : > { %5340 = vadd.xlane.f32.xlu1 %v13309_v53 }
0x1302   : > { %v13312_v60 = vpop.eup %10860 }
0x1303   : > { %5342 = vadd.xlane.f32.xlu0 %v13312_v60 }
0x1304   : > { %v13315_v41 = vpop.eup %10862 }
0x1305   : > { %5344 = vadd.xlane.f32.xlu1 %v13315_v41 }
0x1306   : > { %v13318_v50 = vpop.eup %10864 }
0x1307   : > { %5346 = vadd.xlane.f32.xlu0 %v13318_v50 }
0x1308   : > { %v13321_v43 = vpop.eup %10866 }
0x1309   : > { %5348 = vadd.xlane.f32.xlu1 %v13321_v43 }
0x130a   : > { %v13324_v62 = vpop.eup %10868 }
0x130b   : > { %5350 = vadd.xlane.f32.xlu0 %v13324_v62 }
0x137a   : > { %v5321_v26 = vpop.xlane.xlu1 %5320 }
0x137b   : > { %10870 = vrcp.f32 %v5321_v26 }
0x137c   : > { %v5323_v48 = vpop.xlane.xlu0 %5322 }
0x137d   : > { %10872 = vrcp.f32 %v5323_v48 }
0x137e   : > { %v5325_v59 = vpop.xlane.xlu1 %5324 }
0x137f   : > { %10874 = vrcp.f32 %v5325_v59 }
0x1380   : > { %v5327_v54 = vpop.xlane.xlu0 %5326 }
0x1381   : > { %10876 = vrcp.f32 %v5327_v54 }
0x1382   : > { %v5329_v7 = vpop.xlane.xlu1 %5328 }
0x1383   : > { %10878 = vrcp.f32 %v5329_v7 }
0x1384   : > { %v5331_v32 = vpop.xlane.xlu0 %5330 }
0x1385   : > { %v10871_v15 = vpop.eup %10870  ;;  %10880 = vrcp.f32 %v5331_v32 }
0x1386   : > { %v5333_v14 = vpop.xlane.xlu1 %5332  ;;  %v5368_v0 = vmul.f32 %v10871_v15, %v13270_v58 }
0x1387   : > { %v10873_v17 = vpop.eup %10872  ;;  %10882 = vrcp.f32 %v5333_v14 }
0x1388   : > { %v5335_v51 = vpop.xlane.xlu0 %5334  ;;  %v5369_v22 = vmul.f32 %v10873_v17, %v13274_v30 }
0x1389   : > { %v10875_v11 = vpop.eup %10874  ;;  %10884 = vrcp.f32 %v5335_v51 }
0x138a   : > { %v5337_v56 = vpop.xlane.xlu1 %5336  ;;  %v5384_v25 = vpack.c.bf16 %v5369_v22, %v5368_v0  ;;  %v5370_v26 = vmul.f32 %v10875_v11, %v13278_v37 }
0x138b   : > { %v10877_v3 = vpop.eup %10876  ;;  %10886 = vrcp.f32 %v5337_v56 }
0x138c   : > { %v5371_v48 = vmul.f32 %v10877_v3, %v13282_v10  ;;  %9964 = vmatprep.mubr.bf16.mxu0 %v5384_v25  ;;  %v5339_v59 = vpop.xlane.xlu0 %5338 }
0x138d   : > { %v10879_v54 = vpop.eup %10878  ;;  %10888 = vrcp.f32 %v5339_v59 }
0x138e   : > { %v5341_v7 = vpop.xlane.xlu1 %5340  ;;  %v5385_v32 = vpack.c.bf16 %v5371_v48, %v5370_v26  ;;  %v5372_v30 = vmul.f32 %v10879_v54, %v13286_v27 }
0x138f   : > { %v10881_v14 = vpop.eup %10880  ;;  %10890 = vrcp.f32 %v5341_v7 }
0x1390   : > { %9965 = vmatmul.mubr.bf16.vlgmr.msra.gmra.mrb[208].mxu0 %v5385_v32  ;;  %v5343_v58 = vpop.xlane.xlu0 %5342  ;;  %v5373_v15 = vmul.f32 %v10881_v14, %v13290_v49 }
0x1391   : > { %v10883_v17 = vpop.eup %10882  ;;  %10013 = vmatpush3.bf16.msra.mxu0 %v11430_v20  ;;  %10892 = vrcp.f32 %v5343_v58 }
0x1392   : > { %10014 = vmatprep.subr.bf16.mxu0 %v11436_v24  ;;  %v5345_v37 = vpop.xlane.xlu1 %5344  ;;  %v5386_v10 = vpack.c.bf16 %v5373_v15, %v5372_v30  ;;  %v5374_v22 = vmul.f32 %v10883_v17, %v13294_v18 }
0x1393   : > { %v10885_v51 = vpop.eup %10884  ;;  %10894 = vrcp.f32 %v5345_v37  ;;  %v10465_v37 = vld [vmem:[%s14176_s3 + $0xd8] sm:$0xff]  }
0x1394   : > { %9968 = vmatprep.mubr.bf16.mxu0 %v5386_v10  ;;  %v5347_v0 = vpop.xlane.xlu0 %5346  ;;  %v5375_v11 = vmul.f32 %v10885_v51, %v13298_v33  ;;  %v14382_v10 = vpack.c.bf16 %v13220_v36, %v13216_v45 }
0x1395   : > { %v10887_v56 = vpop.eup %10886  ;;  %10015 = vmatpush3.bf16.msra.mxu0 %v11436_v24  ;;  %10896 = vrcp.f32 %v5347_v0 }
0x1396   : > { %10016 = vmatprep.subr.bf16.mxu0 %v11441_v28  ;;  %v5349_v27 = vpop.xlane.xlu1 %5348  ;;  %v5387_v49 = vpack.c.bf16 %v5375_v11, %v5374_v22  ;;  %v5376_v26 = vmul.f32 %v10887_v56, %v13302_v16 }
0x1397   : > { %v10889_v25 = vpop.eup %10888  ;;  %10898 = vrcp.f32 %v5349_v27 }
0x1398   : > { %9969 = vmatmul.mubr.bf16.gmra.mrb[212].mxu0 %v5387_v49  ;;  %v5351_v3 = vpop.xlane.xlu0 %5350  ;;  %v5377_v48 = vmul.f32 %v10889_v25, %v13306_v46 }
0x1399   : > { %v10891_v59 = vpop.eup %10890  ;;  %10017 = vmatpush3.bf16.msra.mxu0 %v11441_v28  ;;  %10900 = vrcp.f32 %v5351_v3 }
0x139a   : > { %10018 = vmatprep.subr.bf16.mxu0 %v11445_v31  ;;  %v5388_v18 = vpack.c.bf16 %v5377_v48, %v5376_v26  ;;  %v5378_v54 = vmul.f32 %v10891_v59, %v13309_v53 }
0x139b   : > { %v10893_v33 = vpop.eup %10892 }
0x139c   : > { %9972 = vmatprep.mubr.bf16.mxu0 %v5388_v18  ;;  %v5379_v7 = vmul.f32 %v10893_v33, %v13312_v60 }
0x139d   : > { %v10895_v32 = vpop.eup %10894  ;;  %10019 = vmatpush3.bf16.msra.mxu0 %v11445_v31 }
0x139e   : > { %10020 = vmatprep.subr.bf16.mxu0 %v11449_v35  ;;  %v5389_v16 = vpack.c.bf16 %v5379_v7, %v5378_v54  ;;  %v5380_v14 = vmul.f32 %v10895_v32, %v13315_v41  ;;  %v10462_v41 = vld [vmem:[%s14176_s3 + $0xc0] sm:$0xff]  }
0x139f   : > { %v10897_v46 = vpop.eup %10896 }
0x13a0   : > { %9973 = vmatmul.mubr.bf16.gmra.mrb[216].mxu0 %v5389_v16  ;;  %v5381_v58 = vmul.f32 %v10897_v46, %v13318_v50 }
0x13a1   : > { %v10899_v30 = vpop.eup %10898  ;;  %10021 = vmatpush3.bf16.msra.mxu0 %v11449_v35 }
0x13a2   : > { %10022 = vmatprep.subr.bf16.mxu0 %v11453_v39  ;;  %v5390_v53 = vpack.c.bf16 %v5381_v58, %v5380_v14  ;;  %v5382_v60 = vmul.f32 %v10899_v30, %v13321_v43  ;;  %v10463_v43 = vld [vmem:[%s14176_s3 + $0xc8] sm:$0xff]   ;;  %v14383_v30 = vpack.c.bf16 %v13218_v55, %v13214_v6  ;;  %v14387_v6 = vpack.c.bf16 %v13242_v4, %v13238_v2 }
0x13a3   : > { %v10901_v15 = vpop.eup %10900  ;;  %v14388_v55 = vpack.c.bf16 %v13256_v19, %v13252_v9 }
0x13a4   : > { %9976 = vmatprep.mubr.bf16.mxu0 %v5390_v53  ;;  %v5383_v17 = vmul.f32 %v10901_v15, %v13324_v62  ;;  %v10464_v62 = vld [vmem:[%s14176_s3 + $0xd0] sm:$0xff]  }
0x13a5   : > { %10023 = vmatpush3.bf16.msra.mxu0 %v11453_v39 }
0x13a6   : > { %10024 = vmatprep.subr.bf16.mxu0 %v11457_v42  ;;  %v5391_v50 = vpack.c.bf16 %v5383_v17, %v5382_v60 }
0x13a8   : > { %9977 = vmatmul.mubr.bf16.gmra.mrb[220].mxu0 %v5391_v50 }
0x13a9   : > { %10025 = vmatpush3.bf16.msra.mxu0 %v11457_v42  ;;  %10028 = vmatprep.mubr.bf16.mxu0 %v10462_v41 }
0x13aa   : > { %10026 = vmatprep.subr.bf16.mxu0 %v11461_v47 }
0x13ad   : > { %10027 = vmatpush3.bf16.msra.mxu0 %v11461_v47 }
0x13b0   : > { %10029 = vmatmul.mubr.bf16.vlgmr.msra.gmra.mrb[224].mxu0 %v10463_v43 }
0x13b1   : > { %10032 = vmatprep.mubr.bf16.mxu0 %v10464_v62 }
0x13b8   : > { %10033 = vmatmul.mubr.bf16.gmra.mrb[228].mxu0 %v10465_v37 }
0x13b9   : > { %10076 = vmatprep.mubr.msk.bf16.mxu0 %vm833_vm0, %v14382_v10 }
0x1463   : > { %v13374_v51 = vpop.f32.mrb[208].mxu0 }
0x1464   : > { %v13376_v0 = vpop.f32.mrb[209].mxu0 }
0x1465   : > { %v13378_v22 = vpop.f32.mrb[210].mxu0 }
0x1466   : > { %v13382_v56 = vpop.f32.mrb[211].mxu0 }
0x146b   : > { %v13386_v49 = vpop.f32.mrb[212].mxu0 }
0x146c   : > { %v13388_v25 = vpop.f32.mrb[213].mxu0 }
0x146d   : > { %v13390_v45 = vpop.f32.mrb[214].mxu0 }
0x146e   : > { %v13394_v3 = vpop.f32.mrb[215].mxu0 }
0x1473   : > { %v13398_v48 = vpop.f32.mrb[216].mxu0 }
0x1474   : > { %v13400_v59 = vpop.f32.mrb[217].mxu0 }
0x1475   : > { %v13402_v18 = vpop.f32.mrb[218].mxu0 }
0x1476   : > { %v13406_v54 = vpop.f32.mrb[219].mxu0 }
0x147b   : > { %v13410_v32 = vpop.f32.mrb[220].mxu0 }
0x147c   : > { %v13412_v16 = vpop.f32.mrb[221].mxu0 }
0x147d   : > { %v13414_v46 = vpop.f32.mrb[222].mxu0 }
0x147e   : > { %v13418_v58 = vpop.f32.mrb[223].mxu0 }
0x1483   : > { %v10030_v53 = vpop.f32.mrb[224].mxu0 }
0x1484   : > { %v5774_v15 = vpop.f32.mrb[225].mxu0 }
0x1485   : > { %v10031_v60 = vpop.f32.mrb[226].mxu0 }
0x1486   : > { %v5992_v17 = vpack.c.bf16 %v10031_v60, %v10030_v53  ;;  %v5777_v41 = vpop.f32.mrb[227].mxu0  ;;  %v14384_v53 = vpack.c.bf16 %v13232_v13, %v13228_v52 }
0x1487   : > { %v5991_v50 = vpack.c.bf16 %v5777_v41, %v5774_v15  ;;  %v14385_v15 = vpack.c.bf16 %v13230_v1, %v13226_v12  ;;  %v14389_v12 = vpack.c.bf16 %v13254_v57, %v13250_v44 }
0x1489   : > { %10068 = vmatprep.subr.bf16.mxu0 %v5991_v50 }
0x148a   : > { %10069 = vmatpush3.bf16.msra.mxu0 %v5991_v50 }
0x148b   : > { %v10034_v43 = vpop.f32.mrb[228].mxu0  ;;  %10070 = vmatprep.subr.bf16.mxu0 %v5992_v17 }
0x148c   : > { %v5790_v62 = vpop.f32.mrb[229].mxu0 }
0x148d   : > { %v10035_v37 = vpop.f32.mrb[230].mxu0 }
0x148e   : > { %v5994_v10 = vpack.c.bf16 %v10035_v37, %v10034_v43  ;;  %v5793_v33 = vpop.f32.mrb[231].mxu0  ;;  %10071 = vmatpush3.bf16.msra.mxu0 %v5992_v17 }
0x148f   : > { %v5993_v14 = vpack.c.bf16 %v5793_v33, %v5790_v62  ;;  %v14386_v33 = vpack.c.bf16 %v13244_v21, %v13240_v61 }
0x1491   : > { %10072 = vmatprep.subr.bf16.mxu0 %v5993_v14 }
0x1492   : > { %10073 = vmatpush3.bf16.msra.mxu0 %v5993_v14 }
0x1493   : > { %10074 = vmatprep.subr.bf16.mxu0 %v5994_v10 }
0x1496   : > { %10075 = vmatpush3.bf16.msra.mxu0 %v5994_v10 }
0x1499   : > { %10077 = vmatmul.mubr.msk.bf16.vlgmr.msra.gmra.mrb[232].mxu0 %vm833_vm0, %v14383_v30 }
0x149a   : > { %10080 = vmatprep.mubr.msk.bf16.mxu0 %vm833_vm0, %v14384_v53 }
0x14a1   : > { %10081 = vmatmul.mubr.msk.bf16.gmra.mrb[236].mxu0 %vm833_vm0, %v14385_v15 }
0x14a2   : > { %10084 = vmatprep.mubr.msk.bf16.mxu0 %vm833_vm0, %v14386_v33 }
0x14a9   : > { %10085 = vmatmul.mubr.msk.bf16.gmra.mrb[240].mxu0 %vm833_vm0, %v14387_v6 }
0x14aa   : > { %10088 = vmatprep.mubr.msk.bf16.mxu0 %vm833_vm0, %v14388_v55 }
0x14b1   : > { %10089 = vmatmul.mubr.msk.bf16.gmra.mrb[244].mxu0 %vm833_vm0, %v14389_v12 }
0x14b2   : > { %10140 = vmatprep.mubr.bf16.mxu0 %v11220_v8 }
0x156c   : > { %v10078_v52 = vpop.f32.mrb[232].mxu0 }
0x156d   : > { %v6053_v1 = vpop.f32.mrb[233].mxu0 }
0x156e   : > { %6116 = vmax.xlane.f32.xlu1 %v6053_v1  ;;  %v10079_v13 = vpop.f32.mrb[234].mxu0 }
0x156f   : > { %v6056_v61 = vpop.f32.mrb[235].mxu0 }
0x1570   : > { %6118 = vmax.xlane.f32.xlu0 %v6056_v61 }
0x1572   : > { %6120 = vmax.xlane.f32.xlu1 %v10078_v52 }
0x1574   : > { %6122 = vmax.xlane.f32.xlu0 %v10079_v13  ;;  %v10082_v2 = vpop.f32.mrb[236].mxu0 }
0x1575   : > { %v6069_v4 = vpop.f32.mrb[237].mxu0 }
0x1576   : > { %6124 = vmax.xlane.f32.xlu1 %v6069_v4  ;;  %v10083_v19 = vpop.f32.mrb[238].mxu0 }
0x1577   : > { %v6072_v9 = vpop.f32.mrb[239].mxu0 }
0x1578   : > { %6126 = vmax.xlane.f32.xlu0 %v6072_v9 }
0x157a   : > { %6128 = vmax.xlane.f32.xlu1 %v10082_v2 }
0x157c   : > { %6130 = vmax.xlane.f32.xlu0 %v10083_v19  ;;  %v13451_v57 = vpop.f32.mrb[240].mxu0 }
0x157d   : > { %v6085_v21 = vpop.f32.mrb[241].mxu0 }
0x157e   : > { %6132 = vmax.xlane.f32.xlu1 %v6085_v21  ;;  %v13453_v8 = vpop.f32.mrb[242].mxu0 }
0x157f   : > { %v6088_v44 = vpop.f32.mrb[243].mxu0 }
0x1580   : > { %6134 = vmax.xlane.f32.xlu0 %v6088_v44 }
0x1582   : > { %6136 = vmax.xlane.f32.xlu1 %v13451_v57 }
0x1584   : > { %6138 = vmax.xlane.f32.xlu0 %v13453_v8  ;;  %v13457_v14 = vpop.f32.mrb[244].mxu0 }
0x1585   : > { %v13459_v30 = vpop.f32.mrb[245].mxu0 }
0x1586   : > { %6140 = vmax.xlane.f32.xlu1 %v13459_v30  ;;  %v13462_v60 = vpop.f32.mrb[246].mxu0 }
0x1587   : > { %v13464_v17 = vpop.f32.mrb[247].mxu0 }
0x1588   : > { %6142 = vmax.xlane.f32.xlu0 %v13464_v17 }
0x158a   : > { %6144 = vmax.xlane.f32.xlu1 %v13457_v14 }
0x158c   : > { %6146 = vmax.xlane.f32.xlu0 %v13462_v60 }
0x15fb   : > { %v6117_v41 = vpop.xlane.xlu1 %6116 }
0x15fc   : > { %v6148_v50 = vsub.f32 %v6053_v1, %v6117_v41 }
0x15fd   : > { %v6119_v43 = vpop.xlane.xlu0 %6118 }
0x15fe   : > { %v6164_v62 = vmul.f32 1.442695, %v6148_v50  ;;  %v6149_v37 = vsub.f32 %v6056_v61, %v6119_v43 }
0x15ff   : > { %v6121_v10 = vpop.xlane.xlu1 %6120 }
0x1600   : > { %10902 = vpow2.f32 %v6164_v62  ;;  %v6166_v53 = vmul.f32 1.442695, %v6149_v37  ;;  %v6150_v15 = vsub.f32 %v10078_v52, %v6121_v10 }
0x1601   : > { %v6123_v33 = vpop.xlane.xlu0 %6122 }
0x1602   : > { %10904 = vpow2.f32 %v6166_v53  ;;  %v6168_v6 = vmul.f32 1.442695, %v6150_v15  ;;  %v6151_v55 = vsub.f32 %v10079_v13, %v6123_v33 }
0x1603   : > { %v6125_v12 = vpop.xlane.xlu1 %6124 }
0x1604   : > { %10906 = vpow2.f32 %v6168_v6  ;;  %v6170_v36 = vmul.f32 1.442695, %v6151_v55  ;;  %v6152_v7 = vsub.f32 %v6069_v4, %v6125_v12 }
0x1605   : > { %v6127_v26 = vpop.xlane.xlu0 %6126 }
0x1606   : > { %10908 = vpow2.f32 %v6170_v36  ;;  %v6172_v11 = vmul.f32 1.442695, %v6152_v7  ;;  %v6153_v27 = vsub.f32 %v6072_v9, %v6127_v26 }
0x1607   : > { %v6129_v1 = vpop.xlane.xlu1 %6128 }
0x1608   : > { %10910 = vpow2.f32 %v6172_v11  ;;  %v6174_v41 = vmul.f32 1.442695, %v6153_v27  ;;  %v6154_v61 = vsub.f32 %v10082_v2, %v6129_v1 }
0x1609   : > { %v6131_v50 = vpop.xlane.xlu0 %6130 }
0x160a   : > { %v13469_v43 = vpop.eup %10902  ;;  %10912 = vpow2.f32 %v6174_v41  ;;  %v6176_v52 = vmul.f32 1.442695, %v6154_v61  ;;  %v6155_v62 = vsub.f32 %v10083_v19, %v6131_v50 }
0x160b   : > { %v6133_v37 = vpop.xlane.xlu1 %6132  ;;  %6196 = vadd.xlane.f32.xlu1 %v13469_v43 }
0x160c   : > { %v13472_v13 = vpop.eup %10904  ;;  %10914 = vpow2.f32 %v6176_v52  ;;  %v6178_v4 = vmul.f32 1.442695, %v6155_v62  ;;  %v6156_v36 = vsub.f32 %v6085_v21, %v6133_v37 }
0x160d   : > { %v6135_v7 = vpop.xlane.xlu0 %6134  ;;  %6198 = vadd.xlane.f32.xlu0 %v13472_v13 }
0x160e   : > { %v13475_v11 = vpop.eup %10906  ;;  %10916 = vpow2.f32 %v6178_v4  ;;  %v6180_v27 = vmul.f32 1.442695, %v6156_v36  ;;  %v6157_v26 = vsub.f32 %v6088_v44, %v6135_v7 }
0x160f   : > { %v6137_v2 = vpop.xlane.xlu1 %6136  ;;  %6200 = vadd.xlane.f32.xlu1 %v13475_v11 }
0x1610   : > { %v13478_v19 = vpop.eup %10908  ;;  %10918 = vpow2.f32 %v6180_v27  ;;  %v6182_v9 = vmul.f32 1.442695, %v6157_v26  ;;  %v6158_v10 = vsub.f32 %v13451_v57, %v6137_v2 }
0x1611   : > { %v6139_v53 = vpop.xlane.xlu0 %6138  ;;  %6202 = vadd.xlane.f32.xlu0 %v13478_v19 }
0x1612   : > { %v13482_v21 = vpop.eup %10910  ;;  %10920 = vpow2.f32 %v6182_v9  ;;  %v6184_v15 = vmul.f32 1.442695, %v6158_v10  ;;  %v6159_v33 = vsub.f32 %v13453_v8, %v6139_v53  ;;  %v10466_v10 = vld [vmem:[%s14175_s2 + $0x1c0] sm:$0xff]   ;;  %v10467_v53 = vld [vmem:[%s14175_s2 + $0x1c8] sm:$0xff]  }
0x1613   : > { %6204 = vadd.xlane.f32.xlu1 %v13482_v21  ;;  %v6141_v44 = vpop.xlane.xlu1 %6140  ;;  %10124 = vmatprep.subr.bf16.mxu0 %v10466_v10 }
0x1614   : > { %v13486_v6 = vpop.eup %10912  ;;  %10922 = vpow2.f32 %v6184_v15  ;;  %v6186_v55 = vmul.f32 1.442695, %v6159_v33  ;;  %v6160_v12 = vsub.f32 %v13459_v30, %v6141_v44  ;;  %10125 = vmatpush3.bf16.msra.mxu0 %v10466_v10  ;;  %v10468_v15 = vld [vmem:[%s14175_s2 + $0x1d0] sm:$0xff]   ;;  %v10469_v33 = vld [vmem:[%s14175_s2 + $0x1d8] sm:$0xff]   ;;  %v10470_v44 = vld [vmem:[%s14175_s2 + $0x1e0] sm:$0xff]  }
0x1615   : > { %6206 = vadd.xlane.f32.xlu0 %v13486_v6  ;;  %v6143_v57 = vpop.xlane.xlu0 %6142  ;;  %10126 = vmatprep.subr.bf16.mxu0 %v10467_v53 }
0x1616   : > { %v13490_v1 = vpop.eup %10914  ;;  %10924 = vpow2.f32 %v6186_v55  ;;  %v6188_v41 = vmul.f32 1.442695, %v6160_v12  ;;  %v6161_v61 = vsub.f32 %v13464_v17, %v6143_v57  ;;  %v10471_v55 = vld [vmem:[%s14175_s2 + $0x1e8] sm:$0xff]   ;;  %v10474_v12 = vld [vmem:[%s14175_s2 + $0x1f0] sm:$0xff]   ;;  %v10475_v57 = vld [vmem:[%s14175_s2 + $0x1f8] sm:$0xff]  }
0x1617   : > { %6208 = vadd.xlane.f32.xlu1 %v13490_v1  ;;  %v6145_v8 = vpop.xlane.xlu1 %6144 }
0x1618   : > { %v13494_v50 = vpop.eup %10916  ;;  %10926 = vpow2.f32 %v6188_v41  ;;  %v6190_v52 = vmul.f32 1.442695, %v6161_v61  ;;  %v6162_v62 = vsub.f32 %v13457_v14, %v6145_v8  ;;  %10127 = vmatpush3.bf16.msra.mxu0 %v10467_v53  ;;  %v14390_v41 = vld [vmem:[#allocation12_spill] sm:$0xff] }
0x1619   : > { %6210 = vadd.xlane.f32.xlu0 %v13494_v50  ;;  %v6147_v30 = vpop.xlane.xlu0 %6146  ;;  %10128 = vmatprep.subr.bf16.mxu0 %v10468_v15 }
0x161a   : > { %v13498_v37 = vpop.eup %10918  ;;  %10928 = vpow2.f32 %v6190_v52  ;;  %v6192_v4 = vmul.f32 1.442695, %v6162_v62  ;;  %v6163_v36 = vsub.f32 %v13462_v60, %v6147_v30 }
0x161b   : > { %6212 = vadd.xlane.f32.xlu1 %v13498_v37 }
0x161c   : > { %v13502_v17 = vpop.eup %10920  ;;  %10930 = vpow2.f32 %v6192_v4  ;;  %v6194_v7 = vmul.f32 1.442695, %v6163_v36  ;;  %10129 = vmatpush3.bf16.msra.mxu0 %v10468_v15 }
0x161d   : > { %6214 = vadd.xlane.f32.xlu0 %v13502_v17  ;;  %10130 = vmatprep.subr.bf16.mxu0 %v10469_v33 }
0x161e   : > { %v13505_v27 = vpop.eup %10922  ;;  %10932 = vpow2.f32 %v6194_v7 }
0x161f   : > { %6216 = vadd.xlane.f32.xlu1 %v13505_v27 }
0x1620   : > { %v13508_v14 = vpop.eup %10924  ;;  %10131 = vmatpush3.bf16.msra.mxu0 %v10469_v33 }
0x1621   : > { %6218 = vadd.xlane.f32.xlu0 %v13508_v14  ;;  %10132 = vmatprep.subr.bf16.mxu0 %v10470_v44 }
0x1622   : > { %v13511_v26 = vpop.eup %10926 }
0x1623   : > { %6220 = vadd.xlane.f32.xlu1 %v13511_v26 }
0x1624   : > { %v13514_v60 = vpop.eup %10928  ;;  %10133 = vmatpush3.bf16.msra.mxu0 %v10470_v44 }
0x1625   : > { %6222 = vadd.xlane.f32.xlu0 %v13514_v60  ;;  %10134 = vmatprep.subr.bf16.mxu0 %v10471_v55 }
0x1626   : > { %v13517_v2 = vpop.eup %10930 }
0x1627   : > { %6224 = vadd.xlane.f32.xlu1 %v13517_v2 }
0x1628   : > { %v13520_v9 = vpop.eup %10932  ;;  %10135 = vmatpush3.bf16.msra.mxu0 %v10471_v55 }
0x1629   : > { %6226 = vadd.xlane.f32.xlu0 %v13520_v9  ;;  %10136 = vmatprep.subr.bf16.mxu0 %v10474_v12 }
0x162c   : > { %10137 = vmatpush3.bf16.msra.mxu0 %v10474_v12 }
0x162d   : > { %10138 = vmatprep.subr.bf16.mxu0 %v10475_v57 }
0x1630   : > { %10139 = vmatpush3.bf16.msra.mxu0 %v10475_v57 }
0x1633   : > { %10141 = vmatmul.mubr.bf16.vlgmr.msra.gmra.mrb[248].mxu0 %v11261_v23 }
0x1634   : > { %10144 = vmatprep.mubr.bf16.mxu0 %v14272_v63 }
0x163b   : > { %10145 = vmatmul.mubr.bf16.gmra.mrb[252].mxu0 %v14273_v29 }
0x163c   : > { %10148 = vmatprep.mubr.bf16.mxu0 %v14274_v38 }
0x1643   : > { %10149 = vmatmul.mubr.bf16.gmra.mrb[0].mxu0 %v14275_v40 }
0x1644   : > { %10152 = vmatprep.mubr.bf16.mxu0 %v14276_v5 }
0x164b   : > { %10153 = vmatmul.mubr.bf16.gmra.mrb[4].mxu0 %v14277_v34 }
0x164c   : > { %10196 = vmatprep.mubr.bf16.mxu0 %v14390_v41 }
0x1698   : > { %v6197_v61 = vpop.xlane.xlu1 %6196 }
0x1699   : > { %10934 = vrcp.f32 %v6197_v61 }
0x169a   : > { %v6199_v8 = vpop.xlane.xlu0 %6198 }
0x169b   : > { %10936 = vrcp.f32 %v6199_v8 }
0x169c   : > { %v6201_v52 = vpop.xlane.xlu1 %6200 }
0x169d   : > { %10938 = vrcp.f32 %v6201_v52 }
0x169e   : > { %v6203_v23 = vpop.xlane.xlu0 %6202 }
0x169f   : > { %10940 = vrcp.f32 %v6203_v23 }
0x16a0   : > { %v6205_v63 = vpop.xlane.xlu1 %6204 }
0x16a1   : > { %10942 = vrcp.f32 %v6205_v63 }
0x16a2   : > { %v6207_v29 = vpop.xlane.xlu0 %6206 }
0x16a3   : > { %v10935_v38 = vpop.eup %10934  ;;  %10944 = vrcp.f32 %v6207_v29 }
0x16a4   : > { %v6209_v40 = vpop.xlane.xlu1 %6208  ;;  %v6244_v34 = vmul.f32 %v10935_v38, %v13469_v43 }
0x16a5   : > { %v10937_v62 = vpop.eup %10936  ;;  %10946 = vrcp.f32 %v6209_v40 }
0x16a6   : > { %v6211_v5 = vpop.xlane.xlu0 %6210  ;;  %v6245_v30 = vmul.f32 %v10937_v62, %v13472_v13 }
0x16a7   : > { %v10939_v4 = vpop.eup %10938  ;;  %10948 = vrcp.f32 %v6211_v5 }
0x16a8   : > { %v6213_v36 = vpop.xlane.xlu1 %6212  ;;  %v6260_v7 = vpack.c.bf16 %v6245_v30, %v6244_v34  ;;  %v6246_v53 = vmul.f32 %v10939_v4, %v13475_v11 }
0x16a9   : > { %v10941_v10 = vpop.eup %10940  ;;  %10950 = vrcp.f32 %v6213_v36 }
0x16aa   : > { %v6247_v15 = vmul.f32 %v10941_v10, %v13478_v19  ;;  %10108 = vmatprep.mubr.bf16.mxu1 %v6260_v7  ;;  %v6215_v33 = vpop.xlane.xlu0 %6214 }
0x16ab   : > { %v10943_v44 = vpop.eup %10942  ;;  %10952 = vrcp.f32 %v6215_v33 }
0x16ac   : > { %v6217_v55 = vpop.xlane.xlu1 %6216  ;;  %v6261_v12 = vpack.c.bf16 %v6247_v15, %v6246_v53  ;;  %v6248_v13 = vmul.f32 %v10943_v44, %v13482_v21 }
0x16ad   : > { %v10945_v57 = vpop.eup %10944  ;;  %10954 = vrcp.f32 %v6217_v55 }
0x16ae   : > { %v6219_v43 = vpop.xlane.xlu0 %6218  ;;  %10109 = vmatmul.mubr.bf16.vlgmr.msra.gmra.mrb[240].mxu1 %v6261_v12  ;;  %v6249_v41 = vmul.f32 %v10945_v57, %v13486_v6 }
0x16af   : > { %v10947_v61 = vpop.eup %10946  ;;  %10956 = vrcp.f32 %v6219_v43  ;;  %10157 = vmatpush3.bf16.msra.mxu1 %v11430_v20 }
0x16b0   : > { %10158 = vmatprep.subr.bf16.mxu1 %v11436_v24  ;;  %v6221_v11 = vpop.xlane.xlu1 %6220  ;;  %v6262_v19 = vpack.c.bf16 %v6249_v41, %v6248_v13  ;;  %v6250_v23 = vmul.f32 %v10947_v61, %v13490_v1 }
0x16b1   : > { %v10949_v8 = vpop.eup %10948  ;;  %10958 = vrcp.f32 %v6221_v11 }
0x16b2   : > { %v6223_v52 = vpop.xlane.xlu0 %6222  ;;  %10112 = vmatprep.mubr.bf16.mxu1 %v6262_v19  ;;  %v6251_v63 = vmul.f32 %v10949_v8, %v13494_v50 }
0x16b3   : > { %v10951_v29 = vpop.eup %10950  ;;  %10960 = vrcp.f32 %v6223_v52  ;;  %10159 = vmatpush3.bf16.msra.mxu1 %v11436_v24 }
0x16b4   : > { %10160 = vmatprep.subr.bf16.mxu1 %v11441_v28  ;;  %v6225_v21 = vpop.xlane.xlu1 %6224  ;;  %v6263_v20 = vpack.c.bf16 %v6251_v63, %v6250_v23  ;;  %v6252_v40 = vmul.f32 %v10951_v29, %v13498_v37 }
0x16b5   : > { %v10953_v6 = vpop.eup %10952  ;;  %10962 = vrcp.f32 %v6225_v21 }
0x16b6   : > { %v6227_v38 = vpop.xlane.xlu0 %6226  ;;  %10113 = vmatmul.mubr.bf16.gmra.mrb[244].mxu1 %v6263_v20  ;;  %v6253_v62 = vmul.f32 %v10953_v6, %v13502_v17 }
0x16b7   : > { %v10955_v5 = vpop.eup %10954  ;;  %10964 = vrcp.f32 %v6227_v38  ;;  %10161 = vmatpush3.bf16.msra.mxu1 %v11441_v28 }
0x16b8   : > { %10162 = vmatprep.subr.bf16.mxu1 %v11445_v31  ;;  %v6264_v1 = vpack.c.bf16 %v6253_v62, %v6252_v40  ;;  %v6254_v50 = vmul.f32 %v10955_v5, %v13505_v27 }
0x16b9   : > { %v10957_v24 = vpop.eup %10956 }
0x16ba   : > { %10116 = vmatprep.mubr.bf16.mxu1 %v6264_v1  ;;  %v6255_v34 = vmul.f32 %v10957_v24, %v13508_v14 }
0x16bb   : > { %v10959_v30 = vpop.eup %10958  ;;  %10163 = vmatpush3.bf16.msra.mxu1 %v11445_v31 }
0x16bc   : > { %10164 = vmatprep.subr.bf16.mxu1 %v11449_v35  ;;  %v6265_v37 = vpack.c.bf16 %v6255_v34, %v6254_v50  ;;  %v6256_v4 = vmul.f32 %v10959_v30, %v13511_v26  ;;  %v10472_v26 = vld [vmem:[%s14176_s3 + $0xe0] sm:$0xff]  }
0x16bd   : > { %v10961_v17 = vpop.eup %10960 }
0x16be   : > { %10117 = vmatmul.mubr.bf16.gmra.mrb[248].mxu1 %v6265_v37  ;;  %v6257_v28 = vmul.f32 %v10961_v17, %v13514_v60 }
0x16bf   : > { %v10963_v36 = vpop.eup %10962  ;;  %10165 = vmatpush3.bf16.msra.mxu1 %v11449_v35  ;;  %v10473_v35 = vld [vmem:[%s14176_s3 + $0xe8] sm:$0xff]  }
0x16c0   : > { %10166 = vmatprep.subr.bf16.mxu1 %v11453_v39  ;;  %v6266_v27 = vpack.c.bf16 %v6257_v28, %v6256_v4  ;;  %v6258_v14 = vmul.f32 %v10963_v36, %v13517_v2  ;;  %v10477_v2 = vld [vmem:[%s14176_s3 + $0xf8] sm:$0xff]  }
0x16c1   : > { %v10965_v7 = vpop.eup %10964 }
0x16c2   : > { %10120 = vmatprep.mubr.bf16.mxu1 %v6266_v27  ;;  %v6259_v31 = vmul.f32 %v10965_v7, %v13520_v9 }
0x16c3   : > { %10167 = vmatpush3.bf16.msra.mxu1 %v11453_v39  ;;  %v10476_v39 = vld [vmem:[%s14176_s3 + $0xf0] sm:$0xff]  }
0x16c4   : > { %10168 = vmatprep.subr.bf16.mxu1 %v11457_v42  ;;  %v6267_v60 = vpack.c.bf16 %v6259_v31, %v6258_v14 }
0x16c6   : > { %10121 = vmatmul.mubr.bf16.gmra.mrb[252].mxu1 %v6267_v60 }
0x16c7   : > { %10169 = vmatpush3.bf16.msra.mxu1 %v11457_v42  ;;  %10172 = vmatprep.mubr.bf16.mxu1 %v10472_v26 }
0x16c8   : > { %10170 = vmatprep.subr.bf16.mxu1 %v11461_v47 }
0x16cb   : > { %10171 = vmatpush3.bf16.msra.mxu1 %v11461_v47 }
0x16ce   : > { %10173 = vmatmul.mubr.bf16.vlgmr.msra.gmra.mrb[0].mxu1 %v10473_v35 }
0x16cf   : > { %10176 = vmatprep.mubr.bf16.mxu1 %v10476_v39 }
0x16d6   : > { %10177 = vmatmul.mubr.bf16.gmra.mrb[4].mxu1 %v10477_v2 }
0x1706   : > { %v10142_v42 = vpop.f32.mrb[248].mxu0 }
0x1707   : > { %v13598_v9 = vmul.f32 0.125, %v10142_v42  ;;  %v6488_v10 = vpop.f32.mrb[249].mxu0 }
0x1708   : > { %v6811_v53 = vmul.f32 0.125, %v6488_v10  ;;  %v10143_v15 = vpop.f32.mrb[250].mxu0 }
0x1709   : > { %v13600_v33 = vmul.f32 0.125, %v10143_v15  ;;  %v6491_v47 = vpop.f32.mrb[251].mxu0 }
0x170a   : > { %v6812_v44 = vmul.f32 0.125, %v6491_v47 }
0x170b   : > { %v6828_v55 = vpack.c.bf16 %v13600_v33, %v13598_v9  ;;  %v10478_v9 = vld [vmem:[%s14177_s4 + $0x1c0] sm:$0xff]   ;;  %v10479_v33 = vld [vmem:[%s14177_s4 + $0x1c8] sm:$0xff]  }
0x170c   : > { %v6827_v12 = vpack.c.bf16 %v6812_v44, %v6811_v53  ;;  %10180 = vmatprep.subr.bf16.mxu0 %v10478_v9 }
0x170d   : > { %10181 = vmatpush3.bf16.msra.mxu0 %v10478_v9 }
0x170e   : > { %10220 = vmatprep.mubr.msk.bf16.mxu1 %vm833_vm0, %v6827_v12  ;;  %v10146_v57 = vpop.f32.mrb[252].mxu0  ;;  %10182 = vmatprep.subr.bf16.mxu0 %v10479_v33 }
0x170f   : > { %v6504_v43 = vpop.f32.mrb[253].mxu0  ;;  %v13605_v13 = vmul.f32 0.125, %v10146_v57 }
0x1710   : > { %v13607_v41 = vmul.f32 0.125, %v6504_v43  ;;  %v10147_v61 = vpop.f32.mrb[254].mxu0 }
0x1711   : > { %v13609_v11 = vmul.f32 0.125, %v10147_v61  ;;  %v6507_v19 = vpop.f32.mrb[255].mxu0  ;;  %10183 = vmatpush3.bf16.msra.mxu0 %v10479_v33 }
0x1712   : > { %v13611_v8 = vmul.f32 0.125, %v6507_v19 }
0x1713   : > { %v6830_v52 = vpack.c.bf16 %v13609_v11, %v13605_v13  ;;  %v10481_v13 = vld [vmem:[%s14177_s4 + $0x1d8] sm:$0xff]   ;;  %v10483_v11 = vld [vmem:[%s14177_s4 + $0x1e8] sm:$0xff]  }
0x1714   : > { %v6829_v23 = vpack.c.bf16 %v13611_v8, %v13607_v41  ;;  %v10482_v41 = vld [vmem:[%s14177_s4 + $0x1e0] sm:$0xff]   ;;  %v10484_v8 = vld [vmem:[%s14177_s4 + $0x1f0] sm:$0xff]  }
0x1716   : > { %v10150_v63 = vpop.f32.mrb[0].mxu0 }
0x1717   : > { %v6520_v29 = vpop.f32.mrb[1].mxu0  ;;  %v13617_v21 = vmul.f32 0.125, %v10150_v63 }
0x1718   : > { %v13619_v20 = vmul.f32 0.125, %v6520_v29  ;;  %v10151_v6 = vpop.f32.mrb[2].mxu0 }
0x1719   : > { %v13621_v38 = vmul.f32 0.125, %v10151_v6  ;;  %v6523_v40 = vpop.f32.mrb[3].mxu0 }
0x171a   : > { %v13623_v62 = vmul.f32 0.125, %v6523_v40 }
0x171b   : > { %v6832_v5 = vpack.c.bf16 %v13621_v38, %v13617_v21  ;;  %v14392_v21 = vld [vmem:[#allocation14_spill] sm:$0xff]  ;;  %v14394_v38 = vld [vmem:[#allocation16_spill] sm:$0xff] }
0x171c   : > { %v6831_v1 = vpack.c.bf16 %v13623_v62, %v13619_v20  ;;  %v14393_v20 = vld [vmem:[#allocation15_spill] sm:$0xff]  ;;  %v14395_v62 = vld [vmem:[#allocation17_spill] sm:$0xff] }
0x171e   : > { %v10154_v24 = vpop.f32.mrb[4].mxu0 }
0x171f   : > { %v6536_v50 = vpop.f32.mrb[5].mxu0  ;;  %v13629_v34 = vmul.f32 0.125, %v10154_v24 }
0x1720   : > { %v13631_v30 = vmul.f32 0.125, %v6536_v50  ;;  %v10155_v37 = vpop.f32.mrb[6].mxu0 }
0x1721   : > { %v13633_v17 = vmul.f32 0.125, %v10155_v37  ;;  %v6539_v4 = vpop.f32.mrb[7].mxu0 }
0x1722   : > { %v6824_v28 = vmul.f32 0.125, %v6539_v4 }
0x1723   : > { %v6834_v36 = vpack.c.bf16 %v13633_v17, %v13629_v34 }
0x1724   : > { %v6833_v27 = vpack.c.bf16 %v6824_v28, %v13631_v30 }
0x1781   : > { %v10110_v7 = vpop.f32.mrb[240].mxu1 }
0x1782   : > { %v6310_v14 = vpop.f32.mrb[241].mxu1 }
0x1783   : > { %v10111_v31 = vpop.f32.mrb[242].mxu1 }
0x1784   : > { %v6374_v26 = vpack.c.bf16 %v10111_v31, %v10110_v7  ;;  %v6313_v60 = vpop.f32.mrb[243].mxu1 }
0x1785   : > { %v6373_v35 = vpack.c.bf16 %v6313_v60, %v6310_v14 }
0x1786   : > { %6382 = vst.msk [vmem:[#allocation2 + $0x38] sm:$0xff] %vm833_vm0, %v6374_v26 }
0x1787   : > { %6381 = vst.msk [vmem:[#allocation2 + $0x18] sm:$0xff] %vm833_vm0, %v6373_v35 }
0x1789   : > { %v10114_v39 = vpop.f32.mrb[244].mxu1 }
0x178a   : > { %v6326_v2 = vpop.f32.mrb[245].mxu1 }
0x178b   : > { %v10115_v42 = vpop.f32.mrb[246].mxu1 }
0x178c   : > { %v6376_v10 = vpack.c.bf16 %v10115_v42, %v10114_v39  ;;  %v6329_v53 = vpop.f32.mrb[247].mxu1 }
0x178d   : > { %v6375_v15 = vpack.c.bf16 %v6329_v53, %v6326_v2 }
0x178e   : > { %6384 = vst.msk [vmem:[#allocation2 + $0x78] sm:$0xff] %vm833_vm0, %v6376_v10 }
0x178f   : > { %6383 = vst.msk [vmem:[#allocation2 + $0x58] sm:$0xff] %vm833_vm0, %v6375_v15 }
0x1791   : > { %v10118_v47 = vpop.f32.mrb[248].mxu1 }
0x1792   : > { %v6342_v44 = vpop.f32.mrb[249].mxu1 }
0x1793   : > { %v10119_v12 = vpop.f32.mrb[250].mxu1 }
0x1794   : > { %v6378_v57 = vpack.c.bf16 %v10119_v12, %v10118_v47  ;;  %v6345_v43 = vpop.f32.mrb[251].mxu1 }
0x1795   : > { %v6377_v61 = vpack.c.bf16 %v6345_v43, %v6342_v44 }
0x1796   : > { %6386 = vst.msk [vmem:[#allocation2 + $0xb8] sm:$0xff] %vm833_vm0, %v6378_v57 }
0x1797   : > { %6385 = vst.msk [vmem:[#allocation2 + $0x98] sm:$0xff] %vm833_vm0, %v6377_v61 }
0x1799   : > { %v10122_v19 = vpop.f32.mrb[252].mxu1 }
0x179a   : > { %v6358_v63 = vpop.f32.mrb[253].mxu1 }
0x179b   : > { %v10123_v29 = vpop.f32.mrb[254].mxu1 }
0x179c   : > { %v6380_v6 = vpack.c.bf16 %v10123_v29, %v10122_v19  ;;  %v6361_v40 = vpop.f32.mrb[255].mxu1 }
0x179d   : > { %v6379_v24 = vpack.c.bf16 %v6361_v40, %v6358_v63 }
0x179e   : > { %6388 = vst.msk [vmem:[#allocation2 + $0xf8] sm:$0xff] %vm833_vm0, %v6380_v6 }
0x179f   : > { %6387 = vst.msk [vmem:[#allocation2 + $0xd8] sm:$0xff] %vm833_vm0, %v6379_v24 }
0x17a1   : > { %v10174_v50 = vpop.f32.mrb[0].mxu1 }
0x17a2   : > { %v6618_v34 = vpop.f32.mrb[1].mxu1 }
0x17a3   : > { %v10175_v30 = vpop.f32.mrb[2].mxu1 }
0x17a4   : > { %v6836_v37 = vpack.c.bf16 %v10175_v30, %v10174_v50  ;;  %v6621_v17 = vpop.f32.mrb[3].mxu1 }
0x17a5   : > { %v6835_v4 = vpack.c.bf16 %v6621_v17, %v6618_v34 }
0x17a7   : > { %10212 = vmatprep.subr.bf16.mxu1 %v6835_v4 }
0x17a8   : > { %10213 = vmatpush3.bf16.msra.mxu1 %v6835_v4 }
0x17a9   : > { %v10178_v28 = vpop.f32.mrb[4].mxu1  ;;  %10214 = vmatprep.subr.bf16.mxu1 %v6836_v37 }
0x17aa   : > { %v6634_v7 = vpop.f32.mrb[5].mxu1 }
0x17ab   : > { %v10179_v14 = vpop.f32.mrb[6].mxu1 }
0x17ac   : > { %v6838_v31 = vpack.c.bf16 %v10179_v14, %v10178_v28  ;;  %v6637_v26 = vpop.f32.mrb[7].mxu1  ;;  %10215 = vmatpush3.bf16.msra.mxu1 %v6836_v37 }
0x17ad   : > { %v6837_v60 = vpack.c.bf16 %v6637_v26, %v6634_v7 }
0x17af   : > { %10216 = vmatprep.subr.bf16.mxu1 %v6837_v60 }
0x17b0   : > { %10217 = vmatpush3.bf16.msra.mxu1 %v6837_v60 }
0x17b1   : > { %10218 = vmatprep.subr.bf16.mxu1 %v6838_v31 }
0x17b4   : > { %10219 = vmatpush3.bf16.msra.mxu1 %v6838_v31 }
0x17b7   : > { %10221 = vmatmul.mubr.msk.bf16.vlgmr.msra.gmra.mrb[8].mxu1 %vm833_vm0, %v6828_v55  ;;  %v10480_v55 = vld [vmem:[%s14177_s4 + $0x1d0] sm:$0xff]  }
0x17b8   : > { %10224 = vmatprep.mubr.msk.bf16.mxu1 %vm833_vm0, %v6829_v23  ;;  %10184 = vmatprep.subr.bf16.mxu0 %v10480_v55  ;;  %v14391_v23 = vld [vmem:[#allocation13_spill] sm:$0xff] }
0x17b9   : > { %10185 = vmatpush3.bf16.msra.mxu0 %v10480_v55 }
0x17ba   : > { %10186 = vmatprep.subr.bf16.mxu0 %v10481_v13 }
0x17bd   : > { %10187 = vmatpush3.bf16.msra.mxu0 %v10481_v13 }
0x17be   : > { %10188 = vmatprep.subr.bf16.mxu0 %v10482_v41 }
0x17bf   : > { %10225 = vmatmul.mubr.msk.bf16.gmra.mrb[12].mxu1 %vm833_vm0, %v6830_v52  ;;  %v10485_v52 = vld [vmem:[%s14177_s4 + $0x1f8] sm:$0xff]  }
0x17c0   : > { %10228 = vmatprep.mubr.msk.bf16.mxu1 %vm833_vm0, %v6831_v1  ;;  %v14397_v1 = vld [vmem:[#allocation19_spill] sm:$0xff] }
0x17c1   : > { %10189 = vmatpush3.bf16.msra.mxu0 %v10482_v41 }
0x17c2   : > { %10190 = vmatprep.subr.bf16.mxu0 %v10483_v11 }
0x17c5   : > { %10191 = vmatpush3.bf16.msra.mxu0 %v10483_v11 }
0x17c6   : > { %10192 = vmatprep.subr.bf16.mxu0 %v10484_v8 }
0x17c7   : > { %10229 = vmatmul.mubr.msk.bf16.gmra.mrb[16].mxu1 %vm833_vm0, %v6832_v5  ;;  %v14396_v5 = vld [vmem:[#allocation18_spill] sm:$0xff] }
0x17c8   : > { %10232 = vmatprep.mubr.msk.bf16.mxu1 %vm833_vm0, %v6833_v27 }
0x17c9   : > { %10193 = vmatpush3.bf16.msra.mxu0 %v10484_v8 }
0x17ca   : > { %10194 = vmatprep.subr.bf16.mxu0 %v10485_v52 }
0x17cd   : > { %10195 = vmatpush3.bf16.msra.mxu0 %v10485_v52 }
0x17cf   : > { %10233 = vmatmul.mubr.msk.bf16.gmra.mrb[20].mxu1 %vm833_vm0, %v6834_v36 }
0x17d0   : > { %10197 = vmatmul.mubr.bf16.vlgmr.msra.gmra.mrb[8].mxu0 %v14391_v23 }
0x17d1   : > { %10200 = vmatprep.mubr.bf16.mxu0 %v14392_v21 }
0x17d8   : > { %10201 = vmatmul.mubr.bf16.gmra.mrb[12].mxu0 %v14393_v20 }
0x17d9   : > { %10204 = vmatprep.mubr.bf16.mxu0 %v14394_v38 }
0x17e0   : > { %10205 = vmatmul.mubr.bf16.gmra.mrb[16].mxu0 %v14395_v62 }
0x17e1   : > { %10208 = vmatprep.mubr.bf16.mxu0 %v14396_v5 }
0x17e8   : > { %10209 = vmatmul.mubr.bf16.gmra.mrb[20].mxu0 %v14397_v1 }
0x188a   : > { %v10222_v36 = vpop.f32.mrb[8].mxu1 }
0x188b   : > { %v6897_v27 = vpop.f32.mrb[9].mxu1 }
0x188c   : > { %6960 = vmax.xlane.f32.xlu1 %v6897_v27  ;;  %v10223_v35 = vpop.f32.mrb[10].mxu1 }
0x188d   : > { %v6900_v39 = vpop.f32.mrb[11].mxu1 }
0x188e   : > { %6962 = vmax.xlane.f32.xlu0 %v6900_v39 }
0x1890   : > { %6964 = vmax.xlane.f32.xlu1 %v10222_v36 }
0x1892   : > { %6966 = vmax.xlane.f32.xlu0 %v10223_v35  ;;  %v10226_v2 = vpop.f32.mrb[12].mxu1 }
0x1893   : > { %v6913_v42 = vpop.f32.mrb[13].mxu1 }
0x1894   : > { %6968 = vmax.xlane.f32.xlu1 %v6913_v42  ;;  %v13699_v10 = vpop.f32.mrb[14].mxu1 }
0x1895   : > { %v6916_v53 = vpop.f32.mrb[15].mxu1 }
0x1896   : > { %6970 = vmax.xlane.f32.xlu0 %v6916_v53 }
0x1898   : > { %6972 = vmax.xlane.f32.xlu1 %v10226_v2 }
0x189a   : > { %6974 = vmax.xlane.f32.xlu0 %v13699_v10  ;;  %v13702_v15 = vpop.f32.mrb[16].mxu1 }
0x189b   : > { %v13704_v47 = vpop.f32.mrb[17].mxu1 }
0x189c   : > { %6976 = vmax.xlane.f32.xlu1 %v13704_v47  ;;  %v13707_v44 = vpop.f32.mrb[18].mxu1 }
0x189d   : > { %v13709_v12 = vpop.f32.mrb[19].mxu1 }
0x189e   : > { %6978 = vmax.xlane.f32.xlu0 %v13709_v12 }
0x18a0   : > { %6980 = vmax.xlane.f32.xlu1 %v13702_v15 }
0x18a2   : > { %6982 = vmax.xlane.f32.xlu0 %v13707_v44  ;;  %v13714_v57 = vpop.f32.mrb[20].mxu1 }
0x18a3   : > { %v13716_v43 = vpop.f32.mrb[21].mxu1  ;;  %v10198_v17 = vpop.f32.mrb[8].mxu0 }
0x18a4   : > { %6984 = vmax.xlane.f32.xlu1 %v13716_v43  ;;  %v13719_v61 = vpop.f32.mrb[22].mxu1  ;;  %v6748_v7 = vpop.f32.mrb[9].mxu0 }
0x18a5   : > { %v13721_v19 = vpop.f32.mrb[23].mxu1  ;;  %v10199_v31 = vpop.f32.mrb[10].mxu0 }
0x18a6   : > { %6986 = vmax.xlane.f32.xlu0 %v13721_v19  ;;  %v7113_v9 = vpack.c.bf16 %v10199_v31, %v10198_v17  ;;  %v6751_v33 = vpop.f32.mrb[11].mxu0 }
0x18a7   : > { %v7112_v13 = vpack.c.bf16 %v6751_v33, %v6748_v7 }
0x18a8   : > { %6988 = vmax.xlane.f32.xlu1 %v13714_v57 }
0x18a9   : > { %10236 = vmatprep.subr.bf16.mxu0 %v7112_v13 }
0x18aa   : > { %6990 = vmax.xlane.f32.xlu0 %v13719_v61  ;;  %10237 = vmatpush3.bf16.msra.mxu0 %v7112_v13 }
0x18ab   : > { %v10202_v20 = vpop.f32.mrb[12].mxu0  ;;  %10238 = vmatprep.subr.bf16.mxu0 %v7113_v9 }
0x18ac   : > { %v6764_v1 = vpop.f32.mrb[13].mxu0 }
0x18ae   : > { %10239 = vmatpush3.bf16.msra.mxu0 %v7113_v9 }
0x1919   : > { %v6961_v63 = vpop.xlane.xlu1 %6960 }
0x191a   : > { %v6992_v29 = vsub.f32 %v6897_v27, %v6961_v63  ;;  %v10203_v27 = vpop.f32.mrb[14].mxu0 }
0x191b   : > { %v6963_v6 = vpop.xlane.xlu0 %6962 }
0x191c   : > { %v7008_v40 = vmul.f32 1.442695, %v6992_v29  ;;  %v6993_v24 = vsub.f32 %v6900_v39, %v6963_v6 }
0x191d   : > { %v6965_v50 = vpop.xlane.xlu1 %6964 }
0x191e   : > { %10966 = vpow2.f32 %v7008_v40  ;;  %v7010_v34 = vmul.f32 1.442695, %v6993_v24  ;;  %v6994_v30 = vsub.f32 %v10222_v36, %v6965_v50 }
0x191f   : > { %v6967_v37 = vpop.xlane.xlu0 %6966 }
0x1920   : > { %10968 = vpow2.f32 %v7010_v34  ;;  %v7012_v4 = vmul.f32 1.442695, %v6994_v30  ;;  %v6995_v28 = vsub.f32 %v10223_v35, %v6967_v37 }
0x1921   : > { %v6969_v14 = vpop.xlane.xlu1 %6968 }
0x1922   : > { %10970 = vpow2.f32 %v7012_v4  ;;  %v7014_v26 = vmul.f32 1.442695, %v6995_v28  ;;  %v6996_v60 = vsub.f32 %v6913_v42, %v6969_v14  ;;  %v7115_v42 = vpack.c.bf16 %v10203_v27, %v10202_v20 }
0x1923   : > { %v6971_v55 = vpop.xlane.xlu0 %6970 }
0x1924   : > { %10972 = vpow2.f32 %v7014_v26  ;;  %v7016_v41 = vmul.f32 1.442695, %v6996_v60  ;;  %v6997_v11 = vsub.f32 %v6916_v53, %v6971_v55  ;;  %v6767_v53 = vpop.f32.mrb[15].mxu0 }
0x1925   : > { %v6973_v8 = vpop.xlane.xlu1 %6972  ;;  %v7114_v29 = vpack.c.bf16 %v6767_v53, %v6764_v1  ;;  %v10206_v37 = vpop.f32.mrb[16].mxu0 }
0x1926   : > { %10974 = vpow2.f32 %v7016_v41  ;;  %v7018_v52 = vmul.f32 1.442695, %v6997_v11  ;;  %v6998_v23 = vsub.f32 %v10226_v2, %v6973_v8  ;;  %v6780_v28 = vpop.f32.mrb[17].mxu0 }
0x1927   : > { %v6975_v21 = vpop.xlane.xlu0 %6974  ;;  %10240 = vmatprep.subr.bf16.mxu0 %v7114_v29  ;;  %v10207_v14 = vpop.f32.mrb[18].mxu0 }
0x1928   : > { %v13726_v38 = vpop.eup %10966  ;;  %10976 = vpow2.f32 %v7018_v52  ;;  %v7020_v62 = vmul.f32 1.442695, %v6998_v23  ;;  %v6999_v5 = vsub.f32 %v13699_v10, %v6975_v21  ;;  %10241 = vmatpush3.bf16.msra.mxu0 %v7114_v29  ;;  %v7117_v60 = vpack.c.bf16 %v10207_v14, %v10206_v37  ;;  %v6783_v9 = vpop.f32.mrb[19].mxu0  ;;  %v10487_v29 = vld [vmem:[%s14178_s5] sm:$0xff]   ;;  %v10491_v37 = vld [vmem:[%s14178_s5 + $0x10] sm:$0xff]   ;;  %v10496_v14 = vld [vmem:[%s14178_s5 + $0x68] sm:$0xff]  }
0x1929   : > { %v6977_v36 = vpop.xlane.xlu1 %6976  ;;  %7040 = vadd.xlane.f32.xlu1 %v13726_v38  ;;  %10242 = vmatprep.subr.bf16.mxu0 %v7115_v42  ;;  %v7116_v55 = vpack.c.bf16 %v6783_v9, %v6780_v28  ;;  %v10210_v21 = vpop.f32.mrb[20].mxu0  ;;  %v10494_v28 = vld [vmem:[%s14178_s5 + $0x60] sm:$0xff]  }
0x192a   : > { %v13730_v35 = vpop.eup %10968  ;;  %10978 = vpow2.f32 %v7020_v62  ;;  %v7022_v39 = vmul.f32 1.442695, %v6999_v5  ;;  %v7000_v2 = vsub.f32 %v13704_v47, %v6977_v36  ;;  %v6796_v5 = vpop.f32.mrb[21].mxu0 }
0x192b   : > { %v6979_v63 = vpop.xlane.xlu0 %6978  ;;  %7042 = vadd.xlane.f32.xlu0 %v13730_v35  ;;  %v10211_v1 = vpop.f32.mrb[22].mxu0 }
0x192c   : > { %v13734_v6 = vpop.eup %10970  ;;  %10980 = vpow2.f32 %v7022_v39  ;;  %v7024_v10 = vmul.f32 1.442695, %v7000_v2  ;;  %v7001_v40 = vsub.f32 %v13709_v12, %v6979_v63  ;;  %10243 = vmatpush3.bf16.msra.mxu0 %v7115_v42  ;;  %v7119_v27 = vpack.c.bf16 %v10211_v1, %v10210_v21  ;;  %v6799_v39 = vpop.f32.mrb[23].mxu0  ;;  %v10486_v63 = vld [vmem:[%s14178_s5 + $0x40] sm:$0xff]  }
0x192d   : > { %v6981_v24 = vpop.xlane.xlu1 %6980  ;;  %7044 = vadd.xlane.f32.xlu1 %v13734_v6  ;;  %10244 = vmatprep.subr.bf16.mxu0 %v7116_v55  ;;  %v7118_v2 = vpack.c.bf16 %v6799_v39, %v6796_v5  ;;  %v14408_v5 = vld [vmem:[#allocation6_spill] sm:$0xff] }
0x192e   : > { %v13738_v50 = vpop.eup %10972  ;;  %10982 = vpow2.f32 %v7024_v10  ;;  %v7026_v47 = vmul.f32 1.442695, %v7001_v40  ;;  %v7002_v34 = vsub.f32 %v13702_v15, %v6981_v24  ;;  %8988 = vmatprep.subr.bf16.mxu1 %v10486_v63  ;;  %v10488_v24 = vld [vmem:[%s14178_s5 + $0x48] sm:$0xff]  }
0x192f   : > { %v6983_v30 = vpop.xlane.xlu0 %6982  ;;  %7046 = vadd.xlane.f32.xlu0 %v13738_v50  ;;  %8989 = vmatpush3.bf16.msra.mxu1 %v10487_v29  ;;  %v14414_v63 = vld [vmem:[#allocation11_spill] sm:$0xff] }
0x1930   : > { %v13742_v17 = vpop.eup %10974  ;;  %10984 = vpow2.f32 %v7026_v47  ;;  %v7028_v12 = vmul.f32 1.442695, %v7002_v34  ;;  %v7003_v4 = vsub.f32 %v13707_v44, %v6983_v30  ;;  %10245 = vmatpush3.bf16.msra.mxu0 %v7116_v55  ;;  %v10489_v47 = vld [vmem:[%s14178_s5 + $0x8] sm:$0xff]   ;;  %8990 = vmatprep.subr.bf16.mxu1 %v10488_v24  ;;  %v10490_v30 = vld [vmem:[%s14178_s5 + $0x50] sm:$0xff]  }
0x1931   : > { %7048 = vadd.xlane.f32.xlu1 %v13742_v17  ;;  %v6985_v7 = vpop.xlane.xlu1 %6984  ;;  %10246 = vmatprep.subr.bf16.mxu0 %v7117_v60  ;;  %v10499_v55 = vld [vmem:[%s14178_s5 + $0x30] sm:$0xff]  }
0x1932   : > { %v13746_v31 = vpop.eup %10976  ;;  %10986 = vpow2.f32 %v7028_v12  ;;  %v7030_v15 = vmul.f32 1.442695, %v7003_v4  ;;  %v7004_v26 = vsub.f32 %v13716_v43, %v6985_v7  ;;  %v10492_v12 = vld [vmem:[%s14178_s5 + $0x58] sm:$0xff]   ;;  %v10495_v7 = vld [vmem:[%s14178_s5 + $0x20] sm:$0xff]   ;;  %v14416_v24 = vld [vmem:[#allocation36_spill] sm:$0xff] }
0x1933   : > { %7050 = vadd.xlane.f32.xlu0 %v13746_v31  ;;  %v6987_v33 = vpop.xlane.xlu0 %6986  ;;  %8991 = vmatpush3.bf16.msra.mxu1 %v10489_v47  ;;  %v10493_v4 = vld [vmem:[%s14178_s5 + $0x18] sm:$0xff]   ;;  %v14417_v47 = vld [vmem:[#allocation34_spill] sm:$0xff] }
0x1934   : > { %v13750_v13 = vpop.eup %10978  ;;  %10988 = vpow2.f32 %v7030_v15  ;;  %v7032_v44 = vmul.f32 1.442695, %v7004_v26  ;;  %v7005_v41 = vsub.f32 %v13721_v19, %v6987_v33  ;;  %10247 = vmatpush3.bf16.msra.mxu0 %v7117_v60  ;;  %8992 = vmatprep.subr.bf16.mxu1 %v10490_v30  ;;  %v10497_v15 = vld [vmem:[%s14178_s5 + $0x28] sm:$0xff]   ;;  %v14398_v26 = vld [vmem:[#allocation33_spill] sm:$0xff]  ;;  %v10498_v33 = vld [vmem:[%s14178_s5 + $0x70] sm:$0xff]   ;;  %v14418_v30 = vpack.c.bf16 %v14416_v24, %v14417_v47 }
0x1935   : > { %7052 = vadd.xlane.f32.xlu1 %v13750_v13  ;;  %v6989_v11 = vpop.xlane.xlu1 %6988  ;;  %10248 = vmatprep.subr.bf16.mxu0 %v7118_v2  ;;  %v14399_v60 = vld [vmem:[#allocation31_spill] sm:$0xff] }
0x1936   : > { %v13754_v8 = vpop.eup %10980  ;;  %10990 = vpow2.f32 %v7032_v44  ;;  %v7034_v43 = vmul.f32 1.442695, %v7005_v41  ;;  %v7006_v52 = vsub.f32 %v13714_v57, %v6989_v11  ;;  %v14400_v9 = vpack.c.bf16 %v14398_v26, %v14399_v60  ;;  %v14401_v44 = vld [vmem:[#allocation32_spill] sm:$0xff]  ;;  %v14402_v41 = vld [vmem:[#allocation30_spill] sm:$0xff]  ;;  %v14426_v26 = vld [vmem:[#allocation23_spill] sm:$0xff] }
0x1937   : > { %7054 = vadd.xlane.f32.xlu0 %v13754_v8  ;;  %v6991_v23 = vpop.xlane.xlu0 %6990  ;;  %8993 = vmatpush3.bf16.msra.mxu1 %v10491_v37  ;;  %v14403_v11 = vpack.c.bf16 %v14401_v44, %v14402_v41  ;;  %v14419_v37 = vld [vmem:[#allocation20_spill] sm:$0xff]  ;;  %v14432_v41 = vld [vmem:[#allocation22_spill] sm:$0xff] }
0x1938   : > { %v13758_v20 = vpop.eup %10982  ;;  %10992 = vpow2.f32 %v7034_v43  ;;  %v7036_v19 = vmul.f32 1.442695, %v7006_v52  ;;  %v7007_v62 = vsub.f32 %v13719_v61, %v6991_v23  ;;  %10249 = vmatpush3.bf16.msra.mxu0 %v7118_v2  ;;  %8994 = vmatprep.subr.bf16.mxu1 %v10492_v12  ;;  %v10500_v43 = vld [vmem:[%s14178_s5 + $0x78] sm:$0xff]   ;;  %v14405_v23 = vld [vmem:[#allocation7_spill] sm:$0xff]  ;;  %v14420_v12 = vld [vmem:[#allocation10_spill] sm:$0xff] }
0x1939   : > { %7056 = vadd.xlane.f32.xlu1 %v13758_v20  ;;  %10250 = vmatprep.subr.bf16.mxu0 %v7119_v27  ;;  %v14404_v52 = vld [vmem:[#allocation9_spill] sm:$0xff]  ;;  %v14431_v44 = vld [vmem:[#allocation24_spill] sm:$0xff] }
0x193a   : > { %v13762_v36 = vpop.eup %10984  ;;  %10994 = vpow2.f32 %v7036_v19  ;;  %v7038_v57 = vmul.f32 1.442695, %v7007_v62  ;;  %v14406_v21 = vpack.c.bf16 %v14404_v52, %v14405_v23  ;;  %v10501_v19 = vld [vmem:[%s14178_s5 + $0x38] sm:$0xff]   ;;  %v14407_v62 = vld [vmem:[#allocation8_spill] sm:$0xff]  ;;  %v14435_v52 = vld [vmem:[#allocation43_spill] sm:$0xff] }
0x193b   : > { %7058 = vadd.xlane.f32.xlu0 %v13762_v36  ;;  %8995 = vmatpush3.bf16.msra.mxu1 %v10493_v4  ;;  %v14409_v1 = vpack.c.bf16 %v14407_v62, %v14408_v5  ;;  %v14413_v2 = vld [vmem:[#allocation21_spill] sm:$0xff]  ;;  %v14421_v4 = vpack.c.bf16 %v14419_v37, %v14420_v12  ;;  %v14440_v5 = vld [vmem:[#allocation44_spill] sm:$0xff] }
0x193c   : > { %v13765_v42 = vpop.eup %10986  ;;  %10996 = vpow2.f32 %v7038_v57  ;;  %10251 = vmatpush3.bf16.msra.mxu0 %v7119_v27  ;;  %8996 = vmatprep.subr.bf16.mxu1 %v10494_v28  ;;  %v14410_v57 = vld [vmem:[#allocation37_spill] sm:$0xff]  ;;  %v14411_v27 = vld [vmem:[#allocation35_spill] sm:$0xff]  ;;  %v14415_v29 = vpack.c.bf16 %v14413_v2, %v14414_v63 }
0x193d   : > { %7060 = vadd.xlane.f32.xlu1 %v13765_v42  ;;  %v14412_v39 = vpack.c.bf16 %v14410_v57, %v14411_v27  ;;  %v14422_v28 = vld [vmem:[#allocation41_spill] sm:$0xff]  ;;  %v14443_v27 = vld [vmem:[#allocation28_spill] sm:$0xff] }
0x193e   : > { %v13768_v61 = vpop.eup %10988 }
0x193f   : > { %7062 = vadd.xlane.f32.xlu0 %v13768_v61  ;;  %8997 = vmatpush3.bf16.msra.mxu1 %v10495_v7  ;;  %v14423_v7 = vld [vmem:[#allocation39_spill] sm:$0xff] }
0x1940   : > { %v13771_v53 = vpop.eup %10990  ;;  %8998 = vmatprep.subr.bf16.mxu1 %v10496_v14  ;;  %v14424_v14 = vpack.c.bf16 %v14422_v28, %v14423_v7 }
0x1941   : > { %7064 = vadd.xlane.f32.xlu1 %v13771_v53 }
0x1942   : > { %v13780_v10 = vpop.eup %10992 }
0x1943   : > { %7066 = vadd.xlane.f32.xlu0 %v13780_v10  ;;  %8999 = vmatpush3.bf16.msra.mxu1 %v10497_v15  ;;  %v14425_v15 = vld [vmem:[#allocation25_spill] sm:$0xff] }
0x1944   : > { %v13783_v40 = vpop.eup %10994  ;;  %9000 = vmatprep.subr.bf16.mxu1 %v10498_v33  ;;  %v14427_v60 = vpack.c.bf16 %v14425_v15, %v14426_v26  ;;  %v14429_v33 = vld [vmem:[#allocation38_spill] sm:$0xff] }
0x1945   : > { %7068 = vadd.xlane.f32.xlu1 %v13783_v40 }
0x1946   : > { %v13792_v34 = vpop.eup %10996 }
0x1947   : > { %7070 = vadd.xlane.f32.xlu0 %v13792_v34  ;;  %9001 = vmatpush3.bf16.msra.mxu1 %v10499_v55 }
0x1948   : > { %9002 = vmatprep.subr.bf16.mxu1 %v10500_v43  ;;  %v14434_v43 = vld [vmem:[#allocation45_spill] sm:$0xff] }
0x1949   : > { %v14436_v23 = vpack.c.bf16 %v14434_v43, %v14435_v52 }
0x194b   : > { %9003 = vmatpush3.bf16.msra.mxu1 %v10501_v19  ;;  %v14438_v19 = vld [vmem:[#allocation27_spill] sm:$0xff] }
0x1956   : > { %3793 = vrot.lane.b32.xlu1 %v14400_v9, %s11094_s18  ;;  %v14428_v9 = vld [vmem:[#allocation40_spill] sm:$0xff] }
0x1957   : > { %v14430_v55 = vpack.c.bf16 %v14428_v9, %v14429_v33 }
0x195a   : > { %3795 = vrot.lane.b32.xlu1 %v14403_v11, %s11094_s18  ;;  %v14433_v11 = vpack.c.bf16 %v14431_v44, %v14432_v41 }
0x195d   : > { %2072 = vrot.lane.b32.xlu0 %v14406_v21, %s11094_s18  ;;  %v14437_v21 = vld [vmem:[#allocation29_spill] sm:$0xff] }
0x195e   : > { %2074 = vrot.lane.b32.xlu1 %v14409_v1, %s11094_s18  ;;  %v14439_v62 = vpack.c.bf16 %v14437_v21, %v14438_v19  ;;  %v14441_v1 = vld [vmem:[#allocation42_spill] sm:$0xff] }
0x195f   : > { %v14442_v57 = vpack.c.bf16 %v14440_v5, %v14441_v1 }
0x1961   : > { %3797 = vrot.lane.b32.xlu0 %v14412_v39, %s11094_s18  ;;  %v14444_v39 = vld [vmem:[#allocation26_spill] sm:$0xff] }
0x1962   : > { %2076 = vrot.lane.b32.xlu1 %v14415_v29, %s11094_s18  ;;  %v14445_v2 = vpack.c.bf16 %v14443_v27, %v14444_v39 }
0x1965   : > { %3799 = vrot.lane.b32.xlu0 %v14418_v30, %s11094_s18 }
0x1966   : > { %2078 = vrot.lane.b32.xlu1 %v14421_v4, %s11094_s18 }
0x1969   : > { %3801 = vrot.lane.b32.xlu0 %v14424_v14, %s11094_s18 }
0x196d   : > { %2080 = vrot.lane.b32.xlu0 %v14427_v60, %s11094_s18 }
0x1971   : > { %3803 = vrot.lane.b32.xlu0 %v14430_v55, %s11094_s18 }
0x1975   : > { %2082 = vrot.lane.b32.xlu0 %v14433_v11, %s11094_s18 }
0x1979   : > { %3805 = vrot.lane.b32.xlu0 %v14436_v23, %s11094_s18 }
0x197d   : > { %2084 = vrot.lane.b32.xlu0 %v14439_v62, %s11094_s18 }
0x1981   : > { %3807 = vrot.lane.b32.xlu0 %v14442_v57, %s11094_s18 }
0x1985   : > { %2086 = vrot.lane.b32.xlu0 %v14445_v2, %s11094_s18 }
0x19b6   : > { %v7041_v63 = vpop.xlane.xlu1 %7040 }
0x19b7   : > { %10998 = vrcp.f32 %v7041_v63 }
0x19b8   : > { %v7043_v29 = vpop.xlane.xlu0 %7042 }
0x19b9   : > { %11000 = vrcp.f32 %v7043_v29 }
0x19ba   : > { %v7045_v24 = vpop.xlane.xlu1 %7044 }
0x19bb   : > { %11002 = vrcp.f32 %v7045_v24 }
0x19bc   : > { %v7047_v47 = vpop.xlane.xlu0 %7046 }
0x19bd   : > { %11004 = vrcp.f32 %v7047_v47 }
0x19be   : > { %v7049_v30 = vpop.xlane.xlu1 %7048 }
0x19bf   : > { %11006 = vrcp.f32 %v7049_v30 }
0x19c0   : > { %v7051_v37 = vpop.xlane.xlu0 %7050 }
0x19c1   : > { %v10999_v12 = vpop.eup %10998  ;;  %11008 = vrcp.f32 %v7051_v37 }
0x19c2   : > { %v7053_v4 = vpop.xlane.xlu1 %7052  ;;  %v7088_v14 = vmul.f32 %v10999_v12, %v13726_v38 }
0x19c3   : > { %v11001_v28 = vpop.eup %11000  ;;  %11010 = vrcp.f32 %v7053_v4 }
0x19c4   : > { %v7055_v7 = vpop.xlane.xlu0 %7054  ;;  %v7089_v15 = vmul.f32 %v11001_v28, %v13730_v35 }
0x19c5   : > { %v11003_v26 = vpop.eup %11002  ;;  %11012 = vrcp.f32 %v7055_v7 }
0x19c6   : > { %v7057_v60 = vpop.xlane.xlu1 %7056  ;;  %v7104_v9 = vpack.c.bf16 %v7089_v15, %v7088_v14  ;;  %v7090_v55 = vmul.f32 %v11003_v26, %v13734_v6 }
0x19c7   : > { %v11005_v33 = vpop.eup %11004  ;;  %11014 = vrcp.f32 %v7057_v60 }
0x19c8   : > { %v7091_v44 = vmul.f32 %v11005_v33, %v13738_v50  ;;  %10252 = vmatprep.mubr.bf16.mxu0 %v7104_v9  ;;  %v7059_v41 = vpop.xlane.xlu0 %7058 }
0x19c9   : > { %v11007_v11 = vpop.eup %11006  ;;  %11016 = vrcp.f32 %v7059_v41 }
0x19ca   : > { %v7105_v43 = vpack.c.bf16 %v7091_v44, %v7090_v55  ;;  %v7061_v52 = vpop.xlane.xlu1 %7060  ;;  %v7092_v35 = vmul.f32 %v11007_v11, %v13742_v17 }
0x19cb   : > { %v11009_v23 = vpop.eup %11008  ;;  %11018 = vrcp.f32 %v7061_v52 }
0x19cc   : > { %10253 = vmatmul.mubr.bf16.vlgmr.msra.gmra.mrb[24].mxu0 %v7105_v43  ;;  %v7063_v38 = vpop.xlane.xlu0 %7062  ;;  %v7093_v21 = vmul.f32 %v11009_v23, %v13746_v31 }
0x19cd   : > { %v11011_v19 = vpop.eup %11010  ;;  %11020 = vrcp.f32 %v7063_v38 }
0x19ce   : > { %v7065_v62 = vpop.xlane.xlu1 %7064  ;;  %v7106_v6 = vpack.c.bf16 %v7093_v21, %v7092_v35  ;;  %v7094_v50 = vmul.f32 %v11011_v19, %v13750_v13 }
0x19cf   : > { %v11013_v5 = vpop.eup %11012  ;;  %11022 = vrcp.f32 %v7065_v62 }
0x19d0   : > { %v7095_v1 = vmul.f32 %v11013_v5, %v13754_v8  ;;  %10256 = vmatprep.mubr.bf16.mxu0 %v7106_v6  ;;  %v7067_v57 = vpop.xlane.xlu0 %7066 }
0x19d1   : > { %v11015_v27 = vpop.eup %11014  ;;  %11024 = vrcp.f32 %v7067_v57 }
0x19d2   : > { %v7107_v39 = vpack.c.bf16 %v7095_v1, %v7094_v50  ;;  %v7069_v2 = vpop.xlane.xlu1 %7068  ;;  %v7096_v31 = vmul.f32 %v11015_v27, %v13758_v20 }
0x19d3   : > { %v11017_v63 = vpop.eup %11016  ;;  %11026 = vrcp.f32 %v7069_v2 }
0x19d4   : > { %10257 = vmatmul.mubr.bf16.gmra.mrb[28].mxu0 %v7107_v39  ;;  %v7071_v17 = vpop.xlane.xlu0 %7070  ;;  %v7097_v29 = vmul.f32 %v11017_v63, %v13762_v36 }
0x19d5   : > { %v11019_v24 = vpop.eup %11018  ;;  %11028 = vrcp.f32 %v7071_v17 }
0x19d6   : > { %v3794_v13 = vpop.permute.xlu1 %3793  ;;  %v7108_v47 = vpack.c.bf16 %v7097_v29, %v7096_v31  ;;  %v7098_v30 = vmul.f32 %v11019_v24, %v13765_v42  ;;  %v10502_v24 = vld [vmem:[%s14178_s5 + $0xc0] sm:$0xff]  }
0x19d7   : > { %v11021_v8 = vpop.eup %11020  ;;  %3817 = vst.msk [vmem:[#allocation2 + $0x8] sm:$0xff] %vm2096_vm1, %v3794_v13  ;;  %v10503_v13 = vld [vmem:[%s14178_s5 + $0x80] sm:$0xff]   ;;  %9052 = vmatprep.subr.bf16.mxu0 %v10502_v24  ;;  %10268 = vmatprep.subr.bf16.mxu1 %v10502_v24 }
0x19d8   : > { %v7099_v37 = vmul.f32 %v11021_v8, %v13768_v61  ;;  %10260 = vmatprep.mubr.bf16.mxu0 %v7108_v47  ;;  %v2073_v12 = vpop.permute.xlu0 %2072  ;;  %v10504_v47 = vld [vmem:[%s14178_s5 + $0xc8] sm:$0xff]   ;;  %9053 = vmatpush3.bf16.msra.mxu0 %v10503_v13 }
0x19d9   : > { %v11023_v4 = vpop.eup %11022  ;;  %2097 = vst.msk [vmem:[#allocation2] sm:$0xff] %vm2096_vm1, %v2073_v12  ;;  %v10505_v8 = vld [vmem:[%s14178_s5 + $0x88] sm:$0xff]   ;;  %9054 = vmatprep.subr.bf16.mxu0 %v10504_v47  ;;  %v10508_v12 = vld [vmem:[%s14178_s5 + $0xd8] sm:$0xff]  }
0x19da   : > { %v7109_v28 = vpack.c.bf16 %v7099_v37, %v7098_v30  ;;  %v3796_v20 = vpop.permute.xlu1 %3795  ;;  %v7100_v14 = vmul.f32 %v11023_v4, %v13771_v53  ;;  %v10506_v30 = vld [vmem:[%s14178_s5 + $0xd0] sm:$0xff]   ;;  %v10509_v4 = vld [vmem:[%s14178_s5 + $0x98] sm:$0xff]  }
0x19db   : > { %v11025_v7 = vpop.eup %11024  ;;  %3818 = vst.msk [vmem:[#allocation2 + $0x28] sm:$0xff] %vm2096_vm1, %v3796_v20  ;;  %v10507_v37 = vld [vmem:[%s14178_s5 + $0x90] sm:$0xff]   ;;  %v10511_v20 = vld [vmem:[%s14178_s5 + $0xa0] sm:$0xff]  }
0x19dc   : > { %10261 = vmatmul.mubr.bf16.gmra.mrb[32].mxu0 %v7109_v28  ;;  %v3798_v36 = vpop.permute.xlu0 %3797  ;;  %v7101_v15 = vmul.f32 %v11025_v7, %v13780_v10  ;;  %v10510_v28 = vld [vmem:[%s14178_s5 + $0xe0] sm:$0xff]   ;;  %v10512_v7 = vld [vmem:[%s14178_s5 + $0xe8] sm:$0xff]  }
0x19dd   : > { %v11027_v26 = vpop.eup %11026  ;;  %3819 = vst.msk [vmem:[#allocation2 + $0x48] sm:$0xff] %vm2096_vm1, %v3798_v36  ;;  %9055 = vmatpush3.bf16.msra.mxu0 %v10505_v8  ;;  %v10513_v36 = vld [vmem:[%s14178_s5 + $0xa8] sm:$0xff]  }
0x19de   : > { %v2075_v42 = vpop.permute.xlu1 %2074  ;;  %v7266_v61 = vld [vmem:[#allocation2 + $0x8] sm:$0xff]  ;;  %v7110_v60 = vpack.c.bf16 %v7101_v15, %v7100_v14  ;;  %v7102_v33 = vmul.f32 %v11027_v26, %v13783_v40  ;;  %9056 = vmatprep.subr.bf16.mxu0 %v10506_v30  ;;  %v10514_v14 = vld [vmem:[%s14178_s5 + $0xf0] sm:$0xff]  }
0x19df   : > { %v11029_v9 = vpop.eup %11028  ;;  %2098 = vst.msk [vmem:[#allocation2 + $0x20] sm:$0xff] %vm2096_vm1, %v2075_v42  ;;  %7592 = vmatprep.mubr.bf16.mxu1 %v7266_v61  ;;  %v10515_v15 = vld [vmem:[%s14178_s5 + $0xb0] sm:$0xff]   ;;  %v10516_v42 = vld [vmem:[%s14178_s5 + $0xf8] sm:$0xff]  }
0x19e0   : > { %v7103_v55 = vmul.f32 %v11029_v9, %v13792_v34  ;;  %10264 = vmatprep.mubr.bf16.mxu0 %v7110_v60  ;;  %v3800_v44 = vpop.permute.xlu0 %3799  ;;  %v7265_v41 = vld [vmem:[#allocation2] sm:$0xff]  ;;  %v10517_v60 = vld [vmem:[%s14178_s5 + $0xb8] sm:$0xff]  }
0x19e1   : > { %3820 = vst.msk [vmem:[#allocation2 + $0x68] sm:$0xff] %vm2096_vm1, %v3800_v44  ;;  %7593 = vmatmul.mubr.bf16.vlgmr.msra.gmra.mrb[24].mxu1 %v7265_v41  ;;  %9057 = vmatpush3.bf16.msra.mxu0 %v10507_v37 }
0x19e2   : > { %v7111_v53 = vpack.c.bf16 %v7103_v55, %v7102_v33  ;;  %v2077_v10 = vpop.permute.xlu1 %2076  ;;  %v7270_v11 = vld [vmem:[#allocation2 + $0x28] sm:$0xff]  ;;  %10276 = vmatpush3.bf16.msra.mxu1 %v10503_v13  ;;  %9058 = vmatprep.subr.bf16.mxu0 %v10508_v12 }
0x19e3   : > { %2099 = vst.msk [vmem:[#allocation2 + $0x40] sm:$0xff] %vm2096_vm1, %v2077_v10  ;;  %7600 = vmatprep.mubr.bf16.mxu1 %v7270_v11  ;;  %10269 = vmatprep.subr.bf16.mxu1 %v10504_v47  ;;  %v14446_v10 = vpack.c.bf16 %v13382_v56, %v13376_v0 }
0x19e4   : > { %10265 = vmatmul.mubr.bf16.gmra.mrb[36].mxu0 %v7111_v53  ;;  %v3802_v43 = vpop.permute.xlu0 %3801  ;;  %v7274_v23 = vld [vmem:[#allocation2 + $0x48] sm:$0xff] }
0x19e5   : > { %3821 = vst.msk [vmem:[#allocation2 + $0x88] sm:$0xff] %vm2096_vm1, %v3802_v43  ;;  %9059 = vmatpush3.bf16.msra.mxu0 %v10509_v4 }
0x19e6   : > { %v2079_v52 = vpop.permute.xlu1 %2078  ;;  %v7269_v34 = vld [vmem:[#allocation2 + $0x20] sm:$0xff]  ;;  %10277 = vmatpush3.bf16.msra.mxu1 %v10505_v8  ;;  %9060 = vmatprep.subr.bf16.mxu0 %v10510_v28 }
0x19e7   : > { %2100 = vst.msk [vmem:[#allocation2 + $0x60] sm:$0xff] %vm2096_vm1, %v2079_v52  ;;  %10270 = vmatprep.subr.bf16.mxu1 %v10506_v30 }
0x19e8   : > { %v2081_v40 = vpop.permute.xlu0 %2080  ;;  %v7278_v19 = vld [vmem:[#allocation2 + $0x68] sm:$0xff] }
0x19e9   : > { %2101 = vst.msk [vmem:[#allocation2 + $0x80] sm:$0xff] %vm2096_vm1, %v2081_v40  ;;  %7601 = vmatmul.mubr.bf16.gmra.mrb[28].mxu1 %v7269_v34  ;;  %9061 = vmatpush3.bf16.msra.mxu0 %v10511_v20 }
0x19ea   : > { %7608 = vmatprep.mubr.bf16.mxu1 %v7274_v23  ;;  %v7273_v21 = vld [vmem:[#allocation2 + $0x40] sm:$0xff]  ;;  %10278 = vmatpush3.bf16.msra.mxu1 %v10507_v37 }
0x19eb   : > { %10271 = vmatprep.subr.bf16.mxu1 %v10508_v12  ;;  %9062 = vmatprep.subr.bf16.mxu0 %v10512_v7 }
0x19ec   : > { %v3804_v38 = vpop.permute.xlu0 %3803  ;;  %v7282_v50 = vld [vmem:[#allocation2 + $0x88] sm:$0xff] }
0x19ed   : > { %3822 = vst.msk [vmem:[#allocation2 + $0xa8] sm:$0xff] %vm2096_vm1, %v3804_v38  ;;  %9063 = vmatpush3.bf16.msra.mxu0 %v10513_v36  ;;  %v14447_v38 = vpack.c.bf16 %v13378_v22, %v13374_v51  ;;  %v14448_v51 = vpack.c.bf16 %v13394_v3, %v13388_v25  ;;  %v14449_v22 = vpack.c.bf16 %v13406_v54, %v13400_v59 }
0x19ee   : > { %v7277_v5 = vld [vmem:[#allocation2 + $0x60] sm:$0xff]  ;;  %10279 = vmatpush3.bf16.msra.mxu1 %v10509_v4  ;;  %9064 = vmatprep.subr.bf16.mxu0 %v10514_v14  ;;  %v14450_v59 = vpack.c.bf16 %v13390_v45, %v13386_v49  ;;  %v14451_v54 = vpack.c.bf16 %v13402_v18, %v13398_v48  ;;  %v14452_v49 = vpack.c.bf16 %v13418_v58, %v13412_v16 }
0x19ef   : > { %10272 = vmatprep.subr.bf16.mxu1 %v10510_v28 }
0x19f0   : > { %v2083_v35 = vpop.permute.xlu0 %2082  ;;  %v7281_v27 = vld [vmem:[#allocation2 + $0x80] sm:$0xff] }
0x19f1   : > { %2102 = vst.msk [vmem:[#allocation2 + $0xa0] sm:$0xff] %vm2096_vm1, %v2083_v35  ;;  %7609 = vmatmul.mubr.bf16.gmra.mrb[32].mxu1 %v7273_v21  ;;  %9065 = vmatpush3.bf16.msra.mxu0 %v10515_v15 }
0x19f2   : > { %7616 = vmatprep.mubr.bf16.mxu1 %v7278_v19  ;;  %10280 = vmatpush3.bf16.msra.mxu1 %v10511_v20 }
0x19f3   : > { %10273 = vmatprep.subr.bf16.mxu1 %v10512_v7  ;;  %9066 = vmatprep.subr.bf16.mxu0 %v10516_v42 }
0x19f4   : > { %v3806_v62 = vpop.permute.xlu0 %3805  ;;  %v7286_v39 = vld [vmem:[#allocation2 + $0xa8] sm:$0xff] }
0x19f5   : > { %3823 = vst.msk [vmem:[#allocation2 + $0xc8] sm:$0xff] %vm2096_vm1, %v3806_v62  ;;  %9067 = vmatpush3.bf16.msra.mxu0 %v10517_v60 }
0x19f6   : > { %10281 = vmatpush3.bf16.msra.mxu1 %v10513_v36  ;;  %v14453_v36 = vpack.c.bf16 %v13414_v46, %v13410_v32 }
0x19f7   : > { %10274 = vmatprep.subr.bf16.mxu1 %v10514_v14 }
0x19f8   : > { %v2085_v6 = vpop.permute.xlu0 %2084  ;;  %v7285_v2 = vld [vmem:[#allocation2 + $0xa0] sm:$0xff] }
0x19f9   : > { %2103 = vst.msk [vmem:[#allocation2 + $0xc0] sm:$0xff] %vm2096_vm1, %v2085_v6  ;;  %7617 = vmatmul.mubr.bf16.gmra.mrb[36].mxu1 %v7277_v5 }
0x19fa   : > { %7624 = vmatprep.mubr.bf16.mxu1 %v7282_v50  ;;  %10282 = vmatpush3.bf16.msra.mxu1 %v10515_v15 }
0x19fb   : > { %10275 = vmatprep.subr.bf16.mxu1 %v10516_v42 }
0x19fc   : > { %v3808_v1 = vpop.permute.xlu0 %3807  ;;  %v7290_v63 = vld [vmem:[#allocation2 + $0xc8] sm:$0xff] }
0x19fd   : > { %3824 = vst.msk [vmem:[#allocation2 + $0xe8] sm:$0xff] %vm2096_vm1, %v3808_v1 }
0x19fe   : > { %10283 = vmatpush3.bf16.msra.mxu1 %v10517_v60 }
0x1a00   : > { %v2087_v57 = vpop.permute.xlu0 %2086  ;;  %v7289_v17 = vld [vmem:[#allocation2 + $0xc0] sm:$0xff] }
0x1a01   : > { %2104 = vst.msk [vmem:[#allocation2 + $0xe0] sm:$0xff] %vm2096_vm1, %v2087_v57  ;;  %7625 = vmatmul.mubr.bf16.gmra.mrb[40].mxu1 %v7281_v27 }
0x1a02   : > { %7632 = vmatprep.mubr.bf16.mxu1 %v7286_v39 }
0x1a04   : > { %v7294_v31 = vld [vmem:[#allocation2 + $0xe8] sm:$0xff] }
0x1a08   : > { %v7293_v29 = vld [vmem:[#allocation2 + $0xe0] sm:$0xff] }
0x1a09   : > { %7633 = vmatmul.mubr.bf16.gmra.mrb[44].mxu1 %v7285_v2 }
0x1a0a   : > { %7640 = vmatprep.mubr.bf16.mxu1 %v7290_v63 }
0x1a11   : > { %7641 = vmatmul.mubr.bf16.gmra.mrb[48].mxu1 %v7289_v17 }
0x1a12   : > { %7648 = vmatprep.mubr.bf16.mxu1 %v7294_v31 }
0x1a19   : > { %7649 = vmatmul.mubr.bf16.gmra.mrb[52].mxu1 %v7293_v29 }
0x1a9f   : > { %v10254_v26 = vpop.f32.mrb[24].mxu0 }
0x1aa0   : > { %v7154_v61 = vpop.f32.mrb[25].mxu0 }
0x1aa1   : > { %v10255_v9 = vpop.f32.mrb[26].mxu0 }
0x1aa2   : > { %v7218_v33 = vpack.c.bf16 %v10255_v9, %v10254_v26  ;;  %v7157_v55 = vpop.f32.mrb[27].mxu0 }
0x1aa3   : > { %v7217_v44 = vpack.c.bf16 %v7157_v55, %v7154_v61 }
0x1aa5   : > { %7233 = vrot.lane.b32.xlu1 %v7217_v44, %s11094_s18 }
0x1aa7   : > { %v10258_v41 = vpop.f32.mrb[28].mxu0 }
0x1aa8   : > { %v7170_v53 = vpop.f32.mrb[29].mxu0 }
0x1aa9   : > { %5513 = vrot.lane.b32.xlu1 %v14446_v10, %s11094_s18  ;;  %v10259_v11 = vpop.f32.mrb[30].mxu0 }
0x1aaa   : > { %v7220_v43 = vpack.c.bf16 %v10259_v11, %v10258_v41  ;;  %v7173_v52 = vpop.f32.mrb[31].mxu0 }
0x1aab   : > { %v7219_v40 = vpack.c.bf16 %v7173_v52, %v7170_v53 }
0x1aad   : > { %7235 = vrot.lane.b32.xlu1 %v7218_v33, %s11094_s18 }
0x1aaf   : > { %v10262_v34 = vpop.f32.mrb[32].mxu0 }
0x1ab0   : > { %v7186_v23 = vpop.f32.mrb[33].mxu0 }
0x1ab1   : > { %5515 = vrot.lane.b32.xlu1 %v14447_v38, %s11094_s18  ;;  %v10263_v35 = vpop.f32.mrb[34].mxu0 }
0x1ab2   : > { %v7222_v21 = vpack.c.bf16 %v10263_v35, %v10262_v34  ;;  %v7189_v19 = vpop.f32.mrb[35].mxu0 }
0x1ab3   : > { %v7221_v62 = vpack.c.bf16 %v7189_v19, %v7186_v23 }
0x1ab4   : > { %v9004_v6 = vpop.f32.mrb[24].mxu1 }
0x1ab5   : > { %7237 = vrot.lane.b32.xlu1 %v7219_v40, %s11094_s18  ;;  %7241 = vrot.lane.b32.xlu0 %v7221_v62, %s11094_s18  ;;  %v9005_v0 = vpop.f32.mrb[25].mxu1 }
0x1ab6   : > { %v13987_v56 = vadd.f32 %v9005_v0, %v9004_v6  ;;  %v9007_v5 = vpop.f32.mrb[26].mxu1 }
0x1ab7   : > { %v10266_v50 = vpop.f32.mrb[36].mxu0  ;;  %v9008_v1 = vpop.f32.mrb[27].mxu1 }
0x1ab8   : > { %v13989_v57 = vadd.f32 %v9008_v1, %v9007_v5  ;;  %v7202_v27 = vpop.f32.mrb[37].mxu0 }
0x1ab9   : > { %5517 = vrot.lane.b32.xlu1 %v14448_v51, %s11094_s18  ;;  %5521 = vrot.lane.b32.xlu0 %v14449_v22, %s11094_s18  ;;  %v10267_v39 = vpop.f32.mrb[38].mxu0 }
0x1aba   : > { %v7224_v2 = vpack.c.bf16 %v10267_v39, %v10266_v50  ;;  %v7205_v63 = vpop.f32.mrb[39].mxu0 }
0x1abb   : > { %v7223_v17 = vpack.c.bf16 %v7205_v63, %v7202_v27 }
0x1abc   : > { %v9010_v31 = vpop.f32.mrb[28].mxu1 }
0x1abd   : > { %7239 = vrot.lane.b32.xlu1 %v7220_v43, %s11094_s18  ;;  %7243 = vrot.lane.b32.xlu0 %v7222_v21, %s11094_s18  ;;  %v9011_v29 = vpop.f32.mrb[29].mxu1 }
0x1abe   : > { %v14001_v24 = vadd.f32 %v9011_v29, %v9010_v31  ;;  %v9013_v13 = vpop.f32.mrb[30].mxu1 }
0x1abf   : > { %v9014_v25 = vpop.f32.mrb[31].mxu1 }
0x1ac0   : > { %v14003_v3 = vadd.f32 %v9014_v25, %v9013_v13 }
0x1ac1   : > { %5519 = vrot.lane.b32.xlu1 %v14450_v59, %s11094_s18  ;;  %5523 = vrot.lane.b32.xlu0 %v14451_v54, %s11094_s18 }
0x1ac4   : > { %v9016_v47 = vpop.f32.mrb[32].mxu1 }
0x1ac5   : > { %7245 = vrot.lane.b32.xlu1 %v7223_v17, %s11094_s18  ;;  %v9017_v8 = vpop.f32.mrb[33].mxu1 }
0x1ac6   : > { %v14014_v30 = vadd.f32 %v9017_v8, %v9016_v47  ;;  %v9019_v37 = vpop.f32.mrb[34].mxu1 }
0x1ac7   : > { %v9020_v12 = vpop.f32.mrb[35].mxu1 }
0x1ac8   : > { %v14016_v4 = vadd.f32 %v9020_v12, %v9019_v37 }
0x1ac9   : > { %5525 = vrot.lane.b32.xlu1 %v14452_v49, %s11094_s18 }
0x1acc   : > { %v9022_v45 = vpop.f32.mrb[36].mxu1 }
0x1acd   : > { %7247 = vrot.lane.b32.xlu1 %v7224_v2, %s11094_s18  ;;  %v9023_v48 = vpop.f32.mrb[37].mxu1 }
0x1ace   : > { %v14023_v18 = vadd.f32 %v9023_v48, %v9022_v45  ;;  %v9025_v28 = vpop.f32.mrb[38].mxu1 }
0x1acf   : > { %v9026_v20 = vpop.f32.mrb[39].mxu1 }
0x1ad0   : > { %v14025_v7 = vadd.f32 %v9026_v20, %v9025_v28 }
0x1ad1   : > { %5527 = vrot.lane.b32.xlu1 %v14453_v36, %s11094_s18  ;;  %s284_s18 = sand.u32 1, %s11084_s25  }
0x1ad2   : > { %s7862_s21 = sshll.u32 %s284_s18, 7  ;;  %s14132_s9 = scalar_lea.sflag [#allocation4], %s284_s18 }
0x1ad3   : > { %s14075_s22 = scalar_lea.vmem [#allocation3], %s7862_s21 }
0x1ad4   : > { %v9028_v14 = vpop.f32.mrb[40].mxu1  ;;  %s7784_s8 = sshll.u32 %s14075_s22, 4  ;;  %s14124_s8 = int_to_ptr.vmem [resolvable:$true] %s7784_s8 }
0x1ad5   : > { %v9029_v15 = vpop.f32.mrb[41].mxu1  ;;  %s11030_s15 = scalar_lea.vmem %s14124_s8, 2048  ;;  %p11037_p0 = scmp.lt.s32.totalorder %s14124_s8, %s11035_s17 }
0x1ad6   : > { %v14031_v26 = vadd.f32 %v9029_v15, %v9028_v14  ;;  %v9031_v16 = vpop.f32.mrb[42].mxu1  ;;  %v14067_v14 = vld [vmem:[%s14179_s6] ss:$0 sm:$0xff]  ;;  %p11031_p11 = scmp.ne.s32.totalorder %s14124_s8, %s11030_s15  ;;  %p11038_p1 = scmp.lt.s32.totalorder %s11036_s19, %s11030_s15 }
0x1ad7   : > { %v9032_v58 = vpop.f32.mrb[43].mxu1 }
0x1ad8   : > { %v14033_v42 = vadd.f32 %v9032_v58, %v9031_v16  ;;  %v7595_v58 = vadd.f32 %v13987_v56, %v14067_v14  ;;  %v7603_v56 = vadd.f32 %v14001_v24, %v14067_v14  ;;  %p11032_p12 = pnand %p11031_p11, %p11176_p5  ;;  %p11039_p2 = por %p11038_p1, %p11037_p0 }
0x1ada   : > { %p11033_p13 = pneg %p11032_p12 }
0x1adc   : > { %v9034_v61 = vpop.f32.mrb[44].mxu1  ;;  %p11040_p3 = pnand %p11039_p2, %p11033_p13 }
0x1add   : > { %v9035_v60 = vpop.f32.mrb[45].mxu1 }
0x1ade   : > { %v14035_v9 = vadd.f32 %v9035_v60, %v9034_v61  ;;  %v9037_v33 = vpop.f32.mrb[46].mxu1 }
0x1adf   : > { %v9038_v55 = vpop.f32.mrb[47].mxu1 }
0x1ae0   : > { %v14037_v44 = vadd.f32 %v9038_v55, %v9037_v33  ;;  %v7598_v55 = vadd.f32 %v13989_v57, %v14067_v14  ;;  %v7606_v57 = vadd.f32 %v14003_v3, %v14067_v14 }
0x1ae4   : > { %v9040_v41 = vpop.f32.mrb[48].mxu1 }
0x1ae5   : > { %v9041_v53 = vpop.f32.mrb[49].mxu1 }
0x1ae6   : > { %v14039_v32 = vadd.f32 %v9041_v53, %v9040_v41  ;;  %v9043_v46 = vpop.f32.mrb[50].mxu1 }
0x1ae7   : > { %v9044_v10 = vpop.f32.mrb[51].mxu1 }
0x1ae8   : > { %v14041_v11 = vadd.f32 %v9044_v10, %v9043_v46 }
0x1aec   : > { %v9046_v43 = vpop.f32.mrb[52].mxu1 }
0x1aed   : > { %v9047_v52 = vpop.f32.mrb[53].mxu1 }
0x1aee   : > { %v14043_v40 = vadd.f32 %v9047_v52, %v9046_v43  ;;  %v9049_v34 = vpop.f32.mrb[54].mxu1 }
0x1aef   : > { %v9050_v23 = vpop.f32.mrb[55].mxu1 }
0x1af0   : > { %v14045_v38 = vadd.f32 %v9050_v23, %v9049_v34 }
0x1b17   : > { %v7234_v35 = vpop.permute.xlu1 %7233 }
0x1b18   : > { %7257 = vst.msk [vmem:[#allocation2 + $0x18] sm:$0xff] %vm2096_vm1, %v7234_v35 }
0x1b1b   : > { %v5514_v21 = vpop.permute.xlu1 %5513 }
0x1b1c   : > { %5537 = vst.msk [vmem:[#allocation2 + $0x10] sm:$0xff] %vm2096_vm1, %v5514_v21 }
0x1b1f   : > { %v7236_v19 = vpop.permute.xlu1 %7235  ;;  %v7268_v62 = vld [vmem:[#allocation2 + $0x18] sm:$0xff] }
0x1b20   : > { %7258 = vst.msk [vmem:[#allocation2 + $0x38] sm:$0xff] %vm2096_vm1, %v7236_v19  ;;  %7689 = vmatprep.mubr.bf16.mxu0 %v7268_v62 }
0x1b23   : > { %v5516_v6 = vpop.permute.xlu1 %5515  ;;  %v7267_v0 = vld [vmem:[#allocation2 + $0x10] sm:$0xff] }
0x1b24   : > { %5538 = vst.msk [vmem:[#allocation2 + $0x30] sm:$0xff] %vm2096_vm1, %v5516_v6  ;;  %7690 = vmatmul.mubr.bf16.vlgmr.msra.gmra.mrb[40].mxu0 %v7267_v0  ;;  %v7611_v0 = vadd.f32 %v14014_v30, %v14067_v14 }
0x1b27   : > { %v7238_v5 = vpop.permute.xlu1 %7237  ;;  %v7242_v50 = vpop.permute.xlu0 %7241  ;;  %v7272_v1 = vld [vmem:[#allocation2 + $0x38] sm:$0xff] }
0x1b28   : > { %7259 = vst.msk [vmem:[#allocation2 + $0x58] sm:$0xff] %vm2096_vm1, %v7238_v5  ;;  %7261 = vst.msk [vmem:[#allocation2 + $0x98] sm:$0xff] %vm2096_vm1, %v7242_v50  ;;  %7697 = vmatprep.mubr.bf16.mxu0 %v7272_v1  ;;  %v7614_v1 = vadd.f32 %v14016_v4, %v14067_v14 }
0x1b2b   : > { %v5518_v27 = vpop.permute.xlu1 %5517  ;;  %v5522_v51 = vpop.permute.xlu0 %5521  ;;  %v7271_v22 = vld [vmem:[#allocation2 + $0x30] sm:$0xff] }
0x1b2c   : > { %5539 = vst.msk [vmem:[#allocation2 + $0x50] sm:$0xff] %vm2096_vm1, %v5518_v27  ;;  %5541 = vst.msk [vmem:[#allocation2 + $0x90] sm:$0xff] %vm2096_vm1, %v5522_v51  ;;  %7698 = vmatmul.mubr.bf16.gmra.mrb[44].mxu0 %v7271_v22 }
0x1b2f   : > { %v7240_v39 = vpop.permute.xlu1 %7239  ;;  %v7244_v2 = vpop.permute.xlu0 %7243  ;;  %v7276_v63 = vld [vmem:[#allocation2 + $0x58] sm:$0xff] }
0x1b30   : > { %7260 = vst.msk [vmem:[#allocation2 + $0x78] sm:$0xff] %vm2096_vm1, %v7240_v39  ;;  %7262 = vst.msk [vmem:[#allocation2 + $0xb8] sm:$0xff] %vm2096_vm1, %v7244_v2  ;;  %7705 = vmatprep.mubr.bf16.mxu0 %v7276_v63  ;;  %v7284_v47 = vld [vmem:[#allocation2 + $0x98] sm:$0xff]  ;;  %v7619_v2 = vadd.f32 %v14023_v18, %v14067_v14  ;;  %v7627_v18 = vadd.f32 %v14031_v26, %v14067_v14 }
0x1b33   : > { %v5520_v17 = vpop.permute.xlu1 %5519  ;;  %v5524_v31 = vpop.permute.xlu0 %5523  ;;  %v7275_v29 = vld [vmem:[#allocation2 + $0x50] sm:$0xff] }
0x1b34   : > { %5540 = vst.msk [vmem:[#allocation2 + $0x70] sm:$0xff] %vm2096_vm1, %v5520_v17  ;;  %5542 = vst.msk [vmem:[#allocation2 + $0xb0] sm:$0xff] %vm2096_vm1, %v5524_v31  ;;  %7706 = vmatmul.mubr.bf16.gmra.mrb[48].mxu0 %v7275_v29  ;;  %v7283_v49 = vld [vmem:[#allocation2 + $0x90] sm:$0xff]  ;;  %v7622_v31 = vadd.f32 %v14025_v7, %v14067_v14 }
0x1b37   : > { %v7246_v13 = vpop.permute.xlu1 %7245  ;;  %v7280_v25 = vld [vmem:[#allocation2 + $0x78] sm:$0xff] }
0x1b38   : > { %7263 = vst.msk [vmem:[#allocation2 + $0xd8] sm:$0xff] %vm2096_vm1, %v7246_v13  ;;  %7713 = vmatprep.mubr.bf16.mxu0 %v7280_v25  ;;  %v7288_v48 = vld [vmem:[#allocation2 + $0xb8] sm:$0xff] }
0x1b3b   : > { %v5526_v59 = vpop.permute.xlu1 %5525  ;;  %v7279_v54 = vld [vmem:[#allocation2 + $0x70] sm:$0xff] }
0x1b3c   : > { %5543 = vst.msk [vmem:[#allocation2 + $0xd0] sm:$0xff] %vm2096_vm1, %v5526_v59  ;;  %7714 = vmatmul.mubr.bf16.gmra.mrb[52].mxu0 %v7279_v54  ;;  %v7287_v20 = vld [vmem:[#allocation2 + $0xb0] sm:$0xff] }
0x1b3d   : > { %7721 = vmatprep.mubr.bf16.mxu0 %v7284_v47 }
0x1b3f   : > { %v7248_v8 = vpop.permute.xlu1 %7247  ;;  %v7292_v37 = vld [vmem:[#allocation2 + $0xd8] sm:$0xff] }
0x1b40   : > { %7264 = vst.msk [vmem:[#allocation2 + $0xf8] sm:$0xff] %vm2096_vm1, %v7248_v8  ;;  %7737 = vmatprep.mubr.bf16.mxu1 %v7292_v37  ;;  %v7643_v8 = vadd.f32 %v14039_v32, %v14067_v14 }
0x1b43   : > { %v5528_v12 = vpop.permute.xlu1 %5527  ;;  %v7291_v45 = vld [vmem:[#allocation2 + $0xd0] sm:$0xff] }
0x1b44   : > { %5544 = vst.msk [vmem:[#allocation2 + $0xf0] sm:$0xff] %vm2096_vm1, %v5528_v12  ;;  %7722 = vmatmul.mubr.bf16.gmra.mrb[56].mxu0 %v7283_v49  ;;  %7738 = vmatmul.mubr.bf16.vlgmr.msra.gmra.mrb[56].mxu1 %v7291_v45  ;;  %v7630_v45 = vadd.f32 %v14033_v42, %v14067_v14 }
0x1b45   : > { %7729 = vmatprep.mubr.bf16.mxu0 %v7288_v48  ;;  %v7646_v48 = vadd.f32 %v14041_v11, %v14067_v14  ;;  %v7635_v11 = vadd.f32 %v14035_v9, %v14067_v14  ;;  %v7654_v9 = vadd.f32 %v14045_v38, %v14067_v14 }
0x1b47   : > { %v7296_v28 = vld [vmem:[#allocation2 + $0xf8] sm:$0xff] }
0x1b48   : > { %7745 = vmatprep.mubr.bf16.mxu1 %v7296_v28 }
0x1b4b   : > { %v7295_v36 = vld [vmem:[#allocation2 + $0xf0] sm:$0xff] }
0x1b4c   : > { %7730 = vmatmul.mubr.bf16.gmra.mrb[60].mxu0 %v7287_v20  ;;  %7746 = vmatmul.mubr.bf16.gmra.mrb[60].mxu1 %v7295_v36 }
0x1bf7   : > { %v9068_v15 = vpop.f32.mrb[40].mxu0 }
0x1bf8   : > { %v9069_v16 = vpop.f32.mrb[41].mxu0 }
0x1bf9   : > { %v9070_v61 = vadd.f32 %v9069_v16, %v9068_v15  ;;  %v9071_v60 = vpop.f32.mrb[42].mxu0 }
0x1bfa   : > { %v9072_v33 = vpop.f32.mrb[43].mxu0 }
0x1bfb   : > { %v7692_v41 = vadd.f32 %v9070_v61, %v7595_v58  ;;  %v9073_v53 = vadd.f32 %v9072_v33, %v9071_v60 }
0x1bfd   : > { %7754 = vst [vmem:[%s14075_s22] sm:$0xff] %v7692_v41  ;;  %v7695_v46 = vadd.f32 %v9073_v53, %v7598_v55  ;;  %v7651_v55 = vadd.f32 %v14043_v40, %v14067_v14 }
0x1bff   : > { %7755 = vst [vmem:[%s14075_s22 + $0x8] sm:$0xff] %v7695_v46  ;;  %v9074_v10 = vpop.f32.mrb[44].mxu0 }
0x1c00   : > { %v9075_v43 = vpop.f32.mrb[45].mxu0 }
0x1c01   : > { %v9076_v52 = vadd.f32 %v9075_v43, %v9074_v10  ;;  %v9077_v34 = vpop.f32.mrb[46].mxu0  ;;  %v7638_v43 = vadd.f32 %v14037_v44, %v14067_v14 }
0x1c02   : > { %v9078_v23 = vpop.f32.mrb[47].mxu0 }
0x1c03   : > { %v7700_v35 = vadd.f32 %v9076_v52, %v7603_v56  ;;  %v9079_v21 = vadd.f32 %v9078_v23, %v9077_v34 }
0x1c05   : > { %7756 = vst [vmem:[%s14075_s22 + $0x10] sm:$0xff] %v7700_v35  ;;  %v7703_v19 = vadd.f32 %v9079_v21, %v7606_v57 }
0x1c07   : > { %7757 = vst [vmem:[%s14075_s22 + $0x18] sm:$0xff] %v7703_v19  ;;  %v9080_v62 = vpop.f32.mrb[48].mxu0 }
0x1c08   : > { %v9081_v6 = vpop.f32.mrb[49].mxu0 }
0x1c09   : > { %v9082_v5 = vadd.f32 %v9081_v6, %v9080_v62  ;;  %v9083_v24 = vpop.f32.mrb[50].mxu0 }
0x1c0a   : > { %v9084_v50 = vpop.f32.mrb[51].mxu0 }
0x1c0b   : > { %v7708_v27 = vadd.f32 %v9082_v5, %v7611_v0  ;;  %v9085_v3 = vadd.f32 %v9084_v50, %v9083_v24 }
0x1c0d   : > { %7758 = vst [vmem:[%s14075_s22 + $0x20] sm:$0xff] %v7708_v27  ;;  %v7711_v51 = vadd.f32 %v9085_v3, %v7614_v1 }
0x1c0f   : > { %7759 = vst [vmem:[%s14075_s22 + $0x28] sm:$0xff] %v7711_v51  ;;  %v9086_v22 = vpop.f32.mrb[52].mxu0 }
0x1c10   : > { %v9087_v39 = vpop.f32.mrb[53].mxu0 }
0x1c11   : > { %v9088_v63 = vadd.f32 %v9087_v39, %v9086_v22  ;;  %v9089_v30 = vpop.f32.mrb[54].mxu0 }
0x1c12   : > { %v9090_v17 = vpop.f32.mrb[55].mxu0 }
0x1c13   : > { %v7716_v29 = vadd.f32 %v9088_v63, %v7619_v2  ;;  %v9091_v13 = vadd.f32 %v9090_v17, %v9089_v30 }
0x1c15   : > { %7760 = vst [vmem:[%s14075_s22 + $0x30] sm:$0xff] %v7716_v29  ;;  %v7719_v4 = vadd.f32 %v9091_v13, %v7622_v31 }
0x1c17   : > { %7761 = vst [vmem:[%s14075_s22 + $0x38] sm:$0xff] %v7719_v4  ;;  %v9092_v25 = vpop.f32.mrb[56].mxu0  ;;  %v9104_v59 = vpop.f32.mrb[56].mxu1 }
0x1c18   : > { %v9093_v54 = vpop.f32.mrb[57].mxu0  ;;  %v9105_v47 = vpop.f32.mrb[57].mxu1 }
0x1c19   : > { %v9094_v37 = vadd.f32 %v9093_v54, %v9092_v25  ;;  %v9106_v7 = vadd.f32 %v9105_v47, %v9104_v59  ;;  %v9095_v12 = vpop.f32.mrb[58].mxu0  ;;  %v9107_v49 = vpop.f32.mrb[58].mxu1 }
0x1c1a   : > { %v9096_v28 = vpop.f32.mrb[59].mxu0  ;;  %v9108_v20 = vpop.f32.mrb[59].mxu1 }
0x1c1b   : > { %v7724_v36 = vadd.f32 %v9094_v37, %v7627_v18  ;;  %v7740_v15 = vadd.f32 %v9106_v7, %v7643_v8  ;;  %v9097_v26 = vadd.f32 %v9096_v28, %v9095_v12  ;;  %v9109_v16 = vadd.f32 %v9108_v20, %v9107_v49 }
0x1c1d   : > { %7762 = vst [vmem:[%s14075_s22 + $0x40] sm:$0xff] %v7724_v36  ;;  %7766 = vst [vmem:[%s14075_s22 + $0x60] sm:$0xff] %v7740_v15  ;;  %v7727_v32 = vadd.f32 %v9097_v26, %v7630_v45  ;;  %v7743_v58 = vadd.f32 %v9109_v16, %v7646_v48 }
0x1c1f   : > { %7763 = vst [vmem:[%s14075_s22 + $0x48] sm:$0xff] %v7727_v32  ;;  %7767 = vst [vmem:[%s14075_s22 + $0x68] sm:$0xff] %v7743_v58  ;;  %v9098_v61 = vpop.f32.mrb[60].mxu0  ;;  %v9110_v60 = vpop.f32.mrb[60].mxu1 }
0x1c20   : > { %v9099_v42 = vpop.f32.mrb[61].mxu0  ;;  %v9111_v33 = vpop.f32.mrb[61].mxu1 }
0x1c21   : > { %v9100_v41 = vadd.f32 %v9099_v42, %v9098_v61  ;;  %v9112_v53 = vadd.f32 %v9111_v33, %v9110_v60  ;;  %v9101_v46 = vpop.f32.mrb[62].mxu0  ;;  %v9113_v10 = vpop.f32.mrb[62].mxu1 }
0x1c22   : > { %v9102_v56 = vpop.f32.mrb[63].mxu0  ;;  %v9114_v52 = vpop.f32.mrb[63].mxu1 }
0x1c23   : > { %v7732_v40 = vadd.f32 %v9100_v41, %v7635_v11  ;;  %v7748_v34 = vadd.f32 %v9112_v53, %v7651_v55  ;;  %v9103_v23 = vadd.f32 %v9102_v56, %v9101_v46  ;;  %v9115_v57 = vadd.f32 %v9114_v52, %v9113_v10 }
0x1c25   : > { %7764 = vst [vmem:[%s14075_s22 + $0x50] sm:$0xff] %v7732_v40  ;;  %7768 = vst [vmem:[%s14075_s22 + $0x70] sm:$0xff] %v7748_v34  ;;  %v7735_v44 = vadd.f32 %v9103_v23, %v7638_v43  ;;  %v7751_v38 = vadd.f32 %v9115_v57, %v7654_v9 }
0x1c27   : > { %7765 = vst [vmem:[%s14075_s22 + $0x58] sm:$0xff] %v7735_v44  ;;  %7769 = vst [vmem:[%s14075_s22 + $0x78] sm:$0xff] %v7751_v38 }
0x1c28   : > { %11043 = shalt.err (!%p11040_p3)
}
0x1c29   : > { %s11044_s18 = scalar_lea.hbm %s14122_s28, 2048  ;;  %s11048_s21 = scalar_lea.hbm %s14180_s7, 4096 }
0x1c2a   : > { %p11045_p4 = scmp.ne.s32.totalorder %s14122_s28, %s11044_s18  ;;  %p11049_p9 = scmp.lt.u32.totalorder %s14122_s28, %s14180_s7 }
0x1c2b   : > { %p11050_p10 = scmp.lt.u32.totalorder %s11048_s21, %s11044_s18  ;;  %p11052_p12 = scmp.lt.u32.totalorder %s11044_s18, %s14122_s28 }
0x1c2c   : > { %p11046_p7 = pnand %p11045_p4, %p11176_p5 }
0x1c2d   : > { %p11051_p11 = por %p11050_p10, %p11049_p9 }
0x1c2e   : > { %p11047_p8 = pneg %p11046_p7 }
0x1c2f   : > { %p11053_p13 = por %p11052_p12, %p11051_p11 }
0x1c31   : > { %p11054_p0 = pnand %p11053_p13, %p11047_p8 }
0x1c33   : > { %11057 = shalt.err (!%p11054_p0)
}
0x1c34   : > { %s11096_s13 = smov 128   ;;  %s11097_s14 = smov 8  }
0x1c35   : > { %10284 = dma.vmem_to_hbm [thread:$0]  (%p11176_p5), %s14124_s8, 2048, %s14122_s28, %s14132_s9, %s11096_s13, %s11096_s13, %s11097_s14  }
0x1c36 PF: > { %p10290_p1 = scmp.ge.s32.totalorder %s11092_s27, 2  ;;  %s7799_s15 = sand.u32 1, %s11080_s24  }
0x1c37   : > { %s7800_s16 = scalar_lea.sflag [#allocation4], %s7799_s15 }
0x1c38   : > { %p10287_p2 = pnand %p10290_p1, %p11180_p6 }
0x1c3a   : > { %11075 = dma.done.wait (!%p10287_p2), %s7800_s16, 2048  }
0x1c3b   : > { %11077 = vsyncadd (!%p10287_p2), %s7800_s16, 4294965248  ;;  %p17_p3 = scmp.ge.s32.totalorder %s11163_s30, 4   ;;  %s14454_s24 = smov %s11084_s25 }
0x1c3c   : > { %s14455_s25 = smov %s11088_s26  ;;  %s14456_s26 = smov %s11174_s10 }
0x1c3d   : > { %s14457_s27 = smov %s11163_s30  ;;  %19 = sbr.rel (!%p17_p3) target bundleno = 3 (0x3), region = 107 }
0x1c44   :  { %7805 = vsyncpa [#allocation4], 1 }
0x1c45   :  { %7807 = vsyncpa [#allocation4 + $0x1], 1 }

</bundles_post_ra>
